<compile_context>
chip_gen: v6e
topology: v6e:2x2x1
jax: 0.10.0
libtpu: 0.0.40
codegen_flags: <defaults>
</compile_context>

<pallas_src>
import math

import jax
import jax.numpy as jnp
from jax.experimental import pallas as pl
from jax.experimental.pallas import tpu as pltpu


def _round_up(v, m):
    return ((v + m - 1) // m) * m


# ----------------------------------------------------------------------------
# Pallas kernel: second MLP layer + masked max aggregation
#   s_ref   : (tm, K, H) bf16  = (x_j @ W1x + pos_j @ W1p + b1)[nb_idx]
#   pwi_ref : (tm, H)    bf16  = (pos @ W1p)[idx]        (per-query correction)
#   mask_ref: (tm, K, 1) f32   1.0 = valid edge, 0.0 = padding
#   w2_ref  : (H, O)     bf16
#   b2_ref  : (1, O)     f32
#   out_ref : (tm, O)    f32
# ----------------------------------------------------------------------------
def _pointconv_kernel(s_ref, pwi_ref, mask_ref, w2_ref, b2_ref, out_ref):
    tm, K, H = s_ref.shape
    O = w2_ref.shape[1]

    s = s_ref[...]                                   # (tm, K, H) bf16
    pwi = pwi_ref[...]                               # (tm, H)    bf16
    mask = mask_ref[...]                             # (tm, K, 1) f32

    # layer-1 finish (sublane broadcast of pwi over K) + ReLU, in bf16
    h = jnp.maximum(s - pwi[:, None, :], 0.0)        # (tm, K, H) bf16

    # layer-2 on the MXU, f32 accumulation
    o = jnp.dot(h.reshape(tm * K, H), w2_ref[...],
                preferred_element_type=jnp.float32)  # (tm*K, O) f32
    o3 = o.reshape(tm, K, O)

    # masked max aggregation over neighbors (PyG aggr='max'); all in f32
    neg = jnp.finfo(jnp.float32).min
    masked = jnp.where(mask > 0.5, o3, neg)          # mask lane-splat over O
    agg = jnp.max(masked, axis=1)                    # (tm, O)
    has_nb = jnp.max(mask, axis=1) > 0.5             # (tm, 1)
    # b2 added once after the max (max_j(o_j + b2) == max_j(o_j) + b2);
    # queries with no neighbor get the scatter-max fill value 0.
    out_ref[...] = jnp.where(has_nb, agg + b2_ref[...], 0.0)


def pointconv_pallas(s, pwi, mask, w2, b2, *, tm=64):
    """s:(M,K,H) bf16, pwi:(M,H) bf16, mask:(M,K,1) f32, w2:(H,O) bf16, b2:(1,O) f32."""
    M, K, H = s.shape
    O = w2.shape[1]

    # Tile rows; keep tm a multiple of 8 and pad M up to a tile multiple
    # (padded queries have mask == 0 -> output 0, sliced off below).
    # On v7x prefer a tm that leaves an even grid length so both TCs get work.
    tm = _round_up(max(8, min(tm, _round_up(M, 8))), 8)
    M_pad = _round_up(M, tm)
    if M_pad != M:
        pad = M_pad - M
        s = jnp.pad(s, ((0, pad), (0, 0), (0, 0)))
        pwi = jnp.pad(pwi, ((0, pad), (0, 0)))
        mask = jnp.pad(mask, ((0, pad), (0, 0), (0, 0)))

    out = pl.pallas_call(
        _pointconv_kernel,
        out_shape=jax.ShapeDtypeStruct((M_pad, O), jnp.float32),
        grid=(M_pad // tm,),
        in_specs=[
            pl.BlockSpec((tm, K, H), lambda i: (i, 0, 0)),   # s   (gathered layer-1 acts)
            pl.BlockSpec((tm, H),    lambda i: (i, 0)),      # pwi (per-query pos@W1p)
            pl.BlockSpec((tm, K, 1), lambda i: (i, 0, 0)),   # mask (K on sublanes)
            pl.BlockSpec((H, O),     lambda i: (0, 0)),      # w2
            pl.BlockSpec((1, O),     lambda i: (0, 0)),      # b2
        ],
        out_specs=pl.BlockSpec((tm, O), lambda i: (i, 0)),
        compiler_params=pltpu.CompilerParams(
            dimension_semantics=("parallel",),
            vmem_limit_bytes=48 * 1024 * 1024,   # explicit budget: fits v7x's 64 MiB, generous for v5e/v6e
        ),
    )(s, pwi, mask, w2, b2)
    return out[:M]


# ----------------------------------------------------------------------------
# JAX glue: farthest point sampling + radius neighbor search (data-dependent)
# ----------------------------------------------------------------------------
def _fps_single(pos_g, m):
    # TODO(synk): torch_cluster fps uses a random start point by default; we
    # start deterministically at point 0 for reproducibility.
    n = pos_g.shape[0]

    def body(i, carry):
        sel, dist, last = carry
        sel = sel.at[i].set(last)
        d = jnp.sum((pos_g - pos_g[last]) ** 2, axis=-1)
        dist = jnp.minimum(dist, d)
        nxt = jnp.argmax(dist).astype(jnp.int32)
        return sel, dist, nxt

    sel0 = jnp.zeros((m,), jnp.int32)
    dist0 = jnp.full((n,), jnp.inf, jnp.float32)
    sel, _, _ = jax.lax.fori_loop(0, m, body, (sel0, dist0, jnp.int32(0)))
    return sel


def fps_equal_graphs(pos, num_graphs, ratio):
    """FPS for a batch of equally-sized graphs; returns global indices."""
    N = pos.shape[0]
    n = N // num_graphs
    m = int(math.ceil(n * ratio))
    posr = pos.reshape(num_graphs, n, -1)
    sel = jax.vmap(lambda p: _fps_single(p, m))(posr)          # (B, m) local idx
    offs = (jnp.arange(num_graphs, dtype=jnp.int32) * n)[:, None]
    return (sel + offs).reshape(-1)                            # (B*m,)


def radius_neighbors(pos, batch, idx, r, max_neighbors):
    """For each query pos[idx], up to `max_neighbors` same-graph points within r."""
    # TODO(synk): like torch_cluster.radius we return the first-K-by-index
    # neighbors (not nearest-K) when more than max_neighbors are in range.
    N = pos.shape[0]
    qpos = pos[idx]                                            # (M, 3)
    qb = batch[idx]                                            # (M,)
    d2 = jnp.sum((qpos[:, None, :] - pos[None, :, :]) ** 2, axis=-1)   # (M, N)
    valid = (d2 <= r * r) & (qb[:, None] == batch[None, :])
    key = jnp.where(valid, jnp.arange(N)[None, :], N)          # invalid sorted last
    order = jnp.argsort(key, axis=1)[:, :max_neighbors]        # (M, K)
    count = jnp.minimum(jnp.sum(valid, axis=1), max_neighbors)
    nb_mask = jnp.arange(max_neighbors)[None, :] < count[:, None]
    nb_idx = jnp.where(nb_mask, order, 0)
    return nb_idx.astype(jnp.int32), nb_mask.astype(jnp.float32)


# ----------------------------------------------------------------------------
# SetAbstraction forward
# ----------------------------------------------------------------------------
def set_abstraction(x, pos, batch, params, *, ratio, r, num_graphs,
                    max_neighbors=64, tm=64):
    w1x, w1p, b1, w2, b2 = params
    idx = fps_equal_graphs(pos, num_graphs, ratio)                       # fps
    nb_idx, nb_mask = radius_neighbors(pos, batch, idx, r, max_neighbors)  # radius

    # Hoisted layer-1: per-NODE precompute (N rows) instead of per-edge matmuls.
    pw = pos @ w1p                                   # (N, H)
    s_node = x @ w1x + pw + b1                       # (N, H), b1 folded in
    s = s_node[nb_idx].astype(jnp.bfloat16)          # (M, K, H) gathered activations
    pwi = pw[idx].astype(jnp.bfloat16)               # (M, H)   per-query correction
    mask3 = nb_mask[:, :, None]                      # (M, K, 1)

    x_out = pointconv_pallas(s, pwi, mask3, w2.astype(jnp.bfloat16), b2, tm=tm)
    return x_out, pos[idx], batch[idx]


# Pure-JAX f32 reference of the PointConv hot path (for validation).
def _pointconv_ref(xj, pj, pi, mask, w1x, w1p, b1, w2, b2):
    rel = pj - pi[:, None, :]
    h = jnp.maximum(jnp.einsum('mkc,ch->mkh', xj, w1x)
                    + jnp.einsum('mkp,ph->mkh', rel, w1p) + b1, 0.0)
    o = jnp.einsum('mkh,ho->mko', h, w2) + b2
    neg = jnp.finfo(jnp.float32).min
    o = jnp.where(mask[:, :, None] > 0.5, o, neg)
    agg = jnp.max(o, axis=1)
    return jnp.where(jnp.max(mask, axis=1, keepdims=True) > 0.5, agg, 0.0)


if __name__ == "__main__":
    key = jax.random.PRNGKey(0)
    kpos, kx, kw = jax.random.split(key, 3)

    num_graphs, n_per = 2, 32
    N = num_graphs * n_per            # 64 points total
    C, P, H, O = 8, 3, 32, 64         # in-feat, pos-dim, hidden, out-feat
    ratio, r, K = 0.5, 0.5, 64        # SetAbstraction(ratio, r, nn), max_num_neighbors=64

    pos = jax.random.uniform(kpos, (N, P), jnp.float32)
    x = jax.random.normal(kx, (N, C), jnp.float32)
    batch = jnp.repeat(jnp.arange(num_graphs, dtype=jnp.int32), n_per)

    # nn = Linear(C + P, H) -> ReLU -> Linear(H, O)   (plain last layer, no norm)
    ks = jax.random.split(kw, 4)
    w1x = jax.random.normal(ks[0], (C, H), jnp.float32) * 0.1   # rows for x_j part of concat
    w1p = jax.random.normal(ks[1], (P, H), jnp.float32) * 0.1   # rows for (pos_j - pos_i) part
    b1 = jax.random.normal(ks[2], (1, H), jnp.float32) * 0.01
    w2 = jax.random.normal(ks[3], (H, O), jnp.float32) * 0.1
    b2 = jnp.zeros((1, O), jnp.float32)
    params = (w1x, w1p, b1, w2, b2)

    x_out, pos_out, batch_out = set_abstraction(
        x, pos, batch, params, ratio=ratio, r=r, num_graphs=num_graphs, max_neighbors=K)
    jax.block_until_ready(x_out)

    # validate the Pallas hot path against a pure-JAX f32 reference
    idx = fps_equal_graphs(pos, num_graphs, ratio)
    nb_idx, nb_mask = radius_neighbors(pos, batch, idx, r, K)
    ref = _pointconv_ref(x[nb_idx], pos[nb_idx], pos[idx], nb_mask, *params)
    assert x_out.shape == (num_graphs * int(math.ceil(n_per * ratio)), O)
    assert pos_out.shape == (x_out.shape[0], P) and batch_out.shape == (x_out.shape[0],)
    # bf16 gathered activations / weights, f32 accumulation -> modest tolerance
    assert jnp.allclose(x_out, ref, atol=2e-2, rtol=2e-2), "mismatch vs reference"

    print("KERNEL_OK")
</pallas_src>

<mosaic_0001>
module attributes {stable_mosaic.version = 11 : i64} {
  func.func @_pointconv_kernel(%arg0: i32, %arg1: memref<32x64x32xbf16, #tpu.memory_space<vmem>>, %arg2: memref<32x32xbf16, #tpu.memory_space<vmem>>, %arg3: memref<32x64x1xf32, #tpu.memory_space<vmem>>, %arg4: memref<32x64xbf16, #tpu.memory_space<vmem>>, %arg5: memref<1x64xf32, #tpu.memory_space<vmem>>, %arg6: memref<32x64xf32, #tpu.memory_space<vmem>>) attributes {dimension_semantics = [#tpu.dimension_semantics<parallel>], iteration_bounds = array<i64: 1>, scalar_prefetch = 0 : i64, scratch_operands = 0 : i64, tpu.core_type = #tpu.core_type<tc>, window_params = [{transform_indices = @transform_0, window_bounds = array<i64: 32, 64, 32>}, {transform_indices = @transform_1, window_bounds = array<i64: 32, 32>}, {transform_indices = @transform_2, window_bounds = array<i64: 32, 64, 1>}, {pipeline_mode = #tpu.pipeline_mode<synchronous>, transform_indices = @transform_3, window_bounds = array<i64: 32, 64>}, {pipeline_mode = #tpu.pipeline_mode<synchronous>, transform_indices = @transform_4, window_bounds = array<i64: 1, 64>}, {transform_indices = @transform_5, window_bounds = array<i64: 32, 64>}]} {
    %c0 = arith.constant 0 : index
    %c0_0 = arith.constant 0 : index
    %c0_1 = arith.constant 0 : index
    %0 = vector.load %arg1[%c0, %c0_0, %c0_1] : memref<32x64x32xbf16, #tpu.memory_space<vmem>>, vector<32x64x32xbf16>
    %c0_2 = arith.constant 0 : index
    %c0_3 = arith.constant 0 : index
    %1 = vector.load %arg2[%c0_2, %c0_3] : memref<32x32xbf16, #tpu.memory_space<vmem>>, vector<32x32xbf16>
    %c0_4 = arith.constant 0 : index
    %c0_5 = arith.constant 0 : index
    %c0_6 = arith.constant 0 : index
    %2 = vector.load %arg3[%c0_4, %c0_5, %c0_6] : memref<32x64x1xf32, #tpu.memory_space<vmem>>, vector<32x64x1xf32>
    %3 = vector.shape_cast %1 : vector<32x32xbf16> to vector<32x1x32xbf16>
    %4 = vector.broadcast %3 : vector<32x1x32xbf16> to vector<32x64x32xbf16>
    %5 = arith.subf %0, %4 : vector<32x64x32xbf16>
    %cst = arith.constant 0.000000e+00 : bf16
    %6 = vector.broadcast %cst : bf16 to vector<32x64x32xbf16>
    %7 = arith.maximumf %5, %6 : vector<32x64x32xbf16>
    %8 = vector.shape_cast %7 : vector<32x64x32xbf16> to vector<2048x32xbf16>
    %c0_7 = arith.constant 0 : index
    %c0_8 = arith.constant 0 : index
    %9 = vector.load %arg4[%c0_7, %c0_8] : memref<32x64xbf16, #tpu.memory_space<vmem>>, vector<32x64xbf16>
    %cst_9 = arith.constant dense<0.000000e+00> : vector<2048x64xf32>
    %10 = tpu.matmul %8, %9, %cst_9 {dimension_numbers = #tpu.dot_dimension_numbers<[1], [0], [0], [1], [0, 0, 1, 1], [], []>} : vector<2048x32xbf16>, vector<32x64xbf16>, vector<2048x64xf32> -> vector<2048x64xf32>
    %11 = vector.shape_cast %10 : vector<2048x64xf32> to vector<32x64x64xf32>
    %cst_10 = arith.constant 5.000000e-01 : f32
    %12 = vector.broadcast %cst_10 : f32 to vector<32x64x1xf32>
    %13 = arith.cmpf ogt, %2, %12 : vector<32x64x1xf32>
    %cst_11 = arith.constant -3.40282347E+38 : f32
    %14 = vector.shape_cast %13 : vector<32x64x1xi1> to vector<32x64x1xi1>
    %15 = vector.broadcast %14 : vector<32x64x1xi1> to vector<32x64x64xi1>
    %16 = vector.broadcast %cst_11 : f32 to vector<32x64x64xf32>
    %17 = arith.select %15, %11, %16 : vector<32x64x64xi1>, vector<32x64x64xf32>
    %cst_12 = arith.constant dense<0xFF800000> : vector<32x64xf32>
    %18 = vector.multi_reduction <maximumf>, %17, %cst_12 [1] : vector<32x64x64xf32> to vector<32x64xf32>
    %cst_13 = arith.constant dense<0xFF800000> : vector<32x1xf32>
    %19 = vector.multi_reduction <maximumf>, %2, %cst_13 [1] : vector<32x64x1xf32> to vector<32x1xf32>
    %cst_14 = arith.constant 5.000000e-01 : f32
    %20 = vector.broadcast %cst_14 : f32 to vector<32x1xf32>
    %21 = arith.cmpf ogt, %19, %20 : vector<32x1xf32>
    %c0_15 = arith.constant 0 : index
    %c0_16 = arith.constant 0 : index
    %22 = vector.load %arg5[%c0_15, %c0_16] : memref<1x64xf32, #tpu.memory_space<vmem>>, vector<1x64xf32>
    %23 = vector.broadcast %22 : vector<1x64xf32> to vector<32x64xf32>
    %24 = arith.addf %18, %23 : vector<32x64xf32>
    %cst_17 = arith.constant 0.000000e+00 : f32
    %25 = vector.shape_cast %21 : vector<32x1xi1> to vector<32x1xi1>
    %26 = vector.broadcast %25 : vector<32x1xi1> to vector<32x64xi1>
    %27 = vector.broadcast %cst_17 : f32 to vector<32x64xf32>
    %28 = arith.select %26, %24, %27 : vector<32x64xi1>, vector<32x64xf32>
    %c0_18 = arith.constant 0 : index
    %c0_19 = arith.constant 0 : index
    %29 = vector.load %arg6[%c0_18, %c0_19] : memref<32x64xf32, #tpu.memory_space<vmem>>, vector<32x64xf32>
    tpu.vector_store %arg6[%c0_18, %c0_19], %28 {strides = array<i32>} : memref<32x64xf32, #tpu.memory_space<vmem>>, vector<32x64xf32>,
    return
  }
  func.func @transform_0(%arg0: i32) -> (i32, i32, i32) {
    %c0_i32 = arith.constant 0 : i32
    %c0_i32_0 = arith.constant 0 : i32
    %c0_i32_1 = arith.constant 0 : i32
    return %arg0, %c0_i32, %c0_i32_0 : i32, i32, i32
  }
  func.func @transform_1(%arg0: i32) -> (i32, i32) {
    %c0_i32 = arith.constant 0 : i32
    %c0_i32_0 = arith.constant 0 : i32
    return %arg0, %c0_i32 : i32, i32
  }
  func.func @transform_2(%arg0: i32) -> (i32, i32, i32) {
    %c0_i32 = arith.constant 0 : i32
    %c0_i32_0 = arith.constant 0 : i32
    %c0_i32_1 = arith.constant 0 : i32
    return %arg0, %c0_i32, %c0_i32_0 : i32, i32, i32
  }
  func.func @transform_3(%arg0: i32) -> (i32, i32) {
    %c0_i32 = arith.constant 0 : i32
    %c0_i32_0 = arith.constant 0 : i32
    %c0_i32_1 = arith.constant 0 : i32
    return %c0_i32, %c0_i32_0 : i32, i32
  }
  func.func @transform_4(%arg0: i32) -> (i32, i32) {
    %c0_i32 = arith.constant 0 : i32
    %c0_i32_0 = arith.constant 0 : i32
    %c0_i32_1 = arith.constant 0 : i32
    return %c0_i32, %c0_i32_0 : i32, i32
  }
  func.func @transform_5(%arg0: i32) -> (i32, i32) {
    %c0_i32 = arith.constant 0 : i32
    %c0_i32_0 = arith.constant 0 : i32
    return %arg0, %c0_i32 : i32, i32
  }
}

</mosaic_0001>

<bundles_post_ra>
// kernel: tpu_custom_call.1
= control target key start
LH: loop header
LB: loop body
LE: loop exit
PB: predicated region body
PF: predicated region fallthrough
CT: control target
= control target key end

     0   :  { %vm6257_vm0 = vcmask 7168   ;;  %v14180_v3 = vmov 0   ;;  %v553_v24 = vlaneseq  ;;  %v8049_v43 = vmov 1966171168   ;;  %s14172_s0 = inlined_call_operand.vmem [shape: bf16[32,64,32], index: 0, kind: input, shape index: {}]   ;;  %s14173_s1 = inlined_call_operand.vmem [shape: bf16[32,32], index: 1, kind: input, shape index: {}]   ;;  %s14174_s2 = inlined_call_operand.vmem [shape: f32[32,64,1], index: 2, kind: input, shape index: {}]   ;;  %s14175_s3 = inlined_call_operand.vmem [shape: bf16[32,64], index: 3, kind: input, shape index: {}]   ;;  %s14176_s4 = inlined_call_operand.vmem [shape: f32[1,64], index: 4, kind: input, shape index: {}]   ;;  %s14177_s5 = inlined_call_operand.hbm [shape: f32[32,64], index: 5, kind: output, shape index: {}]  }
   0x1   :  { %v284_v0 = vld [vmem:[%s14174_s2 + $0x10] sm:$0xff]  ;;  %v282_v1 = vld [vmem:[%s14174_s2] sm:$0xff]  ;;  %v285_v2 = vld [vmem:[%s14174_s2 + $0x18] sm:$0xff]  ;;  %8023 = vset.pattern.permute.xlu1 %v14180_v3  ;;  %8022 = vset.pattern.permute.xlu0 %v14180_v3  ;;  %v551_v44 = vunpack.c.l.s4 %v8049_v43 }
   0x2   :  { %vm3794_vm1 = vcmp.gt.f32.partialorder %v284_v0, 0.5  ;;  %vm3792_vm2 = vcmp.gt.f32.partialorder %v282_v1, 0.5  ;;  %v6258_v4 = vsel %vm6257_vm0, %v282_v1, -inf  ;;  %v283_v5 = vld [vmem:[%s14174_s2 + $0x8] sm:$0xff]  ;;  %vm3795_vm3 = vcmp.gt.f32.partialorder %v285_v2, 0.5  ;;  %v286_v9 = vld [vmem:[%s14174_s2 + $0x20] sm:$0xff] }
   0x3   :  { %v4050_v6 = vsel %vm3794_vm1, 1, %v14180_v3  ;;  %v4048_v7 = vsel %vm3792_vm2, 1, %v14180_v3  ;;  %v287_v8 = vld [vmem:[%s14174_s2 + $0x28] sm:$0xff]  ;;  %v6261_v10 = vsel %vm6257_vm0, %v284_v0, -inf  ;;  %vm3793_vm4 = vcmp.gt.f32.partialorder %v283_v5, 0.5  ;;  %v289_v17 = vld [vmem:[%s14174_s2 + $0x38] sm:$0xff] }
   0x4   :  { %4311 = vperm.xlu1 %8023, %v4050_v6   ;;  %4305 = vperm.xlu0 %8022, %v4048_v7   ;;  %v6259_v11 = vsel %vm6257_vm0, %v283_v5, -inf  ;;  %v8024_v12 = vld [vmem:[%s14175_s3 + $0x8] sm:$0xff]   ;;  %v4051_v13 = vsel %vm3795_vm3, 1, %v14180_v3  ;;  %v4049_v14 = vsel %vm3793_vm4, 1, %v14180_v3  ;;  %v6263_v16 = vsel %vm6257_vm0, %v285_v2, -inf  ;;  %v288_v19 = vld [vmem:[%s14174_s2 + $0x30] sm:$0xff] }
   0x5   :  { %v6260_v15 = vmax.f32 %v6258_v4, %v6259_v11  ;;  %vm3797_vm5 = vcmp.gt.f32.partialorder %v287_v8, 0.5  ;;  %vm3796_vm6 = vcmp.gt.f32.partialorder %v286_v9, 0.5  ;;  %7753 = vmatprep.subr.bf16.mxu0 %v8024_v12  ;;  %8013 = vmatprep.subr.bf16.mxu1 %v8024_v12  ;;  %v291_v20 = vld [vmem:[%s14174_s2 + $0x48] sm:$0xff]  ;;  %v6265_v21 = vsel %vm6257_vm0, %v286_v9, -inf  ;;  %v290_v23 = vld [vmem:[%s14174_s2 + $0x40] sm:$0xff]  ;;  %v292_v32 = vld [vmem:[%s14174_s2 + $0x50] sm:$0xff] }
   0x6   :  { %7754 = vmatpush3.bf16.msra.mxu0 %v8024_v12  ;;  %8015 = vmatpush3.bf16.msra.mxu1 %v8024_v12  ;;  %v6280_v22 = vsel %vm6257_vm0, %v291_v20, -inf  ;;  %v4053_v25 = vsel %vm3797_vm5, 1, %v14180_v3  ;;  %v4052_v26 = vsel %vm3796_vm6, 1, %v14180_v3  ;;  %v6279_v28 = vsel %vm6257_vm0, %v290_v23, -inf  ;;  %v8025_v29 = vld [vmem:[%s14175_s3] sm:$0xff]   ;;  %v293_v34 = vld [vmem:[%s14174_s2 + $0x58] sm:$0xff] }
   0x7   :  { %v6262_v18 = vmax.f32 %v6260_v15, %v6261_v10  ;;  %v6267_v30 = vsel %vm6257_vm0, %v287_v8, -inf  ;;  %vm3799_vm7 = vcmp.gt.f32.partialorder %v289_v17, 0.5  ;;  %vm3798_vm8 = vcmp.gt.f32.partialorder %v288_v19, 0.5  ;;  %7755 = vmatprep.subr.bf16.mxu0 %v8025_v29  ;;  %8014 = vmatprep.subr.bf16.mxu1 %v8025_v29  ;;  %v295_v48 = vld [vmem:[%s14174_s2 + $0x68] sm:$0xff]  ;;  %v294_v49 = vld [vmem:[%s14174_s2 + $0x60] sm:$0xff]  ;;  %v296_v58 = vld [vmem:[%s14174_s2 + $0x70] sm:$0xff] }
   0x8   :  { %4314 = vperm.xlu1 %8023, %v4051_v13   ;;  %4308 = vperm.xlu0 %8022, %v4049_v14   ;;  %v6281_v31 = vmax.f32 %v6279_v28, %v6280_v22  ;;  %v6282_v35 = vsel %vm6257_vm0, %v292_v32, -inf  ;;  %v6269_v36 = vsel %vm6257_vm0, %v288_v19, -inf  ;;  %vm3801_vm9 = vcmp.gt.f32.partialorder %v291_v20, 0.5  ;;  %v297_v63 = vld [vmem:[%s14174_s2 + $0x78] sm:$0xff]  ;;  %v299_v1 = vld [vmem:[%s14174_s2 + $0x88] sm:$0xff]  ;;  %v298_v7 = vld [vmem:[%s14174_s2 + $0x80] sm:$0xff] }
   0x9   :  { %v6264_v27 = vmax.f32 %v6262_v18, %v6263_v16  ;;  %v6284_v37 = vsel %vm6257_vm0, %v293_v34, -inf  ;;  %v4055_v39 = vsel %vm3799_vm7, 1, %v14180_v3  ;;  %v4054_v40 = vsel %vm3798_vm8, 1, %v14180_v3  ;;  %v301_v12 = vld [vmem:[%s14174_s2 + $0x98] sm:$0xff]  ;;  %v8202_v13 = vld [vmem:[%s14174_s2 + $0x90] sm:$0xff] }
   0xa   :  { %v6283_v38 = vmax.f32 %v6281_v31, %v6282_v35  ;;  %7756 = vmatpush3.bf16.msra.mxu0 %v8025_v29  ;;  %8016 = vmatpush3.bf16.msra.mxu1 %v8025_v29  ;;  %v6271_v42 = vsel %vm6257_vm0, %v289_v17, -inf  ;;  %vm3800_vm10 = vcmp.gt.f32.partialorder %v290_v23, 0.5  ;;  %v554_v45 = vshrl.u32 %v553_v24, 7  ;;  %v8216_v23 = vld [vmem:[%s14174_s2 + $0xa0] sm:$0xff]  ;;  %v25_v31 = vld [vmem:[%s14172_s0 + $0xc] sm:$0xf] }
   0xb   :  { %v6266_v33 = vmax.f32 %v6264_v27, %v6265_v21  ;;  %v4057_v47 = vsel %vm3801_vm9, 1, %v14180_v3  ;;  %vm3803_vm11 = vcmp.gt.f32.partialorder %v293_v34, 0.5  ;;  %vm3802_vm12 = vcmp.gt.f32.partialorder %v292_v32, 0.5  ;;  %v22_v28 = vld [vmem:[%s14172_s0] sm:$0xf] }
   0xc   :  { %4320 = vperm.xlu1 %8023, %v4053_v25   ;;  %4317 = vperm.xlu0 %8022, %v4052_v26   ;;  %v6285_v50 = vmax.f32 %v6283_v38, %v6284_v37  ;;  %v552_v51 = vunpack.c.0.s8 %v551_v44  ;;  %v6288_v52 = vsel %vm6257_vm0, %v295_v48, -inf  ;;  %v6286_v53 = vsel %vm6257_vm0, %v294_v49, -inf  ;;  %v8165_v56 = vld.sshfl [vmem:[%s14173_s1] sm:$0x33 pattern:$0x75316420] }
   0xd   :  { %v6268_v41 = vmax.f32 %v6266_v33, %v6267_v30  ;;  %v4056_v55 = vsel %vm3800_vm10, 1, %v14180_v3  ;;  %v6290_v60 = vsel %vm6257_vm0, %v296_v58, -inf  ;;  %v4059_v61 = vsel %vm3803_vm11, 1, %v14180_v3  ;;  %v8221_v25 = vld [vmem:[%s14174_s2 + $0xa8] sm:$0xff]  ;;  %v23_v29 = vld [vmem:[%s14172_s0 + $0x4] sm:$0xf] }
   0xe   :  { %v6287_v57 = vmax.f32 %v6285_v50, %v6286_v53  ;;  %v8170_v59 = vsub.s32 %v552_v51, %v554_v45  ;;  %v4058_v62 = vsel %vm3802_vm12, 1, %v14180_v3  ;;  %v8186_v4 = vsub.s32 0, %v554_v45  ;;  %v24_v30 = vld [vmem:[%s14172_s0 + $0x8] sm:$0xf]  ;;  %v26_v37 = vld [vmem:[%s14172_s0 + $0x10] sm:$0xf] }
   0xf   :  { %v6270_v46 = vmax.f32 %v6268_v41, %v6269_v36  ;;  %v6292_v5 = vsel %vm6257_vm0, %v297_v63, -inf  ;;  %v6301_v6 = vsel %vm6257_vm0, %v299_v1, -inf  ;;  %vm3805_vm13 = vcmp.gt.f32.partialorder %v295_v48, 0.5  ;;  %v27_v38 = vld [vmem:[%s14172_s0 + $0x14] sm:$0xf]  ;;  %v8274_v50 = vld [vmem:[%s14174_s2 + $0xc8] sm:$0xff] }
  0x10   :  { %4326 = vperm.xlu1 %8023, %v4055_v39   ;;  %4323 = vperm.xlu0 %8022, %v4054_v40   ;;  %14266 = vst [vmem:[#allocation6_spill] sm:$0xff] %v8170_v59  ;;  %v6289_v0 = vmax.f32 %v6287_v57, %v6288_v52  ;;  %v8184_v2 = vrot.slane %v8165_v56, %v8170_v59  ;;  %vm3804_vm14 = vcmp.gt.f32.partialorder %v294_v49, 0.5  ;;  %v6300_v9 = vsel %vm6257_vm0, %v298_v7, -inf  ;;  %v28_v39 = vld [vmem:[%s14172_s0 + $0x18] sm:$0xf]  ;;  %v8269_v48 = vld [vmem:[%s14174_s2 + $0xb0] sm:$0xff] }
  0x11   :  { %v8158_v54 = vmax.f32 %v6270_v46, %v6271_v42  ;;  %v6302_v11 = vmax.f32 %v6300_v9, %v6301_v6  ;;  %v6305_v15 = vsel %vm6257_vm0, %v301_v12, -inf  ;;  %v6303_v16 = vsel %vm6257_vm0, %v8202_v13, -inf  ;;  %v29_v42 = vld [vmem:[%s14172_s0 + $0x1c] sm:$0xf]  ;;  %v8279_v51 = vld [vmem:[%s14174_s2 + $0xc0] sm:$0xff] }
  0x12   :  { %v6291_v8 = vmax.f32 %v6289_v0, %v6290_v60  ;;  %v7316_v10 = vpack.i.b16 %v8184_v2, %v8184_v2  ;;  %v639_v17 = vunpack.i.h.s16 %v8184_v2  ;;  %v4061_v19 = vsel %vm3805_vm13, 1, %v14180_v3 }
  0x13   :  { %14265 = vst [vmem:[#allocation5_spill] sm:$0xff] %v8158_v54  ;;  %v4060_v20 = vsel %vm3804_vm14, 1, %v14180_v3  ;;  %v6304_v21 = vmax.f32 %v6302_v11, %v6303_v16  ;;  %vm3807_vm15 = vcmp.gt.f32.partialorder %v297_v63, 0.5  ;;  %vm3806_vm1 = vcmp.gt.f32.partialorder %v296_v58, 0.5  ;;  %v30_v16 = vld [vmem:[%s14172_s0 + $0x20] sm:$0xf] }
  0x14   :  { %4332 = vperm.xlu1 %8023, %v4057_v47   ;;  %4329 = vperm.xlu0 %8022, %v4056_v55   ;;  %v8204_v14 = vmax.f32 %v6291_v8, %v6292_v5  ;;  %v705_v18 = vrot.slane %v7316_v10, %v8186_v4  ;;  %vm3809_vm2 = vcmp.gt.f32.partialorder %v299_v1, 0.5  ;;  %v671_v22 = vpack.i.b16 %v639_v17, %v639_v17  ;;  %v305_v10 = vld [vmem:[%s14174_s2 + $0xb8] sm:$0xff]  ;;  %v31_v17 = vld [vmem:[%s14172_s0 + $0x24] sm:$0xf] }
  0x15   :  { %vm3808_vm3 = vcmp.gt.f32.partialorder %v298_v7, 0.5  ;;  %v6306_v26 = vmax.f32 %v6304_v21, %v6305_v15  ;;  %v6307_v27 = vsel %vm6257_vm0, %v8216_v23, -inf  ;;  %vm2350_vm4 = vcmask 261120  }
  0x16   :  { %14267 = vst [vmem:[#allocation7_spill] sm:$0xff] %v8204_v14  ;;  %v831_v24 = vpack.i.b16 %v705_v18, %v705_v18  ;;  %vm3811_vm5 = vcmp.gt.f32.partialorder %v301_v12, 0.5  ;;  %v709_v32 = vrot.slane %v671_v22, %v8186_v4  ;;  %v6309_v33 = vsel %vm6257_vm0, %v8221_v25, -inf }
  0x17   :  { %v549_v34 = vcombine.high %v8165_v56, %v8165_v56  ;;  %v4063_v36 = vsel %vm3807_vm15, 1, %v14180_v3  ;;  %v6308_v40 = vmax.f32 %v6306_v26, %v6307_v27  ;;  %v4062_v41 = vsel %vm3806_vm1, 1, %v14180_v3  ;;  %v35_v56 = vld [vmem:[%s14172_s0 + $0x34] sm:$0xf] }
  0x18   :  { %4338 = vperm.xlu1 %8023, %v4059_v61   ;;  %4335 = vperm.xlu0 %8022, %v4058_v62   ;;  %v836_v35 = vrot.slane %v831_v24, %v8186_v4  ;;  %v4065_v43 = vsel %vm3809_vm2, 1, %v14180_v3  ;;  %v4064_v44 = vsel %vm3808_vm3, 1, %v14180_v3  ;;  %v838_v45 = vpack.i.b16 %v709_v32, %v709_v32 }
  0x19   :  { %v4067_v47 = vsel %vm3811_vm5, 1, %v14180_v3  ;;  %vm3810_vm6 = vcmp.gt.f32.partialorder %v8202_v13, 0.5  ;;  %v6310_v49 = vmax.f32 %v6308_v40, %v6309_v33  ;;  %v6311_v53 = vsel %vm6257_vm0, %v8269_v48, -inf }
  0x1a   :  { %v7332_v46 = vcombine.low %v836_v35, %v836_v35  ;;  %v843_v52 = vrot.slane %v838_v45, %v8186_v4  ;;  %v8286_v55 = vsel %vm6257_vm0, %v8274_v50, -inf  ;;  %v8290_v57 = vsel %vm6257_vm0, %v8279_v51, -inf }
  0x1b   :  { %v4066_v15 = vsel %vm3810_vm6, 1, %v14180_v3  ;;  %v6313_v18 = vsel %vm6257_vm0, %v305_v10, -inf  ;;  %v6312_v22 = vmax.f32 %v6310_v49, %v6311_v53  ;;  %vm3813_vm7 = vcmp.gt.f32.partialorder %v8221_v25, 0.5 }
  0x1c   :  { %4344 = vperm.xlu1 %8023, %v4061_v19   ;;  %4341 = vperm.xlu0 %8022, %v4060_v20   ;;  %v1182_v58 = vsub.bf16 %v22_v28, %v7332_v46  ;;  %v1183_v60 = vsub.bf16 %v23_v29, %v7332_v46  ;;  %v1184_v61 = vsub.bf16 %v24_v30, %v7332_v46  ;;  %vm3812_vm8 = vcmp.gt.f32.partialorder %v8216_v23, 0.5  ;;  %v32_v30 = vld [vmem:[%s14172_s0 + $0x28] sm:$0xf] }
  0x1d   :  { %v1185_v62 = vsub.bf16 %v25_v31, %v7332_v46  ;;  %v1186_v63 = vsub.bf16 %v26_v37, %v7332_v46  ;;  %v1187_v0 = vsub.bf16 %v27_v38, %v7332_v46  ;;  %v1188_v1 = vsub.bf16 %v28_v39, %v7332_v46  ;;  %v34_v37 = vld [vmem:[%s14172_s0 + $0x30] sm:$0xf] }
  0x1e   :  { %v1189_v5 = vsub.bf16 %v29_v42, %v7332_v46  ;;  %v1438_v6 = vmax.bf16 %v14180_v3, %v1182_v58  ;;  %v1439_v7 = vmax.bf16 %v14180_v3, %v1183_v60  ;;  %v1440_v8 = vmax.bf16 %v14180_v3, %v1184_v61  ;;  %v36_v46 = vld [vmem:[%s14172_s0 + $0x38] sm:$0xf]  ;;  %v8383_v58 = vld [vmem:[%s14174_s2 + $0xe0] sm:$0xff]  ;;  %v37_v60 = vld [vmem:[%s14172_s0 + $0x3c] sm:$0xf] }
  0x1f   :  { %v1441_v9 = vmax.bf16 %v14180_v3, %v1185_v62  ;;  %v1442_v11 = vmax.bf16 %v14180_v3, %v1186_v63  ;;  %v1443_v12 = vmax.bf16 %v14180_v3, %v1187_v0  ;;  %v8311_v21 = vcombine.low %v843_v52, %v843_v52 }
  0x20   :  { %4350 = vperm.xlu1 %8023, %v4063_v36   ;;  %4347 = vperm.xlu0 %8022, %v4062_v41   ;;  %v7364_v19 = vcombine.low %v1438_v6, %v1439_v7  ;;  %v6323_v13 = vmax.f32 %v8290_v57, %v8286_v55  ;;  %v1444_v26 = vmax.bf16 %v14180_v3, %v1188_v1  ;;  %v33_v36 = vld [vmem:[%s14172_s0 + $0x2c] sm:$0xf]  ;;  %v4068_v38 = vsel %vm3812_vm8, 1, %v14180_v3  ;;  %v308_v41 = vld [vmem:[%s14174_s2 + $0xd0] sm:$0xff] }
  0x21   :  { %v7365_v20 = vcombine.low %v1440_v8, %v1441_v9  ;;  %v7366_v24 = vcombine.low %v1442_v11, %v1443_v12  ;;  %v1445_v27 = vmax.bf16 %v14180_v3, %v1189_v5  ;;  %v1190_v28 = vsub.bf16 %v30_v16, %v8311_v21  ;;  %v311_v1 = vld [vmem:[%s14174_s2 + $0xe8] sm:$0xff] }
  0x22   :  { %7757 = vmatprep.mubr.msk.bf16.mxu0 %vm2350_vm4, %v7364_v19  ;;  %v1191_v29 = vsub.bf16 %v31_v17, %v8311_v21  ;;  %v8326_v31 = vmax.f32 %v6312_v22, %v6313_v18  ;;  %v8332_v32 = vrot.slane %v549_v34, %v8170_v59  ;;  %v4069_v34 = vsel %vm3813_vm7, 1, %v14180_v3  ;;  %v8408_v9 = vld [vmem:[%s14174_s2 + $0x108] sm:$0xff]  ;;  %v8421_v17 = vld [vmem:[%s14174_s2 + $0x100] sm:$0xff] }
  0x23   :  { %7758 = vmatmul.mubr.msk.bf16.vlgmr.msra.gmra.mxu0 %vm2350_vm4, %v7365_v20  ;;  %v1446_v33 = vmax.bf16 %v14180_v3, %v1190_v28  ;;  %vm3815_vm9 = vcmp.gt.f32.partialorder %v305_v10, 0.5  ;;  %vm3814_vm10 = vcmp.gt.f32.partialorder %v8269_v48, 0.5  ;;  %v7367_v39 = vcombine.low %v1444_v26, %v1445_v27  ;;  %v38_v18 = vld [vmem:[%s14172_s0 + $0x40] sm:$0xf]  ;;  %v313_v26 = vld [vmem:[%s14174_s2 + $0xf8] sm:$0xff] }
  0x24   :  { %4356 = vperm.xlu1 %8023, %v4065_v43   ;;  %4353 = vperm.xlu0 %8022, %v4064_v44   ;;  %14268 = vst [vmem:[#allocation8_spill] sm:$0xff] %v8326_v31  ;;  %v1447_v35 = vmax.bf16 %v14180_v3, %v1191_v29  ;;  %v1192_v40 = vsub.bf16 %v32_v30, %v8311_v21  ;;  %vm3817_vm11 = vcmp.gt.f32.partialorder %v8274_v50, 0.5  ;;  %vm3816_vm12 = vcmp.gt.f32.partialorder %v8279_v51, 0.5  ;;  %v309_v43 = vld [vmem:[%s14174_s2 + $0xd8] sm:$0xff]  ;;  %v8442_v29 = vld [vmem:[%s14174_s2 + $0x110] sm:$0xff] }
  0x25   :  { %7761 = vmatprep.mubr.msk.bf16.mxu0 %vm2350_vm4, %v7366_v24  ;;  %v1193_v25 = vsub.bf16 %v33_v36, %v8311_v21  ;;  %v1194_v42 = vsub.bf16 %v34_v37, %v8311_v21  ;;  %v1195_v23 = vsub.bf16 %v35_v56, %v8311_v21  ;;  %v6324_v44 = vsel %vm6257_vm0, %v308_v41, -inf }
  0x26   :  { %v7368_v45 = vcombine.low %v1446_v33, %v1447_v35  ;;  %v6325_v49 = vmax.f32 %v6323_v13, %v6324_v44  ;;  %v7317_v52 = vpack.i.b16 %v8332_v32, %v8332_v32  ;;  %v4071_v53 = vsel %vm3815_vm9, 1, %v14180_v3  ;;  %v39_v13 = vld [vmem:[%s14172_s0 + $0x44] sm:$0xf] }
  0x27   :  { %v4070_v55 = vsel %vm3814_vm10, 1, %v14180_v3  ;;  %v4073_v57 = vsel %vm3817_vm11, 1, %v14180_v3  ;;  %v4072_v61 = vsel %vm3816_vm12, 1, %v14180_v3  ;;  %vm3819_vm13 = vcmp.gt.f32.partialorder %v309_v43, 0.5 }
  0x28   :  { %4362 = vperm.xlu1 %8023, %v4067_v47   ;;  %4359 = vperm.xlu0 %8022, %v4066_v15   ;;  %v6326_v47 = vsel %vm6257_vm0, %v309_v43, -inf  ;;  %v713_v48 = vrot.slane %v7317_v52, %v8186_v4  ;;  %v6328_v50 = vsel %vm6257_vm0, %v8383_v58, -inf  ;;  %v1448_v62 = vmax.bf16 %v14180_v3, %v1192_v40  ;;  %v312_v15 = vld [vmem:[%s14174_s2 + $0xf0] sm:$0xff] }
  0x29   :  { %v1449_v63 = vmax.bf16 %v14180_v3, %v1193_v25  ;;  %v1196_v0 = vsub.bf16 %v36_v46, %v8311_v21  ;;  %v6327_v51 = vmax.f32 %v6325_v49, %v6326_v47  ;;  %v1450_v5 = vmax.bf16 %v14180_v3, %v1194_v42  ;;  %v40_v42 = vld [vmem:[%s14172_s0 + $0x48] sm:$0xf]  ;;  %v8474_v46 = vld [vmem:[%s14174_s2 + $0x118] sm:$0xff]  ;;  %v43_v52 = vld [vmem:[%s14172_s0 + $0x54] sm:$0xf] }
  0x2a   :  { %v1451_v6 = vmax.bf16 %v14180_v3, %v1195_v23  ;;  %v845_v7 = vpack.i.b16 %v713_v48, %v713_v48  ;;  %v6330_v8 = vsel %vm6257_vm0, %v311_v1, -inf  ;;  %v1197_v10 = vsub.bf16 %v37_v60, %v8311_v21 }
  0x2b   :  { %7762 = vmatmul.mubr.msk.bf16.gmra.mxu0 %vm2350_vm4, %v7367_v39  ;;  %v4075_v11 = vsel %vm3819_vm13, 1, %v14180_v3  ;;  %v6329_v12 = vmax.f32 %v6327_v51, %v6328_v50  ;;  %v6343_v16 = vsel %vm6257_vm0, %v8408_v9, -inf  ;;  %vm3818_vm14 = vcmp.gt.f32.partialorder %v308_v41, 0.5  ;;  %v41_v41 = vld [vmem:[%s14172_s0 + $0x4c] sm:$0xf] }
  0x2c   :  { %4368 = vperm.xlu1 %8023, %v4069_v34   ;;  %4365 = vperm.xlu0 %8022, %v4068_v38   ;;  %v850_v19 = vrot.slane %v845_v7, %v8186_v4  ;;  %v6332_v20 = vsel %vm6257_vm0, %v312_v15, -inf  ;;  %v6342_v21 = vsel %vm6257_vm0, %v8421_v17, -inf  ;;  %v7369_v22 = vcombine.low %v1448_v62, %v1449_v63 }
  0x2d   :  { %7765 = vmatprep.mubr.msk.bf16.mxu0 %vm2350_vm4, %v7368_v45  ;;  %v8431_v24 = vmax.bf16 %v14180_v3, %v1196_v0  ;;  %v6331_v27 = vmax.f32 %v6329_v12, %v6330_v8  ;;  %v6344_v28 = vmax.f32 %v6342_v21, %v6343_v16  ;;  %v7370_v30 = vcombine.low %v1450_v5, %v1451_v6  ;;  %v42_v45 = vld [vmem:[%s14172_s0 + $0x50] sm:$0xf]  ;;  %v319_v5 = vld [vmem:[%s14174_s2 + $0x128] sm:$0xff]  ;;  %v318_v6 = vld [vmem:[%s14174_s2 + $0x120] sm:$0xff] }
  0x2e   :  { %v8444_v33 = vcombine.low %v850_v19, %v850_v19  ;;  %v6334_v35 = vsel %vm6257_vm0, %v313_v26, -inf  ;;  %v6345_v36 = vsel %vm6257_vm0, %v8442_v29, -inf  ;;  %v1453_v37 = vmax.bf16 %v14180_v3, %v1197_v10  ;;  %v8516_v19 = vld [vmem:[%s14174_s2 + $0x130] sm:$0xff] }
  0x2f   :  { %v4074_v56 = vsel %vm3818_vm14, 1, %v14180_v3  ;;  %v6333_v34 = vmax.f32 %v6331_v27, %v6332_v20  ;;  %v6346_v38 = vmax.f32 %v6344_v28, %v6345_v36  ;;  %vm3821_vm15 = vcmp.gt.f32.partialorder %v311_v1, 0.5  ;;  %v8521_v20 = vld [vmem:[%s14174_s2 + $0x148] sm:$0xff]  ;;  %v46_v28 = vld [vmem:[%s14172_s0 + $0x60] sm:$0xf] }
  0x30   :  { %4374 = vperm.xlu1 %8023, %v4071_v53   ;;  %4371 = vperm.xlu0 %8022, %v4070_v55   ;;  %v1198_v39 = vsub.bf16 %v38_v18, %v8444_v33  ;;  %v1199_v40 = vsub.bf16 %v39_v13, %v8444_v33  ;;  %v641_v25 = vunpack.i.h.s16 %v8332_v32  ;;  %vm3820_vm1 = vcmp.gt.f32.partialorder %v8383_v58, 0.5  ;;  %v45_v58 = vld [vmem:[%s14172_s0 + $0x5c] sm:$0xf]  ;;  %v8545_v36 = vld [vmem:[%s14174_s2 + $0x140] sm:$0xff] }
  0x31   :  { %v8463_v23 = vmax.f32 %v6333_v34, %v6334_v35  ;;  %vm3823_vm2 = vcmp.gt.f32.partialorder %v313_v26, 0.5  ;;  %vm3822_vm3 = vcmp.gt.f32.partialorder %v312_v15, 0.5  ;;  %v7371_v47 = vcombine.low %v8431_v24, %v1453_v37  ;;  %v321_v37 = vld [vmem:[%s14174_s2 + $0x138] sm:$0xff] }
  0x32   :  { %v1454_v43 = vmax.bf16 %v14180_v3, %v1198_v39  ;;  %v1455_v44 = vmax.bf16 %v14180_v3, %v1199_v40  ;;  %v4077_v49 = vsel %vm3821_vm15, 1, %v14180_v3  ;;  %v6347_v53 = vsel %vm6257_vm0, %v8474_v46, -inf }
  0x33   :  { %7766 = vmatmul.mubr.msk.bf16.gmra.mxu0 %vm2350_vm4, %v7369_v22  ;;  %14269 = vst [vmem:[#allocation9_spill] sm:$0xff] %v8463_v23  ;;  %v1200_v55 = vsub.bf16 %v40_v42, %v8444_v33  ;;  %v4076_v60 = vsel %vm3820_vm1, 1, %v14180_v3  ;;  %v673_v48 = vpack.i.b16 %v641_v25, %v641_v25  ;;  %v4079_v50 = vsel %vm3823_vm2, 1, %v14180_v3 }
  0x34   :  { %4380 = vperm.xlu1 %8023, %v4073_v57   ;;  %4377 = vperm.xlu0 %8022, %v4072_v61   ;;  %v1201_v57 = vsub.bf16 %v41_v41, %v8444_v33  ;;  %v44_v61 = vld [vmem:[%s14172_s0 + $0x58] sm:$0xf]  ;;  %v4078_v62 = vsel %vm3822_vm3, 1, %v14180_v3  ;;  %v1202_v63 = vsub.bf16 %v42_v45, %v8444_v33  ;;  %vm3825_vm5 = vcmp.gt.f32.partialorder %v8408_v9, 0.5  ;;  %v48_v45 = vld [vmem:[%s14172_s0 + $0x68] sm:$0xf] }
  0x35   :  { %7769 = vmatprep.mubr.msk.bf16.mxu0 %vm2350_vm4, %v7370_v30  ;;  %v7372_v0 = vcombine.low %v1454_v43, %v1455_v44  ;;  %v1203_v1 = vsub.bf16 %v43_v52, %v8444_v33  ;;  %v717_v51 = vrot.slane %v673_v48, %v8186_v4  ;;  %v6348_v7 = vmax.f32 %v6346_v38, %v6347_v53  ;;  %v47_v30 = vld [vmem:[%s14172_s0 + $0x64] sm:$0xf]  ;;  %v8582_v53 = vld [vmem:[%s14174_s2 + $0x150] sm:$0xff] }
  0x36   :  { %v1204_v8 = vsub.bf16 %v44_v61, %v8444_v33  ;;  %vm3824_vm6 = vcmp.gt.f32.partialorder %v8421_v17, 0.5  ;;  %v6351_v10 = vsel %vm6257_vm0, %v319_v5, -inf  ;;  %v1456_v12 = vmax.bf16 %v14180_v3, %v1200_v55 }
  0x37   :  { %v1457_v15 = vmax.bf16 %v14180_v3, %v1201_v57  ;;  %v852_v16 = vpack.i.b16 %v717_v51, %v717_v51  ;;  %v1458_v21 = vmax.bf16 %v14180_v3, %v1202_v63  ;;  %v1205_v22 = vsub.bf16 %v45_v58, %v8444_v33  ;;  %v52_v51 = vld [vmem:[%s14172_s0 + $0x78] sm:$0xf] }
  0x38   :  { %4386 = vperm.xlu1 %8023, %v4075_v11   ;;  %4383 = vperm.xlu0 %8022, %v4074_v56   ;;  %v6349_v11 = vsel %vm6257_vm0, %v318_v6, -inf  ;;  %v6353_v24 = vsel %vm6257_vm0, %v8516_v19, -inf  ;;  %v6364_v13 = vsel %vm6257_vm0, %v8521_v20, -inf  ;;  %v1459_v26 = vmax.bf16 %v14180_v3, %v1203_v1  ;;  %v8615_v1 = vld [vmem:[%s14174_s2 + $0x158] sm:$0xff] }
  0x39   :  { %v6350_v18 = vmax.f32 %v6348_v7, %v6349_v11  ;;  %v4081_v27 = vsel %vm3825_vm5, 1, %v14180_v3  ;;  %v857_v33 = vrot.slane %v852_v16, %v8186_v4  ;;  %v4080_v9 = vsel %vm3824_vm6, 1, %v14180_v3  ;;  %v8639_v16 = vld [vmem:[%s14174_s2 + $0x160] sm:$0xff] }
  0x3a   :  { %vm3827_vm7 = vcmp.gt.f32.partialorder %v8474_v46, 0.5  ;;  %vm3826_vm8 = vcmp.gt.f32.partialorder %v8442_v29, 0.5  ;;  %v6363_v56 = vsel %vm6257_vm0, %v8545_v36, -inf  ;;  %v6355_v38 = vsel %vm6257_vm0, %v321_v37, -inf  ;;  %v51_v29 = vld [vmem:[%s14172_s0 + $0x74] sm:$0xf] }
  0x3b   :  { %7770 = vmatmul.mubr.msk.bf16.gmra.mxu0 %vm2350_vm4, %v7371_v47  ;;  %v6352_v35 = vmax.f32 %v6350_v18, %v6351_v10  ;;  %v8557_v34 = vcombine.low %v857_v33, %v857_v33  ;;  %v6365_v40 = vmax.f32 %v6363_v56, %v6364_v13  ;;  %v7373_v25 = vcombine.low %v1456_v12, %v1457_v15  ;;  %v53_v12 = vld [vmem:[%s14172_s0 + $0x7c] sm:$0xf]  ;;  %v8659_v33 = vld [vmem:[%s14174_s2 + $0x188] sm:$0xff]  ;;  %v328_v56 = vld [vmem:[%s14174_s2 + $0x170] sm:$0xff] }
  0x3c   :  { %4392 = vperm.xlu1 %8023, %v4077_v49   ;;  %4389 = vperm.xlu0 %8022, %v4076_v60   ;;  %v8561_v17 = vmax.bf16 %v14180_v3, %v1204_v8  ;;  %v8564_v42 = vmax.bf16 %v14180_v3, %v1205_v22  ;;  %vm3829_vm9 = vcmp.gt.f32.partialorder %v319_v5, 0.5  ;;  %v7374_v41 = vcombine.low %v1458_v21, %v1459_v26  ;;  %v49_v49 = vld [vmem:[%s14172_s0 + $0x6c] sm:$0xf]  ;;  %v50_v60 = vld [vmem:[%s14172_s0 + $0x70] sm:$0xf] }
  0x3d   :  { %7773 = vmatprep.mubr.msk.bf16.mxu0 %vm2350_vm4, %v7372_v0  ;;  %v6354_v39 = vmax.f32 %v6352_v35, %v6353_v24  ;;  %v1206_v43 = vsub.bf16 %v46_v28, %v8557_v34  ;;  %v1207_v44 = vsub.bf16 %v47_v30, %v8557_v34  ;;  %vm3828_vm10 = vcmp.gt.f32.partialorder %v318_v6, 0.5  ;;  %v327_v24 = vld [vmem:[%s14174_s2 + $0x168] sm:$0xff] }
  0x3e   :  { %v4083_v47 = vsel %vm3827_vm7, 1, %v14180_v3  ;;  %vm3831_vm11 = vcmp.gt.f32.partialorder %v321_v37, 0.5  ;;  %v8586_v55 = vcombine.high %v8184_v2, %v8184_v2  ;;  %v4082_v46 = vsel %vm3826_vm8, 1, %v14180_v3 }
  0x3f   :  { %v8577_v52 = vmax.f32 %v6354_v39, %v6355_v38  ;;  %v4085_v57 = vsel %vm3829_vm9, 1, %v14180_v3  ;;  %v6366_v61 = vsel %vm6257_vm0, %v8582_v53, -inf  ;;  %v7375_v48 = vcombine.low %v8561_v17, %v8564_v42  ;;  %v8671_v38 = vld [vmem:[%s14174_s2 + $0x180] sm:$0xff] }
  0x40   :  { %4398 = vperm.xlu1 %8023, %v4079_v50   ;;  %4395 = vperm.xlu0 %8022, %v4078_v62   ;;  %v4084_v2 = vsel %vm3828_vm10, 1, %v14180_v3  ;;  %vm3830_vm12 = vcmp.gt.f32.partialorder %v8516_v19, 0.5  ;;  %vm3833_vm13 = vcmp.gt.f32.partialorder %v8521_v20, 0.5  ;;  %v1462_v50 = vmax.bf16 %v14180_v3, %v1206_v43 }
  0x41   :  { %14270 = vst [vmem:[#allocation10_spill] sm:$0xff] %v8577_v52  ;;  %v1463_v62 = vmax.bf16 %v14180_v3, %v1207_v44  ;;  %v1208_v63 = vsub.bf16 %v48_v45, %v8557_v34  ;;  %v4087_v0 = vsel %vm3831_vm11, 1, %v14180_v3  ;;  %v1209_v58 = vsub.bf16 %v49_v49, %v8557_v34  ;;  %v8692_v44 = vld [vmem:[%s14174_s2 + $0x190] sm:$0xff]  ;;  %v55_v49 = vld [vmem:[%s14172_s0 + $0x84] sm:$0xf] }
  0x42   :  { %v6368_v5 = vsel %vm6257_vm0, %v8615_v1, -inf  ;;  %v6367_v6 = vmax.f32 %v6365_v40, %v6366_v61  ;;  %v7318_v7 = vpack.i.b16 %v8586_v55, %v8586_v55  ;;  %v4086_v8 = vsel %vm3830_vm12, 1, %v14180_v3 }
  0x43   :  { %7774 = vmatmul.mubr.msk.bf16.gmra.mxu0 %vm2350_vm4, %v7373_v25  ;;  %v1210_v10 = vsub.bf16 %v50_v60, %v8557_v34  ;;  %v1211_v11 = vsub.bf16 %v51_v29, %v8557_v34  ;;  %v4089_v15 = vsel %vm3833_vm13, 1, %v14180_v3  ;;  %vm3832_vm14 = vcmp.gt.f32.partialorder %v8545_v36, 0.5  ;;  %v329_v36 = vld [vmem:[%s14174_s2 + $0x178] sm:$0xff] }
  0x44   :  { %4404 = vperm.xlu1 %8023, %v4081_v27   ;;  %4401 = vperm.xlu0 %8022, %v4080_v9   ;;  %vm3835_vm15 = vcmp.gt.f32.partialorder %v8615_v1, 0.5  ;;  %v721_v18 = vrot.slane %v7318_v7, %v8186_v4  ;;  %v6370_v19 = vsel %vm6257_vm0, %v8639_v16, -inf  ;;  %v7376_v21 = vcombine.low %v1462_v50, %v1463_v62  ;;  %v58_v7 = vld [vmem:[%s14172_s0 + $0x90] sm:$0xf] }
  0x45   :  { %7777 = vmatprep.mubr.msk.bf16.mxu0 %vm2350_vm4, %v7374_v41  ;;  %v8647_v22 = vmax.bf16 %v14180_v3, %v1208_v63  ;;  %v1212_v20 = vsub.bf16 %v52_v51, %v8557_v34  ;;  %v6369_v13 = vmax.f32 %v6367_v6, %v6368_v5  ;;  %v1465_v26 = vmax.bf16 %v14180_v3, %v1209_v58  ;;  %v57_v58 = vld [vmem:[%s14172_s0 + $0x8c] sm:$0xf] }
  0x46   :  { %v1213_v27 = vsub.bf16 %v53_v12, %v8557_v34  ;;  %v859_v28 = vpack.i.b16 %v721_v18, %v721_v18  ;;  %v6372_v30 = vsel %vm6257_vm0, %v327_v24, -inf  ;;  %v1466_v35 = vmax.bf16 %v14180_v3, %v1210_v10 }
  0x47   :  { %v1467_v9 = vmax.bf16 %v14180_v3, %v1211_v11  ;;  %v6371_v37 = vmax.f32 %v6369_v13, %v6370_v19  ;;  %v6385_v34 = vsel %vm6257_vm0, %v8659_v33, -inf  ;;  %v4088_v39 = vsel %vm3832_vm14, 1, %v14180_v3  ;;  %v59_v11 = vld [vmem:[%s14172_s0 + $0x94] sm:$0xf] }
  0x48   :  { %4410 = vperm.xlu1 %8023, %v4083_v47   ;;  %4407 = vperm.xlu0 %8022, %v4082_v46   ;;  %v864_v40 = vrot.slane %v859_v28, %v8186_v4  ;;  %v6374_v25 = vsel %vm6257_vm0, %v328_v56, -inf  ;;  %v6384_v17 = vsel %vm6257_vm0, %v8671_v38, -inf  ;;  %v8683_v42 = vmax.bf16 %v14180_v3, %v1212_v20  ;;  %v54_v47 = vld [vmem:[%s14172_s0 + $0x80] sm:$0xf] }
  0x49   :  { %vm3834_vm1 = vcmp.gt.f32.partialorder %v8582_v53, 0.5  ;;  %v6373_v41 = vmax.f32 %v6371_v37, %v6372_v30  ;;  %v6386_v43 = vmax.f32 %v6384_v17, %v6385_v34  ;;  %v8695_v45 = vmax.bf16 %v14180_v3, %v1213_v27  ;;  %v335_v30 = vld [vmem:[%s14174_s2 + $0x1a8] sm:$0xff]  ;;  %v336_v17 = vld [vmem:[%s14174_s2 + $0x1b0] sm:$0xff] }
  0x4a   :  { %v8703_v46 = vcombine.low %v864_v40, %v864_v40  ;;  %v6387_v60 = vsel %vm6257_vm0, %v8692_v44, -inf  ;;  %v7377_v61 = vcombine.low %v8647_v22, %v1465_v26  ;;  %vm3837_vm2 = vcmp.gt.f32.partialorder %v327_v24, 0.5  ;;  %v61_v24 = vld [vmem:[%s14172_s0 + $0x9c] sm:$0xf] }
  0x4b   :  { %7778 = vmatmul.mubr.msk.bf16.gmra.mxu0 %vm2350_vm4, %v7375_v48  ;;  %v7378_v48 = vcombine.low %v1466_v35, %v1467_v9  ;;  %v6388_v29 = vmax.f32 %v6386_v43, %v6387_v60  ;;  %vm3836_vm3 = vcmp.gt.f32.partialorder %v8639_v16, 0.5  ;;  %vm3839_vm5 = vcmp.gt.f32.partialorder %v329_v36, 0.5  ;;  %v60_v16 = vld [vmem:[%s14172_s0 + $0x98] sm:$0xf]  ;;  %v334_v35 = vld [vmem:[%s14174_s2 + $0x1a0] sm:$0xff] }
  0x4c   :  { %4416 = vperm.xlu1 %8023, %v4085_v57   ;;  %4413 = vperm.xlu0 %8022, %v4084_v2   ;;  %v6376_v57 = vsel %vm6257_vm0, %v329_v36, -inf  ;;  %v6375_v2 = vmax.f32 %v6373_v41, %v6374_v25  ;;  %v643_v50 = vunpack.i.h.s16 %v8586_v55  ;;  %v1214_v62 = vsub.bf16 %v54_v47, %v8703_v46  ;;  %v338_v60 = vld [vmem:[%s14174_s2 + $0x1c0] sm:$0xff] }
  0x4d   :  { %7781 = vmatprep.mubr.msk.bf16.mxu0 %vm2350_vm4, %v7376_v21  ;;  %v1215_v63 = vsub.bf16 %v55_v49, %v8703_v46  ;;  %vm3838_vm6 = vcmp.gt.f32.partialorder %v328_v56, 0.5  ;;  %v7379_v5 = vcombine.low %v8683_v42, %v8695_v45  ;;  %v4091_v55 = vsel %vm3835_vm15, 1, %v14180_v3  ;;  %v339_v42 = vld [vmem:[%s14174_s2 + $0x1c8] sm:$0xff] }
  0x4e   :  { %v8719_v51 = vmax.f32 %v6375_v2, %v6376_v57  ;;  %v4090_v6 = vsel %vm3834_vm1, 1, %v14180_v3  ;;  %vm3841_vm7 = vcmp.gt.f32.partialorder %v8659_v33, 0.5  ;;  %v4093_v10 = vsel %vm3837_vm2, 1, %v14180_v3 }
  0x4f   :  { %v4092_v1 = vsel %vm3836_vm3, 1, %v14180_v3  ;;  %v4095_v53 = vsel %vm3839_vm5, 1, %v14180_v3  ;;  %v4094_v18 = vsel %vm3838_vm6, 1, %v14180_v3  ;;  %vm3840_vm8 = vcmp.gt.f32.partialorder %v8671_v38, 0.5 }
  0x50   :  { %4422 = vperm.xlu1 %8023, %v4087_v0   ;;  %4419 = vperm.xlu0 %8022, %v4086_v8   ;;  %v56_v0 = vld [vmem:[%s14172_s0 + $0x88] sm:$0xf]  ;;  %14271 = vst [vmem:[#allocation11_spill] sm:$0xff] %v8719_v51  ;;  %v333_v8 = vld [vmem:[%s14174_s2 + $0x198] sm:$0xff]  ;;  %v675_v19 = vpack.i.b16 %v643_v50, %v643_v50  ;;  %v1470_v21 = vmax.bf16 %v14180_v3, %v1214_v62  ;;  %v8765_v13 = vsel %vm3841_vm7, 1, %v14180_v3  ;;  %v6393_v37 = vsel %vm6257_vm0, %v335_v30, -inf }
  0x51   :  { %v6389_v12 = vsel %vm6257_vm0, %v333_v8, -inf  ;;  %v1471_v22 = vmax.bf16 %v14180_v3, %v1215_v63  ;;  %v1217_v20 = vsub.bf16 %v57_v58, %v8703_v46  ;;  %v1218_v26 = vsub.bf16 %v58_v7, %v8703_v46  ;;  %v62_v50 = vld [vmem:[%s14172_s0 + $0xa0] sm:$0xf] }
  0x52   :  { %v1219_v27 = vsub.bf16 %v59_v11, %v8703_v46  ;;  %v725_v28 = vrot.slane %v675_v19, %v8186_v4  ;;  %v6390_v9 = vmax.f32 %v6388_v29, %v6389_v12  ;;  %v1220_v33 = vsub.bf16 %v60_v16, %v8703_v46  ;;  %v65_v11 = vld [vmem:[%s14172_s0 + $0xac] sm:$0xf] }
  0x53   :  { %7782 = vmatmul.mubr.msk.bf16.gmra.mxu0 %vm2350_vm4, %v7377_v61  ;;  %vm3843_vm9 = vcmp.gt.f32.partialorder %v333_v8, 0.5  ;;  %v6391_v56 = vsel %vm6257_vm0, %v334_v35, -inf  ;;  %v7380_v36 = vcombine.low %v1470_v21, %v1471_v22  ;;  %v8790_v41 = vmax.bf16 %v14180_v3, %v1217_v20  ;;  %v64_v8 = vld [vmem:[%s14172_s0 + $0xa8] sm:$0xf] }
  0x54   :  { %4428 = vperm.xlu1 %8023, %v4089_v15   ;;  %4425 = vperm.xlu0 %8022, %v4088_v39   ;;  %v1216_v15 = vsub.bf16 %v56_v0, %v8703_v46  ;;  %v1221_v39 = vsub.bf16 %v61_v24, %v8703_v46  ;;  %v866_v40 = vpack.i.b16 %v725_v28, %v725_v28  ;;  %v6395_v43 = vsel %vm6257_vm0, %v336_v17, -inf }
  0x55   :  { %7785 = vmatprep.mubr.msk.bf16.mxu0 %vm2350_vm4, %v7378_v48  ;;  %v6392_v25 = vmax.f32 %v6390_v9, %v6391_v56  ;;  %v6406_v45 = vsel %vm6257_vm0, %v339_v42, -inf  ;;  %v8795_v47 = vmax.bf16 %v14180_v3, %v1218_v26  ;;  %v8798_v49 = vmax.bf16 %v14180_v3, %v1219_v27  ;;  %v337_v48 = vld [vmem:[%s14174_s2 + $0x1b8] sm:$0xff] }
  0x56   :  { %v8780_v34 = vmax.bf16 %v14180_v3, %v1216_v15  ;;  %v871_v46 = vrot.slane %v866_v40, %v8186_v4  ;;  %v8805_v61 = vmax.bf16 %v14180_v3, %v1220_v33  ;;  %vm3842_vm10 = vcmp.gt.f32.partialorder %v8692_v44, 0.5  ;;  %v8854_v44 = vld [vmem:[%s14174_s2 + $0x1d0] sm:$0xff] }
  0x57   :  { %v6394_v57 = vmax.f32 %v6392_v25, %v6393_v37  ;;  %vm3845_vm11 = vcmp.gt.f32.partialorder %v335_v30, 0.5  ;;  %v6405_v2 = vsel %vm6257_vm0, %v338_v60, -inf  ;;  %v8814_v29 = vmax.bf16 %v14180_v3, %v1221_v39 }
  0x58   :  { %4434 = vperm.xlu1 %8023, %v4091_v55   ;;  %4431 = vperm.xlu0 %8022, %v4090_v6   ;;  %v6397_v62 = vsel %vm6257_vm0, %v337_v48, -inf  ;;  %v6407_v0 = vmax.f32 %v6405_v2, %v6406_v45  ;;  %v4096_v58 = vsel %vm3840_vm8, 1, %v14180_v3  ;;  %v63_v55 = vld [vmem:[%s14172_s0 + $0xa4] sm:$0xf]  ;;  %v8829_v6 = vcombine.low %v871_v46, %v871_v46 }
  0x59   :  { %v6396_v63 = vmax.f32 %v6394_v57, %v6395_v43  ;;  %vm3844_vm12 = vcmp.gt.f32.partialorder %v334_v35, 0.5  ;;  %v7381_v7 = vcombine.low %v8780_v34, %v8790_v41  ;;  %v4098_v38 = vsel %vm3842_vm10, 1, %v14180_v3 }
  0x5a   :  { %vm3847_vm13 = vcmp.gt.f32.partialorder %v337_v48, 0.5  ;;  %vm3846_vm14 = vcmp.gt.f32.partialorder %v336_v17, 0.5  ;;  %v8858_v15 = vcombine.high %v8332_v32, %v8332_v32  ;;  %v4100_v16 = vsel %vm3844_vm12, 1, %v14180_v3 }
  0x5b   :  { %7786 = vmatmul.mubr.msk.bf16.gmra.mxu0 %vm2350_vm4, %v7379_v5  ;;  %v4099_v5 = vsel %vm3843_vm9, 1, %v14180_v3  ;;  %v8849_v12 = vmax.f32 %v6396_v63, %v6397_v62  ;;  %vm3849_vm15 = vcmp.gt.f32.partialorder %v339_v42, 0.5  ;;  %v6408_v19 = vsel %vm6257_vm0, %v8854_v44, -inf }
  0x5c   :  { %4440 = vperm.xlu1 %8023, %v4093_v10   ;;  %4437 = vperm.xlu0 %8022, %v4092_v1   ;;  %v7382_v10 = vcombine.low %v8795_v47, %v8798_v49  ;;  %v4101_v1 = vsel %vm3845_vm11, 1, %v14180_v3 }
  0x5d   :  { %7789 = vmatprep.mubr.msk.bf16.mxu0 %vm2350_vm4, %v7380_v36  ;;  %14272 = vst [vmem:[#allocation12_spill] sm:$0xff] %v8849_v12 }
  0x60   :  { %4446 = vperm.xlu1 %8023, %v4095_v53   ;;  %4443 = vperm.xlu0 %8022, %v4094_v18   ;;  %v341_v53 = vld [vmem:[%s14174_s2 + $0x1d8] sm:$0xff]  ;;  %v7383_v18 = vcombine.low %v8805_v61, %v8814_v29 }
  0x61   :  { %10 = vsyncpa [#allocation3], 0  ;;  %v1222_v21 = vsub.bf16 %v62_v50, %v8829_v6  ;;  %v1223_v22 = vsub.bf16 %v63_v55, %v8829_v6  ;;  %v66_v32 = vld [vmem:[%s14172_s0 + $0xb0] sm:$0xf]  ;;  %v67_v20 = vld [vmem:[%s14172_s0 + $0xb4] sm:$0xf]  ;;  %v1224_v24 = vsub.bf16 %v64_v8, %v8829_v6  ;;  %v1225_v26 = vsub.bf16 %v65_v11, %v8829_v6 }
  0x62   :  { %vm3848_vm1 = vcmp.gt.f32.partialorder %v338_v60, 0.5  ;;  %vm3851_vm2 = vcmp.gt.f32.partialorder %v341_v53, 0.5  ;;  %v8880_v27 = vsel %vm3846_vm14, 1, %v14180_v3  ;;  %v68_v28 = vld [vmem:[%s14172_s0 + $0xb8] sm:$0xf]  ;;  %v8887_v30 = vsel %vm3849_vm15, 1, %v14180_v3 }
  0x63   :  { %v6410_v35 = vsel %vm6257_vm0, %v341_v53, -inf  ;;  %v6409_v9 = vmax.f32 %v6407_v0, %v6408_v19  ;;  %v7319_v33 = vpack.i.b16 %v8858_v15, %v8858_v15  ;;  %7790 = vmatmul.mubr.msk.bf16.gmra.mxu0 %vm2350_vm4, %v7381_v7  ;;  %v1226_v37 = vsub.bf16 %v66_v32, %v8829_v6  ;;  %v69_v34 = vld [vmem:[%s14172_s0 + $0xbc] sm:$0xf]  ;;  %v8909_v25 = vld [vmem:[%s14174_s2 + $0x1e0] sm:$0xff]  ;;  %v343_v49 = vld [vmem:[%s14174_s2 + $0x1e8] sm:$0xff] }
  0x64   :  { %4452 = vperm.xlu1 %8023, %v8765_v13   ;;  %4449 = vperm.xlu0 %8022, %v4096_v58   ;;  %v4103_v13 = vsel %vm3847_vm13, 1, %v14180_v3  ;;  %v1227_v56 = vsub.bf16 %v67_v20, %v8829_v6  ;;  %v8900_v39 = vsel %vm3848_vm1, 1, %v14180_v3  ;;  %v8904_v40 = vsel %vm3851_vm2, 1, %v14180_v3  ;;  %v347_v2 = vld [vmem:[%s14174_s2 + $0x208] sm:$0xff]  ;;  %v344_v0 = vld [vmem:[%s14174_s2 + $0x1f0] sm:$0xff]  ;;  %v345_v53 = vld [vmem:[%s14174_s2 + $0x1f8] sm:$0xff] }
  0x65   :  { %7793 = vmatprep.mubr.msk.bf16.mxu0 %vm2350_vm4, %v7382_v10  ;;  %v1478_v17 = vmax.bf16 %v14180_v3, %v1222_v21  ;;  %v1479_v42 = vmax.bf16 %v14180_v3, %v1223_v22  ;;  %v729_v36 = vrot.slane %v7319_v33, %v8186_v4  ;;  %v6412_v41 = vsel %vm6257_vm0, %v8909_v25, -inf  ;;  %v72_v61 = vld [vmem:[%s14172_s0 + $0xc8] sm:$0xf]  ;;  %v373_v51 = vld [vmem:[%s14174_s2 + $0x2d8] sm:$0xff]  ;;  %v9544_v23 = vld [vmem:[%s14174_s2 + $0x2d0] sm:$0xff] }
  0x66   :  { %v8918_v43 = vmax.bf16 %v14180_v3, %v1224_v24  ;;  %v8921_v45 = vmax.bf16 %v14180_v3, %v1225_v26  ;;  %v1228_v47 = vsub.bf16 %v68_v28, %v8829_v6  ;;  %v6411_v46 = vmax.f32 %v6409_v9, %v6410_v35  ;;  %v70_v24 = vld [vmem:[%s14172_s0 + $0xc0] sm:$0xf]  ;;  %v71_v26 = vld [vmem:[%s14172_s0 + $0xc4] sm:$0xf]  ;;  %v9000_v9 = vld [vmem:[%s14174_s2 + $0x218] sm:$0xff] }
  0x67   :  { %v1229_v57 = vsub.bf16 %v69_v34, %v8829_v6  ;;  %vm3850_vm3 = vcmp.gt.f32.partialorder %v8854_v44, 0.5  ;;  %v873_v60 = vpack.i.b16 %v729_v36, %v729_v36  ;;  %v6414_v48 = vsel %vm6257_vm0, %v343_v49, -inf  ;;  %v75_v34 = vld [vmem:[%s14172_s0 + $0xd4] sm:$0xf] }
  0x68   :  { %4458 = vperm.xlu1 %8023, %v4099_v5   ;;  %4455 = vperm.xlu0 %8022, %v4098_v38   ;;  %v8934_v50 = vmax.bf16 %v14180_v3, %v1226_v37  ;;  %v8937_v62 = vmax.bf16 %v14180_v3, %v1227_v56  ;;  %v6413_v63 = vmax.f32 %v6411_v46, %v6412_v41  ;;  %v6427_v58 = vsel %vm6257_vm0, %v347_v2, -inf  ;;  %v346_v5 = vld [vmem:[%s14174_s2 + $0x200] sm:$0xff]  ;;  %v74_v56 = vld [vmem:[%s14172_s0 + $0xd0] sm:$0xf]  ;;  %v76_v41 = vld [vmem:[%s14172_s0 + $0xd8] sm:$0xf] }
  0x69   :  { %v7384_v55 = vcombine.low %v1478_v17, %v1479_v42  ;;  %v878_v6 = vrot.slane %v873_v60, %v8186_v4  ;;  %v6416_v7 = vsel %vm6257_vm0, %v344_v0, -inf  ;;  %v6426_v10 = vsel %vm6257_vm0, %v346_v5, -inf }
  0x6a   :  { %v7385_v38 = vcombine.low %v8918_v43, %v8921_v45  ;;  %v8952_v8 = vmax.bf16 %v14180_v3, %v1228_v47  ;;  %v6415_v11 = vmax.f32 %v6413_v63, %v6414_v48  ;;  %v6428_v19 = vmax.f32 %v6426_v10, %v6427_v58  ;;  %v351_v48 = vld [vmem:[%s14174_s2 + $0x228] sm:$0xff]  ;;  %v352_v10 = vld [vmem:[%s14174_s2 + $0x230] sm:$0xff] }
  0x6b   :  { %v8963_v21 = vmax.bf16 %v14180_v3, %v1229_v57  ;;  %v8965_v22 = vcombine.low %v878_v6, %v878_v6  ;;  %7794 = vmatmul.mubr.msk.bf16.gmra.mxu0 %vm2350_vm4, %v7383_v18  ;;  %v4106_v20 = vsel %vm3850_vm3, 1, %v14180_v3  ;;  %vm3853_vm5 = vcmp.gt.f32.partialorder %v343_v49, 0.5  ;;  %v73_v18 = vld [vmem:[%s14172_s0 + $0xcc] sm:$0xf] }
  0x6c   :  { %4464 = vperm.xlu1 %8023, %v4101_v1   ;;  %4461 = vperm.xlu0 %8022, %v4100_v16   ;;  %v8960_v1 = vld [vmem:[%s14174_s2 + $0x210] sm:$0xff]  ;;  %v6418_v16 = vsel %vm6257_vm0, %v345_v53, -inf  ;;  %v6417_v28 = vmax.f32 %v6415_v11, %v6416_v7  ;;  %vm3852_vm6 = vcmp.gt.f32.partialorder %v8909_v25, 0.5  ;;  %vm3855_vm7 = vcmp.gt.f32.partialorder %v345_v53, 0.5  ;;  %v77_v25 = vld [vmem:[%s14172_s0 + $0xdc] sm:$0xf] }
  0x6d   :  { %v6429_v32 = vsel %vm6257_vm0, %v8960_v1, -inf  ;;  %7797 = vmatprep.mubr.msk.bf16.mxu0 %vm2350_vm4, %v7384_v55  ;;  %vm3854_vm8 = vcmp.gt.f32.partialorder %v344_v0, 0.5  ;;  %v645_v29 = vunpack.i.h.s16 %v8858_v15  ;;  %v7386_v44 = vcombine.low %v8934_v50, %v8937_v62 }
  0x6e   :  { %v6430_v35 = vmax.f32 %v6428_v19, %v6429_v32  ;;  %vm3857_vm9 = vcmp.gt.f32.partialorder %v347_v2, 0.5  ;;  %vm3856_vm10 = vcmp.gt.f32.partialorder %v346_v5, 0.5  ;;  %v7387_v15 = vcombine.low %v8952_v8, %v8963_v21  ;;  %v82_v8 = vld [vmem:[%s14172_s0 + $0xf0] sm:$0xf] }
  0x6f   :  { %v1231_v33 = vsub.bf16 %v71_v26, %v8965_v22  ;;  %v4109_v37 = vsel %vm3853_vm5, 1, %v14180_v3  ;;  %v4108_v17 = vsel %vm3852_vm6, 1, %v14180_v3  ;;  %v9019_v42 = vsel %vm3855_vm7, 1, %v14180_v3 }
  0x70   :  { %4470 = vperm.xlu1 %8023, %v4103_v13   ;;  %4467 = vperm.xlu0 %8022, %v8880_v27   ;;  %v8995_v13 = vmax.f32 %v6417_v28, %v6418_v16  ;;  %v1230_v27 = vsub.bf16 %v70_v24, %v8965_v22  ;;  %v9023_v36 = vsel %vm3854_vm8, 1, %v14180_v3  ;;  %v6431_v43 = vsel %vm6257_vm0, %v9000_v9, -inf }
  0x71   :  { %v9036_v45 = vsel %vm3857_vm9, 1, %v14180_v3  ;;  %v9040_v47 = vsel %vm3856_vm10, 1, %v14180_v3  ;;  %vm3859_vm11 = vcmp.gt.f32.partialorder %v9000_v9, 0.5  ;;  %v677_v49 = vpack.i.b16 %v645_v29, %v645_v29  ;;  %v353_v29 = vld [vmem:[%s14174_s2 + $0x238] sm:$0xff]  ;;  %v80_v9 = vld [vmem:[%s14172_s0 + $0xe8] sm:$0xf] }
  0x72   :  { %14273 = vst [vmem:[#allocation13_spill] sm:$0xff] %v8995_v13  ;;  %v1232_v46 = vsub.bf16 %v72_v61, %v8965_v22  ;;  %v1234_v57 = vsub.bf16 %v74_v56, %v8965_v22  ;;  %v1235_v60 = vsub.bf16 %v75_v34, %v8965_v22  ;;  %v1486_v2 = vmax.bf16 %v14180_v3, %v1230_v27  ;;  %v78_v61 = vld [vmem:[%s14172_s0 + $0xe0] sm:$0xf] }
  0x73   :  { %v1487_v50 = vmax.bf16 %v14180_v3, %v1231_v33  ;;  %v733_v62 = vrot.slane %v677_v49, %v8186_v4  ;;  %v6432_v63 = vmax.f32 %v6430_v35, %v6431_v43  ;;  %7798 = vmatmul.mubr.msk.bf16.gmra.mxu0 %vm2350_vm4, %v7385_v38  ;;  %v1236_v0 = vsub.bf16 %v76_v41, %v8965_v22  ;;  %v355_v38 = vld [vmem:[%s14174_s2 + $0x248] sm:$0xff]  ;;  %v9111_v34 = vld.sshfl [vmem:[%s14173_s1 + $0x4] sm:$0x33 pattern:$0x75316420] }
  0x74   :  { %4476 = vperm.xlu1 %8023, %v8887_v30   ;;  %4473 = vperm.xlu0 %8022, %v8900_v39   ;;  %v1233_v30 = vsub.bf16 %v73_v18, %v8965_v22  ;;  %v9057_v39 = vld [vmem:[%s14174_s2 + $0x220] sm:$0xff]  ;;  %v1237_v58 = vsub.bf16 %v77_v25, %v8965_v22  ;;  %v6435_v5 = vsel %vm6257_vm0, %v351_v48, -inf  ;;  %vm3858_vm12 = vcmp.gt.f32.partialorder %v8960_v1, 0.5  ;;  %v356_v1 = vld [vmem:[%s14174_s2 + $0x250] sm:$0xff] }
  0x75   :  { %v6433_v55 = vsel %vm6257_vm0, %v9057_v39, -inf  ;;  %7801 = vmatprep.mubr.msk.bf16.mxu0 %vm2350_vm4, %v7386_v44  ;;  %v880_v6 = vpack.i.b16 %v733_v62, %v733_v62  ;;  %vm3861_vm13 = vcmp.gt.f32.partialorder %v351_v48, 0.5  ;;  %v9075_v53 = vmax.bf16 %v14180_v3, %v1232_v46  ;;  %v79_v25 = vld [vmem:[%s14172_s0 + $0xe4] sm:$0xf]  ;;  %v83_v62 = vld [vmem:[%s14172_s0 + $0xf4] sm:$0xf] }
  0x76   :  { %v6434_v7 = vmax.f32 %v6432_v63, %v6433_v55  ;;  %v9078_v11 = vmax.bf16 %v14180_v3, %v1233_v30  ;;  %v6448_v19 = vsel %vm6257_vm0, %v355_v38, -inf  ;;  %v9083_v22 = vmax.bf16 %v14180_v3, %v1234_v57  ;;  %v81_v30 = vld [vmem:[%s14172_s0 + $0xec] sm:$0xf]  ;;  %v357_v63 = vld [vmem:[%s14174_s2 + $0x258] sm:$0xff] }
  0x77   :  { %v9086_v16 = vmax.bf16 %v14180_v3, %v1235_v60  ;;  %v885_v32 = vrot.slane %v880_v6, %v8186_v4  ;;  %v7388_v26 = vcombine.low %v1486_v2, %v1487_v50  ;;  %v9093_v28 = vmax.bf16 %v14180_v3, %v1236_v0  ;;  %v84_v0 = vld [vmem:[%s14172_s0 + $0xf8] sm:$0xf] }
  0x78   :  { %4482 = vperm.xlu1 %8023, %v8904_v40   ;;  %4479 = vperm.xlu0 %8022, %v4106_v20   ;;  %v6437_v40 = vsel %vm6257_vm0, %v352_v10, -inf  ;;  %v6436_v24 = vmax.f32 %v6434_v7, %v6435_v5  ;;  %v354_v20 = vld [vmem:[%s14174_s2 + $0x240] sm:$0xff]  ;;  %v9096_v35 = vmax.bf16 %v14180_v3, %v1237_v58  ;;  %v6439_v27 = vsel %vm6257_vm0, %v353_v29, -inf  ;;  %v85_v7 = vld [vmem:[%s14172_s0 + $0xfc] sm:$0xf] }
  0x79   :  { %v6447_v44 = vsel %vm6257_vm0, %v354_v20, -inf  ;;  %v9105_v18 = vcombine.low %v885_v32, %v885_v32  ;;  %v7389_v41 = vcombine.low %v9075_v53, %v9078_v11  ;;  %v9118_v43 = vsel %vm3859_vm11, 1, %v14180_v3 }
  0x7a   :  { %v6438_v33 = vmax.f32 %v6436_v24, %v6437_v40  ;;  %v6449_v56 = vmax.f32 %v6447_v44, %v6448_v19  ;;  %vm3860_vm14 = vcmp.gt.f32.partialorder %v9057_v39, 0.5  ;;  %v7390_v49 = vcombine.low %v9083_v22, %v9086_v16 }
  0x7b   :  { %vm3863_vm15 = vcmp.gt.f32.partialorder %v353_v29, 0.5  ;;  %vm3862_vm1 = vcmp.gt.f32.partialorder %v352_v10, 0.5  ;;  %vm3865_vm2 = vcmp.gt.f32.partialorder %v355_v38, 0.5  ;;  %7802 = vmatmul.mubr.msk.bf16.gmra.mxu0 %vm2350_vm4, %v7387_v15  ;;  %v9150_v57 = vsel %vm3861_vm13, 1, %v14180_v3  ;;  %v359_v29 = vld [vmem:[%s14174_s2 + $0x268] sm:$0xff] }
  0x7c   :  { %4488 = vperm.xlu1 %8023, %v4109_v37   ;;  %4485 = vperm.xlu0 %8022, %v4108_v17   ;;  %v9123_v37 = vsel %vm3858_vm12, 1, %v14180_v3  ;;  %v9152_v60 = vmax.f32 %v6438_v33, %v6439_v27  ;;  %v6450_v21 = vsel %vm6257_vm0, %v356_v1, -inf  ;;  %v9160_v15 = vrot.slane %v9111_v34, %v8170_v59 }
  0x7d   :  { %7805 = vmatprep.mubr.msk.bf16.mxu0 %vm2350_vm4, %v7388_v26  ;;  %v7391_v48 = vcombine.low %v9093_v28, %v9096_v35  ;;  %v1238_v2 = vsub.bf16 %v78_v61, %v9105_v18  ;;  %v9170_v50 = vsel %vm3860_vm14, 1, %v14180_v3  ;;  %vm3864_vm3 = vcmp.gt.f32.partialorder %v354_v20, 0.5  ;;  %v9220_v26 = vld [vmem:[%s14174_s2 + $0x260] sm:$0xff]  ;;  %v92_v28 = vld [vmem:[%s14172_s0 + $0x118] sm:$0xf] }
  0x7e   :  { %14274 = vst [vmem:[#allocation14_spill] sm:$0xff] %v9152_v60  ;;  %v9185_v39 = vsel %vm3862_vm1, 1, %v14180_v3  ;;  %v9192_v58 = vsel %vm3865_vm2, 1, %v14180_v3  ;;  %v6452_v5 = vsel %vm6257_vm0, %v357_v63, -inf  ;;  %v1240_v55 = vsub.bf16 %v80_v9, %v9105_v18 }
  0x7f   :  { %v9141_v17 = vpop.permute.xlu1 %4311  ;;  %v9143_v46 = vpop.permute.xlu0 %4305  ;;  %v1241_v6 = vsub.bf16 %v81_v30, %v9105_v18  ;;  %v6451_v10 = vmax.f32 %v6449_v56, %v6450_v21  ;;  %v9206_v38 = vsel %vm3864_vm3, 1, %v14180_v3  ;;  %vm3867_vm5 = vcmp.gt.f32.partialorder %v357_v63, 0.5 }
  0x80   :  { %4494 = vperm.xlu1 %8023, %v9019_v42   ;;  %4491 = vperm.xlu0 %8022, %v9023_v36   ;;  %v9181_v42 = vsel %vm3863_vm15, 1, %v14180_v3  ;;  %v1239_v36 = vsub.bf16 %v79_v25, %v9105_v18  ;;  %vm3866_vm6 = vcmp.gt.f32.partialorder %v356_v1, 0.5  ;;  %v7320_v40 = vpack.i.b16 %v9160_v15, %v9160_v15 }
  0x81   :  { %v9212_v19 = vmax.bf16 %v14180_v3, %v1238_v2  ;;  %v1242_v32 = vsub.bf16 %v82_v8, %v9105_v18  ;;  %v1243_v24 = vsub.bf16 %v83_v62, %v9105_v18  ;;  %v1244_v20 = vsub.bf16 %v84_v0, %v9105_v18  ;;  %v360_v62 = vld [vmem:[%s14174_s2 + $0x270] sm:$0xff] }
  0x82   :  { %v1245_v61 = vsub.bf16 %v85_v7, %v9105_v18  ;;  %v6453_v44 = vmax.f32 %v6451_v10, %v6452_v5  ;;  %v6454_v27 = vsel %vm6257_vm0, %v9220_v26, -inf  ;;  %v9231_v33 = vmax.bf16 %v14180_v3, %v1239_v36  ;;  %v9274_v5 = vld [vmem:[%s14174_s2 + $0x288] sm:$0xff]  ;;  %v86_v7 = vld [vmem:[%s14172_s0 + $0x100] sm:$0xf]  ;;  %v87_v10 = vld [vmem:[%s14172_s0 + $0x104] sm:$0xf] }
  0x83   :  { %v9201_v53 = vpop.permute.xlu1 %4314  ;;  %v9203_v11 = vpop.permute.xlu0 %4308  ;;  %v9234_v56 = vmax.bf16 %v14180_v3, %v1240_v55  ;;  %v6456_v18 = vsel %vm6257_vm0, %v359_v29, -inf  ;;  %7806 = vmatmul.mubr.msk.bf16.gmra.mxu0 %vm2350_vm4, %v7389_v41  ;;  %v9247_v30 = vsel %vm3867_vm5, 1, %v14180_v3  ;;  %v9251_v8 = vsel %vm3866_vm6, 1, %v14180_v3  ;;  %v9289_v55 = vld [vmem:[%s14174_s2 + $0x280] sm:$0xff] }
  0x84   :  { %4500 = vperm.xlu1 %8023, %v9036_v45   ;;  %4497 = vperm.xlu0 %8022, %v9040_v47   ;;  %v737_v45 = vrot.slane %v7320_v40, %v8186_v4  ;;  %v9237_v47 = vmax.bf16 %v14180_v3, %v1241_v6  ;;  %v6455_v2 = vmax.f32 %v6453_v44, %v6454_v27  ;;  %v6458_v0 = vsel %vm6257_vm0, %v360_v62, -inf }
  0x85   :  { %7809 = vmatprep.mubr.msk.bf16.mxu0 %vm2350_vm4, %v7390_v49  ;;  %v9262_v41 = vmax.bf16 %v14180_v3, %v1242_v32  ;;  %v9265_v1 = vmax.bf16 %v14180_v3, %v1243_v24  ;;  %v9268_v63 = vmax.bf16 %v14180_v3, %v1244_v20  ;;  %v9278_v22 = vmax.bf16 %v14180_v3, %v1245_v61  ;;  %v88_v20 = vld [vmem:[%s14172_s0 + $0x108] sm:$0xf]  ;;  %v89_v61 = vld [vmem:[%s14172_s0 + $0x10c] sm:$0xf] }
  0x86   :  { %v887_v21 = vpack.i.b16 %v737_v45, %v737_v45  ;;  %v6457_v49 = vmax.f32 %v6455_v2, %v6456_v18  ;;  %v6469_v36 = vsel %vm6257_vm0, %v9274_v5, -inf  ;;  %vm3869_vm7 = vcmp.gt.f32.partialorder %v359_v29, 0.5  ;;  %v91_v29 = vld [vmem:[%s14172_s0 + $0x114] sm:$0xf] }
  0x87   :  { %v9241_v25 = vpop.permute.xlu1 %4320  ;;  %v9243_v9 = vpop.permute.xlu0 %4317  ;;  %v6468_v40 = vsel %vm6257_vm0, %v9289_v55, -inf  ;;  %vm3868_vm8 = vcmp.gt.f32.partialorder %v9220_v26, 0.5  ;;  %vm3870_vm10 = vcmp.gt.f32.partialorder %v360_v62, 0.5  ;;  %vm3873_vm11 = vcmp.gt.f32.partialorder %v9274_v5, 0.5  ;;  %v367_v5 = vld [vmem:[%s14174_s2 + $0x2a8] sm:$0xff] }
  0x88   :  { %4506 = vperm.xlu1 %8023, %v9118_v43   ;;  %4503 = vperm.xlu0 %8022, %v9123_v37   ;;  %v892_v16 = vrot.slane %v887_v21, %v8186_v4  ;;  %v361_v43 = vld [vmem:[%s14174_s2 + $0x278] sm:$0xff]  ;;  %v7392_v37 = vcombine.low %v9212_v19, %v9231_v33  ;;  %v6459_v44 = vmax.f32 %v6457_v49, %v6458_v0  ;;  %v9327_v0 = vsel %vm3869_vm7, 1, %v14180_v3 }
  0x89   :  { %v6460_v45 = vsel %vm6257_vm0, %v361_v43, -inf  ;;  %v6470_v27 = vmax.f32 %v6468_v40, %v6469_v36  ;;  %vm3871_vm9 = vcmp.gt.f32.partialorder %v361_v43, 0.5  ;;  %v90_v36 = vld [vmem:[%s14172_s0 + $0x110] sm:$0xf]  ;;  %vm3872_vm12 = vcmp.gt.f32.partialorder %v9289_v55, 0.5  ;;  %v366_v55 = vld [vmem:[%s14174_s2 + $0x2a0] sm:$0xff] }
  0x8a   :  { %v9307_v19 = vcombine.low %v892_v16, %v892_v16  ;;  %vm3877_vm15 = vcmp.gt.f32.partialorder %v367_v5, 0.5  ;;  %vm3876_vm1 = vcmp.gt.f32.partialorder %v366_v55, 0.5  ;;  %vm3883_vm7 = vcmp.gt.f32.partialorder %v373_v51, 0.5 }
  0x8b   :  { %v9303_v32 = vpop.permute.xlu1 %4326  ;;  %v9305_v24 = vpop.permute.xlu0 %4323  ;;  %7810 = vmatmul.mubr.msk.bf16.gmra.mxu0 %vm2350_vm4, %v7391_v48  ;;  %v93_v48 = vld [vmem:[%s14172_s0 + $0x11c] sm:$0xf] }
  0x8c   :  { %4512 = vperm.xlu1 %8023, %v9150_v57   ;;  %4509 = vperm.xlu0 %8022, %v9170_v50   ;;  %v1246_v21 = vsub.bf16 %v86_v7, %v9307_v19  ;;  %v1247_v2 = vsub.bf16 %v87_v10, %v9307_v19  ;;  %v365_v57 = vld [vmem:[%s14174_s2 + $0x298] sm:$0xff]  ;;  %v1248_v16 = vsub.bf16 %v88_v20, %v9307_v19  ;;  %v9345_v7 = vld [vmem:[%s14174_s2 + $0x290] sm:$0xff]  ;;  %v647_v10 = vunpack.i.h.s16 %v9160_v15 }
  0x8d   :  { %v1249_v49 = vsub.bf16 %v89_v61, %v9307_v19  ;;  %v9334_v50 = vmax.f32 %v6459_v44, %v6460_v45  ;;  %v9359_v61 = vsel %vm3868_vm8, 1, %v14180_v3  ;;  %v9363_v45 = vsel %vm3871_vm9, 1, %v14180_v3  ;;  %7813 = vmatprep.mubr.msk.bf16.mxu0 %vm2350_vm4, %v7392_v37 }
  0x8e   :  { %v9367_v44 = vsel %vm3870_vm10, 1, %v14180_v3  ;;  %v6471_v35 = vsel %vm6257_vm0, %v9345_v7, -inf  ;;  %vm3875_vm13 = vcmp.gt.f32.partialorder %v365_v57, 0.5  ;;  %v6473_v26 = vsel %vm6257_vm0, %v365_v57, -inf }
  0x8f   :  { %14275 = vst [vmem:[#allocation15_spill] sm:$0xff] %v9334_v50  ;;  %v9352_v40 = vpop.permute.xlu1 %4332  ;;  %v9354_v20 = vpop.permute.xlu0 %4329  ;;  %v9384_v62 = vmax.bf16 %v14180_v3, %v1246_v21  ;;  %v9387_v43 = vmax.bf16 %v14180_v3, %v1247_v2  ;;  %v1251_v37 = vsub.bf16 %v91_v29, %v9307_v19  ;;  %v9392_v18 = vmax.bf16 %v14180_v3, %v1248_v16 }
  0x90   :  { %4518 = vperm.xlu1 %8023, %v9181_v42   ;;  %4515 = vperm.xlu0 %8022, %v9185_v39   ;;  %v1250_v42 = vsub.bf16 %v90_v36, %v9307_v19  ;;  %v9395_v33 = vmax.bf16 %v14180_v3, %v1249_v49  ;;  %v6472_v6 = vmax.f32 %v6470_v27, %v6471_v35  ;;  %v9406_v36 = vsel %vm3873_vm11, 1, %v14180_v3 }
  0x91   :  { %v679_v50 = vpack.i.b16 %v647_v10, %v647_v10  ;;  %v1252_v21 = vsub.bf16 %v92_v28, %v9307_v19  ;;  %v1253_v2 = vsub.bf16 %v93_v48, %v9307_v19  ;;  %v9411_v16 = vsel %vm3872_vm12, 1, %v14180_v3  ;;  %v368_v48 = vld [vmem:[%s14174_s2 + $0x2b0] sm:$0xff]  ;;  %v94_v28 = vld [vmem:[%s14172_s0 + $0x120] sm:$0xf] }
  0x92   :  { %v9416_v27 = vsel %vm3875_vm13, 1, %v14180_v3  ;;  %vm3874_vm14 = vcmp.gt.f32.partialorder %v9345_v7, 0.5  ;;  %v6474_v49 = vmax.f32 %v6472_v6, %v6473_v26  ;;  %v9431_v57 = vmax.bf16 %v14180_v3, %v1251_v37  ;;  %v371_v26 = vld [vmem:[%s14174_s2 + $0x2c8] sm:$0xff]  ;;  %v98_v7 = vld [vmem:[%s14172_s0 + $0x130] sm:$0xf] }
  0x93   :  { %v9397_v60 = vpop.permute.xlu1 %4338  ;;  %v9399_v39 = vpop.permute.xlu0 %4335  ;;  %v741_v19 = vrot.slane %v679_v50, %v8186_v4  ;;  %v6477_v29 = vsel %vm6257_vm0, %v367_v5, -inf  ;;  %v6475_v50 = vsel %vm6257_vm0, %v366_v55, -inf  ;;  %v6479_v10 = vsel %vm6257_vm0, %v368_v48, -inf  ;;  %v100_v55 = vld [vmem:[%s14172_s0 + $0x138] sm:$0xf] }
  0x94   :  { %4524 = vperm.xlu1 %8023, %v9192_v58   ;;  %4521 = vperm.xlu0 %8022, %v9206_v38   ;;  %v9428_v58 = vmax.bf16 %v14180_v3, %v1250_v42  ;;  %v6476_v6 = vmax.f32 %v6474_v49, %v6475_v50  ;;  %v369_v38 = vld [vmem:[%s14174_s2 + $0x2b8] sm:$0xff]  ;;  %v14276_v42 = vcombine.low %v9234_v56, %v9237_v47  ;;  %v9467_v56 = vsel %vm6257_vm0, %v371_v26, -inf }
  0x95   :  { %v894_v35 = vpack.i.b16 %v741_v19, %v741_v19  ;;  %v9457_v49 = vmax.bf16 %v14180_v3, %v1252_v21  ;;  %v9460_v50 = vmax.bf16 %v14180_v3, %v1253_v2  ;;  %v14278_v47 = vcombine.low %v9262_v41, %v9265_v1  ;;  %v95_v21 = vld [vmem:[%s14172_s0 + $0x124] sm:$0xf] }
  0x96   :  { %7814 = vmatmul.mubr.msk.bf16.gmra.mxu0 %vm2350_vm4, %v14276_v42  ;;  %v6478_v42 = vmax.f32 %v6476_v6, %v6477_v29  ;;  %v370_v3 = vld [vmem:[%s14174_s2 + $0x2c0] sm:$0xff]  ;;  %v14279_v1 = vmov 0   ;;  %vm3879_vm2 = vcmp.gt.f32.partialorder %v369_v38, 0.5  ;;  %vm3878_vm3 = vcmp.gt.f32.partialorder %v368_v48, 0.5 }
  0x97   :  { %v9452_v37 = vpop.permute.xlu1 %4344  ;;  %v9454_v19 = vpop.permute.xlu0 %4341  ;;  %7817 = vmatprep.mubr.msk.bf16.mxu0 %vm2350_vm4, %v14278_v47  ;;  %v899_v2 = vrot.slane %v894_v35, %v8186_v4  ;;  %v96_v35 = vld [vmem:[%s14172_s0 + $0x128] sm:$0xf]  ;;  %v6489_v29 = vsel %vm6257_vm0, %v370_v3, -inf  ;;  %v6481_v47 = vsel %vm6257_vm0, %v369_v38, -inf  ;;  %v9513_v52 = vsel %vm3876_vm1, 1, %v14279_v1 }
  0x98   :  { %14277 = vst [vmem:[#allocation16_spill] sm:$0xff] %v9454_v19  ;;  %4530 = vperm.xlu1 %8023, %v9247_v30   ;;  %4527 = vperm.xlu0 %8022, %v9251_v8   ;;  %v9487_v30 = vsel %vm3874_vm14, 1, %v14279_v1  ;;  %v97_v8 = vld [vmem:[%s14172_s0 + $0x12c] sm:$0xf]  ;;  %v6480_v41 = vmax.f32 %v6478_v42, %v6479_v10  ;;  %v6491_v13 = vmax.f32 %v6489_v29, %v9467_v56  ;;  %v99_v10 = vld [vmem:[%s14172_s0 + $0x134] sm:$0xf] }
  0x99   :  { %v9493_v6 = vcombine.low %v899_v2, %v899_v2  ;;  %v9509_v2 = vsel %vm3877_vm15, 1, %v14279_v1  ;;  %v9525_v5 = vsel %vm3879_vm2, 1, %v14279_v1  ;;  %vm3881_vm5 = vcmp.gt.f32.partialorder %v371_v26, 0.5  ;;  %v101_v38 = vld [vmem:[%s14172_s0 + $0x13c] sm:$0xf] }
  0x9a   :  { %vm3880_vm6 = vcmp.gt.f32.partialorder %v370_v3, 0.5  ;;  %v9548_v31 = vsel %vm3878_vm3, 1, %v14279_v1  ;;  %v14284_v14 = vcombine.low %v9384_v62, %v9387_v43  ;;  %v9605_v3 = vsel %vm3883_vm7, 1, %v14279_v1 }
  0x9b   :  { %v9503_v12 = vpop.permute.xlu1 %4350  ;;  %v9518_v42 = vpop.permute.xlu0 %4347  ;;  %v1254_v56 = vsub.bf16 %v94_v28, %v9493_v6  ;;  %v1255_v29 = vsub.bf16 %v95_v21, %v9493_v6  ;;  %v1257_v28 = vsub.bf16 %v97_v8, %v9493_v6  ;;  %v9536_v21 = vmax.f32 %v6480_v41, %v6481_v47  ;;  %v7314_v8 = vld.sshfl [vmem:[%s14173_s1 + $0x8] sm:$0x33 pattern:$0x75316420] }
  0x9c   :  { %14280 = vst [vmem:[#allocation17_spill] sm:$0xff] %v9503_v12  ;;  %4536 = vperm.xlu1 %8023, %v9327_v0   ;;  %4533 = vperm.xlu0 %8022, %v9359_v61   ;;  %v1256_v0 = vsub.bf16 %v96_v35, %v9493_v6  ;;  %v1258_v61 = vsub.bf16 %v98_v7, %v9493_v6  ;;  %v6492_v41 = vsel %vm6257_vm0, %v9544_v23, -inf  ;;  %v9566_v7 = vsel %vm3881_vm5, 1, %v14279_v1 }
  0x9d   :  { %14281 = vst [vmem:[#allocation18_spill] sm:$0xff] %v9536_v21  ;;  %v1259_v35 = vsub.bf16 %v99_v10, %v9493_v6  ;;  %v14282_v47 = vcombine.low %v9268_v63, %v9278_v22  ;;  %v1260_v48 = vsub.bf16 %v100_v55, %v9493_v6  ;;  %v6494_v10 = vsel %vm6257_vm0, %v373_v51, -inf  ;;  %v375_v51 = vld [vmem:[%s14174_s2 + $0x2e8] sm:$0xff] }
  0x9e   :  { %v9577_v63 = vmax.bf16 %v14279_v1, %v1254_v56  ;;  %v9580_v22 = vmax.bf16 %v14279_v1, %v1255_v29  ;;  %v1261_v26 = vsub.bf16 %v101_v38, %v9493_v6  ;;  %v9585_v55 = vsel %vm3880_vm6, 1, %v14279_v1  ;;  %v9623_v38 = vld [vmem:[%s14174_s2 + $0x2e0] sm:$0xff] }
  0x9f   :  { %7818 = vmatmul.mubr.msk.bf16.gmra.mxu0 %vm2350_vm4, %v14282_v47  ;;  %v9561_v21 = vpop.permute.xlu1 %4356  ;;  %v9573_v54 = vpop.permute.xlu0 %4353  ;;  %v9592_v62 = vmax.bf16 %v14279_v1, %v1257_v28  ;;  %v9595_v43 = vrot.slane %v7314_v8, %v8170_v59  ;;  %v9598_v56 = vmax.bf16 %v14279_v1, %v1258_v61  ;;  %v9601_v6 = vmax.bf16 %v14279_v1, %v1259_v35 }
  0xa0   :  { %14283 = vst [vmem:[#allocation19_spill] sm:$0xff] %v9561_v21  ;;  %7821 = vmatprep.mubr.msk.bf16.mxu0 %vm2350_vm4, %v14284_v14  ;;  %14285 = vst [vmem:[#allocation20_spill] sm:$0xff] %v9573_v54  ;;  %4542 = vperm.xlu1 %8023, %v9363_v45   ;;  %v9589_v14 = vmax.bf16 %v14279_v1, %v1256_v0  ;;  %v6493_v45 = vmax.f32 %v6491_v13, %v6492_v41  ;;  %vm3882_vm8 = vcmp.gt.f32.partialorder %v9544_v23, 0.5  ;;  %v378_v23 = vld [vmem:[%s14174_s2 + $0x300] sm:$0xff] }
  0xa1   :  { %4539 = vperm.xlu0 %8022, %v9367_v44   ;;  %v573_v44 = vcombine.high %v9111_v34, %v9111_v34  ;;  %v9612_v13 = vmax.bf16 %v14279_v1, %v1260_v48  ;;  %v597_v0 = vcombine.high %v7314_v8, %v7314_v8  ;;  %v7324_v28 = vpack.i.b16 %v9595_v43, %v9595_v43  ;;  %v9655_v48 = vld [vmem:[%s14174_s2 + $0x308] sm:$0xff] }
  0xa2   :  { %v9629_v61 = vmax.bf16 %v14279_v1, %v1261_v26  ;;  %v6495_v41 = vmax.f32 %v6493_v45, %v6494_v10  ;;  %v6496_v8 = vsel %vm6257_vm0, %v9623_v38, -inf  ;;  %v6498_v26 = vsel %vm6257_vm0, %v375_v51, -inf }
  0xa3   :  { %v9609_v29 = vpop.permute.xlu1 %4362  ;;  %v9625_v34 = vpop.permute.xlu0 %4359  ;;  %v9632_v35 = vrot.slane %v573_v44, %v8170_v59  ;;  %vm3885_vm9 = vcmp.gt.f32.partialorder %v375_v51, 0.5  ;;  %v9664_v47 = vrot.slane %v597_v0, %v8170_v59  ;;  %v6511_v21 = vsel %vm6257_vm0, %v9655_v48, -inf  ;;  %v9718_v51 = vld [vmem:[%s14174_s2 + $0x310] sm:$0xff] }
  0xa4   :  { %14286 = vst [vmem:[#allocation21_spill] sm:$0xff] %v9609_v29  ;;  %14287 = vst [vmem:[#allocation22_spill] sm:$0xff] %v9625_v34  ;;  %4548 = vperm.xlu1 %8023, %v9406_v36   ;;  %v769_v36 = vrot.slane %v7324_v28, %v8186_v4  ;;  %v6497_v45 = vmax.f32 %v6495_v41, %v6496_v8  ;;  %v14288_v28 = vcombine.low %v9392_v18, %v9395_v33  ;;  %v152_v18 = vld [vmem:[%s14172_s0 + $0x208] sm:$0xf] }
  0xa5   :  { %4545 = vperm.xlu0 %8022, %v9411_v16   ;;  %v7321_v10 = vpack.i.b16 %v9632_v35, %v9632_v35  ;;  %v9650_v16 = vld [vmem:[%s14174_s2 + $0x2f0] sm:$0xff]  ;;  %v14290_v29 = vcombine.low %v9428_v58, %v9431_v57  ;;  %v9682_v0 = vsel %vm3882_vm8, 1, %v14279_v1  ;;  %v151_v58 = vld [vmem:[%s14172_s0 + $0x204] sm:$0xf]  ;;  %vm3884_vm10 = vcmp.gt.f32.partialorder %v9623_v38, 0.5 }
  0xa6   :  { %v943_v41 = vpack.i.b16 %v769_v36, %v769_v36  ;;  %v6500_v8 = vsel %vm6257_vm0, %v9650_v16, -inf  ;;  %v150_v36 = vld [vmem:[%s14172_s0 + $0x200] sm:$0xf]  ;;  %vm3886_vm12 = vcmp.gt.f32.partialorder %v9650_v16, 0.5  ;;  %vm3889_vm13 = vcmp.gt.f32.partialorder %v9655_v48, 0.5 }
  0xa7   :  { %7822 = vmatmul.mubr.msk.bf16.gmra.mxu0 %vm2350_vm4, %v14288_v28  ;;  %v9661_v44 = vpop.permute.xlu1 %4368  ;;  %v9674_v33 = vpop.permute.xlu0 %4365  ;;  %v745_v57 = vrot.slane %v7321_v10, %v8186_v4  ;;  %v9704_v10 = vsel %vm3885_vm9, 1, %v14279_v1  ;;  %vm3888_vm14 = vcmp.gt.f32.partialorder %v378_v23, 0.5  ;;  %v106_v16 = vld [vmem:[%s14172_s0 + $0x150] sm:$0xf]  ;;  %vm3890_vm1 = vcmp.gt.f32.partialorder %v9718_v51, 0.5 }
  0xa8   :  { %14289 = vst [vmem:[#allocation23_spill] sm:$0xff] %v9661_v44  ;;  %7825 = vmatprep.mubr.msk.bf16.mxu0 %vm2350_vm4, %v14290_v29  ;;  %14291 = vst [vmem:[#allocation24_spill] sm:$0xff] %v9674_v33  ;;  %4554 = vperm.xlu1 %8023, %v9416_v27   ;;  %v377_v27 = vld [vmem:[%s14174_s2 + $0x2f8] sm:$0xff]  ;;  %v6499_v29 = vmax.f32 %v6497_v45, %v6498_v26  ;;  %v948_v28 = vrot.slane %v943_v41, %v8186_v4  ;;  %v6510_v26 = vsel %vm6257_vm0, %v378_v23, -inf  ;;  %v153_v44 = vld [vmem:[%s14172_s0 + $0x20c] sm:$0xf] }
  0xa9   :  { %4551 = vperm.xlu0 %8022, %v9487_v30   ;;  %v6502_v59 = vsel %vm6257_vm0, %v377_v27, -inf  ;;  %v901_v45 = vpack.i.b16 %v745_v57, %v745_v57  ;;  %v154_v41 = vld [vmem:[%s14172_s0 + $0x210] sm:$0xf]  ;;  %v6512_v33 = vmax.f32 %v6510_v26, %v6511_v21  ;;  %vm3887_vm11 = vcmp.gt.f32.partialorder %v377_v27, 0.5 }
  0xaa   :  { %v6501_v30 = vmax.f32 %v6499_v29, %v6500_v8  ;;  %v9722_v57 = vcombine.low %v948_v28, %v948_v28  ;;  %v155_v8 = vld [vmem:[%s14172_s0 + $0x214] sm:$0xf]  ;;  %v6513_v29 = vsel %vm6257_vm0, %v9718_v51, -inf }
  0xab   :  { %v9720_v54 = vpop.permute.xlu1 %4374  ;;  %v9730_v21 = vpop.permute.xlu0 %4371  ;;  %v906_v26 = vrot.slane %v901_v45, %v8186_v4  ;;  %v9737_v28 = vmax.f32 %v6512_v33, %v6513_v29 }
  0xac   :  { %14292 = vst [vmem:[#allocation25_spill] sm:$0xff] %v9720_v54  ;;  %14293 = vst [vmem:[#allocation26_spill] sm:$0xff] %v9730_v21  ;;  %4560 = vperm.xlu1 %8023, %v9509_v2   ;;  %v9734_v34 = vmax.f32 %v6501_v30, %v6502_v59  ;;  %v1310_v54 = vsub.bf16 %v150_v36, %v9722_v57  ;;  %v1311_v12 = vsub.bf16 %v151_v58, %v9722_v57  ;;  %v102_v2 = vld [vmem:[%s14172_s0 + $0x140] sm:$0xf]  ;;  %v103_v59 = vld [vmem:[%s14172_s0 + $0x144] sm:$0xf] }
  0xad   :  { %4557 = vperm.xlu0 %8022, %v9513_v52   ;;  %v1312_v19 = vsub.bf16 %v152_v18, %v9722_v57  ;;  %v1313_v21 = vsub.bf16 %v153_v44, %v9722_v57  ;;  %v9750_v33 = vcombine.low %v906_v26, %v906_v26  ;;  %v1314_v52 = vsub.bf16 %v154_v41, %v9722_v57  ;;  %v104_v41 = vld [vmem:[%s14172_s0 + $0x148] sm:$0xf]  ;;  %v157_v26 = vld [vmem:[%s14172_s0 + $0x21c] sm:$0xf] }
  0xae   :  { %14294 = vst [vmem:[#allocation27_spill] sm:$0xff] %v9734_v34  ;;  %v1315_v36 = vsub.bf16 %v155_v8, %v9722_v57  ;;  %v14295_v18 = vcombine.low %v9457_v49, %v9460_v50  ;;  %v1566_v58 = vmax.bf16 %v14279_v1, %v1310_v54  ;;  %v1567_v45 = vmax.bf16 %v14279_v1, %v1311_v12  ;;  %v105_v49 = vld [vmem:[%s14172_s0 + $0x14c] sm:$0xf]  ;;  %v381_v50 = vld [vmem:[%s14174_s2 + $0x318] sm:$0xff] }
  0xaf   :  { %v9758_v44 = vpop.permute.xlu1 %4380  ;;  %v1568_v30 = vmax.bf16 %v14279_v1, %v1312_v19  ;;  %v1569_v29 = vmax.bf16 %v14279_v1, %v1313_v21  ;;  %v14297_v54 = vcombine.low %v9577_v63, %v9580_v22  ;;  %v9777_v12 = vpop.permute.xlu0 %4377  ;;  %v9783_v19 = vsel %vm3884_vm10, 1, %v14279_v1  ;;  %v156_v63 = vld [vmem:[%s14172_s0 + $0x218] sm:$0xf] }
  0xb0   :  { %7826 = vmatmul.mubr.msk.bf16.gmra.mxu0 %vm2350_vm4, %v14295_v18  ;;  %14296 = vst [vmem:[#allocation28_spill] sm:$0xff] %v9758_v44  ;;  %4566 = vperm.xlu1 %8023, %v9525_v5   ;;  %v9787_v8 = vsel %vm3887_vm11, 1, %v14279_v1  ;;  %v9792_v21 = vsel %vm3886_vm12, 1, %v14279_v1  ;;  %v9800_v5 = vsel %vm3889_vm13, 1, %v14279_v1  ;;  %v7428_v22 = vcombine.low %v1566_v58, %v1567_v45 }
  0xb1   :  { %7829 = vmatprep.mubr.msk.bf16.mxu0 %vm2350_vm4, %v14297_v54  ;;  %4563 = vperm.xlu0 %8022, %v9548_v31   ;;  %v7429_v38 = vcombine.low %v1568_v30, %v1569_v29  ;;  %v1570_v27 = vmax.bf16 %v14279_v1, %v1314_v52  ;;  %v9812_v18 = vsel %vm3888_vm14, 1, %v14279_v1  ;;  %v1262_v48 = vsub.bf16 %v102_v2, %v9750_v33  ;;  %v107_v52 = vld [vmem:[%s14172_s0 + $0x154] sm:$0xf] }
  0xb2   :  { %v1571_v31 = vmax.bf16 %v14279_v1, %v1315_v36  ;;  %vm3891_vm15 = vcmp.gt.f32.partialorder %v381_v50, 0.5  ;;  %v655_v58 = vunpack.i.h.s16 %v9595_v43  ;;  %7885 = vmatprep.mubr.msk.bf16.mxu1 %vm2350_vm4, %v7428_v22  ;;  %v1263_v30 = vsub.bf16 %v103_v59, %v9750_v33  ;;  %v108_v36 = vld [vmem:[%s14172_s0 + $0x158] sm:$0xf] }
  0xb3   :  { %v9820_v45 = vpop.permute.xlu1 %4386  ;;  %v1264_v23 = vsub.bf16 %v104_v41, %v9750_v33  ;;  %v1265_v29 = vsub.bf16 %v105_v49, %v9750_v33  ;;  %v1316_v2 = vsub.bf16 %v156_v63, %v9722_v57  ;;  %v9830_v54 = vpop.permute.xlu0 %4383  ;;  %7886 = vmatmul.mubr.msk.bf16.vlgmr.msra.gmra.mxu1 %vm2350_vm4, %v7429_v38  ;;  %v1266_v22 = vsub.bf16 %v106_v16, %v9750_v33  ;;  %v109_v41 = vld [vmem:[%s14172_s0 + $0x15c] sm:$0xf] }
  0xb4   :  { %4572 = vperm.xlu1 %8023, %v9566_v7   ;;  %v7430_v34 = vcombine.low %v1570_v27, %v1571_v31  ;;  %v1317_v59 = vsub.bf16 %v157_v26, %v9722_v57  ;;  %v649_v49 = vunpack.i.h.s16 %v9632_v35  ;;  %v1267_v63 = vsub.bf16 %v107_v52, %v9750_v33 }
  0xb5   :  { %4569 = vperm.xlu0 %8022, %v9585_v55   ;;  %v1572_v44 = vmax.bf16 %v14279_v1, %v1316_v2  ;;  %v9845_v7 = vsel %vm3891_vm15, 1, %v14279_v1  ;;  %v6515_v38 = vsel %vm6257_vm0, %v381_v50, -inf  ;;  %v9849_v57 = vmax.bf16 %v14279_v1, %v1262_v48  ;;  %v383_v2 = vld [vmem:[%s14174_s2 + $0x328] sm:$0xff] }
  0xb6   :  { %7889 = vmatprep.mubr.msk.bf16.mxu1 %vm2350_vm4, %v7430_v34  ;;  %v1573_v27 = vmax.bf16 %v14279_v1, %v1317_v59  ;;  %v1268_v16 = vsub.bf16 %v108_v36, %v9750_v33  ;;  %v687_v55 = vpack.i.b16 %v655_v58, %v655_v58  ;;  %v14298_v26 = vcombine.low %v9589_v14, %v9592_v62 }
  0xb7   :  { %v9858_v31 = vpop.permute.xlu1 %4392  ;;  %v1519_v52 = vmax.bf16 %v14279_v1, %v1263_v30  ;;  %v9862_v50 = vmax.bf16 %v14279_v1, %v1264_v23  ;;  %v1269_v48 = vsub.bf16 %v109_v41, %v9750_v33  ;;  %v681_v34 = vpack.i.b16 %v649_v49, %v649_v49  ;;  %v9872_v14 = vpop.permute.xlu0 %4389 }
  0xb8   :  { %7830 = vmatmul.mubr.msk.bf16.gmra.mxu0 %vm2350_vm4, %v14298_v26  ;;  %14299 = vst [vmem:[#allocation29_spill] sm:$0xff] %v9858_v31  ;;  %v14300_v58 = vcombine.low %v9598_v56, %v9601_v6  ;;  %4578 = vperm.xlu1 %8023, %v9605_v3   ;;  %v9876_v62 = vmax.bf16 %v14279_v1, %v1265_v29  ;;  %v382_v3 = vld [vmem:[%s14174_s2 + $0x320] sm:$0xff]  ;;  %vm3893_vm2 = vcmp.gt.f32.partialorder %v383_v2, 0.5  ;;  %v161_v31 = vld [vmem:[%s14172_s0 + $0x22c] sm:$0xf] }
  0xb9   :  { %v9879_v30 = vmax.bf16 %v14279_v1, %v1266_v22  ;;  %v7431_v33 = vcombine.low %v1572_v44, %v1573_v27  ;;  %4575 = vperm.xlu0 %8022, %v9682_v0   ;;  %v9884_v23 = vmax.bf16 %v14279_v1, %v1267_v63  ;;  %v773_v56 = vrot.slane %v687_v55, %v8186_v4  ;;  %v158_v26 = vld [vmem:[%s14172_s0 + $0x220] sm:$0xf] }
  0xba   :  { %7833 = vmatprep.mubr.msk.bf16.mxu0 %vm2350_vm4, %v14300_v58  ;;  %v749_v6 = vrot.slane %v681_v34, %v8186_v4  ;;  %v6516_v29 = vmax.f32 %v9737_v28, %v6515_v38  ;;  %v9893_v36 = vmax.bf16 %v14279_v1, %v1268_v16  ;;  %v6519_v44 = vsel %vm6257_vm0, %v383_v2, -inf  ;;  %v384_v28 = vld [vmem:[%s14174_s2 + $0x330] sm:$0xff]  ;;  %v385_v34 = vld [vmem:[%s14174_s2 + $0x338] sm:$0xff]  ;;  %v160_v16 = vld [vmem:[%s14172_s0 + $0x228] sm:$0xf] }
  0xbb   :  { %v6517_v0 = vsel %vm6257_vm0, %v382_v3, -inf  ;;  %v9897_v22 = vpop.permute.xlu1 %4398  ;;  %v9900_v59 = vmax.bf16 %v14279_v1, %v1269_v48  ;;  %v950_v41 = vpack.i.b16 %v773_v56, %v773_v56  ;;  %v7404_v38 = vcombine.low %v9849_v57, %v1519_v52  ;;  %v9906_v27 = vpop.permute.xlu0 %4395  ;;  %7890 = vmatmul.mubr.msk.bf16.gmra.mxu1 %vm2350_vm4, %v7431_v33  ;;  %v159_v57 = vld [vmem:[%s14172_s0 + $0x224] sm:$0xf]  ;;  %v110_v52 = vld [vmem:[%s14172_s0 + $0x160] sm:$0xf]  ;;  %v9936_v33 = vld [vmem:[%s14174_s2 + $0x348] sm:$0xff] }
  0xbc   :  { %14301 = vst [vmem:[#allocation30_spill] sm:$0xff] %v9897_v22  ;;  %v908_v49 = vpack.i.b16 %v749_v6, %v749_v6  ;;  %v6518_v63 = vmax.f32 %v6516_v29, %v6517_v0  ;;  %4584 = vperm.xlu1 %8023, %v9704_v10   ;;  %v9915_v55 = vsel %vm3890_vm1, 1, %v14279_v1  ;;  %v6521_v10 = vsel %vm6257_vm0, %v384_v28, -inf  ;;  %v9941_v56 = vld [vmem:[%s14174_s2 + $0x340] sm:$0xff] }
  0xbd   :  { %4581 = vperm.xlu0 %8022, %v9783_v19   ;;  %v955_v51 = vrot.slane %v950_v41, %v8186_v4  ;;  %vm3892_vm3 = vcmp.gt.f32.partialorder %v382_v3, 0.5  ;;  %v111_v6 = vld [vmem:[%s14172_s0 + $0x164] sm:$0xf]  ;;  %v9950_v29 = vsel %vm3893_vm2, 1, %v14279_v1  ;;  %v9958_v0 = vsel %vm6257_vm0, %v9941_v56, -inf }
  0xbe   :  { %v913_v48 = vrot.slane %v908_v49, %v8186_v4  ;;  %v6520_v58 = vmax.f32 %v6518_v63, %v6519_v44  ;;  %v9954_v44 = vsel %vm6257_vm0, %v9936_v33, -inf  ;;  %v14302_v41 = vcombine.low %v9612_v13, %v9629_v61  ;;  %v112_v13 = vld [vmem:[%s14172_s0 + $0x168] sm:$0xf] }
  0xbf   :  { %v9964_v49 = vpop.permute.xlu1 %4404  ;;  %v9968_v63 = vcombine.low %v955_v51, %v955_v51  ;;  %v113_v51 = vld [vmem:[%s14172_s0 + $0x16c] sm:$0xf]  ;;  %vm3895_vm5 = vcmp.gt.f32.partialorder %v385_v34, 0.5  ;;  %v6523_v2 = vsel %vm6257_vm0, %v385_v34, -inf  ;;  %vm3894_vm6 = vcmp.gt.f32.partialorder %v384_v28, 0.5 }
  0xc0   :  { %7834 = vmatmul.mubr.msk.bf16.gmra.mxu0 %vm2350_vm4, %v14302_v41  ;;  %14303 = vst [vmem:[#allocation31_spill] sm:$0xff] %v9964_v49  ;;  %v9970_v19 = vcombine.low %v913_v48, %v913_v48  ;;  %v6522_v61 = vmax.f32 %v6520_v58, %v6521_v10  ;;  %v9982_v41 = vpop.permute.xlu0 %4401  ;;  %4590 = vperm.xlu1 %8023, %v9787_v8   ;;  %v9990_v48 = vsel %vm3892_vm3, 1, %v14279_v1  ;;  %v162_v10 = vld [vmem:[%s14172_s0 + $0x230] sm:$0xf]  ;;  %v164_v34 = vld [vmem:[%s14172_s0 + $0x238] sm:$0xf] }
  0xc1   :  { %7837 = vmatprep.mubr.msk.bf16.mxu0 %vm2350_vm4, %v7404_v38  ;;  %14304 = vst [vmem:[#allocation32_spill] sm:$0xff] %v9982_v41  ;;  %4587 = vperm.xlu0 %8022, %v9792_v21   ;;  %v1318_v38 = vsub.bf16 %v158_v26, %v9968_v63  ;;  %v1319_v8 = vsub.bf16 %v159_v57, %v9968_v63  ;;  %vm3897_vm7 = vcmp.gt.f32.partialorder %v9936_v33, 0.5  ;;  %v114_v28 = vld [vmem:[%s14172_s0 + $0x170] sm:$0xf]  ;;  %vm3896_vm8 = vcmp.gt.f32.partialorder %v9941_v56, 0.5 }
  0xc2   :  { %v1270_v58 = vsub.bf16 %v110_v52, %v9970_v19  ;;  %v1271_v49 = vsub.bf16 %v111_v6, %v9970_v19  ;;  %v1320_v3 = vsub.bf16 %v160_v16, %v9968_v63  ;;  %v1321_v41 = vsub.bf16 %v161_v31, %v9968_v63  ;;  %v163_v31 = vld [vmem:[%s14172_s0 + $0x234] sm:$0xf] }
  0xc3   :  { %v1272_v22 = vsub.bf16 %v112_v13, %v9970_v19  ;;  %v10006_v21 = vpop.permute.xlu1 %4410  ;;  %v1574_v26 = vmax.bf16 %v14279_v1, %v1318_v38  ;;  %v1575_v57 = vmax.bf16 %v14279_v1, %v1319_v8  ;;  %v1273_v52 = vsub.bf16 %v113_v51, %v9970_v19  ;;  %v388_v33 = vld [vmem:[%s14174_s2 + $0x350] sm:$0xff] }
  0xc4   :  { %14305 = vst [vmem:[#allocation33_spill] sm:$0xff] %v10006_v21  ;;  %v10013_v6 = vsel %vm3895_vm5, 1, %v14279_v1  ;;  %v10018_v16 = vpop.permute.xlu0 %4407  ;;  %4596 = vperm.xlu1 %8023, %v9800_v5   ;;  %v1576_v13 = vmax.bf16 %v14279_v1, %v1320_v3  ;;  %v1577_v38 = vmax.bf16 %v14279_v1, %v1321_v41  ;;  %v10025_v8 = vsel %vm3894_vm6, 1, %v14279_v1  ;;  %v165_v3 = vld [vmem:[%s14172_s0 + $0x23c] sm:$0xf] }
  0xc5   :  { %14306 = vst [vmem:[#allocation34_spill] sm:$0xff] %v10018_v16  ;;  %4593 = vperm.xlu0 %8022, %v9812_v18   ;;  %v7432_v51 = vcombine.low %v1574_v26, %v1575_v57  ;;  %v10033_v21 = vmax.bf16 %v14279_v1, %v1270_v58  ;;  %v10035_v5 = vmax.f32 %v6522_v61, %v6523_v2  ;;  %v115_v61 = vld [vmem:[%s14172_s0 + $0x174] sm:$0xf]  ;;  %v6534_v56 = vsel %vm6257_vm0, %v388_v33, -inf }
  0xc6   :  { %v1322_v41 = vsub.bf16 %v162_v10, %v9968_v63  ;;  %v10045_v16 = vmax.bf16 %v14279_v1, %v1271_v49  ;;  %v7433_v18 = vcombine.low %v1576_v13, %v1577_v38  ;;  %v10048_v26 = vmax.bf16 %v14279_v1, %v1272_v22  ;;  %v116_v10 = vld [vmem:[%s14172_s0 + $0x178] sm:$0xf]  ;;  %v117_v13 = vld [vmem:[%s14172_s0 + $0x17c] sm:$0xf] }
  0xc7   :  { %14307 = vst [vmem:[#allocation35_spill] sm:$0xff] %v10035_v5  ;;  %v1323_v2 = vsub.bf16 %v163_v31, %v9968_v63  ;;  %v14308_v58 = vcombine.low %v9862_v50, %v9876_v62  ;;  %v10061_v49 = vpop.permute.xlu1 %4416  ;;  %7893 = vmatprep.mubr.msk.bf16.mxu1 %vm2350_vm4, %v7432_v51  ;;  %v10065_v22 = vmax.bf16 %v14279_v1, %v1273_v52  ;;  %v10075_v50 = vsel %vm3897_vm7, 1, %v14279_v1 }
  0xc8   :  { %v1578_v57 = vmax.bf16 %v14279_v1, %v1322_v41  ;;  %v1324_v31 = vsub.bf16 %v164_v34, %v9968_v63  ;;  %v14309_v62 = vcombine.low %v9879_v30, %v9884_v23  ;;  %v10081_v52 = vpop.permute.xlu0 %4413  ;;  %4602 = vperm.xlu1 %8023, %v9845_v7   ;;  %v1274_v34 = vsub.bf16 %v114_v28, %v9970_v19 }
  0xc9   :  { %7838 = vmatmul.mubr.msk.bf16.gmra.mxu0 %vm2350_vm4, %v14308_v58  ;;  %v1579_v38 = vmax.bf16 %v14279_v1, %v1323_v2  ;;  %v1325_v51 = vsub.bf16 %v165_v3, %v9968_v63  ;;  %4599 = vperm.xlu0 %8022, %v9915_v55   ;;  %v1275_v30 = vsub.bf16 %v115_v61, %v9970_v19  ;;  %v389_v63 = vld [vmem:[%s14174_s2 + $0x358] sm:$0xff]  ;;  %v10108_v61 = vsel %vm3896_vm8, 1, %v14279_v1 }
  0xca   :  { %7841 = vmatprep.mubr.msk.bf16.mxu0 %vm2350_vm4, %v14309_v62  ;;  %7894 = vmatmul.mubr.msk.bf16.gmra.mxu1 %vm2350_vm4, %v7433_v18  ;;  %v1580_v7 = vmax.bf16 %v14279_v1, %v1324_v31  ;;  %v1276_v23 = vsub.bf16 %v116_v10, %v9970_v19  ;;  %v1277_v3 = vsub.bf16 %v117_v13, %v9970_v19  ;;  %v6536_v10 = vsel %vm6257_vm0, %v389_v63, -inf }
  0xcb   :  { %v7434_v41 = vcombine.low %v1578_v57, %v1579_v38  ;;  %v1581_v28 = vmax.bf16 %v14279_v1, %v1325_v51  ;;  %v14310_v55 = vmax.f32 %v9958_v0, %v9954_v44  ;;  %v10105_v2 = vpop.permute.xlu1 %4422  ;;  %v7325_v58 = vpack.i.b16 %v9664_v47, %v9664_v47  ;;  %v390_v38 = vld [vmem:[%s14174_s2 + $0x360] sm:$0xff]  ;;  %v393_v51 = vld [vmem:[%s14174_s2 + $0x378] sm:$0xff] }
  0xcc   :  { %v10115_v57 = vcombine.high %v9160_v15, %v9160_v15  ;;  %v7408_v19 = vcombine.low %v10033_v21, %v10045_v16  ;;  %v10119_v31 = vpop.permute.xlu0 %4419  ;;  %4608 = vperm.xlu1 %8023, %v9950_v29   ;;  %vm3899_vm9 = vcmp.gt.f32.partialorder %v389_v63, 0.5  ;;  %vm3898_vm10 = vcmp.gt.f32.partialorder %v388_v33, 0.5  ;;  %v391_v16 = vld [vmem:[%s14174_s2 + $0x368] sm:$0xff]  ;;  %v392_v33 = vld [vmem:[%s14174_s2 + $0x370] sm:$0xff] }
  0xcd   :  { %v6535_v18 = vmax.f32 %v14310_v55, %v6534_v56  ;;  %7897 = vmatprep.mubr.msk.bf16.mxu1 %vm2350_vm4, %v7434_v41  ;;  %4605 = vperm.xlu0 %8022, %v9990_v48   ;;  %v10127_v0 = vmax.bf16 %v14279_v1, %v1274_v34  ;;  %v7435_v15 = vcombine.low %v1580_v7, %v1581_v28  ;;  %v6540_v41 = vsel %vm6257_vm0, %v391_v16, -inf  ;;  %v166_v55 = vld [vmem:[%s14172_s0 + $0x240] sm:$0xf] }
  0xce   :  { %v777_v13 = vrot.slane %v7325_v58, %v8186_v4  ;;  %v7322_v21 = vpack.i.b16 %v10115_v57, %v10115_v57  ;;  %v10136_v29 = vmax.bf16 %v14279_v1, %v1275_v30  ;;  %v10139_v62 = vmax.bf16 %v14279_v1, %v1276_v23 }
  0xcf   :  { %v10142_v48 = vmax.bf16 %v14279_v1, %v1277_v3  ;;  %v6537_v34 = vmax.f32 %v6535_v18, %v6536_v10  ;;  %v14311_v7 = vcombine.low %v9893_v36, %v9900_v59  ;;  %v10154_v30 = vpop.permute.xlu1 %4428  ;;  %v6538_v28 = vsel %vm6257_vm0, %v390_v38, -inf }
  0xd0   :  { %14312 = vst [vmem:[#allocation36_spill] sm:$0xff] %v10154_v30  ;;  %v957_v23 = vpack.i.b16 %v777_v13, %v777_v13  ;;  %v753_v56 = vrot.slane %v7322_v21, %v8186_v4  ;;  %v10160_v3 = vpop.permute.xlu0 %4425  ;;  %4614 = vperm.xlu1 %8023, %v10013_v6   ;;  %v4155_v36 = vsel %vm3899_vm9, 1, %v14279_v1  ;;  %v4154_v59 = vsel %vm3898_vm10, 1, %v14279_v1  ;;  %v167_v6 = vld [vmem:[%s14172_s0 + $0x244] sm:$0xf] }
  0xd1   :  { %7842 = vmatmul.mubr.msk.bf16.gmra.mxu0 %vm2350_vm4, %v14311_v7  ;;  %vm3901_vm11 = vcmp.gt.f32.partialorder %v391_v16, 0.5  ;;  %v6539_v18 = vmax.f32 %v6537_v34, %v6538_v28  ;;  %4611 = vperm.xlu0 %8022, %v10025_v8   ;;  %vm3900_vm12 = vcmp.gt.f32.partialorder %v390_v38, 0.5  ;;  %vm3903_vm13 = vcmp.gt.f32.partialorder %v393_v51, 0.5  ;;  %v169_v13 = vld [vmem:[%s14172_s0 + $0x24c] sm:$0xf] }
  0xd2   :  { %7845 = vmatprep.mubr.msk.bf16.mxu0 %vm2350_vm4, %v7408_v19  ;;  %7898 = vmatmul.mubr.msk.bf16.gmra.mxu1 %vm2350_vm4, %v7435_v15  ;;  %v962_v63 = vrot.slane %v957_v23, %v8186_v4  ;;  %v915_v10 = vpack.i.b16 %v753_v56, %v753_v56  ;;  %v7410_v58 = vcombine.low %v10127_v0, %v10136_v29  ;;  %v118_v19 = vld [vmem:[%s14172_s0 + $0x180] sm:$0xf]  ;;  %v168_v15 = vld [vmem:[%s14172_s0 + $0x248] sm:$0xf]  ;;  %v6542_v34 = vsel %vm6257_vm0, %v392_v33, -inf }
  0xd3   :  { %v6541_v21 = vmax.f32 %v6539_v18, %v6540_v41  ;;  %v10193_v7 = vpop.permute.xlu1 %4434  ;;  %v4157_v23 = vsel %vm3901_vm11, 1, %v14279_v1  ;;  %v6544_v56 = vsel %vm6257_vm0, %v393_v51, -inf  ;;  %v170_v28 = vld [vmem:[%s14172_s0 + $0x250] sm:$0xf]  ;;  %v171_v41 = vld [vmem:[%s14172_s0 + $0x254] sm:$0xf] }
  0xd4   :  { %14313 = vst [vmem:[#allocation37_spill] sm:$0xff] %v10193_v7  ;;  %v10195_v0 = vcombine.low %v962_v63, %v962_v63  ;;  %v920_v29 = vrot.slane %v915_v10, %v8186_v4  ;;  %v10207_v18 = vpop.permute.xlu0 %4431  ;;  %4620 = vperm.xlu1 %8023, %v10075_v50   ;;  %v119_v63 = vld [vmem:[%s14172_s0 + $0x184] sm:$0xf]  ;;  %v4156_v16 = vsel %vm3900_vm12, 1, %v14279_v1  ;;  %v10217_v10 = vsel %vm3903_vm13, 1, %v14279_v1 }
  0xd5   :  { %vm3902_vm14 = vcmp.gt.f32.partialorder %v392_v33, 0.5  ;;  %v6543_v8 = vmax.f32 %v6541_v21, %v6542_v34  ;;  %4617 = vperm.xlu0 %8022, %v10108_v61   ;;  %v120_v38 = vld [vmem:[%s14172_s0 + $0x188] sm:$0xf]  ;;  %v121_v21 = vld [vmem:[%s14172_s0 + $0x18c] sm:$0xf]  ;;  %vm5074_vm2 = vcmp.eq.s32.totalorder %v9141_v17, 1 }
  0xd6   :  { %v1326_v44 = vsub.bf16 %v166_v55, %v10195_v0  ;;  %v1327_v5 = vsub.bf16 %v167_v6, %v10195_v0  ;;  %v10222_v50 = vcombine.low %v920_v29, %v920_v29  ;;  %v1328_v30 = vsub.bf16 %v168_v15, %v10195_v0  ;;  %v172_v33 = vld [vmem:[%s14172_s0 + $0x258] sm:$0xf] }
  0xd7   :  { %v1329_v51 = vsub.bf16 %v169_v13, %v10195_v0  ;;  %v10232_v34 = vmax.f32 %v6543_v8, %v6544_v56  ;;  %v1330_v61 = vsub.bf16 %v170_v28, %v10195_v0  ;;  %v1331_v55 = vsub.bf16 %v171_v41, %v10195_v0  ;;  %v10240_v15 = vpop.permute.xlu1 %4440  ;;  %v395_v56 = vld [vmem:[%s14174_s2 + $0x388] sm:$0xff] }
  0xd8   :  { %v14315_v6 = vcombine.low %v10048_v26, %v10065_v22  ;;  %v1582_v29 = vmax.bf16 %v14279_v1, %v1326_v44  ;;  %v1583_v13 = vmax.bf16 %v14279_v1, %v1327_v5  ;;  %v1278_v7 = vsub.bf16 %v118_v19, %v10222_v50  ;;  %v10250_v28 = vpop.permute.xlu0 %4437  ;;  %4626 = vperm.xlu1 %8023, %v4155_v36   ;;  %v122_v19 = vld [vmem:[%s14172_s0 + $0x190] sm:$0xf] }
  0xd9   :  { %14314 = vst [vmem:[#allocation38_spill] sm:$0xff] %v10232_v34  ;;  %v1279_v8 = vsub.bf16 %v119_v63, %v10222_v50  ;;  %v1584_v26 = vmax.bf16 %v14279_v1, %v1328_v30  ;;  %v1585_v22 = vmax.bf16 %v14279_v1, %v1329_v51  ;;  %v1280_v44 = vsub.bf16 %v120_v38, %v10222_v50  ;;  %v173_v38 = vld [vmem:[%s14172_s0 + $0x25c] sm:$0xf] }
  0xda   :  { %7846 = vmatmul.mubr.msk.bf16.gmra.mxu0 %vm2350_vm4, %v14315_v6  ;;  %v4158_v5 = vsel %vm3902_vm14, 1, %v14279_v1  ;;  %4623 = vperm.xlu0 %8022, %v4154_v59   ;;  %v7436_v41 = vcombine.low %v1582_v29, %v1583_v13  ;;  %v1534_v36 = vmax.bf16 %v14279_v1, %v1278_v7  ;;  %v1281_v63 = vsub.bf16 %v121_v21, %v10222_v50  ;;  %v394_v7 = vld [vmem:[%s14174_s2 + $0x380] sm:$0xff] }
  0xdb   :  { %7849 = vmatprep.mubr.msk.bf16.mxu0 %vm2350_vm4, %v7410_v58  ;;  %v123_v58 = vld [vmem:[%s14172_s0 + $0x194] sm:$0xf]  ;;  %v1535_v30 = vmax.bf16 %v14279_v1, %v1279_v8  ;;  %v7437_v51 = vcombine.low %v1584_v26, %v1585_v22  ;;  %v1586_v6 = vmax.bf16 %v14279_v1, %v1330_v61  ;;  %v1587_v59 = vmax.bf16 %v14279_v1, %v1331_v55  ;;  %v10278_v29 = vpop.permute.xlu1 %4446 }
  0xdc   :  { %vm3905_vm15 = vcmp.gt.f32.partialorder %v395_v56, 0.5  ;;  %7901 = vmatprep.mubr.msk.bf16.mxu1 %vm2350_vm4, %v7436_v41  ;;  %v1282_v13 = vsub.bf16 %v122_v19, %v10222_v50  ;;  %v1283_v8 = vsub.bf16 %v123_v58, %v10222_v50  ;;  %v6553_v26 = vsel %vm6257_vm0, %v395_v56, -inf  ;;  %v10284_v61 = vpop.permute.xlu0 %4443  ;;  %4632 = vperm.xlu1 %8023, %v4157_v23   ;;  %v124_v41 = vld [vmem:[%s14172_s0 + $0x198] sm:$0xf]  ;;  %v125_v19 = vld [vmem:[%s14172_s0 + $0x19c] sm:$0xf] }
  0xdd   :  { %v7412_v21 = vcombine.low %v1534_v36, %v1535_v30  ;;  %7902 = vmatmul.mubr.msk.bf16.gmra.mxu1 %vm2350_vm4, %v7437_v51  ;;  %v7438_v55 = vcombine.low %v1586_v6, %v1587_v59  ;;  %v1332_v22 = vsub.bf16 %v172_v33, %v10195_v0  ;;  %v1333_v34 = vsub.bf16 %v173_v38, %v10195_v0  ;;  %v397_v59 = vld [vmem:[%s14174_s2 + $0x398] sm:$0xff]  ;;  %v399_v56 = vld [vmem:[%s14174_s2 + $0x3a8] sm:$0xff] }
  0xde   :  { %v6552_v58 = vsel %vm6257_vm0, %v394_v7, -inf  ;;  %v10296_v36 = vmax.bf16 %v14279_v1, %v1280_v44  ;;  %v1537_v23 = vmax.bf16 %v14279_v1, %v1281_v63  ;;  %4629 = vperm.xlu0 %8022, %v4156_v16   ;;  %v10300_v30 = vmax.bf16 %v14279_v1, %v1282_v13 }
  0xdf   :  { %vm3904_vm1 = vcmp.gt.f32.partialorder %v394_v7, 0.5  ;;  %7905 = vmatprep.mubr.msk.bf16.mxu1 %vm2350_vm4, %v7438_v55  ;;  %v10304_v0 = vmax.bf16 %v14279_v1, %v1283_v8  ;;  %v1588_v33 = vmax.bf16 %v14279_v1, %v1332_v22  ;;  %v1589_v38 = vmax.bf16 %v14279_v1, %v1333_v34  ;;  %v10313_v16 = vpop.permute.xlu1 %4452  ;;  %v398_v7 = vld [vmem:[%s14174_s2 + $0x3a0] sm:$0xff] }
  0xe0   :  { %v6554_v51 = vmax.f32 %v6552_v58, %v6553_v26  ;;  %v14316_v44 = vcombine.low %v10139_v62, %v10142_v48  ;;  %v1284_v63 = vsub.bf16 %v124_v41, %v10222_v50  ;;  %v1285_v6 = vsub.bf16 %v125_v19, %v10222_v50  ;;  %v10321_v34 = vpop.permute.xlu0 %4449  ;;  %4638 = vperm.xlu1 %8023, %v10217_v10   ;;  %v396_v50 = vld [vmem:[%s14174_s2 + $0x390] sm:$0xff] }
  0xe1   :  { %vm5584_vm3 = vcmask 523264   ;;  %v7439_v62 = vcombine.low %v1588_v33, %v1589_v38  ;;  %v4161_v48 = vsel %vm3905_vm15, 1, %v14279_v1  ;;  %v4160_v13 = vsel %vm3904_vm1, 1, %v14279_v1 }
  0xe2   :  { %7850 = vmatmul.mubr.msk.bf16.gmra.mxu0 %vm2350_vm4, %v14316_v44  ;;  %v7413_v8 = vcombine.low %v10296_v36, %v1537_v23  ;;  %vm5072_vm5 = vcmp.eq.s32.totalorder %v9143_v46, 1  ;;  %4635 = vperm.xlu0 %8022, %v4158_v5   ;;  %v6555_v10 = vsel %vm6257_vm0, %v396_v50, -inf  ;;  %v657_v26 = vunpack.i.h.s16 %v9664_v47  ;;  %v401_v23 = vld [vmem:[%s14174_s2 + $0x3b8] sm:$0xff]  ;;  %v177_v46 = vld [vmem:[%s14172_s0 + $0x26c] sm:$0xf] }
  0xe3   :  { %7853 = vmatprep.mubr.msk.bf16.mxu0 %vm2350_vm4, %v7412_v21  ;;  %v6557_v21 = vsel %vm6257_vm0, %v397_v59, -inf  ;;  %v7414_v55 = vcombine.low %v10300_v30, %v10304_v0  ;;  %vm3907_vm6 = vcmp.gt.f32.partialorder %v397_v59, 0.5  ;;  %v6556_v22 = vmax.f32 %v6554_v51, %v6555_v10  ;;  %v10345_v41 = vpop.permute.xlu1 %4458 }
  0xe4   :  { %v651_v5 = vunpack.i.h.s16 %v10115_v57  ;;  %v10348_v19 = vmax.bf16 %v14279_v1, %v1284_v63  ;;  %v10351_v58 = vmax.bf16 %v14279_v1, %v1285_v6  ;;  %vm3906_vm7 = vcmp.gt.f32.partialorder %v396_v50, 0.5  ;;  %v10358_v30 = vpop.permute.xlu0 %4455  ;;  %4644 = vperm.xlu1 %8023, %v4161_v48   ;;  %v400_v63 = vld [vmem:[%s14174_s2 + $0x3b0] sm:$0xff] }
  0xe5   :  { %v689_v36 = vpack.i.b16 %v657_v26, %v657_v26  ;;  %vm5075_vm8 = vcmp.eq.s32.totalorder %v9201_v53, 1  ;;  %7906 = vmatmul.mubr.msk.bf16.gmra.mxu1 %vm2350_vm4, %v7439_v62  ;;  %vm3909_vm9 = vcmp.gt.f32.partialorder %v399_v56, 0.5  ;;  %vm3908_vm10 = vcmp.gt.f32.partialorder %v398_v7, 0.5 }
  0xe6   :  { %v683_v57 = vpack.i.b16 %v651_v5, %v651_v5  ;;  %v6558_v0 = vmax.f32 %v6556_v22, %v6557_v21  ;;  %vm5073_vm11 = vcmp.eq.s32.totalorder %v9203_v11, 1  ;;  %4641 = vperm.xlu0 %8022, %v4160_v13   ;;  %v4163_v33 = vsel %vm3907_vm6, 1, %v14279_v1  ;;  %v7759_v13 = vpop.f32.mrf.mxu0  ;;  %v403_v22 = vld [vmem:[%s14174_s2 + $0x3c8] sm:$0xff] }
  0xe7   :  { %v781_v38 = vrot.slane %v689_v36, %v8186_v4  ;;  %v6561_v51 = vsel %vm6257_vm0, %v399_v56, -inf  ;;  %v6559_v44 = vsel %vm6257_vm0, %v398_v7, -inf  ;;  %v4162_v6 = vsel %vm3906_vm7, 1, %v14279_v1  ;;  %v10375_v21 = vpop.permute.xlu1 %4464  ;;  %v174_v56 = vld [vmem:[%s14172_s0 + $0x260] sm:$0xf] }
  0xe8   :  { %v757_v62 = vrot.slane %v683_v57, %v8186_v4  ;;  %v6560_v48 = vmax.f32 %v6558_v0, %v6559_v44  ;;  %vm3911_vm12 = vcmp.gt.f32.partialorder %v401_v23, 0.5  ;;  %v7415_v59 = vcombine.low %v10348_v19, %v10351_v58  ;;  %14317 = vst [vmem:[#allocation39_spill] sm:$0xff] %v10375_v21  ;;  %4650 = vperm.xlu1 %8023, %v4163_v33   ;;  %v175_v7 = vld [vmem:[%s14172_s0 + $0x264] sm:$0xf]  ;;  %v2769_v36 = vpop.f32.mrf.mxu0 }
  0xe9   :  { %v964_v10 = vpack.i.b16 %v781_v38, %v781_v38  ;;  %v4165_v26 = vsel %vm3909_vm9, 1, %v14279_v1  ;;  %v4164_v50 = vsel %vm3908_vm10, 1, %v14279_v1  ;;  %v5330_v5 = vsel %vm5074_vm2, %v7759_v13, -3.4028235e+38  ;;  %v127_v57 = vld [vmem:[%s14172_s0 + $0x1a4] sm:$0xf] }
  0xea   :  { %7854 = vmatmul.mubr.msk.bf16.gmra.mxu0 %vm2350_vm4, %v7413_v8  ;;  %v10387_v8 = vpop.permute.xlu0 %4461  ;;  %v922_v19 = vpack.i.b16 %v757_v62, %v757_v62  ;;  %vm3910_vm13 = vcmp.gt.f32.partialorder %v400_v63, 0.5  ;;  %v6562_v58 = vmax.f32 %v6560_v48, %v6561_v51  ;;  %vm5076_vm14 = vcmp.eq.s32.totalorder %v9243_v9, 1  ;;  %4647 = vperm.xlu0 %8022, %v4162_v6   ;;  %v176_v6 = vld [vmem:[%s14172_s0 + $0x268] sm:$0xf] }
  0xeb   :  { %7857 = vmatprep.mubr.msk.bf16.mxu0 %vm2350_vm4, %v7414_v55  ;;  %14318 = vst [vmem:[#allocation40_spill] sm:$0xff] %v10387_v8  ;;  %v969_v17 = vrot.slane %v964_v10, %v8186_v4  ;;  %v126_v55 = vld [vmem:[%s14172_s0 + $0x1a0] sm:$0xf]  ;;  %v4167_v0 = vsel %vm3911_vm12, 1, %v14279_v1  ;;  %v6565_v33 = vsel %vm6257_vm0, %v401_v23, -inf  ;;  %v6563_v38 = vsel %vm6257_vm0, %v400_v63, -inf  ;;  %v7760_v23 = vpop.f32.mrf.mxu0 }
  0xec   :  { %v5328_v51 = vsel %vm5072_vm5, %v2769_v36, -3.4028235e+38  ;;  %vm5078_vm15 = vcmp.eq.s32.totalorder %v9305_v24, 1  ;;  %v927_v44 = vrot.slane %v922_v19, %v8186_v4  ;;  %v6564_v62 = vmax.f32 %v6562_v58, %v6563_v38  ;;  %v10421_v36 = vpop.permute.xlu1 %4470  ;;  %4656 = vperm.xlu1 %8023, %v4165_v26   ;;  %v10445_v26 = vld [vmem:[%s14174_s2 + $0x3c0] sm:$0xff] }
  0xed   :  { %vm3913_vm1 = vcmp.gt.f32.partialorder %v403_v22, 0.5  ;;  %v5588_v48 = vsel %vm5584_vm3, %v5330_v5, -inf  ;;  %v5585_v13 = vsel %vm5584_vm3, %v5328_v51, -inf  ;;  %v10416_v10 = vcombine.low %v969_v17, %v969_v17  ;;  %14319 = vst [vmem:[#allocation41_spill] sm:$0xff] %v10421_v36  ;;  %v2772_v21 = vpop.f32.mrf.mxu0 }
  0xee   :  { %v4166_v19 = vsel %vm3910_vm13, 1, %v14279_v1  ;;  %vm5079_vm2 = vcmp.eq.s32.totalorder %v9303_v32, 1  ;;  %v10426_v58 = vcombine.low %v927_v44, %v927_v44  ;;  %v10428_v38 = vpop.permute.xlu0 %4467  ;;  %v10430_v5 = vmax.f32 %v6564_v62, %v6565_v33  ;;  %4653 = vperm.xlu0 %8022, %v4164_v50  }
  0xef   :  { %v4169_v17 = vsel %vm3913_vm1, 1, %v14279_v1  ;;  %v10434_v51 = vsel %vm6257_vm0, %v403_v22, -inf  ;;  %vm5077_vm5 = vcmp.eq.s32.totalorder %v9241_v25, 1  ;;  %v5331_v63 = vsel %vm5075_vm8, %v7760_v23, -3.4028235e+38 }
  0xf0   :  { %14320 = vst [vmem:[#allocation42_spill] sm:$0xff] %v10430_v5  ;;  %v1334_v36 = vsub.bf16 %v174_v56, %v10416_v10  ;;  %v1335_v44 = vsub.bf16 %v175_v7, %v10416_v10  ;;  %v1336_v8 = vsub.bf16 %v176_v6, %v10416_v10  ;;  %v5329_v22 = vsel %vm5073_vm11, %v2772_v21, -3.4028235e+38  ;;  %v128_v56 = vld [vmem:[%s14172_s0 + $0x1a8] sm:$0xf]  ;;  %v7763_v7 = vpop.f32.mrf.mxu0  ;;  %4662 = vperm.xlu1 %8023, %v4167_v0  }
  0xf1   :  { %v1286_v33 = vsub.bf16 %v126_v55, %v10426_v58  ;;  %v1287_v53 = vsub.bf16 %v127_v57, %v10426_v58  ;;  %v1337_v62 = vsub.bf16 %v177_v46, %v10416_v10  ;;  %v5586_v50 = vsel %vm5584_vm3, %v5329_v22, -inf  ;;  %v129_v55 = vld [vmem:[%s14172_s0 + $0x1ac] sm:$0xf]  ;;  %v10463_v57 = vpop.permute.xlu1 %4476  ;;  %v179_v0 = vld [vmem:[%s14172_s0 + $0x274] sm:$0xf] }
  0xf2   :  { %7858 = vmatmul.mubr.msk.bf16.gmra.mxu0 %vm2350_vm4, %v7415_v59  ;;  %v1590_v6 = vmax.bf16 %v14279_v1, %v1334_v36  ;;  %v1591_v11 = vmax.bf16 %v14279_v1, %v1335_v44  ;;  %v1592_v21 = vmax.bf16 %v14279_v1, %v1336_v8  ;;  %14321 = vst [vmem:[#allocation43_spill] sm:$0xff] %v10463_v57  ;;  %v10467_v5 = vpop.permute.xlu0 %4473  ;;  %v178_v59 = vld [vmem:[%s14172_s0 + $0x270] sm:$0xf]  ;;  %vm3912_vm6 = vcmp.gt.f32.partialorder %v10445_v26, 0.5  ;;  %v2785_v36 = vpop.f32.mrf.mxu0  ;;  %v133_v25 = vld [vmem:[%s14172_s0 + $0x1bc] sm:$0xf] }
  0xf3   :  { %v5587_v23 = vmax.f32 %v5585_v13, %v5586_v50  ;;  %v1542_v46 = vmax.bf16 %v14279_v1, %v1286_v33  ;;  %v1543_v22 = vmax.bf16 %v14279_v1, %v1287_v53  ;;  %v5590_v8 = vsel %vm5584_vm3, %v5331_v63, -inf  ;;  %4659 = vperm.xlu0 %8022, %v4166_v19   ;;  %v131_v19 = vld [vmem:[%s14172_s0 + $0x1b4] sm:$0xf] }
  0xf4   :  { %v7440_v44 = vcombine.low %v1590_v6, %v1591_v11  ;;  %v1593_v57 = vmax.bf16 %v14279_v1, %v1337_v62  ;;  %vm5082_vm7 = vcmp.eq.s32.totalorder %v9399_v39, 1  ;;  %v1288_v13 = vsub.bf16 %v128_v56, %v10426_v58  ;;  %v130_v62 = vld [vmem:[%s14172_s0 + $0x1b0] sm:$0xf]  ;;  %4668 = vperm.xlu1 %8023, %v4169_v17  }
  0xf5   :  { %v5589_v33 = vmax.f32 %v5587_v23, %v5588_v48  ;;  %v5332_v53 = vsel %vm5076_vm14, %v2785_v36, -3.4028235e+38  ;;  %v7416_v50 = vcombine.low %v1542_v46, %v1543_v22  ;;  %v1289_v63 = vsub.bf16 %v129_v55, %v10426_v58  ;;  %v7764_v48 = vpop.f32.mrf.mxu0  ;;  %v10496_v55 = vpop.permute.xlu1 %4482 }
  0xf6   :  { %vm5080_vm8 = vcmp.eq.s32.totalorder %v9354_v20, 1  ;;  %v5334_v56 = vsel %vm5078_vm15, %v7763_v7, -3.4028235e+38  ;;  %7909 = vmatprep.mubr.msk.bf16.mxu1 %vm2350_vm4, %v7440_v44  ;;  %v7441_v9 = vcombine.low %v1592_v21, %v1593_v57  ;;  %v1544_v6 = vmax.bf16 %v14279_v1, %v1288_v13  ;;  %v180_v21 = vld [vmem:[%s14172_s0 + $0x278] sm:$0xf]  ;;  %v10505_v57 = vpop.permute.xlu0 %4479 }
  0xf7   :  { %vm5083_vm9 = vcmp.eq.s32.totalorder %v9397_v60, 1  ;;  %v1338_v11 = vsub.bf16 %v178_v59, %v10416_v10  ;;  %v5591_v23 = vmax.f32 %v5589_v33, %v5590_v8  ;;  %v5592_v46 = vsel %vm5584_vm3, %v5332_v53, -inf  ;;  %7861 = vmatprep.mubr.msk.bf16.mxu0 %vm2350_vm4, %v7416_v50  ;;  %v2788_v59 = vpop.f32.mrf.mxu0  ;;  %v181_v13 = vld [vmem:[%s14172_s0 + $0x27c] sm:$0xf]  ;;  %v132_v53 = vld [vmem:[%s14172_s0 + $0x1b8] sm:$0xf] }
  0xf8   :  { %v1545_v24 = vmax.bf16 %v14279_v1, %v1289_v63  ;;  %v1339_v7 = vsub.bf16 %v179_v0, %v10416_v10  ;;  %vm5081_vm10 = vcmp.eq.s32.totalorder %v9352_v40, 1  ;;  %v5335_v22 = vsel %vm5079_vm2, %v7764_v48, -3.4028235e+38  ;;  %7910 = vmatmul.mubr.msk.bf16.gmra.mxu1 %vm2350_vm4, %v7441_v9 }
  0xf9   :  { %v1594_v8 = vmax.bf16 %v14279_v1, %v1338_v11  ;;  %v1290_v36 = vsub.bf16 %v130_v62, %v10426_v58  ;;  %v1291_v44 = vsub.bf16 %v131_v19, %v10426_v58  ;;  %v5593_v0 = vmax.f32 %v5591_v23, %v5592_v46  ;;  %v7767_v63 = vpop.f32.mrf.mxu0  ;;  %v10530_v9 = vpop.permute.xlu1 %4488 }
  0xfa   :  { %v5333_v17 = vsel %vm5077_vm5, %v2788_v59, -3.4028235e+38  ;;  %v7417_v33 = vcombine.low %v1544_v6, %v1545_v24  ;;  %v1595_v32 = vmax.bf16 %v14279_v1, %v1339_v7  ;;  %v1340_v48 = vsub.bf16 %v180_v21, %v10416_v10  ;;  %14322 = vst [vmem:[#allocation44_spill] sm:$0xff] %v10530_v9  ;;  %v10535_v24 = vpop.permute.xlu0 %4485  ;;  %v14341_v9 = vld [vmem:[#allocation19_spill] sm:$0xff] }
  0xfb   :  { %v5594_v50 = vsel %vm5584_vm3, %v5333_v17, -inf  ;;  %v1546_v62 = vmax.bf16 %v14279_v1, %v1290_v36  ;;  %v1547_v19 = vmax.bf16 %v14279_v1, %v1291_v44  ;;  %v5596_v6 = vsel %vm5584_vm3, %v5334_v56, -inf  ;;  %v2801_v59 = vpop.f32.mrf.mxu0 }
  0xfc   :  { %v5595_v11 = vmax.f32 %v5593_v0, %v5594_v50  ;;  %7862 = vmatmul.mubr.msk.bf16.gmra.mxu0 %vm2350_vm4, %v7417_v33  ;;  %v7442_v23 = vcombine.low %v1594_v8, %v1595_v32  ;;  %v1341_v46 = vsub.bf16 %v181_v13, %v10416_v10  ;;  %v5598_v7 = vsel %vm5584_vm3, %v5335_v22, -inf  ;;  %v405_v32 = vld [vmem:[%s14174_s2 + $0x3d8] sm:$0xff] }
  0xfd   :  { %v7418_v21 = vcombine.low %v1546_v62, %v1547_v19  ;;  %v1596_v36 = vmax.bf16 %v14279_v1, %v1340_v48  ;;  %v1292_v44 = vsub.bf16 %v132_v53, %v10426_v58  ;;  %v5338_v56 = vsel %vm5082_vm7, %v7767_v63, -3.4028235e+38  ;;  %v7768_v22 = vpop.f32.mrf.mxu0  ;;  %v404_v62 = vld [vmem:[%s14174_s2 + $0x3d0] sm:$0xff] }
  0xfe   :  { %v5597_v17 = vmax.f32 %v5595_v11, %v5596_v6  ;;  %7913 = vmatprep.mubr.msk.bf16.mxu1 %vm2350_vm4, %v7442_v23  ;;  %v1597_v8 = vmax.bf16 %v14279_v1, %v1341_v46  ;;  %v1293_v10 = vsub.bf16 %v133_v25, %v10426_v58  ;;  %v5336_v13 = vsel %vm5080_vm8, %v2801_v59, -3.4028235e+38  ;;  %v10557_v58 = vpop.permute.xlu1 %4494 }
  0xff   :  { %7865 = vmatprep.mubr.msk.bf16.mxu0 %vm2350_vm4, %v7418_v21  ;;  %v1548_v0 = vmax.bf16 %v14279_v1, %v1292_v44  ;;  %v4168_v33 = vsel %vm3912_vm6, 1, %v14279_v1  ;;  %v6573_v39 = vsel %vm6257_vm0, %v10445_v26, -inf  ;;  %14323 = vst [vmem:[#allocation45_spill] sm:$0xff] %v10557_v58  ;;  %v5339_v53 = vsel %vm5083_vm9, %v7768_v22, -3.4028235e+38  ;;  %v10567_v26 = vpop.permute.xlu0 %4491  ;;  %v2804_v48 = vpop.f32.mrf.mxu0 }
 0x100   :  { %v10559_v20 = vmax.f32 %v5597_v17, %v5598_v7  ;;  %v7443_v50 = vcombine.low %v1596_v36, %v1597_v8  ;;  %v1549_v63 = vmax.bf16 %v14279_v1, %v1293_v10  ;;  %4665 = vperm.xlu0 %8022, %v4168_v33   ;;  %vm5085_vm11 = vcmp.eq.s32.totalorder %v9452_v37, 1  ;;  %v14326_v36 = vld [vmem:[#allocation16_spill] sm:$0xff]  ;;  %v406_v33 = vld [vmem:[%s14174_s2 + $0x3e0] sm:$0xff] }
 0x101   :  { %v5609_v19 = vsel %vm5584_vm3, %v5338_v56, -inf  ;;  %vm5086_vm12 = vcmp.eq.s32.totalorder %v9518_v42, 1  ;;  %v6575_v60 = vmax.f32 %v6573_v39, %v10434_v51  ;;  %v5606_v25 = vsel %vm5584_vm3, %v5336_v13, -inf  ;;  %v7771_v7 = vpop.f32.mrf.mxu0  ;;  %v407_v51 = vld [vmem:[%s14174_s2 + $0x3e8] sm:$0xff] }
 0x102   :  { %14324 = vst [vmem:[#allocation46_spill] sm:$0xff] %v10559_v20  ;;  %v5337_v6 = vsel %vm5081_vm10, %v2804_v48, -3.4028235e+38  ;;  %7914 = vmatmul.mubr.msk.bf16.gmra.mxu1 %vm2350_vm4, %v7443_v50  ;;  %v7419_v11 = vcombine.low %v1548_v0, %v1549_v63  ;;  %vm3915_vm13 = vcmp.gt.f32.partialorder %v405_v32, 0.5  ;;  %v5611_v23 = vsel %vm5584_vm3, %v5339_v53, -inf  ;;  %v10583_v21 = vpop.permute.xlu1 %4500  ;;  %v14328_v50 = vld [vmem:[#allocation17_spill] sm:$0xff] }
 0x103   :  { %v5607_v46 = vsel %vm5584_vm3, %v5337_v6, -inf  ;;  %v4171_v59 = vsel %vm3915_vm13, 1, %v14279_v1  ;;  %vm3914_vm14 = vcmp.gt.f32.partialorder %v404_v62, 0.5  ;;  %14325 = vst [vmem:[#allocation47_spill] sm:$0xff] %v10583_v21  ;;  %vm5084_vm15 = vcmp.eq.s32.totalorder %v14326_v36, 1  ;;  %v10589_v56 = vpop.permute.xlu0 %4497  ;;  %v2817_v10 = vpop.f32.mrf.mxu0 }
 0x104   :  { %v5608_v40 = vmax.f32 %v5606_v25, %v5607_v46  ;;  %7866 = vmatmul.mubr.msk.bf16.gmra.mxu0 %vm2350_vm4, %v7419_v11  ;;  %4674 = vperm.xlu1 %8023, %v4171_v59   ;;  %v4170_v44 = vsel %vm3914_vm14, 1, %v14279_v1  ;;  %v6576_v17 = vsel %vm6257_vm0, %v404_v62, -inf  ;;  %14327 = vst [vmem:[#allocation16_spill] sm:$0xff] %v10589_v56  ;;  %v5342_v8 = vsel %vm5086_vm12, %v7771_v7, -3.4028235e+38 }
 0x105   :  { %v6577_v13 = vmax.f32 %v6575_v60, %v6576_v17  ;;  %4671 = vperm.xlu0 %8022, %v4170_v44   ;;  %v10595_v22 = vcombine.high %v9595_v43, %v9595_v43  ;;  %v10599_v0 = vcombine.high %v9632_v35, %v9632_v35  ;;  %v5340_v53 = vsel %vm5084_vm15, %v2817_v10, -3.4028235e+38  ;;  %v7772_v42 = vpop.f32.mrf.mxu0  ;;  %v409_v17 = vld [vmem:[%s14174_s2 + $0x3f8] sm:$0xff] }
 0x106   :  { %v5610_v39 = vmax.f32 %v5608_v40, %v5609_v19  ;;  %vm5087_vm1 = vcmp.eq.s32.totalorder %v14328_v50, 1  ;;  %vm3917_vm2 = vcmp.gt.f32.partialorder %v407_v51, 0.5  ;;  %v6578_v63 = vsel %vm6257_vm0, %v405_v32, -inf  ;;  %v10611_v48 = vpop.permute.xlu1 %4506  ;;  %v14331_v50 = vld [vmem:[#allocation22_spill] sm:$0xff] }
 0x107   :  { %v7326_v43 = vpack.i.b16 %v10595_v22, %v10595_v22  ;;  %v7323_v62 = vpack.i.b16 %v10599_v0, %v10599_v0  ;;  %v4173_v35 = vsel %vm3917_vm2, 1, %v14279_v1  ;;  %14329 = vst [vmem:[#allocation17_spill] sm:$0xff] %v10611_v48  ;;  %v5617_v60 = vsel %vm5584_vm3, %v5342_v8, -inf  ;;  %v10615_v6 = vpop.permute.xlu0 %4503  ;;  %v2820_v11 = vpop.f32.mrf.mxu0 }
 0x108   :  { %v5612_v19 = vmax.f32 %v5610_v39, %v5611_v23  ;;  %v5613_v25 = vsel %vm5584_vm3, %v5340_v53, -inf  ;;  %4680 = vperm.xlu1 %8023, %v4173_v35   ;;  %vm3916_vm5 = vcmp.gt.f32.partialorder %v406_v33, 0.5  ;;  %14330 = vst [vmem:[#allocation48_spill] sm:$0xff] %v10615_v6  ;;  %v5343_v32 = vsel %vm5087_vm1, %v7772_v42, -3.4028235e+38 }
 0x109   :  { %v785_v46 = vrot.slane %v7326_v43, %v8186_v4  ;;  %v761_v7 = vrot.slane %v7323_v62, %v8186_v4  ;;  %v4172_v59 = vsel %vm3916_vm5, 1, %v14279_v1  ;;  %v5341_v36 = vsel %vm5085_vm11, %v2820_v11, -3.4028235e+38  ;;  %v7775_v53 = vpop.f32.mrf.mxu0  ;;  %v135_v11 = vld [vmem:[%s14172_s0 + $0x1c4] sm:$0xf] }
 0x10a   :  { %v5614_v40 = vmax.f32 %v5612_v19, %v5613_v25  ;;  %v6579_v44 = vmax.f32 %v6577_v13, %v6578_v63  ;;  %v6580_v23 = vsel %vm6257_vm0, %v406_v33, -inf  ;;  %4677 = vperm.xlu0 %8022, %v4172_v59   ;;  %v5615_v8 = vsel %vm5584_vm3, %v5341_v36, -inf  ;;  %v10628_v42 = vpop.permute.xlu1 %4512  ;;  %v182_v13 = vld [vmem:[%s14172_s0 + $0x280] sm:$0xf]  ;;  %v183_v33 = vld [vmem:[%s14172_s0 + $0x284] sm:$0xf] }
 0x10b   :  { %v971_v10 = vpack.i.b16 %v785_v46, %v785_v46  ;;  %v929_v39 = vpack.i.b16 %v761_v7, %v761_v7  ;;  %vm5090_vm6 = vcmp.eq.s32.totalorder %v14331_v50, 1  ;;  %14332 = vst [vmem:[#allocation22_spill] sm:$0xff] %v10628_v42  ;;  %v5619_v37 = vsel %vm5584_vm3, %v5343_v32, -inf  ;;  %v134_v63 = vld [vmem:[%s14172_s0 + $0x1c0] sm:$0xf]  ;;  %v408_v19 = vld [vmem:[%s14174_s2 + $0x3f0] sm:$0xff]  ;;  %v10646_v25 = vpop.permute.xlu0 %4509  ;;  %v2833_v7 = vpop.f32.mrf.mxu0 }
 0x10c   :  { %v5616_v43 = vmax.f32 %v5614_v40, %v5615_v8  ;;  %v10641_v62 = vsel %vm6257_vm0, %v407_v51, -inf  ;;  %v6581_v35 = vmax.f32 %v6579_v44, %v6580_v23  ;;  %14333 = vst [vmem:[#allocation49_spill] sm:$0xff] %v10646_v25  ;;  %v184_v51 = vld [vmem:[%s14172_s0 + $0x288] sm:$0xf]  ;;  %v14334_v59 = vld [vmem:[#allocation20_spill] sm:$0xff]  ;;  %vm3919_vm8 = vcmp.gt.f32.partialorder %v409_v17, 0.5 }
 0x10d   :  { %v976_v32 = vrot.slane %v971_v10, %v8186_v4  ;;  %v934_v46 = vrot.slane %v929_v39, %v8186_v4  ;;  %vm5088_vm7 = vcmp.eq.s32.totalorder %v14334_v59, 1  ;;  %v185_v36 = vld [vmem:[%s14172_s0 + $0x28c] sm:$0xf]  ;;  %v10662_v44 = vsel %vm5090_vm6, %v7775_v53, -3.4028235e+38  ;;  %v14335_v23 = vld [vmem:[#allocation21_spill] sm:$0xff]  ;;  %v7776_v59 = vpop.f32.mrf.mxu0 }
 0x10e   :  { %v5618_v40 = vmax.f32 %v5616_v43, %v5617_v60  ;;  %vm5091_vm9 = vcmp.eq.s32.totalorder %v14335_v23, 1  ;;  %v4175_v8 = vsel %vm3919_vm8, 1, %v14279_v1  ;;  %v136_v60 = vld [vmem:[%s14172_s0 + $0x1c8] sm:$0xf]  ;;  %v5344_v43 = vsel %vm5088_vm7, %v2833_v7, -3.4028235e+38  ;;  %v10673_v20 = vpop.permute.xlu1 %4518 }
 0x10f   :  { %v10666_v10 = vcombine.low %v976_v32, %v976_v32  ;;  %v10668_v39 = vcombine.low %v934_v46, %v934_v46  ;;  %4686 = vperm.xlu1 %8023, %v4175_v8   ;;  %vm3918_vm10 = vcmp.gt.f32.partialorder %v408_v19, 0.5  ;;  %14336 = vst [vmem:[#allocation20_spill] sm:$0xff] %v10673_v20  ;;  %v6586_v50 = vsel %vm6257_vm0, %v409_v17, -inf  ;;  %v10680_v46 = vpop.permute.xlu0 %4515  ;;  %v2836_v17 = vpop.f32.mrf.mxu0 }
 0x110   :  { %v10675_v53 = vmax.f32 %v5618_v40, %v5619_v37  ;;  %v4174_v42 = vsel %vm3918_vm10, 1, %v14279_v1  ;;  %v6583_v32 = vmax.f32 %v6581_v35, %v10641_v62  ;;  %14338 = vst [vmem:[#allocation50_spill] sm:$0xff] %v10680_v46  ;;  %v137_v37 = vld [vmem:[%s14172_s0 + $0x1cc] sm:$0xf]  ;;  %vm5089_vm11 = vcmp.eq.s32.totalorder %v14341_v9, 1 }
 0x111   :  { %v1342_v25 = vsub.bf16 %v182_v13, %v10666_v10  ;;  %v1343_v21 = vsub.bf16 %v183_v33, %v10666_v10  ;;  %v1294_v7 = vsub.bf16 %v134_v63, %v10668_v39  ;;  %v1295_v8 = vsub.bf16 %v135_v11, %v10668_v39  ;;  %4683 = vperm.xlu0 %8022, %v4174_v42   ;;  %v10697_v20 = vpop.f32.mrf.mxu0 }
 0x112   :  { %14337 = vst [vmem:[#allocation21_spill] sm:$0xff] %v10675_v53  ;;  %v1344_v40 = vsub.bf16 %v184_v51, %v10666_v10  ;;  %v1345_v62 = vsub.bf16 %v185_v36, %v10666_v10  ;;  %v1296_v35 = vsub.bf16 %v136_v60, %v10668_v39  ;;  %v5627_v13 = vsel %vm5584_vm3, %v5344_v43, -inf  ;;  %v10699_v42 = vpop.permute.xlu1 %4524 }
 0x113   :  { %v1598_v33 = vmax.bf16 %v14279_v1, %v1342_v25  ;;  %v1599_v63 = vmax.bf16 %v14279_v1, %v1343_v21  ;;  %v1550_v11 = vmax.bf16 %v14279_v1, %v1294_v7  ;;  %v1551_v53 = vmax.bf16 %v14279_v1, %v1295_v8  ;;  %14339 = vst [vmem:[#allocation51_spill] sm:$0xff] %v10699_v42  ;;  %v186_v21 = vld [vmem:[%s14172_s0 + $0x290] sm:$0xf]  ;;  %v187_v25 = vld [vmem:[%s14172_s0 + $0x294] sm:$0xf]  ;;  %v10714_v8 = vpop.permute.xlu0 %4521  ;;  %v10722_v46 = vpop.f32.mrf.mxu0 }
 0x114   :  { %v1600_v51 = vmax.bf16 %v14279_v1, %v1344_v40  ;;  %v1601_v36 = vmax.bf16 %v14279_v1, %v1345_v62  ;;  %v1297_v60 = vsub.bf16 %v137_v37, %v10668_v39  ;;  %v1552_v43 = vmax.bf16 %v14279_v1, %v1296_v35  ;;  %v138_v7 = vld [vmem:[%s14172_s0 + $0x1d0] sm:$0xf]  ;;  %14340 = vst [vmem:[#allocation52_spill] sm:$0xff] %v10714_v8  ;;  %v139_v42 = vld [vmem:[%s14172_s0 + $0x1d4] sm:$0xf] }
 0x115   :  { %v7444_v40 = vcombine.low %v1598_v33, %v1599_v63  ;;  %v7420_v62 = vcombine.low %v1550_v11, %v1551_v53  ;;  %v5347_v37 = vsel %vm5091_vm9, %v7776_v59, -3.4028235e+38  ;;  %v6584_v35 = vsel %vm6257_vm0, %v408_v19, -inf  ;;  %v188_v33 = vld [vmem:[%s14172_s0 + $0x298] sm:$0xf]  ;;  %v10737_v9 = vpop.f32.mrf.mxu0 }
 0x116   :  { %v7445_v48 = vcombine.low %v1600_v51, %v1601_v36  ;;  %v1553_v56 = vmax.bf16 %v14279_v1, %v1297_v60  ;;  %v6585_v6 = vmax.f32 %v6583_v32, %v6584_v35  ;;  %v5345_v23 = vsel %vm5089_vm11, %v2836_v17, -3.4028235e+38  ;;  %v189_v32 = vld [vmem:[%s14172_s0 + $0x29c] sm:$0xf]  ;;  %v10739_v63 = vpop.permute.xlu1 %4530  ;;  %v140_v60 = vld [vmem:[%s14172_s0 + $0x1d8] sm:$0xf] }
 0x117   :  { %7917 = vmatprep.mubr.msk.bf16.mxu1 %vm2350_vm4, %v7444_v40  ;;  %7869 = vmatprep.mubr.msk.bf16.mxu0 %vm2350_vm4, %v7420_v62  ;;  %v1346_v59 = vsub.bf16 %v186_v21, %v10666_v10  ;;  %v1347_v19 = vsub.bf16 %v187_v25, %v10666_v10  ;;  %v1298_v53 = vsub.bf16 %v138_v7, %v10668_v39  ;;  %v5628_v51 = vsel %vm5584_vm3, %v5345_v23, -inf  ;;  %v10749_v21 = vpop.permute.xlu0 %4527  ;;  %v411_v62 = vld [vmem:[%s14174_s2 + $0x408] sm:$0xff] }
 0x118   :  { %14342 = vst [vmem:[#allocation19_spill] sm:$0xff] %v10739_v63  ;;  %7918 = vmatmul.mubr.msk.bf16.gmra.mxu1 %vm2350_vm4, %v7445_v48  ;;  %v7421_v17 = vcombine.low %v1552_v43, %v1553_v56  ;;  %v10742_v11 = vmax.f32 %v6585_v6, %v6586_v50  ;;  %v1299_v36 = vsub.bf16 %v139_v42, %v10668_v39  ;;  %14344 = vst [vmem:[#allocation54_spill] sm:$0xff] %v10749_v21  ;;  %v10754_v56 = vpop.f32.mrf.mxu0 }
 0x119   :  { %v5629_v25 = vmax.f32 %v5627_v13, %v5628_v51  ;;  %v1602_v7 = vmax.bf16 %v14279_v1, %v1346_v59  ;;  %v1603_v40 = vmax.bf16 %v14279_v1, %v1347_v19  ;;  %v1554_v48 = vmax.bf16 %v14279_v1, %v1298_v53  ;;  %v141_v13 = vld [vmem:[%s14172_s0 + $0x1dc] sm:$0xf]  ;;  %v410_v59 = vld [vmem:[%s14174_s2 + $0x400] sm:$0xff] }
 0x11a   :  { %14343 = vst [vmem:[#allocation53_spill] sm:$0xff] %v10742_v11  ;;  %v5630_v6 = vsel %vm5584_vm3, %v10662_v44, -inf  ;;  %7870 = vmatmul.mubr.msk.bf16.gmra.mxu0 %vm2350_vm4, %v7421_v17  ;;  %v1555_v50 = vmax.bf16 %v14279_v1, %v1299_v36  ;;  %v1348_v42 = vsub.bf16 %v188_v33, %v10666_v10  ;;  %v1349_v43 = vsub.bf16 %v189_v32, %v10666_v10  ;;  %v10772_v19 = vpop.f32.mrf.mxu0  ;;  %v10774_v53 = vpop.permute.xlu1 %4536 }
 0x11b   :  { %v5631_v35 = vmax.f32 %v5629_v25, %v5630_v6  ;;  %v7446_v23 = vcombine.low %v1602_v7, %v1603_v40  ;;  %v1300_v44 = vsub.bf16 %v140_v60, %v10668_v39  ;;  %14345 = vst [vmem:[#allocation55_spill] sm:$0xff] %v10774_v53  ;;  %v5632_v10 = vsel %vm5584_vm3, %v5347_v37, -inf  ;;  %v10779_v51 = vpop.permute.xlu0 %4533  ;;  %v413_v37 = vld [vmem:[%s14174_s2 + $0x418] sm:$0xff] }
 0x11c   :  { %v7422_v33 = vcombine.low %v1554_v48, %v1555_v50  ;;  %v1604_v32 = vmax.bf16 %v14279_v1, %v1348_v42  ;;  %v1605_v17 = vmax.bf16 %v14279_v1, %v1349_v43  ;;  %14346 = vst [vmem:[#allocation56_spill] sm:$0xff] %v10779_v51  ;;  %v1301_v36 = vsub.bf16 %v141_v13, %v10668_v39  ;;  %v10788_v7 = vpop.f32.mrf.mxu0  ;;  %v14347_v43 = vld [vmem:[#allocation24_spill] sm:$0xff]  ;;  %v412_v13 = vld [vmem:[%s14174_s2 + $0x410] sm:$0xff] }
 0x11d   :  { %7921 = vmatprep.mubr.msk.bf16.mxu1 %vm2350_vm4, %v7446_v23  ;;  %v1556_v60 = vmax.bf16 %v14279_v1, %v1300_v44  ;;  %vm3921_vm12 = vcmp.gt.f32.partialorder %v411_v62, 0.5  ;;  %v6595_v25 = vsel %vm6257_vm0, %v411_v62, -inf  ;;  %vm3920_vm13 = vcmp.gt.f32.partialorder %v410_v59, 0.5  ;;  %v14349_v44 = vld [vmem:[#allocation26_spill] sm:$0xff] }
 0x11e   :  { %7873 = vmatprep.mubr.msk.bf16.mxu0 %vm2350_vm4, %v7422_v33  ;;  %v7447_v40 = vcombine.low %v1604_v32, %v1605_v17  ;;  %v4177_v48 = vsel %vm3921_vm12, 1, %v14279_v1  ;;  %v6594_v6 = vsel %vm6257_vm0, %v410_v59, -inf  ;;  %v1557_v39 = vmax.bf16 %v14279_v1, %v1301_v36  ;;  %v10799_v62 = vpop.f32.mrf.mxu0  ;;  %v10801_v23 = vpop.permute.xlu1 %4542 }
 0x11f   :  { %4692 = vperm.xlu1 %8023, %v4177_v48   ;;  %v4176_v50 = vsel %vm3920_vm13, 1, %v14279_v1  ;;  %v6596_v42 = vmax.f32 %v6594_v6, %v6595_v25  ;;  %vm5092_vm14 = vcmp.eq.s32.totalorder %v14347_v43, 1  ;;  %14348 = vst [vmem:[#allocation24_spill] sm:$0xff] %v10801_v23  ;;  %vm5094_vm15 = vcmp.eq.s32.totalorder %v14349_v44, 1  ;;  %v10806_v32 = vpop.permute.xlu0 %4539  ;;  %v14351_v25 = vld [vmem:[#allocation25_spill] sm:$0xff]  ;;  %v14360_v23 = vld [vmem:[#allocation28_spill] sm:$0xff] }
 0x120   :  { %7922 = vmatmul.mubr.msk.bf16.gmra.mxu1 %vm2350_vm4, %v7447_v40  ;;  %4689 = vperm.xlu0 %8022, %v4176_v50   ;;  %v5348_v59 = vsel %vm5092_vm14, %v10722_v46, -3.4028235e+38  ;;  %v5633_v33 = vmax.f32 %v5631_v35, %v5632_v10  ;;  %vm3923_vm1 = vcmp.gt.f32.partialorder %v413_v37, 0.5  ;;  %14350 = vst [vmem:[#allocation26_spill] sm:$0xff] %v10806_v32  ;;  %v7423_v17 = vcombine.low %v1556_v60, %v1557_v39  ;;  %v10811_v6 = vpop.f32.mrf.mxu0  ;;  %v415_v46 = vld [vmem:[%s14174_s2 + $0x428] sm:$0xff]  ;;  %v14352_v60 = vld [vmem:[#allocation23_spill] sm:$0xff] }
 0x121   :  { %v5634_v36 = vsel %vm5584_vm3, %v5348_v59, -inf  ;;  %vm5095_vm2 = vcmp.eq.s32.totalorder %v14351_v25, 1  ;;  %v4179_v48 = vsel %vm3923_vm1, 1, %v14279_v1  ;;  %v5350_v40 = vsel %vm5094_vm15, %v10697_v20, -3.4028235e+38 }
 0x122   :  { %v5635_v43 = vmax.f32 %v5633_v33, %v5634_v36  ;;  %v5351_v50 = vsel %vm5095_vm2, %v10737_v9, -3.4028235e+38  ;;  %vm3922_vm5 = vcmp.gt.f32.partialorder %v412_v13, 0.5  ;;  %7874 = vmatmul.mubr.msk.bf16.gmra.mxu0 %vm2350_vm4, %v7423_v17  ;;  %v6597_v10 = vsel %vm6257_vm0, %v412_v13, -inf  ;;  %v10823_v20 = vpop.f32.mrf.mxu0  ;;  %v10825_v44 = vpop.permute.xlu1 %4548  ;;  %v414_v13 = vld [vmem:[%s14174_s2 + $0x420] sm:$0xff] }
 0x123   :  { %4698 = vperm.xlu1 %8023, %v4179_v48   ;;  %v4178_v35 = vsel %vm3922_vm5, 1, %v14279_v1  ;;  %vm5093_vm6 = vcmp.eq.s32.totalorder %v14352_v60, 1  ;;  %v659_v39 = vunpack.i.h.s16 %v10595_v22  ;;  %14353 = vst [vmem:[#allocation25_spill] sm:$0xff] %v10825_v44  ;;  %v6599_v9 = vsel %vm6257_vm0, %v413_v37, -inf  ;;  %v10833_v36 = vpop.permute.xlu0 %4545 }
 0x124   :  { %v6598_v59 = vmax.f32 %v6596_v42, %v6597_v10  ;;  %4695 = vperm.xlu0 %8022, %v4178_v35   ;;  %v5349_v33 = vsel %vm5093_vm6, %v10754_v56, -3.4028235e+38  ;;  %v653_v17 = vunpack.i.h.s16 %v10599_v0  ;;  %14354 = vst [vmem:[#allocation23_spill] sm:$0xff] %v10833_v36  ;;  %v5638_v22 = vsel %vm5584_vm3, %v5350_v40, -inf  ;;  %v10837_v60 = vpop.f32.mrf.mxu0 }
 0x125   :  { %v5636_v25 = vsel %vm5584_vm3, %v5349_v33, -inf  ;;  %v691_v48 = vpack.i.b16 %v659_v39, %v659_v39  ;;  %vm3925_vm7 = vcmp.gt.f32.partialorder %v415_v46, 0.5  ;;  %v5640_v37 = vsel %vm5584_vm3, %v5351_v50, -inf }
 0x126   :  { %v5637_v42 = vmax.f32 %v5635_v43, %v5636_v25  ;;  %v685_v56 = vpack.i.b16 %v653_v17, %v653_v17  ;;  %v4181_v0 = vsel %vm3925_vm7, 1, %v14279_v1  ;;  %vm5098_vm8 = vcmp.eq.s32.totalorder %v9830_v54, 1  ;;  %v10843_v40 = vpop.f32.mrf.mxu0  ;;  %v10845_v33 = vpop.permute.xlu1 %4554  ;;  %v417_v17 = vld [vmem:[%s14174_s2 + $0x438] sm:$0xff] }
 0x127   :  { %v789_v35 = vrot.slane %v691_v48, %v8186_v4  ;;  %4704 = vperm.xlu1 %8023, %v4181_v0   ;;  %vm3924_vm9 = vcmp.gt.f32.partialorder %v414_v13, 0.5  ;;  %v6600_v10 = vmax.f32 %v6598_v59, %v6599_v9  ;;  %14355 = vst [vmem:[#allocation57_spill] sm:$0xff] %v10845_v33  ;;  %v6601_v43 = vsel %vm6257_vm0, %v414_v13, -inf  ;;  %v10853_v25 = vpop.permute.xlu0 %4551  ;;  %v190_v13 = vld [vmem:[%s14172_s0 + $0x2a0] sm:$0xf] }
 0x128   :  { %v5639_v39 = vmax.f32 %v5637_v42, %v5638_v22  ;;  %v765_v11 = vrot.slane %v685_v56, %v8186_v4  ;;  %v4180_v50 = vsel %vm3924_vm9, 1, %v14279_v1  ;;  %14356 = vst [vmem:[#allocation58_spill] sm:$0xff] %v10853_v25  ;;  %v5354_v9 = vsel %vm5098_vm8, %v10772_v19, -3.4028235e+38  ;;  %v10859_v22 = vpop.f32.mrf.mxu0  ;;  %v191_v42 = vld [vmem:[%s14172_s0 + $0x2a4] sm:$0xf] }
 0x129   :  { %v978_v54 = vpack.i.b16 %v789_v35, %v789_v35  ;;  %v10856_v59 = vmax.f32 %v6600_v10, %v6601_v43  ;;  %4701 = vperm.xlu0 %8022, %v4180_v50   ;;  %vm5096_vm10 = vcmp.eq.s32.totalorder %v9777_v12, 1  ;;  %v6603_v19 = vsel %vm6257_vm0, %v415_v46, -inf  ;;  %v416_v12 = vld [vmem:[%s14174_s2 + $0x430] sm:$0xff]  ;;  %v142_v35 = vld [vmem:[%s14172_s0 + $0x1e0] sm:$0xf] }
 0x12a   :  { %v10861_v48 = vmax.f32 %v5639_v39, %v5640_v37  ;;  %v936_v56 = vpack.i.b16 %v765_v11, %v765_v11  ;;  %v5352_v0 = vsel %vm5096_vm10, %v10788_v7, -3.4028235e+38  ;;  %v143_v10 = vld [vmem:[%s14172_s0 + $0x1e4] sm:$0xf]  ;;  %v192_v11 = vld [vmem:[%s14172_s0 + $0x2a8] sm:$0xf]  ;;  %v10884_v7 = vpop.f32.mrf.mxu0  ;;  %v10886_v46 = vpop.permute.xlu1 %4560 }
 0x12b   :  { %v983_v37 = vrot.slane %v978_v54, %v8186_v4  ;;  %vm3927_vm11 = vcmp.gt.f32.partialorder %v417_v17, 0.5  ;;  %14358 = vst [vmem:[#allocation60_spill] sm:$0xff] %v10886_v46  ;;  %v193_v50 = vld [vmem:[%s14172_s0 + $0x2ac] sm:$0xf]  ;;  %v10893_v43 = vsel %vm5584_vm3, %v5354_v9, -inf  ;;  %v10896_v54 = vsel %vm5584_vm3, %v5352_v0, -inf  ;;  %v10899_v33 = vpop.permute.xlu0 %4557 }
 0x12c   :  { %14357 = vst [vmem:[#allocation59_spill] sm:$0xff] %v10861_v48  ;;  %v941_v39 = vrot.slane %v936_v56, %v8186_v4  ;;  %v4183_v48 = vsel %vm3927_vm11, 1, %v14279_v1  ;;  %14359 = vst [vmem:[#allocation61_spill] sm:$0xff] %v10899_v33  ;;  %v144_v56 = vld [vmem:[%s14172_s0 + $0x1e8] sm:$0xf]  ;;  %vm5099_vm12 = vcmp.eq.s32.totalorder %v9820_v45, 1  ;;  %v6604_v0 = vmax.f32 %v10856_v59, %v6603_v19  ;;  %v10912_v36 = vpop.f32.mrf.mxu0 }
 0x12d   :  { %v10901_v44 = vcombine.low %v983_v37, %v983_v37  ;;  %v145_v46 = vld [vmem:[%s14172_s0 + $0x1ec] sm:$0xf]  ;;  %v6607_v9 = vsel %vm6257_vm0, %v417_v17, -inf  ;;  %4710 = vperm.xlu1 %8023, %v4183_v48   ;;  %vm3926_vm13 = vcmp.gt.f32.partialorder %v416_v12, 0.5  ;;  %v6605_v25 = vsel %vm6257_vm0, %v416_v12, -inf }
 0x12e   :  { %v10914_v37 = vcombine.low %v941_v39, %v941_v39  ;;  %v4182_v33 = vsel %vm3926_vm13, 1, %v14279_v1  ;;  %vm5097_vm14 = vcmp.eq.s32.totalorder %v14360_v23, 1  ;;  %v10923_v59 = vpop.f32.mrf.mxu0  ;;  %v10925_v19 = vpop.permute.xlu1 %4566  ;;  %v6606_v21 = vmax.f32 %v6604_v0, %v6605_v25  ;;  %v197_v23 = vld [vmem:[%s14172_s0 + $0x2bc] sm:$0xf] }
 0x12f   :  { %v1350_v53 = vsub.bf16 %v190_v13, %v10901_v44  ;;  %v1351_v32 = vsub.bf16 %v191_v42, %v10901_v44  ;;  %v1352_v17 = vsub.bf16 %v192_v11, %v10901_v44  ;;  %v1353_v48 = vsub.bf16 %v193_v50, %v10901_v44  ;;  %4707 = vperm.xlu0 %8022, %v4182_v33   ;;  %v194_v50 = vld [vmem:[%s14172_s0 + $0x2b0] sm:$0xf] }
 0x130   :  { %14361 = vst [vmem:[#allocation28_spill] sm:$0xff] %v10925_v19  ;;  %v1302_v39 = vsub.bf16 %v142_v35, %v10914_v37  ;;  %v1303_v51 = vsub.bf16 %v143_v10, %v10914_v37  ;;  %v1304_v12 = vsub.bf16 %v144_v56, %v10914_v37  ;;  %v1305_v63 = vsub.bf16 %v145_v46, %v10914_v37  ;;  %v10938_v19 = vpop.f32.mrf.mxu0  ;;  %v10940_v35 = vpop.permute.xlu0 %4563  ;;  %v195_v56 = vld [vmem:[%s14172_s0 + $0x2b4] sm:$0xf] }
 0x131   :  { %v1606_v13 = vmax.bf16 %v14279_v1, %v1350_v53  ;;  %v1607_v42 = vmax.bf16 %v14279_v1, %v1351_v32  ;;  %v1608_v11 = vmax.bf16 %v14279_v1, %v1352_v17  ;;  %v1609_v33 = vmax.bf16 %v14279_v1, %v1353_v48  ;;  %14362 = vst [vmem:[#allocation62_spill] sm:$0xff] %v10940_v35  ;;  %v146_v17 = vld [vmem:[%s14172_s0 + $0x1f0] sm:$0xf] }
 0x132   :  { %v1558_v10 = vmax.bf16 %v14279_v1, %v1302_v39  ;;  %v1559_v46 = vmax.bf16 %v14279_v1, %v1303_v51  ;;  %v1560_v53 = vmax.bf16 %v14279_v1, %v1304_v12  ;;  %v1561_v32 = vmax.bf16 %v14279_v1, %v1305_v63  ;;  %v147_v51 = vld [vmem:[%s14172_s0 + $0x1f4] sm:$0xf]  ;;  %v196_v63 = vld [vmem:[%s14172_s0 + $0x2b8] sm:$0xf]  ;;  %v10961_v12 = vpop.f32.mrf.mxu0 }
 0x133   :  { %v7448_v48 = vcombine.low %v1606_v13, %v1607_v42  ;;  %v7449_v8 = vcombine.low %v1608_v11, %v1609_v33  ;;  %v5353_v39 = vsel %vm5097_vm14, %v10811_v6, -3.4028235e+38  ;;  %v1354_v25 = vsub.bf16 %v194_v50, %v10901_v44  ;;  %v148_v33 = vld [vmem:[%s14172_s0 + $0x1f8] sm:$0xf]  ;;  %v10979_v50 = vpop.permute.xlu1 %4572 }
 0x134   :  { %v7424_v35 = vcombine.low %v1558_v10, %v1559_v46  ;;  %v7425_v58 = vcombine.low %v1560_v53, %v1561_v32  ;;  %v5649_v13 = vsel %vm5584_vm3, %v5353_v39, -inf  ;;  %v10969_v6 = vmax.f32 %v6606_v21, %v6607_v9  ;;  %v10977_v10 = vpop.f32.mrf.mxu0  ;;  %v149_v53 = vld [vmem:[%s14172_s0 + $0x1fc] sm:$0xf]  ;;  %v418_v39 = vld [vmem:[%s14174_s2 + $0x440] sm:$0xff] }
 0x135   :  { %7925 = vmatprep.mubr.msk.bf16.mxu1 %vm2350_vm4, %v7448_v48  ;;  %v5650_v0 = vmax.f32 %v10896_v54, %v5649_v13  ;;  %v1355_v42 = vsub.bf16 %v195_v56, %v10901_v44  ;;  %v1306_v11 = vsub.bf16 %v146_v17, %v10914_v37  ;;  %v5355_v21 = vsel %vm5099_vm12, %v10799_v62, -3.4028235e+38  ;;  %v419_v62 = vld [vmem:[%s14174_s2 + $0x448] sm:$0xff]  ;;  %v11002_v17 = vpop.permute.xlu0 %4569 }
 0x136   :  { %14363 = vst [vmem:[#allocation63_spill] sm:$0xff] %v10969_v6  ;;  %7877 = vmatprep.mubr.msk.bf16.mxu0 %vm2350_vm4, %v7424_v35  ;;  %7926 = vmatmul.mubr.msk.bf16.gmra.mxu1 %vm2350_vm4, %v7449_v8  ;;  %v1610_v54 = vmax.bf16 %v14279_v1, %v1354_v25  ;;  %v1307_v9 = vsub.bf16 %v147_v51, %v10914_v37  ;;  %v11000_v56 = vpop.f32.mrf.mxu0  ;;  %14364 = vst [vmem:[#allocation64_spill] sm:$0xff] %v11002_v17  ;;  %vm3929_vm15 = vcmp.gt.f32.partialorder %v419_v62, 0.5  ;;  %v202_v6 = vld [vmem:[%s14172_s0 + $0x2d0] sm:$0xf] }
 0x137   :  { %v1356_v46 = vsub.bf16 %v196_v63, %v10901_v44  ;;  %7878 = vmatmul.mubr.msk.bf16.gmra.mxu0 %vm2350_vm4, %v7425_v58  ;;  %v5652_v35 = vmax.f32 %v5650_v0, %v10893_v43  ;;  %v1611_v8 = vmax.bf16 %v14279_v1, %v1355_v42  ;;  %v1562_v32 = vmax.bf16 %v14279_v1, %v1306_v11 }
 0x138   :  { %v1357_v45 = vsub.bf16 %v197_v23, %v10901_v44  ;;  %v1563_v48 = vmax.bf16 %v14279_v1, %v1307_v9  ;;  %v1308_v43 = vsub.bf16 %v148_v33, %v10914_v37  ;;  %v5653_v44 = vsel %vm5584_vm3, %v5355_v21, -inf  ;;  %v11013_v25 = vpop.f32.mrf.mxu0  ;;  %v11025_v9 = vpop.permute.xlu1 %4578 }
 0x139   :  { %v1612_v58 = vmax.bf16 %v14279_v1, %v1356_v46  ;;  %v7450_v51 = vcombine.low %v1610_v54, %v1611_v8  ;;  %v1309_v13 = vsub.bf16 %v149_v53, %v10914_v37  ;;  %v6616_v42 = vsel %vm6257_vm0, %v419_v62, -inf  ;;  %v421_v37 = vld [vmem:[%s14174_s2 + $0x458] sm:$0xff]  ;;  %14365 = vst [vmem:[#allocation65_spill] sm:$0xff] %v11025_v9 }
 0x13a   :  { %v1613_v63 = vmax.bf16 %v14279_v1, %v1357_v45  ;;  %v7426_v23 = vcombine.low %v1562_v32, %v1563_v48  ;;  %v1564_v0 = vmax.bf16 %v14279_v1, %v1308_v43  ;;  %v4185_v21 = vsel %vm3929_vm15, 1, %v14279_v1  ;;  %v11023_v54 = vpop.f32.mrf.mxu0  ;;  %v420_v32 = vld [vmem:[%s14174_s2 + $0x450] sm:$0xff]  ;;  %v11038_v43 = vpop.permute.xlu0 %4575 }
 0x13b   :  { %7929 = vmatprep.mubr.msk.bf16.mxu1 %vm2350_vm4, %v7450_v51  ;;  %v1565_v33 = vmax.bf16 %v14279_v1, %v1309_v13  ;;  %vm3928_vm1 = vcmp.gt.f32.partialorder %v418_v39, 0.5  ;;  %4716 = vperm.xlu1 %8023, %v4185_v21   ;;  %v6615_v53 = vsel %vm6257_vm0, %v418_v39, -inf  ;;  %vm5100_vm2 = vcmp.eq.s32.totalorder %v9872_v14, 1  ;;  %14366 = vst [vmem:[#allocation66_spill] sm:$0xff] %v11038_v43  ;;  %v14367_v39 = vld [vmem:[#allocation30_spill] sm:$0xff] }
 0x13c   :  { %v7451_v11 = vcombine.low %v1612_v58, %v1613_v63  ;;  %7881 = vmatprep.mubr.msk.bf16.mxu0 %vm2350_vm4, %v7426_v23  ;;  %v4184_v46 = vsel %vm3928_vm1, 1, %v14279_v1  ;;  %v5654_v8 = vmax.f32 %v5652_v35, %v5653_v44  ;;  %vm5102_vm5 = vcmp.eq.s32.totalorder %v9906_v27, 1  ;;  %v11036_v58 = vpop.f32.mrf.mxu0  ;;  %v423_v27 = vld [vmem:[%s14174_s2 + $0x468] sm:$0xff]  ;;  %v14368_v23 = vld [vmem:[#allocation29_spill] sm:$0xff] }
 0x13d   :  { %v7427_v45 = vcombine.low %v1564_v0, %v1565_v33  ;;  %v6617_v62 = vmax.f32 %v6615_v53, %v6616_v42  ;;  %4713 = vperm.xlu0 %8022, %v4184_v46   ;;  %v5356_v48 = vsel %vm5100_vm2, %v10837_v60, -3.4028235e+38  ;;  %v5358_v14 = vsel %vm5102_vm5, %v10823_v20, -3.4028235e+38  ;;  %v11066_v46 = vpop.permute.xlu1 %4584 }
 0x13e   :  { %7930 = vmatmul.mubr.msk.bf16.gmra.mxu1 %vm2350_vm4, %v7451_v11  ;;  %v5655_v35 = vsel %vm5584_vm3, %v5356_v48, -inf  ;;  %vm5103_vm6 = vcmp.eq.s32.totalorder %v14367_v39, 1  ;;  %vm3931_vm7 = vcmp.gt.f32.partialorder %v421_v37, 0.5  ;;  %vm3930_vm8 = vcmp.gt.f32.partialorder %v420_v32, 0.5  ;;  %v11050_v63 = vpop.f32.mrf.mxu0  ;;  %14369 = vst [vmem:[#allocation30_spill] sm:$0xff] %v11066_v46  ;;  %v11079_v48 = vpop.permute.xlu0 %4581 }
 0x13f   :  { %7882 = vmatmul.mubr.msk.bf16.gmra.mxu0 %vm2350_vm4, %v7427_v45  ;;  %v5656_v60 = vmax.f32 %v5654_v8, %v5655_v35  ;;  %v5359_v44 = vsel %vm5103_vm6, %v10843_v40, -3.4028235e+38  ;;  %v4187_v51 = vsel %vm3931_vm7, 1, %v14279_v1  ;;  %v4186_v20 = vsel %vm3930_vm8, 1, %v14279_v1  ;;  %v422_v40 = vld [vmem:[%s14174_s2 + $0x460] sm:$0xff]  ;;  %14370 = vst [vmem:[#allocation29_spill] sm:$0xff] %v11079_v48 }
 0x140   :  { %4722 = vperm.xlu1 %8023, %v4187_v51   ;;  %v6618_v13 = vsel %vm6257_vm0, %v420_v32, -inf  ;;  %vm5101_vm9 = vcmp.eq.s32.totalorder %v14368_v23, 1  ;;  %v11057_v0 = vcombine.high %v9664_v47, %v9664_v47  ;;  %v6620_v42 = vsel %vm6257_vm0, %v421_v37, -inf  ;;  %v11064_v21 = vpop.f32.mrf.mxu0  ;;  %v425_v37 = vld [vmem:[%s14174_s2 + $0x478] sm:$0xff]  ;;  %v14371_v23 = vld [vmem:[#allocation34_spill] sm:$0xff] }
 0x141   :  { %v6619_v11 = vmax.f32 %v6617_v62, %v6618_v13  ;;  %4719 = vperm.xlu0 %8022, %v4186_v20   ;;  %v5357_v33 = vsel %vm5101_vm9, %v10859_v22, -3.4028235e+38  ;;  %vm3933_vm10 = vcmp.gt.f32.partialorder %v423_v27, 0.5  ;;  %v5659_v32 = vsel %vm5584_vm3, %v5358_v14, -inf }
 0x142   :  { %v5657_v53 = vsel %vm5584_vm3, %v5357_v33, -inf  ;;  %v7327_v47 = vpack.i.b16 %v11057_v0, %v11057_v0  ;;  %v4189_v8 = vsel %vm3933_vm10, 1, %v14279_v1  ;;  %v5661_v22 = vsel %vm5584_vm3, %v5359_v44, -inf  ;;  %v11077_v62 = vpop.f32.mrf.mxu0 }
 0x143   :  { %v5658_v45 = vmax.f32 %v5656_v60, %v5657_v53  ;;  %vm3932_vm11 = vcmp.gt.f32.partialorder %v422_v40, 0.5  ;;  %v6621_v51 = vmax.f32 %v6619_v11, %v6620_v42  ;;  %v6622_v20 = vsel %vm6257_vm0, %v422_v40, -inf  ;;  %v424_v60 = vld [vmem:[%s14174_s2 + $0x470] sm:$0xff]  ;;  %v14372_v42 = vld [vmem:[#allocation32_spill] sm:$0xff]  ;;  %v199_v11 = vld [vmem:[%s14172_s0 + $0x2c4] sm:$0xf] }
 0x144   :  { %v793_v35 = vrot.slane %v7327_v47, %v8186_v4  ;;  %4728 = vperm.xlu1 %8023, %v4189_v8   ;;  %v4188_v39 = vsel %vm3932_vm11, 1, %v14279_v1  ;;  %vm5106_vm12 = vcmp.eq.s32.totalorder %v14371_v23, 1  ;;  %v6624_v14 = vsel %vm6257_vm0, %v423_v27, -inf  ;;  %v11089_v44 = vpop.f32.mrf.mxu0  ;;  %v198_v27 = vld [vmem:[%s14172_s0 + $0x2c0] sm:$0xf] }
 0x145   :  { %v5660_v13 = vmax.f32 %v5658_v45, %v5659_v32  ;;  %4725 = vperm.xlu0 %8022, %v4188_v39   ;;  %vm3935_vm13 = vcmp.gt.f32.partialorder %v425_v37, 0.5  ;;  %v5362_v53 = vsel %vm5106_vm12, %v10884_v7, -3.4028235e+38  ;;  %v6623_v47 = vmax.f32 %v6621_v51, %v6622_v20  ;;  %v200_v8 = vld [vmem:[%s14172_s0 + $0x2c8] sm:$0xf]  ;;  %v14373_v7 = vld [vmem:[#allocation33_spill] sm:$0xff] }
 0x146   :  { %v985_v33 = vpack.i.b16 %v793_v35, %v793_v35  ;;  %vm5104_vm14 = vcmp.eq.s32.totalorder %v14372_v42, 1  ;;  %vm5107_vm15 = vcmp.eq.s32.totalorder %v14373_v7, 1  ;;  %v4191_v45 = vsel %vm3935_vm13, 1, %v14279_v1  ;;  %v11109_v35 = vpop.permute.xlu1 %4590  ;;  %v201_v51 = vld [vmem:[%s14172_s0 + $0x2cc] sm:$0xf] }
 0x147   :  { %v11093_v40 = vmax.f32 %v5660_v13, %v5661_v22  ;;  %v5360_v32 = vsel %vm5104_vm14, %v10912_v36, -3.4028235e+38  ;;  %v11107_v22 = vpop.f32.mrf.mxu0  ;;  %14374 = vst [vmem:[#allocation34_spill] sm:$0xff] %v11109_v35  ;;  %v5363_v20 = vsel %vm5107_vm15, %v10923_v59, -3.4028235e+38  ;;  %vm3934_vm1 = vcmp.gt.f32.partialorder %v424_v60, 0.5 }
 0x148   :  { %v990_v39 = vrot.slane %v985_v33, %v8186_v4  ;;  %4734 = vperm.xlu1 %8023, %v4191_v45   ;;  %v6625_v13 = vmax.f32 %v6623_v47, %v6624_v14  ;;  %v427_v36 = vld [vmem:[%s14174_s2 + $0x488] sm:$0xff]  ;;  %v5672_v23 = vsel %vm5584_vm3, %v5362_v53, -inf  ;;  %v4190_v42 = vsel %vm3934_vm1, 1, %v14279_v1  ;;  %v14375_v33 = vld [vmem:[#allocation31_spill] sm:$0xff]  ;;  %v11128_v45 = vpop.permute.xlu0 %4587 }
 0x149   :  { %v6626_v7 = vsel %vm6257_vm0, %v424_v60, -inf  ;;  %vm5105_vm2 = vcmp.eq.s32.totalorder %v14375_v33, 1  ;;  %v11126_v59 = vpop.f32.mrf.mxu0  ;;  %14376 = vst [vmem:[#allocation32_spill] sm:$0xff] %v11128_v45  ;;  %v6628_v47 = vsel %vm6257_vm0, %v425_v37, -inf  ;;  %4731 = vperm.xlu0 %8022, %v4190_v42   ;;  %v203_v60 = vld [vmem:[%s14172_s0 + $0x2d4] sm:$0xf] }
 0x14a   :  { %v7354_v14 = vcombine.low %v990_v39, %v990_v39  ;;  %v6627_v35 = vmax.f32 %v6625_v13, %v6626_v7  ;;  %v5361_v53 = vsel %vm5105_vm2, %v10938_v19, -3.4028235e+38  ;;  %v5669_v33 = vsel %vm5584_vm3, %v5360_v32, -inf  ;;  %v204_v19 = vld [vmem:[%s14172_s0 + $0x2d8] sm:$0xf]  ;;  %v11150_v17 = vpop.permute.xlu1 %4596 }
 0x14b   :  { %v5674_v46 = vsel %vm5584_vm3, %v5363_v20, -inf  ;;  %v5670_v48 = vsel %vm5584_vm3, %v5361_v53, -inf  ;;  %vm3937_vm5 = vcmp.gt.f32.partialorder %v427_v36, 0.5  ;;  %v11138_v9 = vpop.f32.mrf.mxu0  ;;  %v205_v20 = vld [vmem:[%s14172_s0 + $0x2dc] sm:$0xf]  ;;  %14378 = vst [vmem:[#allocation31_spill] sm:$0xff] %v11150_v17 }
 0x14c   :  { %v1358_v39 = vsub.bf16 %v198_v27, %v7354_v14  ;;  %v1359_v45 = vsub.bf16 %v199_v11, %v7354_v14  ;;  %v1360_v37 = vsub.bf16 %v200_v8, %v7354_v14  ;;  %v1361_v13 = vsub.bf16 %v201_v51, %v7354_v14 }
 0x14d   :  { %v11143_v42 = vmax.f32 %v6627_v35, %v6628_v47  ;;  %v5671_v7 = vmax.f32 %v5669_v33, %v5670_v48  ;;  %v1362_v43 = vsub.bf16 %v202_v6, %v7354_v14  ;;  %v1363_v32 = vsub.bf16 %v203_v60, %v7354_v14  ;;  %v11148_v53 = vpop.f32.mrf.mxu0  ;;  %v426_v60 = vld [vmem:[%s14174_s2 + $0x480] sm:$0xff]  ;;  %v11161_v33 = vpop.permute.xlu0 %4593 }
 0x14e   :  { %v1614_v27 = vmax.bf16 %v14279_v1, %v1358_v39  ;;  %v1615_v11 = vmax.bf16 %v14279_v1, %v1359_v45  ;;  %v1616_v8 = vmax.bf16 %v14279_v1, %v1360_v37  ;;  %v1617_v35 = vmax.bf16 %v14279_v1, %v1361_v13  ;;  %14379 = vst [vmem:[#allocation67_spill] sm:$0xff] %v11161_v33 }
 0x14f   :  { %14377 = vst [vmem:[#allocation33_spill] sm:$0xff] %v11143_v42  ;;  %v5673_v51 = vmax.f32 %v5671_v7, %v5672_v23  ;;  %v1618_v6 = vmax.bf16 %v14279_v1, %v1362_v43  ;;  %v1619_v48 = vmax.bf16 %v14279_v1, %v1363_v32  ;;  %v1364_v47 = vsub.bf16 %v204_v19, %v7354_v14  ;;  %v11163_v42 = vpop.f32.mrf.mxu0  ;;  %v429_v19 = vld [vmem:[%s14174_s2 + $0x498] sm:$0xff] }
 0x150   :  { %v7452_v39 = vcombine.low %v1614_v27, %v1615_v11  ;;  %v7453_v45 = vcombine.low %v1616_v8, %v1617_v35  ;;  %v1365_v17 = vsub.bf16 %v205_v20, %v7354_v14  ;;  %vm5110_vm6 = vcmp.eq.s32.totalorder %v10119_v31, 1  ;;  %v428_v8 = vld [vmem:[%s14174_s2 + $0x490] sm:$0xff]  ;;  %v11185_v35 = vpop.permute.xlu1 %4602 }
 0x151   :  { %v7454_v37 = vcombine.low %v1618_v6, %v1619_v48  ;;  %v1620_v23 = vmax.bf16 %v14279_v1, %v1364_v47  ;;  %v4193_v43 = vsel %vm3937_vm5, 1, %v14279_v1  ;;  %v6637_v13 = vsel %vm6257_vm0, %v427_v36, -inf  ;;  %v11173_v7 = vpop.f32.mrf.mxu0  ;;  %14380 = vst [vmem:[#allocation68_spill] sm:$0xff] %v11185_v35  ;;  %v431_v47 = vld [vmem:[%s14174_s2 + $0x4a8] sm:$0xff] }
 0x152   :  { %7933 = vmatprep.mubr.msk.bf16.mxu1 %vm2350_vm4, %v7452_v39  ;;  %v1621_v14 = vmax.bf16 %v14279_v1, %v1365_v17  ;;  %4740 = vperm.xlu1 %8023, %v4193_v43   ;;  %vm3936_vm7 = vcmp.gt.f32.partialorder %v426_v60, 0.5  ;;  %v6636_v32 = vsel %vm6257_vm0, %v426_v60, -inf  ;;  %vm5108_vm8 = vcmp.eq.s32.totalorder %v10081_v52, 1  ;;  %v11200_v60 = vpop.permute.xlu0 %4599 }
 0x153   :  { %7934 = vmatmul.mubr.msk.bf16.gmra.mxu1 %vm2350_vm4, %v7453_v45  ;;  %v4192_v36 = vsel %vm3936_vm7, 1, %v14279_v1  ;;  %v6638_v20 = vmax.f32 %v6636_v32, %v6637_v13  ;;  %v5364_v27 = vsel %vm5108_vm8, %v10977_v10, -3.4028235e+38  ;;  %v5675_v11 = vmax.f32 %v5673_v51, %v5674_v46  ;;  %v11187_v17 = vpop.f32.mrf.mxu0  ;;  %14381 = vst [vmem:[#allocation69_spill] sm:$0xff] %v11200_v60  ;;  %v14464_v60 = vld [vmem:[#allocation25_spill] sm:$0xff] }
 0x154   :  { %7937 = vmatprep.mubr.msk.bf16.mxu1 %vm2350_vm4, %v7454_v37  ;;  %v5366_v52 = vsel %vm5110_vm6, %v10961_v12, -3.4028235e+38  ;;  %4737 = vperm.xlu0 %8022, %v4192_v36   ;;  %v5676_v6 = vsel %vm5584_vm3, %v5364_v27, -inf  ;;  %vm5111_vm9 = vcmp.eq.s32.totalorder %v10105_v2, 1  ;;  %vm3939_vm10 = vcmp.gt.f32.partialorder %v429_v19, 0.5 }
 0x155   :  { %v7455_v10 = vcombine.low %v1620_v23, %v1621_v14  ;;  %v5677_v46 = vmax.f32 %v5675_v11, %v5676_v6  ;;  %v5367_v51 = vsel %vm5111_vm9, %v11000_v56, -3.4028235e+38  ;;  %v4195_v48 = vsel %vm3939_vm10, 1, %v14279_v1  ;;  %v11205_v2 = vpop.f32.mrf.mxu0  ;;  %v430_v23 = vld [vmem:[%s14174_s2 + $0x4a0] sm:$0xff] }
 0x156   :  { %v6641_v31 = vsel %vm6257_vm0, %v429_v19, -inf  ;;  %4746 = vperm.xlu1 %8023, %v4195_v48   ;;  %vm3938_vm11 = vcmp.gt.f32.partialorder %v428_v8, 0.5  ;;  %v6639_v12 = vsel %vm6257_vm0, %v428_v8, -inf  ;;  %vm5109_vm12 = vcmp.eq.s32.totalorder %v10061_v49, 1 }
 0x157   :  { %v4194_v56 = vsel %vm3938_vm11, 1, %v14279_v1  ;;  %v6640_v39 = vmax.f32 %v6638_v20, %v6639_v12  ;;  %v5365_v45 = vsel %vm5109_vm12, %v11013_v25, -3.4028235e+38  ;;  %v661_v37 = vunpack.i.h.s16 %v11057_v0  ;;  %v433_v25 = vld [vmem:[%s14174_s2 + $0x4b8] sm:$0xff]  ;;  %v11220_v0 = vpop.permute.xlu1 %4608  ;;  %v11224_v27 = vpop.f32.mrf.mxu0  ;;  %v435_v12 = vld [vmem:[%s14174_s2 + $0x4c8] sm:$0xff] }
 0x158   :  { %v5680_v43 = vsel %vm5584_vm3, %v5366_v52, -inf  ;;  %4743 = vperm.xlu0 %8022, %v4194_v56   ;;  %v5678_v13 = vsel %vm5584_vm3, %v5365_v45, -inf  ;;  %vm3941_vm13 = vcmp.gt.f32.partialorder %v431_v47, 0.5  ;;  %v5682_v49 = vsel %vm5584_vm3, %v5367_v51, -inf  ;;  %14382 = vst [vmem:[#allocation70_spill] sm:$0xff] %v11220_v0 }
 0x159   :  { %v5679_v19 = vmax.f32 %v5677_v46, %v5678_v13  ;;  %v693_v14 = vpack.i.b16 %v661_v37, %v661_v37  ;;  %v4197_v32 = vsel %vm3941_vm13, 1, %v14279_v1  ;;  %vm5114_vm14 = vcmp.eq.s32.totalorder %v10207_v18, 1  ;;  %v432_v18 = vld [vmem:[%s14174_s2 + $0x4b0] sm:$0xff]  ;;  %v11233_v46 = vpop.permute.xlu0 %4605  ;;  %v206_v56 = vld [vmem:[%s14172_s0 + $0x2e0] sm:$0xf]  ;;  %v11251_v45 = vpop.f32.mrf.mxu0 }
 0x15a   :  { %4752 = vperm.xlu1 %8023, %v4197_v32   ;;  %vm3940_vm15 = vcmp.gt.f32.partialorder %v430_v23, 0.5  ;;  %v6642_v36 = vmax.f32 %v6640_v39, %v6641_v31  ;;  %v6643_v20 = vsel %vm6257_vm0, %v430_v23, -inf  ;;  %v5370_v52 = vsel %vm5114_vm14, %v11023_v54, -3.4028235e+38  ;;  %14383 = vst [vmem:[#allocation71_spill] sm:$0xff] %v11233_v46 }
 0x15b   :  { %7938 = vmatmul.mubr.msk.bf16.gmra.mxu1 %vm2350_vm4, %v7455_v10  ;;  %v5681_v11 = vmax.f32 %v5679_v19, %v5680_v43  ;;  %v797_v8 = vrot.slane %v693_v14, %v8186_v4  ;;  %v4196_v6 = vsel %vm3940_vm15, 1, %v14279_v1  ;;  %v6645_v51 = vsel %vm6257_vm0, %v431_v47, -inf  ;;  %v207_v47 = vld [vmem:[%s14172_s0 + $0x2e4] sm:$0xf]  ;;  %v208_v37 = vld [vmem:[%s14172_s0 + $0x2e8] sm:$0xf]  ;;  %v11262_v19 = vpop.permute.xlu1 %4614 }
 0x15c   :  { %v6644_v48 = vmax.f32 %v6642_v36, %v6643_v20  ;;  %4749 = vperm.xlu0 %8022, %v4196_v6   ;;  %vm5112_vm1 = vcmp.eq.s32.totalorder %v10160_v3, 1  ;;  %vm3943_vm2 = vcmp.gt.f32.partialorder %v433_v25, 0.5  ;;  %v5693_v3 = vsel %vm5584_vm3, %v5370_v52, -inf  ;;  %v209_v23 = vld [vmem:[%s14172_s0 + $0x2ec] sm:$0xf]  ;;  %v14384_v43 = vld [vmem:[#allocation37_spill] sm:$0xff] }
 0x15d   :  { %v11237_v10 = vmax.f32 %v5681_v11, %v5682_v49  ;;  %v992_v31 = vpack.i.b16 %v797_v8, %v797_v8  ;;  %v5368_v54 = vsel %vm5112_vm1, %v11036_v58, -3.4028235e+38  ;;  %v4199_v39 = vsel %vm3943_vm2, 1, %v14279_v1  ;;  %14385 = vst [vmem:[#allocation37_spill] sm:$0xff] %v11262_v19  ;;  %v14386_v36 = vld [vmem:[#allocation36_spill] sm:$0xff] }
 0x15e   :  { %vm3942_vm5 = vcmp.gt.f32.partialorder %v432_v18, 0.5  ;;  %vm5115_vm6 = vcmp.eq.s32.totalorder %v14384_v43, 1  ;;  %4758 = vperm.xlu1 %8023, %v4199_v39   ;;  %v6646_v49 = vmax.f32 %v6644_v48, %v6645_v51  ;;  %v5690_v14 = vsel %vm5584_vm3, %v5368_v54, -inf  ;;  %v210_v20 = vld [vmem:[%s14172_s0 + $0x2f0] sm:$0xf]  ;;  %v11275_v48 = vpop.permute.xlu0 %4611 }
 0x15f   :  { %v997_v58 = vrot.slane %v992_v31, %v8186_v4  ;;  %v4198_v13 = vsel %vm3942_vm5, 1, %v14279_v1  ;;  %v6647_v32 = vsel %vm6257_vm0, %v432_v18, -inf  ;;  %vm5113_vm7 = vcmp.eq.s32.totalorder %v14386_v36, 1  ;;  %v211_v51 = vld [vmem:[%s14172_s0 + $0x2f4] sm:$0xf]  ;;  %14387 = vst [vmem:[#allocation36_spill] sm:$0xff] %v11275_v48 }
 0x160   :  { %4755 = vperm.xlu0 %8022, %v4198_v13   ;;  %vm3945_vm8 = vcmp.gt.f32.partialorder %v435_v12, 0.5  ;;  %v6649_v8 = vsel %vm6257_vm0, %v433_v25, -inf  ;;  %v6648_v52 = vmax.f32 %v6646_v49, %v6647_v32  ;;  %v5369_v6 = vsel %vm5113_vm7, %v11064_v21, -3.4028235e+38  ;;  %v11285_v25 = vpop.f32.mrf.mxu0  ;;  %v212_v32 = vld [vmem:[%s14172_s0 + $0x2f8] sm:$0xf] }
 0x161   :  { %v7355_v11 = vcombine.low %v997_v58, %v997_v58  ;;  %v5371_v18 = vsel %vm5115_vm6, %v11050_v63, -3.4028235e+38  ;;  %v5691_v31 = vsel %vm5584_vm3, %v5369_v6, -inf  ;;  %v4201_v54 = vsel %vm3945_vm8, 1, %v14279_v1 }
 0x162   :  { %v11283_v39 = vsel %vm6257_vm0, %v435_v12, -inf  ;;  %4764 = vperm.xlu1 %8023, %v4201_v54   ;;  %v11290_v43 = vmax.f32 %v6648_v52, %v6649_v8  ;;  %v5692_v63 = vmax.f32 %v5690_v14, %v5691_v31  ;;  %v213_v12 = vld [vmem:[%s14172_s0 + $0x2fc] sm:$0xf]  ;;  %v11302_v8 = vpop.permute.xlu1 %4620  ;;  %v11306_v31 = vpop.f32.mrf.mxu0  ;;  %vm5116_vm10 = vcmp.eq.s32.totalorder %v10250_v28, 1 }
 0x163   :  { %v1366_v21 = vsub.bf16 %v206_v56, %v7355_v11  ;;  %v1367_v58 = vsub.bf16 %v207_v47, %v7355_v11  ;;  %v1368_v13 = vsub.bf16 %v208_v37, %v7355_v11  ;;  %v1369_v49 = vsub.bf16 %v209_v23, %v7355_v11  ;;  %v434_v23 = vld [vmem:[%s14174_s2 + $0x4c0] sm:$0xff]  ;;  %14389 = vst [vmem:[#allocation73_spill] sm:$0xff] %v11302_v8 }
 0x164   :  { %14388 = vst [vmem:[#allocation72_spill] sm:$0xff] %v11290_v43  ;;  %v1370_v36 = vsub.bf16 %v210_v20, %v7355_v11  ;;  %v1371_v6 = vsub.bf16 %v211_v51, %v7355_v11  ;;  %v5694_v14 = vmax.f32 %v5692_v63, %v5693_v3  ;;  %v1372_v51 = vsub.bf16 %v212_v32, %v7355_v11  ;;  %v11312_v43 = vpop.permute.xlu0 %4617 }
 0x165   :  { %v1622_v0 = vmax.bf16 %v14279_v1, %v1366_v21  ;;  %v1623_v56 = vmax.bf16 %v14279_v1, %v1367_v58  ;;  %v1624_v47 = vmax.bf16 %v14279_v1, %v1368_v13  ;;  %v1625_v37 = vmax.bf16 %v14279_v1, %v1369_v49  ;;  %v437_v49 = vld [vmem:[%s14174_s2 + $0x4d8] sm:$0xff]  ;;  %14390 = vst [vmem:[#allocation74_spill] sm:$0xff] %v11312_v43 }
 0x166   :  { %v1626_v20 = vmax.bf16 %v14279_v1, %v1370_v36  ;;  %v1627_v52 = vmax.bf16 %v14279_v1, %v1371_v6  ;;  %v5695_v58 = vsel %vm5584_vm3, %v5371_v18, -inf  ;;  %v1373_v13 = vsub.bf16 %v213_v12, %v7355_v11  ;;  %v11327_v36 = vld.sshfl [vmem:[%s14173_s1 + $0xc] sm:$0x33 pattern:$0x75316420] }
 0x167   :  { %v7456_v54 = vcombine.low %v1622_v0, %v1623_v56  ;;  %v7457_v21 = vcombine.low %v1624_v47, %v1625_v37  ;;  %v1628_v3 = vmax.bf16 %v14279_v1, %v1372_v51  ;;  %vm3944_vm9 = vcmp.gt.f32.partialorder %v434_v23, 0.5  ;;  %v436_v0 = vld [vmem:[%s14174_s2 + $0x4d0] sm:$0xff]  ;;  %v11332_v56 = vpop.f32.mrf.mxu0  ;;  %v11342_v37 = vpop.permute.xlu1 %4626 }
 0x168   :  { %v7458_v8 = vcombine.low %v1626_v20, %v1627_v52  ;;  %v6657_v63 = vsel %vm6257_vm0, %v434_v23, -inf  ;;  %v1629_v11 = vmax.bf16 %v14279_v1, %v1373_v13  ;;  %v4200_v18 = vsel %vm3944_vm9, 1, %v14279_v1  ;;  %14391 = vst [vmem:[#allocation75_spill] sm:$0xff] %v11342_v37  ;;  %v438_v52 = vld [vmem:[%s14174_s2 + $0x4e0] sm:$0xff]  ;;  %v11355_v51 = vpop.permute.xlu0 %4623 }
 0x169   :  { %7941 = vmatprep.mubr.msk.bf16.mxu1 %vm2350_vm4, %v7456_v54  ;;  %v6659_v32 = vmax.f32 %v6657_v63, %v11283_v39  ;;  %vm5118_vm11 = vcmp.eq.s32.totalorder %v10284_v61, 1  ;;  %4761 = vperm.xlu0 %8022, %v4200_v18   ;;  %v5372_v6 = vsel %vm5116_vm10, %v11089_v44, -3.4028235e+38  ;;  %v5696_v12 = vmax.f32 %v5694_v14, %v5695_v58  ;;  %v439_v61 = vld [vmem:[%s14174_s2 + $0x4e8] sm:$0xff]  ;;  %v11359_v58 = vpop.f32.mrf.mxu0  ;;  %v441_v63 = vld [vmem:[%s14174_s2 + $0x4f8] sm:$0xff] }
 0x16a   :  { %7942 = vmatmul.mubr.msk.bf16.gmra.mxu1 %vm2350_vm4, %v7457_v21  ;;  %vm3947_vm12 = vcmp.gt.f32.partialorder %v437_v49, 0.5  ;;  %v5374_v28 = vsel %vm5118_vm11, %v11077_v62, -3.4028235e+38  ;;  %v5697_v39 = vsel %vm5584_vm3, %v5372_v6, -inf  ;;  %vm5119_vm13 = vcmp.eq.s32.totalorder %v10278_v29, 1  ;;  %v14392_v29 = vld [vmem:[#allocation6_spill] sm:$0xff] }
 0x16b   :  { %7945 = vmatprep.mubr.msk.bf16.mxu1 %vm2350_vm4, %v7458_v8  ;;  %v4203_v47 = vsel %vm3947_vm12, 1, %v14279_v1  ;;  %v7459_v44 = vcombine.low %v1628_v3, %v1629_v11  ;;  %v5698_v23 = vmax.f32 %v5696_v12, %v5697_v39  ;;  %v5375_v14 = vsel %vm5119_vm13, %v11107_v22, -3.4028235e+38  ;;  %14393 = vst [vmem:[#allocation6_spill] sm:$0xff] %v11355_v51  ;;  %v11373_v12 = vpop.permute.xlu1 %4632 }
 0x16c   :  { %4770 = vperm.xlu1 %8023, %v4203_v47   ;;  %vm3946_vm14 = vcmp.gt.f32.partialorder %v436_v0, 0.5  ;;  %v6660_v8 = vsel %vm6257_vm0, %v436_v0, -inf  ;;  %vm5117_vm15 = vcmp.eq.s32.totalorder %v10240_v15, 1  ;;  %v11350_v20 = vrot.slane %v11327_v36, %v14392_v29  ;;  %14394 = vst [vmem:[#allocation76_spill] sm:$0xff] %v11373_v12  ;;  %v440_v47 = vld [vmem:[%s14174_s2 + $0x4f0] sm:$0xff] }
 0x16d   :  { %v4202_v62 = vsel %vm3946_vm14, 1, %v14279_v1  ;;  %v6662_v22 = vsel %vm6257_vm0, %v437_v49, -inf  ;;  %v6661_v54 = vmax.f32 %v6659_v32, %v6660_v8  ;;  %v5373_v21 = vsel %vm5117_vm15, %v11126_v59, -3.4028235e+38 }
 0x16e   :  { %4767 = vperm.xlu0 %8022, %v4202_v62   ;;  %vm3949_vm1 = vcmp.gt.f32.partialorder %v439_v61, 0.5  ;;  %v5699_v15 = vsel %vm5584_vm3, %v5373_v21, -inf  ;;  %v7328_v13 = vpack.i.b16 %v11350_v20, %v11350_v20  ;;  %v5701_v49 = vsel %vm5584_vm3, %v5374_v28, -inf  ;;  %v217_v21 = vld [vmem:[%s14172_s0 + $0x30c] sm:$0xf] }
 0x16f   :  { %v4205_v3 = vsel %vm3949_vm1, 1, %v14279_v1  ;;  %v5703_v0 = vsel %vm5584_vm3, %v5375_v14, -inf  ;;  %v5700_v11 = vmax.f32 %v5698_v23, %v5699_v15  ;;  %vm3948_vm2 = vcmp.gt.f32.partialorder %v438_v52, 0.5  ;;  %v11381_v23 = vpop.f32.mrf.mxu0 }
 0x170   :  { %4776 = vperm.xlu1 %8023, %v4205_v3   ;;  %v801_v59 = vrot.slane %v7328_v13, %v8186_v4  ;;  %v4204_v18 = vsel %vm3948_vm2, 1, %v14279_v1  ;;  %v6663_v32 = vmax.f32 %v6661_v54, %v6662_v22  ;;  %v6664_v6 = vsel %vm6257_vm0, %v438_v52, -inf  ;;  %v216_v22 = vld [vmem:[%s14172_s0 + $0x308] sm:$0xf] }
 0x171   :  { %v5702_v39 = vmax.f32 %v5700_v11, %v5701_v49  ;;  %vm5122_vm5 = vcmp.eq.s32.totalorder %v10358_v30, 1  ;;  %v6666_v28 = vsel %vm6257_vm0, %v439_v61, -inf  ;;  %vm3951_vm6 = vcmp.gt.f32.partialorder %v441_v63, 0.5  ;;  %v214_v30 = vld [vmem:[%s14172_s0 + $0x300] sm:$0xf]  ;;  %v443_v3 = vld [vmem:[%s14174_s2 + $0x508] sm:$0xff] }
 0x172   :  { %7946 = vmatmul.mubr.msk.bf16.gmra.mxu1 %vm2350_vm4, %v7459_v44  ;;  %4773 = vperm.xlu0 %8022, %v4204_v18   ;;  %v999_v14 = vpack.i.b16 %v801_v59, %v801_v59  ;;  %v5378_v62 = vsel %vm5122_vm5, %v11138_v9, -3.4028235e+38  ;;  %v6665_v8 = vmax.f32 %v6663_v32, %v6664_v6  ;;  %vm5120_vm7 = vcmp.eq.s32.totalorder %v10321_v34, 1  ;;  %v11385_v44 = vpop.permute.xlu0 %4629  ;;  %v215_v61 = vld [vmem:[%s14172_s0 + $0x304] sm:$0xf] }
 0x173   :  { %14395 = vst [vmem:[#allocation77_spill] sm:$0xff] %v11385_v44  ;;  %v11387_v52 = vmax.f32 %v5702_v39, %v5703_v0  ;;  %v5376_v9 = vsel %vm5120_vm7, %v11148_v53, -3.4028235e+38  ;;  %vm5123_vm8 = vcmp.eq.s32.totalorder %v10345_v41, 1  ;;  %v4207_v34 = vsel %vm3951_vm6, 1, %v14279_v1  ;;  %v11423_v39 = vpop.permute.xlu1 %4638 }
 0x174   :  { %v1004_v54 = vrot.slane %v999_v14, %v8186_v4  ;;  %v5379_v15 = vsel %vm5123_vm8, %v11163_v42, -3.4028235e+38  ;;  %4782 = vperm.xlu1 %8023, %v4207_v34   ;;  %vm3950_vm9 = vcmp.gt.f32.partialorder %v440_v47, 0.5  ;;  %v6667_v13 = vmax.f32 %v6665_v8, %v6666_v28  ;;  %v218_v0 = vld [vmem:[%s14172_s0 + $0x310] sm:$0xf]  ;;  %v11416_v42 = vpop.f32.mrf.mxu0  ;;  %14396 = vst [vmem:[#allocation78_spill] sm:$0xff] %v11423_v39  ;;  %v11428_v14 = vpop.f32.mrf.mxu1 }
 0x175   :  { %v5714_v53 = vsel %vm5584_vm3, %v5378_v62, -inf  ;;  %v4206_v41 = vsel %vm3950_vm9, 1, %v14279_v1  ;;  %v6668_v49 = vsel %vm6257_vm0, %v440_v47, -inf  ;;  %vm5121_vm10 = vcmp.eq.s32.totalorder %v10313_v16, 1  ;;  %v219_v6 = vld [vmem:[%s14172_s0 + $0x314] sm:$0xf] }
 0x176   :  { %v7356_v11 = vcombine.low %v1004_v54, %v1004_v54  ;;  %v6670_v59 = vsel %vm6257_vm0, %v441_v63, -inf  ;;  %v6669_v18 = vmax.f32 %v6667_v13, %v6668_v49  ;;  %4779 = vperm.xlu0 %8022, %v4206_v41   ;;  %v5377_v32 = vsel %vm5121_vm10, %v11173_v7, -3.4028235e+38  ;;  %v220_v7 = vld [vmem:[%s14172_s0 + $0x318] sm:$0xf]  ;;  %v11433_v54 = vpop.permute.xlu0 %4635 }
 0x177   :  { %v5711_v16 = vsel %vm5584_vm3, %v5376_v9, -inf  ;;  %v5716_v28 = vsel %vm5584_vm3, %v5379_v15, -inf  ;;  %v5712_v47 = vsel %vm5584_vm3, %v5377_v32, -inf  ;;  %vm3953_vm11 = vcmp.gt.f32.partialorder %v443_v3, 0.5  ;;  %14397 = vst [vmem:[#allocation79_spill] sm:$0xff] %v11433_v54  ;;  %v11440_v32 = vpop.f32.mrf.mxu0 }
 0x178   :  { %v1374_v63 = vsub.bf16 %v214_v30, %v7356_v11  ;;  %v1375_v62 = vsub.bf16 %v215_v61, %v7356_v11  ;;  %v1376_v8 = vsub.bf16 %v216_v22, %v7356_v11  ;;  %v1377_v34 = vsub.bf16 %v217_v21, %v7356_v11  ;;  %v221_v49 = vld [vmem:[%s14172_s0 + $0x31c] sm:$0xf]  ;;  %v11442_v30 = vpop.f32.mrf.mxu1 }
 0x179   :  { %v11435_v13 = vmax.f32 %v6669_v18, %v6670_v59  ;;  %v5713_v9 = vmax.f32 %v5711_v16, %v5712_v47  ;;  %v1378_v41 = vsub.bf16 %v218_v0, %v7356_v11  ;;  %v1379_v15 = vsub.bf16 %v219_v6, %v7356_v11  ;;  %v442_v47 = vld [vmem:[%s14174_s2 + $0x500] sm:$0xff] }
 0x17a   :  { %v1630_v61 = vmax.bf16 %v14279_v1, %v1374_v63  ;;  %v1631_v22 = vmax.bf16 %v14279_v1, %v1375_v62  ;;  %v1632_v21 = vmax.bf16 %v14279_v1, %v1376_v8  ;;  %v1633_v59 = vmax.bf16 %v14279_v1, %v1377_v34  ;;  %v11456_v62 = vpop.permute.xlu1 %4644 }
 0x17b   :  { %14398 = vst [vmem:[#allocation80_spill] sm:$0xff] %v11435_v13  ;;  %v5715_v18 = vmax.f32 %v5713_v9, %v5714_v53  ;;  %v1634_v0 = vmax.bf16 %v14279_v1, %v1378_v41  ;;  %v1635_v6 = vmax.bf16 %v14279_v1, %v1379_v15  ;;  %v1380_v16 = vsub.bf16 %v220_v7, %v7356_v11  ;;  %v11453_v13 = vpop.f32.mrf.mxu1  ;;  %v445_v9 = vld [vmem:[%s14174_s2 + $0x518] sm:$0xff]  ;;  %v11465_v41 = vpop.f32.mrf.mxu0 }
 0x17c   :  { %v7460_v39 = vcombine.low %v1630_v61, %v1631_v22  ;;  %v7461_v63 = vcombine.low %v1632_v21, %v1633_v59  ;;  %v1381_v12 = vsub.bf16 %v221_v49, %v7356_v11  ;;  %vm5126_vm12 = vcmp.eq.s32.totalorder %v10428_v38, 1  ;;  %14399 = vst [vmem:[#allocation81_spill] sm:$0xff] %v11456_v62  ;;  %v14400_v61 = vld [vmem:[#allocation40_spill] sm:$0xff]  ;;  %v11473_v22 = vpop.permute.xlu0 %4641 }
 0x17d   :  { %v7462_v8 = vcombine.low %v1634_v0, %v1635_v6  ;;  %v1636_v53 = vmax.bf16 %v14279_v1, %v1380_v16  ;;  %v4209_v34 = vsel %vm3953_vm11, 1, %v14279_v1  ;;  %v6679_v7 = vsel %vm6257_vm0, %v443_v3, -inf  ;;  %v11467_v15 = vpop.f32.mrf.mxu1  ;;  %14401 = vst [vmem:[#allocation40_spill] sm:$0xff] %v11473_v22 }
 0x17e   :  { %7949 = vmatprep.mubr.msk.bf16.mxu1 %vm2350_vm4, %v7460_v39  ;;  %v1637_v11 = vmax.bf16 %v14279_v1, %v1381_v12  ;;  %4788 = vperm.xlu1 %8023, %v4209_v34   ;;  %vm3952_vm13 = vcmp.gt.f32.partialorder %v442_v47, 0.5  ;;  %v6678_v49 = vsel %vm6257_vm0, %v442_v47, -inf  ;;  %vm5124_vm14 = vcmp.eq.s32.totalorder %v14400_v61, 1  ;;  %v444_v12 = vld [vmem:[%s14174_s2 + $0x510] sm:$0xff]  ;;  %v14402_v47 = vld [vmem:[#allocation41_spill] sm:$0xff]  ;;  %v11494_v34 = vpop.f32.mrf.mxu0 }
 0x17f   :  { %7950 = vmatmul.mubr.msk.bf16.gmra.mxu1 %vm2350_vm4, %v7461_v63  ;;  %v4208_v3 = vsel %vm3952_vm13, 1, %v14279_v1  ;;  %v6680_v21 = vmax.f32 %v6678_v49, %v6679_v7  ;;  %v5380_v59 = vsel %vm5124_vm14, %v11205_v2, -3.4028235e+38  ;;  %v5717_v0 = vmax.f32 %v5715_v18, %v5716_v28  ;;  %v11481_v39 = vpop.f32.mrf.mxu1 }
 0x180   :  { %7953 = vmatprep.mubr.msk.bf16.mxu1 %vm2350_vm4, %v7462_v8  ;;  %v5382_v6 = vsel %vm5126_vm12, %v11187_v17, -3.4028235e+38  ;;  %4785 = vperm.xlu0 %8022, %v4208_v3   ;;  %v5718_v16 = vsel %vm5584_vm3, %v5380_v59, -inf  ;;  %vm5127_vm15 = vcmp.eq.s32.totalorder %v14402_v47, 1  ;;  %vm3955_vm1 = vcmp.gt.f32.partialorder %v445_v9, 0.5  ;;  %v447_v8 = vld [vmem:[%s14174_s2 + $0x528] sm:$0xff] }
 0x181   :  { %v7463_v2 = vcombine.low %v1636_v53, %v1637_v11  ;;  %v5719_v28 = vmax.f32 %v5717_v0, %v5718_v16  ;;  %v5383_v18 = vsel %vm5127_vm15, %v11224_v27, -3.4028235e+38  ;;  %v4211_v63 = vsel %vm3955_vm1, 1, %v14279_v1  ;;  %v11496_v38 = vpop.f32.mrf.mxu1  ;;  %v14403_v53 = vld [vmem:[#allocation39_spill] sm:$0xff]  ;;  %v11501_v11 = vpop.permute.xlu1 %4650  ;;  %v446_v59 = vld [vmem:[%s14174_s2 + $0x520] sm:$0xff] }
 0x182   :  { %v6683_v17 = vsel %vm6257_vm0, %v445_v9, -inf  ;;  %4794 = vperm.xlu1 %8023, %v4211_v63   ;;  %vm3954_vm2 = vcmp.gt.f32.partialorder %v444_v12, 0.5  ;;  %v6681_v7 = vsel %vm6257_vm0, %v444_v12, -inf  ;;  %vm5125_vm5 = vcmp.eq.s32.totalorder %v14403_v53, 1  ;;  %14404 = vst [vmem:[#allocation41_spill] sm:$0xff] %v11501_v11  ;;  %v11511_v12 = vpop.permute.xlu0 %4647  ;;  %v11520_v53 = vpop.f32.mrf.mxu0 }
 0x183   :  { %v4210_v27 = vsel %vm3954_vm2, 1, %v14279_v1  ;;  %v6682_v49 = vmax.f32 %v6680_v21, %v6681_v7  ;;  %v5381_v61 = vsel %vm5125_vm5, %v11251_v45, -3.4028235e+38  ;;  %v663_v3 = vunpack.i.h.s16 %v11350_v20  ;;  %14405 = vst [vmem:[#allocation39_spill] sm:$0xff] %v11511_v12  ;;  %v11513_v16 = vpop.f32.mrf.mxu1  ;;  %v449_v7 = vld [vmem:[%s14174_s2 + $0x538] sm:$0xff] }
 0x184   :  { %v5722_v9 = vsel %vm5584_vm3, %v5382_v6, -inf  ;;  %4791 = vperm.xlu0 %8022, %v4210_v27   ;;  %v5720_v0 = vsel %vm5584_vm3, %v5381_v61, -inf  ;;  %vm3957_vm6 = vcmp.gt.f32.partialorder %v447_v8, 0.5  ;;  %v5724_v21 = vsel %vm5584_vm3, %v5383_v18, -inf }
 0x185   :  { %v5721_v47 = vmax.f32 %v5719_v28, %v5720_v0  ;;  %v695_v45 = vpack.i.b16 %v663_v3, %v663_v3  ;;  %v4213_v63 = vsel %vm3957_vm6, 1, %v14279_v1  ;;  %vm5130_vm7 = vcmp.eq.s32.totalorder %v10505_v57, 1  ;;  %v448_v0 = vld [vmem:[%s14174_s2 + $0x530] sm:$0xff] }
 0x186   :  { %4800 = vperm.xlu1 %8023, %v4213_v63   ;;  %vm3956_vm8 = vcmp.gt.f32.partialorder %v446_v59, 0.5  ;;  %v6684_v6 = vmax.f32 %v6682_v49, %v6683_v17  ;;  %v6685_v27 = vsel %vm6257_vm0, %v446_v59, -inf  ;;  %v5386_v61 = vsel %vm5130_vm7, %v11285_v25, -3.4028235e+38  ;;  %v11533_v17 = vpop.permute.xlu1 %4656 }
 0x187   :  { %7954 = vmatmul.mubr.msk.bf16.gmra.mxu1 %vm2350_vm4, %v7463_v2  ;;  %v5723_v18 = vmax.f32 %v5721_v47, %v5722_v9  ;;  %v805_v28 = vrot.slane %v695_v45, %v8186_v4  ;;  %v4212_v3 = vsel %vm3956_vm8, 1, %v14279_v1  ;;  %v6687_v57 = vsel %vm6257_vm0, %v447_v8, -inf  ;;  %14406 = vst [vmem:[#allocation82_spill] sm:$0xff] %v11533_v17  ;;  %v11535_v2 = vpop.f32.mrf.mxu1  ;;  %v451_v9 = vld [vmem:[%s14174_s2 + $0x548] sm:$0xff]  ;;  %v11543_v47 = vpop.f32.mrf.mxu0  ;;  %v223_v8 = vld [vmem:[%s14172_s0 + $0x324] sm:$0xf] }
 0x188   :  { %v6686_v63 = vmax.f32 %v6684_v6, %v6685_v27  ;;  %4797 = vperm.xlu0 %8022, %v4212_v3   ;;  %vm5128_vm9 = vcmp.eq.s32.totalorder %v10467_v5, 1  ;;  %vm3959_vm10 = vcmp.gt.f32.partialorder %v449_v7, 0.5  ;;  %v222_v5 = vld [vmem:[%s14172_s0 + $0x320] sm:$0xf]  ;;  %vm3958_vm11 = vcmp.gt.f32.partialorder %v448_v0, 0.5 }
 0x189   :  { %v11537_v49 = vmax.f32 %v5723_v18, %v5724_v21  ;;  %v1006_v25 = vpack.i.b16 %v805_v28, %v805_v28  ;;  %v5384_v59 = vsel %vm5128_vm9, %v11306_v31, -3.4028235e+38  ;;  %v5735_v21 = vsel %vm5584_vm3, %v5386_v61, -inf  ;;  %v11553_v31 = vpop.permute.xlu0 %4653  ;;  %v224_v27 = vld [vmem:[%s14172_s0 + $0x328] sm:$0xf] }
 0x18a   :  { %v4215_v45 = vsel %vm3959_vm10, 1, %v14279_v1  ;;  %14407 = vst [vmem:[#allocation83_spill] sm:$0xff] %v11553_v31  ;;  %v225_v18 = vld [vmem:[%s14172_s0 + $0x32c] sm:$0xf]  ;;  %vm5131_vm12 = vcmp.eq.s32.totalorder %v10496_v55, 1  ;;  %v4214_v28 = vsel %vm3958_vm11, 1, %v14279_v1  ;;  %v6688_v61 = vmax.f32 %v6686_v63, %v6687_v57  ;;  %v11570_v11 = vpop.f32.mrf.mxu1  ;;  %v11577_v63 = vpop.f32.mrf.mxu0 }
 0x18b   :  { %v1011_v6 = vrot.slane %v1006_v25, %v8186_v4  ;;  %4806 = vperm.xlu1 %8023, %v4215_v45   ;;  %v5732_v3 = vsel %vm5584_vm3, %v5384_v59, -inf  ;;  %v6689_v17 = vsel %vm6257_vm0, %v448_v0, -inf  ;;  %v14408_v25 = vld [vmem:[#allocation43_spill] sm:$0xff]  ;;  %vm3961_vm14 = vcmp.gt.f32.partialorder %v451_v9, 0.5  ;;  %v228_v55 = vld [vmem:[%s14172_s0 + $0x338] sm:$0xf] }
 0x18c   :  { %4803 = vperm.xlu0 %8022, %v4214_v28   ;;  %vm5129_vm13 = vcmp.eq.s32.totalorder %v14408_v25, 1  ;;  %v226_v31 = vld [vmem:[%s14172_s0 + $0x330] sm:$0xf]  ;;  %v6691_v45 = vsel %vm6257_vm0, %v449_v7, -inf  ;;  %v6690_v22 = vmax.f32 %v6688_v61, %v6689_v17  ;;  %v227_v0 = vld [vmem:[%s14172_s0 + $0x334] sm:$0xf]  ;;  %v11587_v7 = vpop.permute.xlu1 %4662 }
 0x18d   :  { %v7357_v62 = vcombine.low %v1011_v6, %v1011_v6  ;;  %v5385_v57 = vsel %vm5129_vm13, %v11359_v58, -3.4028235e+38  ;;  %v5387_v59 = vsel %vm5131_vm12, %v11332_v56, -3.4028235e+38  ;;  %v4217_v25 = vsel %vm3961_vm14, 1, %v14279_v1  ;;  %14409 = vst [vmem:[#allocation43_spill] sm:$0xff] %v11587_v7  ;;  %v11589_v58 = vpop.f32.mrf.mxu1  ;;  %v11599_v7 = vpop.permute.xlu0 %4659 }
 0x18e   :  { %v5733_v28 = vsel %vm5584_vm3, %v5385_v57, -inf  ;;  %v11585_v6 = vsel %vm6257_vm0, %v451_v9, -inf  ;;  %v11594_v56 = vmax.f32 %v6690_v22, %v6691_v45  ;;  %v229_v9 = vld [vmem:[%s14172_s0 + $0x33c] sm:$0xf]  ;;  %14411 = vst [vmem:[#allocation85_spill] sm:$0xff] %v11599_v7  ;;  %vm5132_vm1 = vcmp.eq.s32.totalorder %v10535_v24, 1 }
 0x18f   :  { %v1382_v17 = vsub.bf16 %v222_v5, %v7357_v62  ;;  %v1383_v61 = vsub.bf16 %v223_v8, %v7357_v62  ;;  %v1384_v12 = vsub.bf16 %v224_v27, %v7357_v62  ;;  %v1385_v54 = vsub.bf16 %v225_v18, %v7357_v62  ;;  %4812 = vperm.xlu1 %8023, %v4217_v25   ;;  %v11601_v5 = vpop.f32.mrf.mxu1 }
 0x190   :  { %14410 = vst [vmem:[#allocation84_spill] sm:$0xff] %v11594_v56  ;;  %v5734_v57 = vmax.f32 %v5732_v3, %v5733_v28  ;;  %v1386_v44 = vsub.bf16 %v226_v31, %v7357_v62  ;;  %v1387_v37 = vsub.bf16 %v227_v0, %v7357_v62  ;;  %v450_v31 = vld [vmem:[%s14174_s2 + $0x540] sm:$0xff]  ;;  %v11610_v3 = vpop.f32.mrf.mxu0  ;;  %v1388_v25 = vsub.bf16 %v228_v55, %v7357_v62 }
 0x191   :  { %v1638_v8 = vmax.bf16 %v14279_v1, %v1382_v17  ;;  %v1639_v27 = vmax.bf16 %v14279_v1, %v1383_v61  ;;  %v1640_v18 = vmax.bf16 %v14279_v1, %v1384_v12  ;;  %v1641_v22 = vmax.bf16 %v14279_v1, %v1385_v54  ;;  %v11614_v56 = vpop.f32.mrf.mxu1  ;;  %v453_v54 = vld [vmem:[%s14174_s2 + $0x558] sm:$0xff] }
 0x192   :  { %v5736_v45 = vmax.f32 %v5734_v57, %v5735_v21  ;;  %v1642_v0 = vmax.bf16 %v14279_v1, %v1386_v44  ;;  %v1643_v28 = vmax.bf16 %v14279_v1, %v1387_v37  ;;  %v5737_v12 = vsel %vm5584_vm3, %v5387_v59, -inf  ;;  %v11622_v21 = vpop.permute.xlu1 %4668  ;;  %v452_v57 = vld [vmem:[%s14174_s2 + $0x550] sm:$0xff] }
 0x193   :  { %v7464_v17 = vcombine.low %v1638_v8, %v1639_v27  ;;  %v7465_v61 = vcombine.low %v1640_v18, %v1641_v22  ;;  %v1389_v7 = vsub.bf16 %v229_v9, %v7357_v62  ;;  %v1644_v43 = vmax.bf16 %v14279_v1, %v1388_v25  ;;  %14412 = vst [vmem:[#allocation86_spill] sm:$0xff] %v11622_v21  ;;  %v11624_v37 = vpop.f32.mrf.mxu1  ;;  %v11634_v9 = vpop.f32.mrf.mxu0  ;;  %v14416_v22 = vld [vmem:[#allocation45_spill] sm:$0xff]  ;;  %v14418_v25 = vld [vmem:[#allocation44_spill] sm:$0xff] }
 0x194   :  { %v7466_v51 = vcombine.low %v1642_v0, %v1643_v28  ;;  %vm3960_vm15 = vcmp.gt.f32.partialorder %v450_v31, 0.5  ;;  %v6699_v44 = vsel %vm6257_vm0, %v450_v31, -inf  ;;  %14413 = vst [vmem:[#allocation87_spill] sm:$0xff] %v11624_v37  ;;  %vm5134_vm2 = vcmp.eq.s32.totalorder %v10567_v26, 1  ;;  %v11639_v27 = vpop.permute.xlu0 %4665  ;;  %v455_v26 = vld [vmem:[%s14174_s2 + $0x568] sm:$0xff] }
 0x195   :  { %7957 = vmatprep.mubr.msk.bf16.mxu1 %vm2350_vm4, %v7464_v17  ;;  %v1645_v55 = vmax.bf16 %v14279_v1, %v1389_v7  ;;  %v4216_v62 = vsel %vm3960_vm15, 1, %v14279_v1  ;;  %v6701_v59 = vmax.f32 %v6699_v44, %v11585_v6  ;;  %v5388_v8 = vsel %vm5132_vm1, %v11416_v42, -3.4028235e+38  ;;  %14414 = vst [vmem:[#allocation88_spill] sm:$0xff] %v11639_v27  ;;  %v11641_v6 = vpop.f32.mrf.mxu1  ;;  %v235_v27 = vld [vmem:[%s14172_s0 + $0x354] sm:$0xf] }
 0x196   :  { %7958 = vmatmul.mubr.msk.bf16.gmra.mxu1 %vm2350_vm4, %v7465_v61  ;;  %4809 = vperm.xlu0 %8022, %v4216_v62   ;;  %v5738_v7 = vmax.f32 %v5736_v45, %v5737_v12  ;;  %vm3963_vm5 = vcmp.gt.f32.partialorder %v453_v54, 0.5  ;;  %14415 = vst [vmem:[#allocation89_spill] sm:$0xff] %v11641_v6  ;;  %v5390_v24 = vsel %vm5134_vm2, %v11381_v23, -3.4028235e+38  ;;  %v5739_v18 = vsel %vm5584_vm3, %v5388_v8, -inf  ;;  %v11662_v61 = vpop.f32.mrf.mxu0  ;;  %v457_v8 = vld [vmem:[%s14174_s2 + $0x578] sm:$0xff] }
 0x197   :  { %7961 = vmatprep.mubr.msk.bf16.mxu1 %vm2350_vm4, %v7466_v51  ;;  %vm5135_vm6 = vcmp.eq.s32.totalorder %v14416_v22, 1  ;;  %v4219_v31 = vsel %vm3963_vm5, 1, %v14279_v1  ;;  %v7467_v42 = vcombine.low %v1644_v43, %v1645_v55  ;;  %vm3962_vm7 = vcmp.gt.f32.partialorder %v452_v57, 0.5  ;;  %v11652_v28 = vpop.f32.mrf.mxu1  ;;  %v454_v43 = vld [vmem:[%s14174_s2 + $0x560] sm:$0xff]  ;;  %v11666_v55 = vpop.permute.xlu1 %4674 }
 0x198   :  { %v5740_v45 = vmax.f32 %v5738_v7, %v5739_v18  ;;  %v5391_v0 = vsel %vm5135_vm6, %v11440_v32, -3.4028235e+38  ;;  %4818 = vperm.xlu1 %8023, %v4219_v31   ;;  %14417 = vst [vmem:[#allocation45_spill] sm:$0xff] %v11652_v28  ;;  %v4218_v51 = vsel %vm3962_vm7, 1, %v14279_v1  ;;  %v6702_v23 = vsel %vm6257_vm0, %v452_v57, -inf  ;;  %14419 = vst [vmem:[#allocation44_spill] sm:$0xff] %v11666_v55  ;;  %v11680_v18 = vpop.permute.xlu0 %4671 }
 0x199   :  { %vm5133_vm8 = vcmp.eq.s32.totalorder %v14418_v25, 1  ;;  %v621_v17 = vcombine.high %v11327_v36, %v11327_v36  ;;  %v6704_v32 = vsel %vm6257_vm0, %v453_v54, -inf  ;;  %v6703_v12 = vmax.f32 %v6701_v59, %v6702_v23  ;;  %v11676_v7 = vpop.f32.mrf.mxu1  ;;  %14421 = vst [vmem:[#allocation91_spill] sm:$0xff] %v11680_v18  ;;  %v11686_v23 = vpop.f32.mrf.mxu0  ;;  %v14422_v25 = vld [vmem:[#allocation48_spill] sm:$0xff] }
 0x19a   :  { %4815 = vperm.xlu0 %8022, %v4218_v51   ;;  %v5389_v44 = vsel %vm5133_vm8, %v11465_v41, -3.4028235e+38  ;;  %vm3965_vm9 = vcmp.gt.f32.partialorder %v455_v26, 0.5  ;;  %14420 = vst [vmem:[#allocation90_spill] sm:$0xff] %v11676_v7  ;;  %v5743_v54 = vsel %vm5584_vm3, %v5390_v24, -inf  ;;  %v5745_v41 = vsel %vm5584_vm3, %v5391_v0, -inf }
 0x19b   :  { %v5741_v62 = vsel %vm5584_vm3, %v5389_v44, -inf  ;;  %v11670_v57 = vrot.slane %v621_v17, %v14392_v29  ;;  %v4221_v36 = vsel %vm3965_vm9, 1, %v14279_v1  ;;  %vm3964_vm10 = vcmp.gt.f32.partialorder %v454_v43, 0.5  ;;  %v456_v0 = vld [vmem:[%s14174_s2 + $0x570] sm:$0xff]  ;;  %v237_v18 = vld [vmem:[%s14172_s0 + $0x35c] sm:$0xf] }
 0x19c   :  { %v5742_v59 = vmax.f32 %v5740_v45, %v5741_v62  ;;  %4824 = vperm.xlu1 %8023, %v4221_v36   ;;  %v4220_v22 = vsel %vm3964_vm10, 1, %v14279_v1  ;;  %v6705_v31 = vmax.f32 %v6703_v12, %v6704_v32  ;;  %v6706_v51 = vsel %vm6257_vm0, %v454_v43, -inf  ;;  %v14423_v12 = vld [vmem:[#allocation16_spill] sm:$0xff] }
 0x19d   :  { %v7329_v29 = vpack.i.b16 %v11670_v57, %v11670_v57  ;;  %vm5138_vm11 = vcmp.eq.s32.totalorder %v14422_v25, 1  ;;  %v6708_v45 = vsel %vm6257_vm0, %v455_v26, -inf  ;;  %vm3967_vm12 = vcmp.gt.f32.partialorder %v457_v8, 0.5  ;;  %v11697_v44 = vpop.f32.mrf.mxu1  ;;  %v14425_v26 = vld [vmem:[#allocation17_spill] sm:$0xff] }
 0x19e   :  { %7962 = vmatmul.mubr.msk.bf16.gmra.mxu1 %vm2350_vm4, %v7467_v42  ;;  %v5744_v24 = vmax.f32 %v5742_v59, %v5743_v54  ;;  %4821 = vperm.xlu0 %8022, %v4220_v22   ;;  %v5394_v32 = vsel %vm5138_vm11, %v11494_v34, -3.4028235e+38  ;;  %v6707_v43 = vmax.f32 %v6705_v31, %v6706_v51  ;;  %vm5136_vm13 = vcmp.eq.s32.totalorder %v14423_v12, 1  ;;  %14424 = vst [vmem:[#allocation48_spill] sm:$0xff] %v11697_v44  ;;  %v11704_v54 = vpop.permute.xlu1 %4680  ;;  %v459_v22 = vld [vmem:[%s14174_s2 + $0x588] sm:$0xff] }
 0x19f   :  { %v809_v17 = vrot.slane %v7329_v29, %v8186_v4  ;;  %v5392_v62 = vsel %vm5136_vm13, %v11520_v53, -3.4028235e+38  ;;  %vm5139_vm14 = vcmp.eq.s32.totalorder %v14425_v26, 1  ;;  %v4223_v36 = vsel %vm3967_vm12, 1, %v14279_v1  ;;  %14426 = vst [vmem:[#allocation16_spill] sm:$0xff] %v11704_v54  ;;  %v11712_v31 = vpop.f32.mrf.mxu1 }
 0x1a0   :  { %v11699_v42 = vmax.f32 %v5744_v24, %v5745_v41  ;;  %v5395_v29 = vsel %vm5139_vm14, %v11543_v47, -3.4028235e+38  ;;  %4830 = vperm.xlu1 %8023, %v4223_v36   ;;  %vm3966_vm15 = vcmp.gt.f32.partialorder %v456_v0, 0.5  ;;  %v6709_v34 = vmax.f32 %v6707_v43, %v6708_v45  ;;  %v11710_v41 = vpop.f32.mrf.mxu0  ;;  %14427 = vst [vmem:[#allocation17_spill] sm:$0xff] %v11712_v31  ;;  %v230_v53 = vld [vmem:[%s14172_s0 + $0x340] sm:$0xf]  ;;  %v11727_v43 = vpop.permute.xlu0 %4677 }
 0x1a1   :  { %v1013_v59 = vpack.i.b16 %v809_v17, %v809_v17  ;;  %v231_v51 = vld [vmem:[%s14172_s0 + $0x344] sm:$0xf]  ;;  %v232_v47 = vld [vmem:[%s14172_s0 + $0x348] sm:$0xf]  ;;  %v6712_v24 = vsel %vm6257_vm0, %v457_v8, -inf  ;;  %v4222_v25 = vsel %vm3966_vm15, 1, %v14279_v1  ;;  %v11737_v55 = vpop.f32.mrf.mxu1 }
 0x1a2   :  { %v6710_v45 = vsel %vm6257_vm0, %v456_v0, -inf  ;;  %v14428_v17 = vld [vmem:[#allocation47_spill] sm:$0xff]  ;;  %v233_v26 = vld [vmem:[%s14172_s0 + $0x34c] sm:$0xf]  ;;  %4827 = vperm.xlu0 %8022, %v4222_v25   ;;  %v458_v8 = vld [vmem:[%s14174_s2 + $0x580] sm:$0xff]  ;;  %14430 = vst [vmem:[#allocation92_spill] sm:$0xff] %v11737_v55 }
 0x1a3   :  { %vm5137_vm1 = vcmp.eq.s32.totalorder %v14428_v17, 1  ;;  %14429 = vst [vmem:[#allocation47_spill] sm:$0xff] %v11727_v43  ;;  %v1018_v12 = vrot.slane %v1013_v59, %v8186_v4  ;;  %v6711_v36 = vmax.f32 %v6709_v34, %v6710_v45  ;;  %v5756_v0 = vsel %vm5584_vm3, %v5394_v32, -inf  ;;  %v234_v43 = vld [vmem:[%s14172_s0 + $0x350] sm:$0xf] }
 0x1a4   :  { %v5393_v54 = vsel %vm5137_vm1, %v11577_v63, -3.4028235e+38  ;;  %v5753_v17 = vsel %vm5584_vm3, %v5392_v62, -inf  ;;  %vm3969_vm2 = vcmp.gt.f32.partialorder %v459_v22, 0.5  ;;  %v5758_v63 = vsel %vm5584_vm3, %v5395_v29, -inf  ;;  %v11754_v62 = vpop.f32.mrf.mxu0  ;;  %v11766_v44 = vpop.permute.xlu0 %4683 }
 0x1a5   :  { %v5754_v59 = vsel %vm5584_vm3, %v5393_v54, -inf  ;;  %v7358_v34 = vcombine.low %v1018_v12, %v1018_v12  ;;  %v11746_v25 = vmax.f32 %v6711_v36, %v6712_v24  ;;  %v236_v32 = vld [vmem:[%s14172_s0 + $0x358] sm:$0xf]  ;;  %v11756_v54 = vpop.f32.mrf.mxu1  ;;  %v4225_v21 = vsel %vm3969_vm2, 1, %v14279_v1  ;;  %v11761_v24 = vpop.permute.xlu1 %4686  ;;  %14434 = vst [vmem:[#allocation96_spill] sm:$0xff] %v11766_v44 }
 0x1a6   :  { %v5755_v45 = vmax.f32 %v5753_v17, %v5754_v59  ;;  %14432 = vst [vmem:[#allocation94_spill] sm:$0xff] %v11756_v54  ;;  %v6721_v12 = vsel %vm6257_vm0, %v459_v22, -inf  ;;  %vm3968_vm5 = vcmp.gt.f32.partialorder %v458_v8, 0.5  ;;  %v6720_v29 = vsel %vm6257_vm0, %v458_v8, -inf  ;;  %14433 = vst [vmem:[#allocation95_spill] sm:$0xff] %v11761_v24  ;;  %4836 = vperm.xlu1 %8023, %v4225_v21  }
 0x1a7   :  { %14431 = vst [vmem:[#allocation93_spill] sm:$0xff] %v11746_v25  ;;  %v1390_v36 = vsub.bf16 %v230_v53, %v7358_v34  ;;  %v1391_v17 = vsub.bf16 %v231_v51, %v7358_v34  ;;  %v1392_v59 = vsub.bf16 %v232_v47, %v7358_v34  ;;  %v1393_v25 = vsub.bf16 %v233_v26, %v7358_v34  ;;  %v11768_v22 = vpop.f32.mrf.mxu1  ;;  %v11774_v26 = vpop.f32.mrf.mxu0 }
 0x1a8   :  { %v5757_v19 = vmax.f32 %v5755_v45, %v5756_v0  ;;  %v1394_v46 = vsub.bf16 %v234_v43, %v7358_v34  ;;  %v1395_v48 = vsub.bf16 %v235_v27, %v7358_v34  ;;  %v1396_v55 = vsub.bf16 %v236_v32, %v7358_v34  ;;  %14435 = vst [vmem:[#allocation97_spill] sm:$0xff] %v11768_v22  ;;  %v14436_v0 = vld [vmem:[#allocation50_spill] sm:$0xff]  ;;  %v461_v45 = vld [vmem:[%s14174_s2 + $0x598] sm:$0xff] }
 0x1a9   :  { %v1646_v54 = vmax.bf16 %v14279_v1, %v1390_v36  ;;  %v1647_v53 = vmax.bf16 %v14279_v1, %v1391_v17  ;;  %v1648_v51 = vmax.bf16 %v14279_v1, %v1392_v59  ;;  %v1649_v47 = vmax.bf16 %v14279_v1, %v1393_v25 }
 0x1aa   :  { %v1650_v21 = vmax.bf16 %v14279_v1, %v1394_v46  ;;  %v1651_v43 = vmax.bf16 %v14279_v1, %v1395_v48  ;;  %v1397_v27 = vsub.bf16 %v237_v18, %v7358_v34  ;;  %vm5142_vm6 = vcmp.eq.s32.totalorder %v14436_v0, 1  ;;  %v14437_v46 = vld [vmem:[#allocation49_spill] sm:$0xff]  ;;  %v460_v18 = vld [vmem:[%s14174_s2 + $0x590] sm:$0xff]  ;;  %v11789_v34 = vpop.permute.xlu1 %4692  ;;  %v11791_v0 = vpop.f32.mrf.mxu1 }
 0x1ab   :  { %v7468_v32 = vcombine.low %v1646_v54, %v1647_v53  ;;  %v7469_v36 = vcombine.low %v1648_v51, %v1649_v47  ;;  %v4224_v17 = vsel %vm3968_vm5, 1, %v14279_v1  ;;  %v6722_v59 = vmax.f32 %v6720_v29, %v6721_v12  ;;  %14438 = vst [vmem:[#allocation50_spill] sm:$0xff] %v11791_v0  ;;  %v11797_v12 = vpop.f32.mrf.mxu0  ;;  %v11807_v51 = vpop.permute.xlu0 %4689 }
 0x1ac   :  { %v7470_v25 = vcombine.low %v1650_v21, %v1651_v43  ;;  %v5398_v24 = vsel %vm5142_vm6, %v11610_v3, -3.4028235e+38  ;;  %4833 = vperm.xlu0 %8022, %v4224_v17   ;;  %vm5140_vm7 = vcmp.eq.s32.totalorder %v14437_v46, 1  ;;  %v5759_v48 = vmax.f32 %v5757_v19, %v5758_v63  ;;  %v14439_v63 = vld [vmem:[#allocation20_spill] sm:$0xff]  ;;  %v11818_v17 = vpop.f32.mrf.mxu1 }
 0x1ad   :  { %7965 = vmatprep.mubr.msk.bf16.mxu1 %vm2350_vm4, %v7468_v32  ;;  %v1652_v8 = vmax.bf16 %v14279_v1, %v1396_v55  ;;  %v1653_v54 = vmax.bf16 %v14279_v1, %v1397_v27  ;;  %v5396_v3 = vsel %vm5140_vm7, %v11634_v9, -3.4028235e+38  ;;  %vm3971_vm8 = vcmp.gt.f32.partialorder %v461_v45, 0.5  ;;  %v463_v55 = vld [vmem:[%s14174_s2 + $0x5a8] sm:$0xff]  ;;  %14441 = vst [vmem:[#allocation49_spill] sm:$0xff] %v11818_v17  ;;  %v11822_v46 = vpop.f32.mrf.mxu0 }
 0x1ae   :  { %7966 = vmatmul.mubr.msk.bf16.gmra.mxu1 %vm2350_vm4, %v7469_v36  ;;  %v5760_v19 = vsel %vm5584_vm3, %v5396_v3, -inf  ;;  %vm5143_vm9 = vcmp.eq.s32.totalorder %v14439_v63, 1  ;;  %v4227_v29 = vsel %vm3971_vm8, 1, %v14279_v1  ;;  %v6725_v53 = vsel %vm6257_vm0, %v461_v45, -inf  ;;  %v14440_v32 = vld [vmem:[#allocation22_spill] sm:$0xff]  ;;  %v462_v36 = vld [vmem:[%s14174_s2 + $0x5a0] sm:$0xff] }
 0x1af   :  { %7969 = vmatprep.mubr.msk.bf16.mxu1 %vm2350_vm4, %v7470_v25  ;;  %v5761_v9 = vmax.f32 %v5759_v48, %v5760_v19  ;;  %v5399_v47 = vsel %vm5143_vm9, %v11662_v61, -3.4028235e+38  ;;  %4842 = vperm.xlu1 %8023, %v4227_v29   ;;  %vm3970_vm10 = vcmp.gt.f32.partialorder %v460_v18, 0.5  ;;  %v6723_v21 = vsel %vm6257_vm0, %v460_v18, -inf  ;;  %v11826_v19 = vpop.permute.xlu1 %4698 }
 0x1b0   :  { %v4226_v43 = vsel %vm3970_vm10, 1, %v14279_v1  ;;  %v6724_v27 = vmax.f32 %v6722_v59, %v6723_v21  ;;  %vm5141_vm11 = vcmp.eq.s32.totalorder %v14440_v32, 1  ;;  %v665_v45 = vunpack.i.h.s16 %v11670_v57  ;;  %v11836_v32 = vpop.permute.xlu0 %4695 }
 0x1b1   :  { %v5764_v25 = vsel %vm5584_vm3, %v5398_v24, -inf  ;;  %4839 = vperm.xlu0 %8022, %v4226_v43   ;;  %v5397_v61 = vsel %vm5141_vm11, %v11686_v23, -3.4028235e+38  ;;  %vm3973_vm12 = vcmp.gt.f32.partialorder %v463_v55, 0.5  ;;  %v7471_v48 = vcombine.low %v1652_v8, %v1653_v54  ;;  %v465_v23 = vld [vmem:[%s14174_s2 + $0x5b8] sm:$0xff]  ;;  %v14442_v8 = vld [vmem:[#allocation54_spill] sm:$0xff] }
 0x1b2   :  { %v5762_v59 = vsel %vm5584_vm3, %v5397_v61, -inf  ;;  %v697_v18 = vpack.i.b16 %v665_v45, %v665_v45  ;;  %v4229_v3 = vsel %vm3973_vm12, 1, %v14279_v1  ;;  %v5766_v63 = vsel %vm5584_vm3, %v5399_v47, -inf  ;;  %v11838_v45 = vpop.f32.mrf.mxu1  ;;  %v464_v61 = vld [vmem:[%s14174_s2 + $0x5b0] sm:$0xff] }
 0x1b3   :  { %v5763_v29 = vmax.f32 %v5761_v9, %v5762_v59  ;;  %4848 = vperm.xlu1 %8023, %v4229_v3   ;;  %vm3972_vm13 = vcmp.gt.f32.partialorder %v462_v36, 0.5  ;;  %v6726_v24 = vmax.f32 %v6724_v27, %v6725_v53  ;;  %vm5146_vm14 = vcmp.eq.s32.totalorder %v14442_v8, 1  ;;  %14443 = vst [vmem:[#allocation20_spill] sm:$0xff] %v11838_v45  ;;  %v11845_v59 = vpop.f32.mrf.mxu0  ;;  %v14445_v3 = vld [vmem:[#allocation19_spill] sm:$0xff]  ;;  %v241_v8 = vld [vmem:[%s14172_s0 + $0x36c] sm:$0xf] }
 0x1b4   :  { %v813_v21 = vrot.slane %v697_v18, %v8186_v4  ;;  %v4228_v54 = vsel %vm3972_vm13, 1, %v14279_v1  ;;  %v6727_v43 = vsel %vm6257_vm0, %v462_v36, -inf  ;;  %v5402_v47 = vsel %vm5146_vm14, %v11710_v41, -3.4028235e+38  ;;  %v14444_v18 = vld [vmem:[#allocation52_spill] sm:$0xff] }
 0x1b5   :  { %v5765_v9 = vmax.f32 %v5763_v29, %v5764_v25  ;;  %v6729_v53 = vsel %vm6257_vm0, %v463_v55, -inf  ;;  %v6728_v27 = vmax.f32 %v6726_v24, %v6727_v43  ;;  %4845 = vperm.xlu0 %8022, %v4228_v54   ;;  %vm5144_vm15 = vcmp.eq.s32.totalorder %v14444_v18, 1  ;;  %v238_v41 = vld [vmem:[%s14172_s0 + $0x360] sm:$0xf]  ;;  %v239_v55 = vld [vmem:[%s14172_s0 + $0x364] sm:$0xf] }
 0x1b6   :  { %7970 = vmatmul.mubr.msk.bf16.gmra.mxu1 %vm2350_vm4, %v7471_v48  ;;  %v1020_v36 = vpack.i.b16 %v813_v21, %v813_v21  ;;  %vm5147_vm1 = vcmp.eq.s32.totalorder %v14445_v3, 1  ;;  %vm3975_vm2 = vcmp.gt.f32.partialorder %v465_v23, 0.5  ;;  %v240_v48 = vld [vmem:[%s14172_s0 + $0x368] sm:$0xf]  ;;  %v5400_v29 = vsel %vm5144_vm15, %v11754_v62, -3.4028235e+38  ;;  %v11872_v62 = vpop.permute.xlu1 %4704 }
 0x1b7   :  { %v11850_v25 = vmax.f32 %v5765_v9, %v5766_v63  ;;  %v5403_v24 = vsel %vm5147_vm1, %v11774_v26, -3.4028235e+38  ;;  %v4231_v21 = vsel %vm3975_vm2, 1, %v14279_v1  ;;  %vm3974_vm5 = vcmp.gt.f32.partialorder %v464_v61, 0.5  ;;  %v467_v9 = vld [vmem:[%s14174_s2 + $0x5c8] sm:$0xff]  ;;  %v14448_v3 = vld [vmem:[#allocation51_spill] sm:$0xff] }
 0x1b8   :  { %v1025_v63 = vrot.slane %v1020_v36, %v8186_v4  ;;  %4854 = vperm.xlu1 %8023, %v4231_v21   ;;  %v6730_v54 = vmax.f32 %v6728_v27, %v6729_v53  ;;  %v6731_v43 = vsel %vm6257_vm0, %v464_v61, -inf  ;;  %v11874_v26 = vpop.f32.mrf.mxu1  ;;  %v5777_v18 = vsel %vm5584_vm3, %v5402_v47, -inf  ;;  %v242_v53 = vld [vmem:[%s14172_s0 + $0x370] sm:$0xf]  ;;  %v11882_v27 = vpop.f32.mrf.mxu0  ;;  %v243_v47 = vld [vmem:[%s14172_s0 + $0x374] sm:$0xf] }
 0x1b9   :  { %14446 = vst [vmem:[#allocation22_spill] sm:$0xff] %v11850_v25  ;;  %14447 = vst [vmem:[#allocation54_spill] sm:$0xff] %v11874_v26  ;;  %v4230_v36 = vsel %vm3974_vm5, 1, %v14279_v1  ;;  %vm5145_vm6 = vcmp.eq.s32.totalorder %v14448_v3, 1  ;;  %v6733_v21 = vsel %vm6257_vm0, %v465_v23, -inf  ;;  %v11889_v26 = vpop.permute.xlu0 %4701  ;;  %v5774_v3 = vsel %vm5584_vm3, %v5400_v29, -inf }
 0x1ba   :  { %v7359_v61 = vcombine.low %v1025_v63, %v1025_v63  ;;  %v6732_v44 = vmax.f32 %v6730_v54, %v6731_v43  ;;  %4851 = vperm.xlu0 %8022, %v4230_v36   ;;  %v5401_v22 = vsel %vm5145_vm6, %v11797_v12, -3.4028235e+38  ;;  %v5779_v17 = vsel %vm5584_vm3, %v5403_v24, -inf  ;;  %v11894_v63 = vpop.f32.mrf.mxu1  ;;  %v244_v12 = vld [vmem:[%s14172_s0 + $0x378] sm:$0xf]  ;;  %v3076_v24 = vpop.f32.mrf.mxu0 }
 0x1bb   :  { %v5775_v45 = vsel %vm5584_vm3, %v5401_v22, -inf  ;;  %vm3977_vm7 = vcmp.gt.f32.partialorder %v467_v9, 0.5  ;;  %14449 = vst [vmem:[#allocation52_spill] sm:$0xff] %v11894_v63  ;;  %v245_v22 = vld [vmem:[%s14172_s0 + $0x37c] sm:$0xf] }
 0x1bc   :  { %v1398_v23 = vsub.bf16 %v238_v41, %v7359_v61  ;;  %v1399_v54 = vsub.bf16 %v239_v55, %v7359_v61  ;;  %v1400_v43 = vsub.bf16 %v240_v48, %v7359_v61  ;;  %v1401_v36 = vsub.bf16 %v241_v8, %v7359_v61 }
 0x1bd   :  { %v11899_v0 = vmax.f32 %v6732_v44, %v6733_v21  ;;  %v5776_v31 = vmax.f32 %v5774_v3, %v5775_v45  ;;  %v1402_v35 = vsub.bf16 %v242_v53, %v7359_v61  ;;  %v1403_v29 = vsub.bf16 %v243_v47, %v7359_v61  ;;  %v466_v44 = vld [vmem:[%s14174_s2 + $0x5c0] sm:$0xff]  ;;  %v11911_v45 = vpop.permute.xlu1 %4710  ;;  %v11915_v3 = vpop.f32.mrf.mxu1 }
 0x1be   :  { %v1654_v63 = vmax.bf16 %v14279_v1, %v1398_v23  ;;  %v1655_v41 = vmax.bf16 %v14279_v1, %v1399_v54  ;;  %v1656_v55 = vmax.bf16 %v14279_v1, %v1400_v43  ;;  %v1657_v48 = vmax.bf16 %v14279_v1, %v1401_v36  ;;  %14451 = vst [vmem:[#allocation51_spill] sm:$0xff] %v11915_v3  ;;  %v11919_v36 = vpop.permute.xlu0 %4707 }
 0x1bf   :  { %14450 = vst [vmem:[#allocation19_spill] sm:$0xff] %v11899_v0  ;;  %v5778_v8 = vmax.f32 %v5776_v31, %v5777_v18  ;;  %v1658_v53 = vmax.bf16 %v14279_v1, %v1402_v35  ;;  %v1659_v21 = vmax.bf16 %v14279_v1, %v1403_v29  ;;  %v1404_v47 = vsub.bf16 %v244_v12, %v7359_v61  ;;  %v469_v35 = vld [vmem:[%s14174_s2 + $0x5d8] sm:$0xff]  ;;  %v11926_v18 = vpop.f32.mrf.mxu0 }
 0x1c0   :  { %v7472_v23 = vcombine.low %v1654_v63, %v1655_v41  ;;  %v7473_v54 = vcombine.low %v1656_v55, %v1657_v48  ;;  %v1405_v0 = vsub.bf16 %v245_v22, %v7359_v61  ;;  %v4233_v43 = vsel %vm3977_vm7, 1, %v14279_v1  ;;  %v14452_v29 = vld [vmem:[#allocation56_spill] sm:$0xff]  ;;  %v468_v55 = vld [vmem:[%s14174_s2 + $0x5d0] sm:$0xff]  ;;  %v11938_v48 = vpop.f32.mrf.mxu1 }
 0x1c1   :  { %v7474_v33 = vcombine.low %v1658_v53, %v1659_v21  ;;  %v1660_v28 = vmax.bf16 %v14279_v1, %v1404_v47  ;;  %v6742_v31 = vsel %vm6257_vm0, %v467_v9, -inf  ;;  %4860 = vperm.xlu1 %8023, %v4233_v43   ;;  %vm3976_vm8 = vcmp.gt.f32.partialorder %v466_v44, 0.5  ;;  %14453 = vst [vmem:[#allocation56_spill] sm:$0xff] %v11938_v48  ;;  %v11943_v53 = vpop.permute.xlu1 %4716 }
 0x1c2   :  { %7973 = vmatprep.mubr.msk.bf16.mxu1 %vm2350_vm4, %v7472_v23  ;;  %v1661_v61 = vmax.bf16 %v14279_v1, %v1405_v0  ;;  %v4232_v63 = vsel %vm3976_vm8, 1, %v14279_v1  ;;  %v6741_v12 = vsel %vm6257_vm0, %v466_v44, -inf  ;;  %vm5148_vm9 = vcmp.eq.s32.totalorder %v14452_v29, 1  ;;  %v14454_v0 = vld [vmem:[#allocation26_spill] sm:$0xff]  ;;  %v3089_v23 = vpop.f32.mrf.mxu0  ;;  %v11963_v29 = vpop.f32.mrf.mxu1 }
 0x1c3   :  { %7974 = vmatmul.mubr.msk.bf16.gmra.mxu1 %vm2350_vm4, %v7473_v54  ;;  %v6743_v9 = vmax.f32 %v6741_v12, %v6742_v31  ;;  %4857 = vperm.xlu0 %8022, %v4232_v63   ;;  %v5404_v22 = vsel %vm5148_vm9, %v11845_v59, -3.4028235e+38  ;;  %v5780_v41 = vmax.f32 %v5778_v8, %v5779_v17  ;;  %vm5150_vm10 = vcmp.eq.s32.totalorder %v14454_v0, 1  ;;  %v471_v8 = vld [vmem:[%s14174_s2 + $0x5e8] sm:$0xff]  ;;  %v14455_v54 = vld [vmem:[#allocation55_spill] sm:$0xff]  ;;  %v470_v12 = vld [vmem:[%s14174_s2 + $0x5e0] sm:$0xff] }
 0x1c4   :  { %7977 = vmatprep.mubr.msk.bf16.mxu1 %vm2350_vm4, %v7474_v33  ;;  %v5781_v44 = vsel %vm5584_vm3, %v5404_v22, -inf  ;;  %vm3979_vm11 = vcmp.gt.f32.partialorder %v469_v35, 0.5  ;;  %v7475_v21 = vcombine.low %v1660_v28, %v1661_v61  ;;  %v5406_v47 = vsel %vm5150_vm10, %v11822_v46, -3.4028235e+38  ;;  %v11956_v28 = vpop.permute.xlu0 %4713  ;;  %14456 = vst [vmem:[#allocation26_spill] sm:$0xff] %v11963_v29  ;;  %v14457_v22 = vld [vmem:[#allocation24_spill] sm:$0xff]  ;;  %v11972_v0 = vpop.f32.mrf.mxu0 }
 0x1c5   :  { %v5782_v59 = vmax.f32 %v5780_v41, %v5781_v44  ;;  %v4235_v17 = vsel %vm3979_vm11, 1, %v14279_v1  ;;  %vm3978_vm12 = vcmp.gt.f32.partialorder %v468_v55, 0.5  ;;  %v6744_v33 = vsel %vm6257_vm0, %v468_v55, -inf  ;;  %v250_v29 = vld [vmem:[%s14172_s0 + $0x390] sm:$0xf] }
 0x1c6   :  { %4866 = vperm.xlu1 %8023, %v4235_v17   ;;  %vm5149_vm13 = vcmp.eq.s32.totalorder %v14455_v54, 1  ;;  %v11954_v43 = vcombine.high %v11350_v20, %v11350_v20  ;;  %v6746_v46 = vsel %vm6257_vm0, %v469_v35, -inf  ;;  %v4234_v31 = vsel %vm3978_vm12, 1, %v14279_v1  ;;  %v11976_v54 = vpop.permute.xlu1 %4722 }
 0x1c7   :  { %v6745_v61 = vmax.f32 %v6743_v9, %v6744_v33  ;;  %v5405_v63 = vsel %vm5149_vm13, %v3076_v24, -3.4028235e+38  ;;  %vm5151_vm14 = vcmp.eq.s32.totalorder %v14457_v22, 1  ;;  %4863 = vperm.xlu0 %8022, %v4234_v31   ;;  %vm3981_vm15 = vcmp.gt.f32.partialorder %v471_v8, 0.5 }
 0x1c8   :  { %v5783_v20 = vsel %vm5584_vm3, %v5405_v63, -inf  ;;  %v7330_v41 = vpack.i.b16 %v11954_v43, %v11954_v43  ;;  %v5785_v35 = vsel %vm5584_vm3, %v5406_v47, -inf  ;;  %v5407_v9 = vsel %vm5151_vm14, %v11882_v27, -3.4028235e+38  ;;  %v473_v27 = vld [vmem:[%s14174_s2 + $0x5f8] sm:$0xff] }
 0x1c9   :  { %v5784_v24 = vmax.f32 %v5782_v59, %v5783_v20  ;;  %v4237_v55 = vsel %vm3981_vm15, 1, %v14279_v1  ;;  %vm3980_vm1 = vcmp.gt.f32.partialorder %v470_v12, 0.5  ;;  %v6747_v17 = vmax.f32 %v6745_v61, %v6746_v46  ;;  %v11983_v59 = vpop.f32.mrf.mxu1  ;;  %v11986_v46 = vpop.permute.xlu0 %4719 }
 0x1ca   :  { %v817_v44 = vrot.slane %v7330_v41, %v8186_v4  ;;  %4872 = vperm.xlu1 %8023, %v4237_v55   ;;  %v6748_v33 = vsel %vm6257_vm0, %v470_v12, -inf  ;;  %v4236_v47 = vsel %vm3980_vm1, 1, %v14279_v1  ;;  %14458 = vst [vmem:[#allocation55_spill] sm:$0xff] %v11983_v59  ;;  %v5787_v63 = vsel %vm5584_vm3, %v5407_v9, -inf  ;;  %v472_v41 = vld [vmem:[%s14174_s2 + $0x5f0] sm:$0xff]  ;;  %v12016_v59 = vpop.permute.xlu1 %4728 }
 0x1cb   :  { %7978 = vmatmul.mubr.msk.bf16.gmra.mxu1 %vm2350_vm4, %v7475_v21  ;;  %v5786_v31 = vmax.f32 %v5784_v24, %v5785_v35  ;;  %v6749_v20 = vmax.f32 %v6747_v17, %v6748_v33  ;;  %4869 = vperm.xlu0 %8022, %v4236_v47   ;;  %v246_v21 = vld [vmem:[%s14172_s0 + $0x380] sm:$0xf]  ;;  %v6750_v12 = vsel %vm6257_vm0, %v471_v8, -inf  ;;  %v3092_v35 = vpop.f32.mrf.mxu0  ;;  %v247_v9 = vld [vmem:[%s14172_s0 + $0x384] sm:$0xf]  ;;  %vm3983_vm2 = vcmp.gt.f32.partialorder %v473_v27, 0.5 }
 0x1cc   :  { %v1027_v22 = vpack.i.b16 %v817_v44, %v817_v44  ;;  %v248_v55 = vld [vmem:[%s14172_s0 + $0x388] sm:$0xf]  ;;  %v249_v8 = vld [vmem:[%s14172_s0 + $0x38c] sm:$0xf]  ;;  %v14461_v17 = vld [vmem:[#allocation23_spill] sm:$0xff]  ;;  %v4239_v33 = vsel %vm3983_vm2, 1, %v14279_v1 }
 0x1cd   :  { %v11988_v61 = vmax.f32 %v5786_v31, %v5787_v63  ;;  %v14460_v44 = vld [vmem:[#allocation58_spill] sm:$0xff]  ;;  %vm5152_vm6 = vcmp.eq.s32.totalorder %v14461_v17, 1  ;;  %v12010_v31 = vpop.f32.mrf.mxu1  ;;  %vm3982_vm7 = vcmp.gt.f32.partialorder %v472_v41, 0.5  ;;  %v6751_v63 = vmax.f32 %v6749_v20, %v6750_v12  ;;  %14463 = vst [vmem:[#allocation23_spill] sm:$0xff] %v12016_v59  ;;  %v12026_v37 = vpop.permute.xlu0 %4725 }
 0x1ce   :  { %v1032_v24 = vrot.slane %v1027_v22, %v8186_v4  ;;  %vm5154_vm5 = vcmp.eq.s32.totalorder %v14460_v44, 1  ;;  %14462 = vst [vmem:[#allocation58_spill] sm:$0xff] %v12010_v31  ;;  %4878 = vperm.xlu1 %8023, %v4239_v33   ;;  %v6752_v22 = vsel %vm6257_vm0, %v472_v41, -inf  ;;  %v5408_v3 = vsel %vm5152_vm6, %v3089_v23, -3.4028235e+38  ;;  %v12021_v31 = vpop.f32.mrf.mxu0 }
 0x1cf   :  { %14459 = vst [vmem:[#allocation24_spill] sm:$0xff] %v11988_v61  ;;  %v6754_v48 = vsel %vm6257_vm0, %v473_v27, -inf  ;;  %v4238_v17 = vsel %vm3982_vm7, 1, %v14279_v1  ;;  %vm5153_vm8 = vcmp.eq.s32.totalorder %v14464_v60, 1  ;;  %v251_v41 = vld [vmem:[%s14172_s0 + $0x394] sm:$0xf]  ;;  %v6753_v27 = vmax.f32 %v6751_v63, %v6752_v22  ;;  %v12031_v61 = vpop.f32.mrf.mxu1 }
 0x1d0   :  { %v7360_v47 = vcombine.low %v1032_v24, %v1032_v24  ;;  %4875 = vperm.xlu0 %8022, %v4238_v17   ;;  %v5410_v23 = vsel %vm5154_vm5, %v11926_v18, -3.4028235e+38  ;;  %v5409_v7 = vsel %vm5153_vm8, %v3092_v35, -3.4028235e+38  ;;  %14465 = vst [vmem:[#allocation25_spill] sm:$0xff] %v12031_v61  ;;  %v12047_v22 = vpop.f32.mrf.mxu0  ;;  %v12050_v61 = vpop.permute.xlu1 %4734  ;;  %vm5201_vm14 = vcmp.eq.s32.totalorder %v11789_v34, 1 }
 0x1d1   :  { %v252_v17 = vld [vmem:[%s14172_s0 + $0x398] sm:$0xf]  ;;  %v253_v18 = vld [vmem:[%s14172_s0 + $0x39c] sm:$0xf]  ;;  %v12044_v35 = vmax.f32 %v6753_v27, %v6754_v48  ;;  %v5796_v44 = vsel %vm5584_vm3, %v5409_v7, -inf  ;;  %v5798_v25 = vsel %vm5584_vm3, %v5410_v23, -inf }
 0x1d2   :  { %v1406_v24 = vsub.bf16 %v246_v21, %v7360_v47  ;;  %v1407_v33 = vsub.bf16 %v247_v9, %v7360_v47  ;;  %v1408_v20 = vsub.bf16 %v248_v55, %v7360_v47  ;;  %v1409_v12 = vsub.bf16 %v249_v8, %v7360_v47  ;;  %v475_v7 = vld [vmem:[%s14174_s2 + $0x608] sm:$0xff] }
 0x1d3   :  { %v1410_v60 = vsub.bf16 %v250_v29, %v7360_v47  ;;  %v5795_v29 = vsel %vm5584_vm3, %v5408_v3, -inf  ;;  %14466 = vst [vmem:[#allocation98_spill] sm:$0xff] %v12044_v35  ;;  %v1411_v63 = vsub.bf16 %v251_v41, %v7360_v47  ;;  %v1412_v6 = vsub.bf16 %v252_v17, %v7360_v47  ;;  %v14468_v41 = vld [vmem:[#allocation57_spill] sm:$0xff] }
 0x1d4   :  { %v1662_v21 = vmax.bf16 %v14279_v1, %v1406_v24  ;;  %v1663_v9 = vmax.bf16 %v14279_v1, %v1407_v33  ;;  %v1664_v55 = vmax.bf16 %v14279_v1, %v1408_v20  ;;  %v1665_v8 = vmax.bf16 %v14279_v1, %v1409_v12 }
 0x1d5   :  { %v5797_v20 = vmax.f32 %v5795_v29, %v5796_v44  ;;  %v1666_v12 = vmax.bf16 %v14279_v1, %v1410_v60  ;;  %v1667_v59 = vmax.bf16 %v14279_v1, %v1411_v63  ;;  %v1413_v3 = vsub.bf16 %v253_v18, %v7360_v47  ;;  %v12063_v60 = vpop.permute.xlu0 %4731  ;;  %v477_v18 = vld [vmem:[%s14174_s2 + $0x618] sm:$0xff]  ;;  %v12086_v29 = vpop.permute.xlu1 %4740 }
 0x1d6   :  { %v7476_v24 = vcombine.low %v1662_v21, %v1663_v9  ;;  %v7477_v33 = vcombine.low %v1664_v55, %v1665_v8  ;;  %vm5155_vm9 = vcmp.eq.s32.totalorder %v14468_v41, 1  ;;  %v1668_v47 = vmax.bf16 %v14279_v1, %v1412_v6  ;;  %v474_v55 = vld [vmem:[%s14174_s2 + $0x600] sm:$0xff]  ;;  %v12072_v8 = vpop.f32.mrf.mxu0  ;;  %14470 = vst [vmem:[#allocation100_spill] sm:$0xff] %v12086_v29 }
 0x1d7   :  { %v12061_v27 = vmax.f32 %v5797_v20, %v5798_v25  ;;  %v5411_v23 = vsel %vm5155_vm9, %v11972_v0, -3.4028235e+38  ;;  %v7478_v21 = vcombine.low %v1666_v12, %v1667_v59  ;;  %v1669_v9 = vmax.bf16 %v14279_v1, %v1413_v3  ;;  %v476_v3 = vld [vmem:[%s14174_s2 + $0x610] sm:$0xff] }
 0x1d8   :  { %v12057_v48 = vpop.f32.mrf.mxu1  ;;  %7981 = vmatprep.mubr.msk.bf16.mxu1 %vm2350_vm4, %v7476_v24  ;;  %vm3985_vm10 = vcmp.gt.f32.partialorder %v475_v7, 0.5  ;;  %v6763_v25 = vsel %vm6257_vm0, %v475_v7, -inf  ;;  %v12080_v59 = vsel %vm5584_vm3, %v5411_v23, -inf  ;;  %vm3984_vm11 = vcmp.gt.f32.partialorder %v474_v55, 0.5  ;;  %v12091_v20 = vpop.f32.mrf.mxu0 }
 0x1d9   :  { %14467 = vst [vmem:[#allocation99_spill] sm:$0xff] %v12057_v48  ;;  %7982 = vmatmul.mubr.msk.bf16.gmra.mxu1 %vm2350_vm4, %v7477_v33  ;;  %v4241_v0 = vsel %vm3985_vm10, 1, %v14279_v1  ;;  %v6762_v6 = vsel %vm6257_vm0, %v474_v55, -inf  ;;  %v7479_v44 = vcombine.low %v1668_v47, %v1669_v9  ;;  %v4240_v63 = vsel %vm3984_vm11, 1, %v14279_v1  ;;  %v12098_v7 = vpop.permute.xlu0 %4737 }
 0x1da   :  { %v12075_v17 = vpop.f32.mrf.mxu1  ;;  %7985 = vmatprep.mubr.msk.bf16.mxu1 %vm2350_vm4, %v7478_v21  ;;  %4884 = vperm.xlu1 %8023, %v4241_v0   ;;  %v6764_v24 = vmax.f32 %v6762_v6, %v6763_v25  ;;  %vm3987_vm12 = vcmp.gt.f32.partialorder %v477_v18, 0.5  ;;  %vm3986_vm13 = vcmp.gt.f32.partialorder %v476_v3, 0.5  ;;  %v6765_v47 = vsel %vm6257_vm0, %v476_v3, -inf  ;;  %v12104_v9 = vpop.f32.mrf.mxu0  ;;  %v479_v3 = vld [vmem:[%s14174_s2 + $0x628] sm:$0xff] }
 0x1db   :  { %14469 = vst [vmem:[#allocation57_spill] sm:$0xff] %v12075_v17  ;;  %4881 = vperm.xlu0 %8022, %v4240_v63   ;;  %v4243_v41 = vsel %vm3987_vm12, 1, %v14279_v1  ;;  %v4242_v33 = vsel %vm3986_vm13, 1, %v14279_v1  ;;  %vm5200_vm15 = vcmp.eq.s32.totalorder %v11807_v51, 1  ;;  %vm5202_vm1 = vcmp.eq.s32.totalorder %v11836_v32, 1  ;;  %v478_v17 = vld [vmem:[%s14174_s2 + $0x620] sm:$0xff] }
 0x1dc   :  { %v12093_v12 = vpop.f32.mrf.mxu1  ;;  %v6766_v35 = vmax.f32 %v6764_v24, %v6765_v47  ;;  %v12132_v63 = vpop.f32.mrf.mxu0  ;;  %v5456_v48 = vsel %vm5200_vm15, %v11442_v30, -3.4028235e+38  ;;  %v5457_v32 = vsel %vm5201_vm14, %v11467_v15, -3.4028235e+38  ;;  %vm3989_vm2 = vcmp.gt.f32.partialorder %v479_v3, 0.5 }
 0x1dd   :  { %14471 = vst [vmem:[#allocation101_spill] sm:$0xff] %v12093_v12  ;;  %v12111_v12 = vpop.permute.xlu1 %4746  ;;  %v12124_v23 = vpop.permute.xlu0 %4743  ;;  %v5663_v25 = vrot.slane %v11093_v40, 4  ;;  %v5458_v0 = vsel %vm5202_vm1, %v11428_v14, -3.4028235e+38  ;;  %v4245_v24 = vsel %vm3989_vm2, 1, %v14279_v1  ;;  %vm3988_vm5 = vcmp.gt.f32.partialorder %v478_v17, 0.5 }
 0x1de   :  { %4890 = vperm.xlu1 %8023, %v4243_v41   ;;  %v12106_v55 = vpop.f32.mrf.mxu1  ;;  %14476 = vst [vmem:[#allocation103_spill] sm:$0xff] %v12111_v12  ;;  %14482 = vst [vmem:[#allocation104_spill] sm:$0xff] %v12124_v23  ;;  %v5921_v34 = vsel %vm5584_vm3, %v5456_v48, -inf  ;;  %v5922_v15 = vsel %vm5584_vm3, %v5457_v32, -inf  ;;  %v481_v14 = vld [vmem:[%s14174_s2 + $0x638] sm:$0xff]  ;;  %v6769_v32 = vsel %vm6257_vm0, %v478_v17, -inf }
 0x1df   :  { %14473 = vst [vmem:[#allocation102_spill] sm:$0xff] %v12106_v55  ;;  %4887 = vperm.xlu0 %8022, %v4242_v33   ;;  %v14487_v55 = vld [vmem:[#allocation59_spill] sm:$0xff]  ;;  %vm5203_vm6 = vcmp.eq.s32.totalorder %v11826_v19, 1  ;;  %v254_v23 = vld [vmem:[%s14172_s0 + $0x3a0] sm:$0xf]  ;;  %vm3991_vm7 = vcmp.gt.f32.partialorder %v481_v14, 0.5 }
 0x1e0   :  { %v12134_v6 = vpop.f32.mrf.mxu1  ;;  %v5642_v21 = vrot.slane %v14487_v55, 4  ;;  %v257_v12 = vld [vmem:[%s14172_s0 + $0x3ac] sm:$0xf]  ;;  %vm5204_vm8 = vcmp.eq.s32.totalorder %v11889_v26, 1  ;;  %vm5205_vm12 = vcmp.eq.s32.totalorder %v11872_v62, 1  ;;  %vm5206_vm2 = vcmp.eq.s32.totalorder %v11919_v36, 1 }
 0x1e1   :  { %7986 = vmatmul.mubr.msk.bf16.gmra.mxu1 %vm2350_vm4, %v7479_v44  ;;  %v667_v44 = vunpack.i.h.s16 %v11954_v43  ;;  %v6767_v43 = vsel %vm6257_vm0, %v477_v18, -inf  ;;  %14484 = vst [vmem:[#allocation105_spill] sm:$0xff] %v12134_v6  ;;  %v12149_v30 = vpop.permute.xlu1 %4752  ;;  %v12154_v18 = vpop.f32.mrf.mxu0  ;;  %v5684_v6 = vrot.slane %v11237_v10, 4 }
 0x1e2   :  { %v6768_v51 = vmax.f32 %v6766_v35, %v6767_v43  ;;  %14488 = vst [vmem:[#allocation59_spill] sm:$0xff] %v12149_v30  ;;  %4896 = vperm.xlu1 %8023, %v4245_v24   ;;  %v5924_v24 = vsel %vm5584_vm3, %v5458_v0, -inf  ;;  %v255_v35 = vld [vmem:[%s14172_s0 + $0x3a4] sm:$0xf]  ;;  %v12177_v17 = vmax.f32 %v14487_v55, %v5642_v21  ;;  %v5923_v43 = vmax.f32 %v5921_v34, %v5922_v15  ;;  %v256_v0 = vld [vmem:[%s14172_s0 + $0x3a8] sm:$0xf] }
 0x1e3   :  { %v699_v33 = vpack.i.b16 %v667_v44, %v667_v44  ;;  %v4244_v44 = vsel %vm3988_vm5, 1, %v14279_v1  ;;  %v6771_v21 = vsel %vm6257_vm0, %v479_v3, -inf  ;;  %v12194_v55 = vpop.f32.mrf.mxu0  ;;  %v5459_v34 = vsel %vm5203_vm6, %v11453_v13, -3.4028235e+38 }
 0x1e4   :  { %4893 = vperm.xlu0 %8022, %v4244_v44   ;;  %v6770_v48 = vmax.f32 %v6768_v51, %v6769_v32  ;;  %14494 = vst [vmem:[#allocation108_spill] sm:$0xff] %v12177_v17  ;;  %v12180_v44 = vmax.f32 %v11093_v40, %v5663_v25  ;;  %v480_v40 = vld [vmem:[%s14174_s2 + $0x630] sm:$0xff]  ;;  %v12201_v15 = vmax.f32 %v5923_v43, %v5924_v24  ;;  %vm5207_vm5 = vcmp.eq.s32.totalorder %v11911_v45, 1 }
 0x1e5   :  { %v821_v41 = vrot.slane %v699_v33, %v8186_v4  ;;  %v12159_v33 = vpop.f32.mrf.mxu1  ;;  %v12205_v32 = vpop.permute.xlu1 %4758  ;;  %vm3990_vm9 = vcmp.gt.f32.partialorder %v480_v40, 0.5  ;;  %v6773_v19 = vsel %vm6257_vm0, %v480_v40, -inf  ;;  %v261_v40 = vld [vmem:[%s14172_s0 + $0x3bc] sm:$0xf] }
 0x1e6   :  { %14489 = vst [vmem:[#allocation106_spill] sm:$0xff] %v12159_v33  ;;  %14495 = vst [vmem:[#allocation109_spill] sm:$0xff] %v12180_v44 }
 0x1e7   :  { %v1034_v47 = vpack.i.b16 %v821_v41, %v821_v41  ;;  %v12165_v41 = vpop.permute.xlu0 %4749  ;;  %v12196_v25 = vpop.f32.mrf.mxu1 }
 0x1e8   :  { %14493 = vst [vmem:[#allocation107_spill] sm:$0xff] %v12165_v41  ;;  %14496 = vst [vmem:[#allocation110_spill] sm:$0xff] %v12196_v25  ;;  %v6775_v41 = vsel %vm6257_vm0, %v481_v14, -inf  ;;  %v6772_v25 = vmax.f32 %v6770_v48, %v6771_v21  ;;  %v259_v14 = vld [vmem:[%s14172_s0 + $0x3b4] sm:$0xf] }
 0x1e9   :  { %v1039_v30 = vrot.slane %v1034_v47, %v8186_v4  ;;  %v5705_v47 = vrot.slane %v11387_v52, 4  ;;  %v12223_v48 = vpop.f32.mrf.mxu1  ;;  %v260_v21 = vld [vmem:[%s14172_s0 + $0x3b8] sm:$0xf] }
 0x1ea   :  { %14497 = vst [vmem:[#allocation111_spill] sm:$0xff] %v12223_v48 }
 0x1eb   :  { %v7361_v51 = vcombine.low %v1039_v30, %v1039_v30  ;;  %v4247_v30 = vsel %vm3991_vm7, 1, %v14279_v1  ;;  %v12209_v13 = vpop.permute.xlu0 %4755  ;;  %vm5209_vm7 = vcmp.eq.s32.totalorder %v11943_v53, 1 }
 0x1ec   :  { %4902 = vperm.xlu1 %8023, %v4247_v30   ;;  %v14500_v30 = vld [vmem:[#allocation61_spill] sm:$0xff]  ;;  %v5465_v45 = vsel %vm5209_vm7, %v11614_v56, -3.4028235e+38 }
 0x1ed   :  { %v1414_v3 = vsub.bf16 %v254_v23, %v7361_v51  ;;  %v1415_v17 = vsub.bf16 %v255_v35, %v7361_v51  ;;  %v1416_v44 = vsub.bf16 %v256_v0, %v7361_v51  ;;  %v1417_v33 = vsub.bf16 %v257_v12, %v7361_v51  ;;  %v258_v12 = vld [vmem:[%s14172_s0 + $0x3b0] sm:$0xf]  ;;  %v12221_v35 = vpop.f32.mrf.mxu0 }
 0x1ee   :  { %v12226_v0 = vmax.f32 %v11237_v10, %v5684_v6  ;;  %vm5156_vm10 = vcmp.eq.s32.totalorder %v14500_v30, 1  ;;  %v5460_v10 = vsel %vm5204_vm8, %v11496_v38, -3.4028235e+38  ;;  %v1419_v30 = vsub.bf16 %v259_v14, %v7361_v51 }
 0x1ef   :  { %v1670_v43 = vmax.bf16 %v14279_v1, %v1414_v3  ;;  %v1671_v24 = vmax.bf16 %v14279_v1, %v1415_v17  ;;  %v1672_v29 = vmax.bf16 %v14279_v1, %v1416_v44  ;;  %v1673_v23 = vmax.bf16 %v14279_v1, %v1417_v33  ;;  %v12250_v38 = vpop.f32.mrf.mxu0 }
 0x1f0   :  { %14498 = vst [vmem:[#allocation112_spill] sm:$0xff] %v12226_v0  ;;  %v12229_v17 = vmax.f32 %v11387_v52, %v5705_v47  ;;  %v4246_v33 = vsel %vm3990_vm9, 1, %v14279_v1  ;;  %v6774_v44 = vmax.f32 %v6772_v25, %v6773_v19  ;;  %v5926_v47 = vsel %vm5584_vm3, %v5459_v34, -inf  ;;  %v12246_v0 = vpop.permute.xlu1 %4764  ;;  %v14515_v34 = vld [vmem:[#allocation89_spill] sm:$0xff] }
 0x1f1   :  { %v7480_v6 = vcombine.low %v1670_v43, %v1671_v24  ;;  %v7481_v52 = vcombine.low %v1672_v29, %v1673_v23  ;;  %4899 = vperm.xlu0 %8022, %v4246_v33   ;;  %v5412_v25 = vsel %vm5156_vm10, %v12047_v22, -3.4028235e+38  ;;  %v1418_v19 = vsub.bf16 %v258_v12, %v7361_v51  ;;  %v14503_v43 = vld [vmem:[#allocation62_spill] sm:$0xff] }
 0x1f2   :  { %14499 = vst [vmem:[#allocation113_spill] sm:$0xff] %v12229_v17  ;;  %v12244_v3 = vmax.f32 %v6774_v44, %v6775_v41  ;;  %v5927_v17 = vmax.f32 %v12201_v15, %v5926_v47  ;;  %v1420_v48 = vsub.bf16 %v260_v21, %v7361_v51  ;;  %v1421_v26 = vsub.bf16 %v261_v40, %v7361_v51  ;;  %v12259_v15 = vpop.permute.xlu0 %4761  ;;  %v483_v12 = vld [vmem:[%s14174_s2 + $0x648] sm:$0xff]  ;;  %v14504_v21 = vld [vmem:[#allocation28_spill] sm:$0xff] }
 0x1f3   :  { %7989 = vmatprep.mubr.msk.bf16.mxu1 %vm2350_vm4, %v7480_v6  ;;  %vm5158_vm11 = vcmp.eq.s32.totalorder %v14503_v43, 1  ;;  %v5928_v22 = vsel %vm5584_vm3, %v5460_v10, -inf  ;;  %v1674_v41 = vmax.bf16 %v14279_v1, %v1418_v19  ;;  %v1675_v51 = vmax.bf16 %v14279_v1, %v1419_v30  ;;  %v14505_v40 = vld [vmem:[#allocation60_spill] sm:$0xff]  ;;  %v12281_v19 = vpop.f32.mrf.mxu0 }
 0x1f4   :  { %14501 = vst [vmem:[#allocation61_spill] sm:$0xff] %v12244_v3  ;;  %7990 = vmatmul.mubr.msk.bf16.gmra.mxu1 %vm2350_vm4, %v7481_v52  ;;  %v1676_v24 = vmax.bf16 %v14279_v1, %v1420_v48  ;;  %v1677_v23 = vmax.bf16 %v14279_v1, %v1421_v26  ;;  %v5414_v33 = vsel %vm5158_vm11, %v12021_v31, -3.4028235e+38  ;;  %v5802_v44 = vsel %vm5584_vm3, %v5412_v25, -inf  ;;  %v482_v48 = vld [vmem:[%s14174_s2 + $0x640] sm:$0xff]  ;;  %v12287_v26 = vpop.permute.xlu1 %4770 }
 0x1f5   :  { %vm5159_vm13 = vcmp.eq.s32.totalorder %v14504_v21, 1  ;;  %vm5157_vm14 = vcmp.eq.s32.totalorder %v14505_v40, 1  ;;  %v12277_v10 = vmax.f32 %v5927_v17, %v5928_v22  ;;  %v7482_v47 = vcombine.low %v1674_v41, %v1675_v51  ;;  %v12316_v21 = vpop.f32.mrf.mxu0 }
 0x1f6   :  { %v12252_v29 = vpop.f32.mrf.mxu1  ;;  %v5415_v6 = vsel %vm5159_vm13, %v12072_v8, -3.4028235e+38  ;;  %v5413_v52 = vsel %vm5157_vm14, %v12091_v20, -3.4028235e+38  ;;  %v5461_v31 = vsel %vm5205_vm12, %v11535_v2, -3.4028235e+38  ;;  %v7483_v25 = vcombine.low %v1676_v24, %v1677_v23 }
 0x1f7   :  { %14502 = vst [vmem:[#allocation114_spill] sm:$0xff] %v12252_v29  ;;  %vm3993_vm15 = vcmp.gt.f32.partialorder %v483_v12, 0.5  ;;  %v6784_v30 = vsel %vm6257_vm0, %v483_v12, -inf  ;;  %v14506_v8 = vmax.f32 %v12061_v27, %v12080_v59  ;;  %7993 = vmatprep.mubr.msk.bf16.mxu1 %vm2350_vm4, %v7482_v47  ;;  %vm3992_vm1 = vcmp.gt.f32.partialorder %v482_v48, 0.5  ;;  %v485_v2 = vld [vmem:[%s14174_s2 + $0x658] sm:$0xff]  ;;  %v12303_v59 = vpop.permute.xlu0 %4767 }
 0x1f8   :  { %v12268_v14 = vpop.f32.mrf.mxu1  ;;  %v4249_v20 = vsel %vm3993_vm15, 1, %v14279_v1  ;;  %v6783_v62 = vsel %vm6257_vm0, %v482_v48, -inf  ;;  %v5804_v22 = vsel %vm5584_vm3, %v5413_v52, -inf  ;;  %v4248_v41 = vsel %vm3992_vm1, 1, %v14279_v1  ;;  %v12336_v47 = vpop.permute.xlu1 %4776 }
 0x1f9   :  { %v5803_v17 = vmax.f32 %v14506_v8, %v5802_v44  ;;  %4908 = vperm.xlu1 %8023, %v4249_v20   ;;  %v6785_v27 = vmax.f32 %v6783_v62, %v6784_v30  ;;  %v5806_v24 = vsel %vm5584_vm3, %v5414_v33, -inf  ;;  %v12308_v23 = vsel %vm5584_vm3, %v5415_v6, -inf  ;;  %4905 = vperm.xlu0 %8022, %v4248_v41   ;;  %v484_v44 = vld [vmem:[%s14174_s2 + $0x650] sm:$0xff]  ;;  %v12341_v30 = vpop.f32.mrf.mxu0  ;;  %v14509_v41 = vld [vmem:[#allocation66_spill] sm:$0xff] }
 0x1fa   :  { %v12289_v43 = vpop.f32.mrf.mxu1  ;;  %v12311_v12 = vsel %vm5584_vm3, %v5461_v31, -inf  ;;  %vm3995_vm6 = vcmp.gt.f32.partialorder %v485_v2, 0.5  ;;  %v12324_v33 = vcombine.high %v11670_v57, %v11670_v57  ;;  %v5462_v52 = vsel %vm5206_vm2, %v11481_v39, -3.4028235e+38  ;;  %v14507_v31 = vld [vmem:[#allocation64_spill] sm:$0xff] }
 0x1fb   :  { %v5931_v40 = vmax.f32 %v12277_v10, %v12311_v12  ;;  %v5805_v6 = vmax.f32 %v5803_v17, %v5804_v22  ;;  %v4251_v10 = vsel %vm3995_vm6, 1, %v14279_v1  ;;  %vm5208_vm8 = vcmp.eq.s32.totalorder %v11956_v28, 1  ;;  %v12353_v62 = vpop.permute.xlu0 %4773  ;;  %v12374_v56 = vpop.f32.mrf.mxu0 }
 0x1fc   :  { %7994 = vmatmul.mubr.msk.bf16.gmra.mxu1 %vm2350_vm4, %v7483_v25  ;;  %v12326_v48 = vpop.f32.mrf.mxu1  ;;  %vm5161_vm9 = vcmp.eq.s32.totalorder %v10979_v50, 1  ;;  %vm3994_vm10 = vcmp.gt.f32.partialorder %v484_v44, 0.5  ;;  %v6786_v57 = vsel %vm6257_vm0, %v484_v44, -inf  ;;  %vm5160_vm11 = vcmp.eq.s32.totalorder %v14507_v31, 1 }
 0x1fd   :  { %4914 = vperm.xlu1 %8023, %v4251_v10   ;;  %v5417_v25 = vsel %vm5161_vm9, %v12194_v55, -3.4028235e+38  ;;  %v4250_v39 = vsel %vm3994_vm10, 1, %v14279_v1  ;;  %v6787_v36 = vmax.f32 %v6785_v27, %v6786_v57  ;;  %v5463_v8 = vsel %vm5207_vm5, %v11513_v16, -3.4028235e+38  ;;  %v487_v55 = vld [vmem:[%s14174_s2 + $0x668] sm:$0xff] }
 0x1fe   :  { %v5932_v50 = vsel %vm5584_vm3, %v5462_v52, -inf  ;;  %v5416_v17 = vsel %vm5160_vm11, %v12132_v63, -3.4028235e+38  ;;  %4911 = vperm.xlu0 %8022, %v4250_v39   ;;  %v7331_v20 = vpack.i.b16 %v12324_v33, %v12324_v33  ;;  %v12355_v22 = vpop.f32.mrf.mxu1  ;;  %vm5162_vm12 = vcmp.eq.s32.totalorder %v14509_v41, 1  ;;  %v486_v52 = vld [vmem:[%s14174_s2 + $0x660] sm:$0xff] }
 0x1ff   :  { %14508 = vst [vmem:[#allocation62_spill] sm:$0xff] %v12355_v22  ;;  %v5464_v16 = vsel %vm5208_vm8, %v11589_v58, -3.4028235e+38  ;;  %vm5210_vm13 = vcmp.eq.s32.totalorder %v11986_v46, 1  ;;  %v5807_v63 = vmax.f32 %v5805_v6, %v5806_v24  ;;  %v5817_v27 = vsel %vm5584_vm3, %v5417_v25, -inf  ;;  %v14510_v10 = vld [vmem:[#allocation65_spill] sm:$0xff]  ;;  %v12379_v6 = vpop.permute.xlu1 %4782 }
 0x200   :  { %v6788_v12 = vsel %vm6257_vm0, %v485_v2, -inf  ;;  %v825_v44 = vrot.slane %v7331_v20, %v8186_v4  ;;  %v5418_v28 = vsel %vm5162_vm12, %v12104_v9, -3.4028235e+38  ;;  %v5816_v58 = vsel %vm5584_vm3, %v5416_v17, -inf  ;;  %v12381_v57 = vpop.f32.mrf.mxu1  ;;  %v262_v9 = vld [vmem:[%s14172_s0 + $0x3c0] sm:$0xf] }
 0x201   :  { %vm5163_vm14 = vcmp.eq.s32.totalorder %v14510_v10, 1  ;;  %vm3997_vm15 = vcmp.gt.f32.partialorder %v487_v55, 0.5  ;;  %v5942_v53 = vsel %vm5584_vm3, %v5464_v16, -inf  ;;  %v5943_v46 = vsel %vm5584_vm3, %v5465_v45, -inf  ;;  %14511 = vst [vmem:[#allocation28_spill] sm:$0xff] %v12381_v57  ;;  %v12394_v16 = vpop.permute.xlu0 %4779 }
 0x202   :  { %v5466_v2 = vsel %vm5210_vm13, %v11570_v11, -3.4028235e+38  ;;  %v1041_v24 = vpack.i.b16 %v825_v44, %v825_v44  ;;  %v5818_v31 = vmax.f32 %v5816_v58, %v5817_v27  ;;  %v4253_v25 = vsel %vm3997_vm15, 1, %v14279_v1  ;;  %v263_v11 = vld [vmem:[%s14172_s0 + $0x3c4] sm:$0xf]  ;;  %v12406_v44 = vpop.f32.mrf.mxu0 }
 0x203   :  { %vm3996_vm1 = vcmp.gt.f32.partialorder %v486_v52, 0.5  ;;  %v6789_v39 = vmax.f32 %v6787_v36, %v6788_v12  ;;  %v5419_v17 = vsel %vm5163_vm14, %v12154_v18, -3.4028235e+38  ;;  %vm5211_vm2 = vcmp.eq.s32.totalorder %v11976_v54, 1  ;;  %4920 = vperm.xlu1 %8023, %v4253_v25   ;;  %v264_v36 = vld [vmem:[%s14172_s0 + $0x3c8] sm:$0xf] }
 0x204   :  { %v1046_v20 = vrot.slane %v1041_v24, %v8186_v4  ;;  %v4252_v41 = vsel %vm3996_vm1, 1, %v14279_v1  ;;  %v12397_v45 = vsel %vm5584_vm3, %v5463_v8, -inf  ;;  %v12399_v27 = vmax.f32 %v5931_v40, %v5932_v50  ;;  %v265_v40 = vld [vmem:[%s14172_s0 + $0x3cc] sm:$0xf]  ;;  %v12414_v50 = vpop.f32.mrf.mxu1  ;;  %v14513_v54 = vld [vmem:[#allocation29_spill] sm:$0xff] }
 0x205   :  { %v5945_v18 = vsel %vm5584_vm3, %v5466_v2, -inf  ;;  %v6790_v12 = vsel %vm6257_vm0, %v486_v52, -inf  ;;  %4917 = vperm.xlu0 %8022, %v4252_v41   ;;  %v5819_v58 = vsel %vm5584_vm3, %v5418_v28, -inf  ;;  %v5944_v10 = vmax.f32 %v5942_v53, %v5943_v46  ;;  %14512 = vst [vmem:[#allocation60_spill] sm:$0xff] %v12414_v50  ;;  %v489_v53 = vld [vmem:[%s14174_s2 + $0x678] sm:$0xff]  ;;  %v12444_v41 = vpop.f32.mrf.mxu0 }
 0x206   :  { %v12409_v24 = vcombine.low %v1046_v20, %v1046_v20  ;;  %v6791_v8 = vmax.f32 %v6789_v39, %v6790_v12  ;;  %v12417_v2 = vmax.f32 %v5807_v63, %v12308_v23  ;;  %v12420_v52 = vsel %vm5584_vm3, %v5419_v17, -inf  ;;  %v12438_v17 = vpop.permute.xlu1 %4788  ;;  %v12451_v12 = vpop.f32.mrf.mxu1 }
 0x207   :  { %v12422_v25 = vmax.f32 %v5818_v31, %v5819_v58  ;;  %v5467_v28 = vsel %vm5211_vm2, %v11601_v5, -3.4028235e+38  ;;  %v12430_v46 = vmax.f32 %v5944_v10, %v5945_v18  ;;  %v488_v31 = vld [vmem:[%s14174_s2 + $0x670] sm:$0xff]  ;;  %vm5164_vm5 = vcmp.eq.s32.totalorder %v14513_v54, 1  ;;  %14514 = vst [vmem:[#allocation64_spill] sm:$0xff] %v12451_v12 }
 0x208   :  { %v1422_v39 = vsub.bf16 %v262_v9, %v12409_v24  ;;  %v1423_v23 = vsub.bf16 %v263_v11, %v12409_v24  ;;  %v1424_v63 = vsub.bf16 %v264_v36, %v12409_v24  ;;  %vm5212_vm6 = vcmp.eq.s32.totalorder %v12026_v37, 1  ;;  %v12449_v36 = vpop.permute.xlu0 %4785  ;;  %v269_v37 = vld [vmem:[%s14172_s0 + $0x3dc] sm:$0xf] }
 0x209   :  { %v1425_v5 = vsub.bf16 %v265_v40, %v12409_v24  ;;  %v6792_v20 = vsel %vm6257_vm0, %v487_v55, -inf  ;;  %vm3999_vm7 = vcmp.gt.f32.partialorder %v489_v53, 0.5  ;;  %v5420_v58 = vsel %vm5164_vm5, %v12250_v38, -3.4028235e+38  ;;  %v266_v55 = vld [vmem:[%s14172_s0 + $0x3d0] sm:$0xf] }
 0x20a   :  { %v1678_v9 = vmax.bf16 %v14279_v1, %v1422_v39  ;;  %v1679_v11 = vmax.bf16 %v14279_v1, %v1423_v23  ;;  %v1680_v18 = vmax.bf16 %v14279_v1, %v1424_v63  ;;  %v4255_v40 = vsel %vm3999_vm7, 1, %v14279_v1  ;;  %v267_v38 = vld [vmem:[%s14172_s0 + $0x3d4] sm:$0xf] }
 0x20b   :  { %v1681_v10 = vmax.bf16 %v14279_v1, %v1425_v5  ;;  %vm3998_vm8 = vcmp.gt.f32.partialorder %v488_v31, 0.5  ;;  %4926 = vperm.xlu1 %8023, %v4255_v40   ;;  %v6793_v63 = vmax.f32 %v6791_v8, %v6792_v20  ;;  %v6794_v54 = vsel %vm6257_vm0, %v488_v31, -inf  ;;  %v268_v5 = vld [vmem:[%s14172_s0 + $0x3d8] sm:$0xf]  ;;  %v12472_v8 = vpop.f32.mrf.mxu0 }
 0x20c   :  { %v7484_v39 = vcombine.low %v1678_v9, %v1679_v11  ;;  %v4254_v23 = vsel %vm3998_vm8, 1, %v14279_v1  ;;  %v5947_v51 = vsel %vm5584_vm3, %v5467_v28, -inf  ;;  %v5468_v9 = vsel %vm5212_vm6, %v14515_v34, -3.4028235e+38  ;;  %v12482_v34 = vpop.permute.xlu1 %4794 }
 0x20d   :  { %v7485_v11 = vcombine.low %v1680_v18, %v1681_v10  ;;  %v6796_v40 = vsel %vm6257_vm0, %v489_v53, -inf  ;;  %4923 = vperm.xlu0 %8022, %v4254_v23   ;;  %v5822_v31 = vmax.f32 %v12422_v25, %v12420_v52  ;;  %v5823_v20 = vsel %vm5584_vm3, %v5420_v58, -inf  ;;  %v14517_v18 = vld [vmem:[#allocation23_spill] sm:$0xff] }
 0x20e   :  { %7997 = vmatprep.mubr.msk.bf16.mxu1 %vm2350_vm4, %v7484_v39  ;;  %v6795_v3 = vmax.f32 %v6793_v63, %v6794_v54  ;;  %v1426_v28 = vsub.bf16 %v266_v55, %v12409_v24  ;;  %vm5213_vm9 = vcmp.eq.s32.totalorder %v14517_v18, 1  ;;  %v5948_v10 = vmax.f32 %v12430_v46, %v5947_v51  ;;  %v14518_v55 = vld [vmem:[#allocation30_spill] sm:$0xff]  ;;  %v12496_v63 = vpop.permute.xlu0 %4791 }
 0x20f   :  { %7998 = vmatmul.mubr.msk.bf16.gmra.mxu1 %vm2350_vm4, %v7485_v11  ;;  %v1427_v52 = vsub.bf16 %v267_v38, %v12409_v24  ;;  %v1428_v25 = vsub.bf16 %v268_v5, %v12409_v24  ;;  %v5949_v58 = vsel %vm5584_vm3, %v5468_v9, -inf  ;;  %vm5165_vm10 = vcmp.eq.s32.totalorder %v14518_v55, 1  ;;  %v491_v9 = vld [vmem:[%s14174_s2 + $0x688] sm:$0xff] }
 0x210   :  { %v12493_v39 = vmax.f32 %v6795_v3, %v6796_v40  ;;  %v1682_v23 = vmax.bf16 %v14279_v1, %v1426_v28  ;;  %v5421_v51 = vsel %vm5165_vm10, %v12316_v21, -3.4028235e+38  ;;  %v1429_v38 = vsub.bf16 %v269_v37, %v12409_v24  ;;  %v12507_v3 = vpop.f32.mrf.mxu0  ;;  %v14521_v11 = vld [vmem:[#allocation22_spill] sm:$0xff]  ;;  %v14522_v28 = vld [vmem:[#allocation24_spill] sm:$0xff] }
 0x211   :  { %v1683_v46 = vmax.bf16 %v14279_v1, %v1427_v52  ;;  %v1684_v5 = vmax.bf16 %v14279_v1, %v1428_v25  ;;  %v5824_v21 = vmax.f32 %v5822_v31, %v5823_v20  ;;  %v5950_v24 = vmax.f32 %v5948_v10, %v5949_v58  ;;  %v14524_v40 = vld [vmem:[#allocation90_spill] sm:$0xff]  ;;  %v12527_v31 = vpop.permute.xlu1 %4800  ;;  %v14526_v58 = vld [vmem:[#allocation32_spill] sm:$0xff] }
 0x212   :  { %14519 = vst [vmem:[#allocation65_spill] sm:$0xff] %v12493_v39  ;;  %vm5214_vm11 = vcmp.eq.s32.totalorder %v12063_v60, 1  ;;  %v1685_v25 = vmax.bf16 %v14279_v1, %v1429_v38  ;;  %v5469_v55 = vsel %vm5213_vm9, %v14524_v40, -3.4028235e+38  ;;  %vm4001_vm12 = vcmp.gt.f32.partialorder %v491_v9, 0.5  ;;  %v12535_v18 = vpop.f32.mrf.mxu0  ;;  %v492_v60 = vld [vmem:[%s14174_s2 + $0x690] sm:$0xff] }
 0x213   :  { %v12484_v53 = vpop.f32.mrf.mxu1  ;;  %v7486_v37 = vcombine.low %v1682_v23, %v1683_v46  ;;  %v5810_v10 = vrot.slane %v12417_v2, 4  ;;  %vm5166_vm13 = vcmp.eq.s32.totalorder %v14526_v58, 1  ;;  %v4257_v46 = vsel %vm4001_vm12, 1, %v14279_v1 }
 0x214   :  { %14516 = vst [vmem:[#allocation66_spill] sm:$0xff] %v12484_v53  ;;  %v12513_v53 = vmax.f32 %v12399_v27, %v12397_v45  ;;  %v5825_v45 = vsel %vm5584_vm3, %v5421_v51, -inf  ;;  %v6805_v27 = vsel %vm6257_vm0, %v491_v9, -inf  ;;  %v7487_v23 = vcombine.low %v1684_v5, %v1685_v25  ;;  %v493_v51 = vld [vmem:[%s14174_s2 + $0x698] sm:$0xff]  ;;  %v14527_v9 = vld [vmem:[#allocation87_spill] sm:$0xff]  ;;  %4932 = vperm.xlu1 %8023, %v4257_v46  }
 0x215   :  { %v12498_v54 = vpop.f32.mrf.mxu1  ;;  %8001 = vmatprep.mubr.msk.bf16.mxu1 %vm2350_vm4, %v7486_v37  ;;  %v5422_v38 = vsel %vm5166_vm13, %v12221_v35, -3.4028235e+38  ;;  %v5470_v40 = vsel %vm5214_vm11, %v14527_v9, -3.4028235e+38  ;;  %v12545_v37 = vpop.permute.xlu0 %4797  ;;  %v5951_v25 = vsel %vm5584_vm3, %v5469_v55, -inf  ;;  %vm4003_vm15 = vcmp.gt.f32.partialorder %v493_v51, 0.5 }
 0x216   :  { %14520 = vst [vmem:[#allocation29_spill] sm:$0xff] %v12498_v54  ;;  %v490_v54 = vld [vmem:[%s14174_s2 + $0x680] sm:$0xff]  ;;  %v5936_v46 = vrot.slane %v12513_v53, 4  ;;  %v5952_v9 = vmax.f32 %v5950_v24, %v5951_v25  ;;  %vm5215_vm2 = vcmp.eq.s32.totalorder %v12050_v61, 1  ;;  %v5953_v55 = vsel %vm5584_vm3, %v5470_v40, -inf }
 0x217   :  { %v12515_v52 = vpop.f32.mrf.mxu1  ;;  %vm4000_vm14 = vcmp.gt.f32.partialorder %v490_v54, 0.5  ;;  %v6804_v58 = vsel %vm6257_vm0, %v490_v54, -inf  ;;  %8002 = vmatmul.mubr.msk.bf16.gmra.mxu1 %vm2350_vm4, %v7487_v23  ;;  %v669_v54 = vunpack.i.h.s16 %v12324_v33  ;;  %v5827_v23 = vsel %vm5584_vm3, %v5422_v38, -inf  ;;  %v14531_v61 = vld [vmem:[#allocation69_spill] sm:$0xff] }
 0x218   :  { %14523 = vst [vmem:[#allocation89_spill] sm:$0xff] %v12515_v52  ;;  %v5826_v52 = vmax.f32 %v5824_v21, %v5825_v45  ;;  %v6806_v35 = vmax.f32 %v6804_v58, %v6805_v27  ;;  %v4259_v21 = vsel %vm4003_vm15, 1, %v14279_v1  ;;  %v12561_v45 = vpop.f32.mrf.mxu0  ;;  %vm4002_vm5 = vcmp.gt.f32.partialorder %v492_v60, 0.5  ;;  %v14532_v25 = vld [vmem:[#allocation45_spill] sm:$0xff] }
 0x219   :  { %v12529_v20 = vpop.f32.mrf.mxu1  ;;  %4938 = vperm.xlu1 %8023, %v4259_v21   ;;  %v6807_v33 = vsel %vm6257_vm0, %v492_v60, -inf  ;;  %vm5170_vm6 = vcmp.eq.s32.totalorder %v14531_v61, 1  ;;  %v4258_v40 = vsel %vm4002_vm5, 1, %v14279_v1  ;;  %v5471_v22 = vsel %vm5215_vm2, %v14532_v25, -3.4028235e+38 }
 0x21a   :  { %14525 = vst [vmem:[#allocation23_spill] sm:$0xff] %v12529_v20  ;;  %v4256_v20 = vsel %vm4000_vm14, 1, %v14279_v1  ;;  %v5828_v58 = vmax.f32 %v5826_v52, %v5827_v23  ;;  %v5954_v39 = vmax.f32 %v5952_v9, %v5953_v55  ;;  %v701_v38 = vpack.i.b16 %v669_v54, %v669_v54  ;;  %v12596_v55 = vpop.f32.mrf.mxu0 }
 0x21b   :  { %v12547_v5 = vpop.f32.mrf.mxu1  ;;  %4929 = vperm.xlu0 %8022, %v4256_v20   ;;  %v12568_v20 = vpop.permute.xlu1 %4806  ;;  %v14533_v21 = vrot.slane %v11537_v49, 4  ;;  %v14535_v52 = vrot.slane %v11699_v42, 4  ;;  %v12607_v61 = vmax.f32 %v12513_v53, %v5936_v46  ;;  %v5955_v25 = vsel %vm5584_vm3, %v5471_v22, -inf  ;;  %v14544_v53 = vld [vmem:[#allocation67_spill] sm:$0xff] }
 0x21c   :  { %14528 = vst [vmem:[#allocation30_spill] sm:$0xff] %v12547_v5  ;;  %v14529_v5 = vld [vmem:[#allocation34_spill] sm:$0xff]  ;;  %vm5168_vm7 = vcmp.eq.s32.totalorder %v14544_v53, 1  ;;  %vm5216_vm9 = vcmp.eq.s32.totalorder %v12098_v7, 1  ;;  %v14545_v22 = vld [vmem:[#allocation31_spill] sm:$0xff] }
 0x21d   :  { %vm5167_vm1 = vcmp.eq.s32.totalorder %v14529_v5, 1  ;;  %v12563_v27 = vpop.f32.mrf.mxu1  ;;  %v6808_v5 = vmax.f32 %v6806_v35, %v6807_v33  ;;  %v12579_v60 = vmax.f32 %v11537_v49, %v14533_v21  ;;  %v12584_v23 = vmax.f32 %v11699_v42, %v14535_v52  ;;  %v495_v49 = vld [vmem:[%s14174_s2 + $0x6a8] sm:$0xff]  ;;  %14543 = vst [vmem:[#allocation45_spill] sm:$0xff] %v12607_v61  ;;  %v14549_v61 = vld [vmem:[#allocation100_spill] sm:$0xff] }
 0x21e   :  { %14530 = vst [vmem:[#allocation22_spill] sm:$0xff] %v12563_v27  ;;  %v5423_v24 = vsel %vm5167_vm1, %v12281_v19, -3.4028235e+38  ;;  %v5426_v27 = vsel %vm5170_vm6, %v12341_v30, -3.4028235e+38  ;;  %v12574_v19 = vpop.permute.xlu0 %4803  ;;  %v14537_v35 = vrot.slane %v14521_v11, 4  ;;  %v12604_v42 = vmax.f32 %v12417_v2, %v5810_v10 }
 0x21f   :  { %4935 = vperm.xlu0 %8022, %v4258_v40   ;;  %14534 = vst [vmem:[#allocation24_spill] sm:$0xff] %v12579_v60  ;;  %14536 = vst [vmem:[#allocation90_spill] sm:$0xff] %v12584_v23  ;;  %v14539_v30 = vrot.slane %v14522_v28, 4  ;;  %v12601_v33 = vpop.f32.mrf.mxu1  ;;  %v829_v40 = vrot.slane %v701_v38, %v8186_v4  ;;  %v12615_v21 = vsel %vm5584_vm3, %v5426_v27, -inf  ;;  %v6809_v52 = vsel %vm6257_vm0, %v493_v51, -inf  ;;  %v494_v2 = vld [vmem:[%s14174_s2 + $0x6a0] sm:$0xff]  ;;  %v12636_v38 = vpop.f32.mrf.mxu0 }
 0x220   :  { %v12589_v9 = vmax.f32 %v14521_v11, %v14537_v35  ;;  %14541 = vst [vmem:[#allocation34_spill] sm:$0xff] %v12601_v33  ;;  %14542 = vst [vmem:[#allocation69_spill] sm:$0xff] %v12604_v42  ;;  %v5829_v11 = vsel %vm5584_vm3, %v5423_v24, -inf  ;;  %v12621_v10 = vmax.f32 %v5954_v39, %v5955_v25  ;;  %vm4005_vm8 = vcmp.gt.f32.partialorder %v495_v49, 0.5  ;;  %v12624_v24 = vpop.permute.xlu1 %4812  ;;  %v270_v51 = vld [vmem:[%s14172_s0 + $0x3e0] sm:$0xf] }
 0x221   :  { %v12594_v54 = vmax.f32 %v14522_v28, %v14539_v30  ;;  %v12611_v28 = vmax.f32 %v5828_v58, %v5829_v11  ;;  %v1048_v46 = vpack.i.b16 %v829_v40, %v829_v40  ;;  %v5424_v58 = vsel %vm5168_vm7, %v12374_v56, -3.4028235e+38  ;;  %v271_v39 = vld [vmem:[%s14172_s0 + $0x3e4] sm:$0xf]  ;;  %v12638_v35 = vpop.f32.mrf.mxu1  ;;  %v272_v11 = vld [vmem:[%s14172_s0 + $0x3e8] sm:$0xf] }
 0x222   :  { %14538 = vst [vmem:[#allocation32_spill] sm:$0xff] %v12589_v9  ;;  %vm5169_vm10 = vcmp.eq.s32.totalorder %v14545_v22, 1  ;;  %v4261_v27 = vsel %vm4005_vm8, 1, %v14279_v1  ;;  %14546 = vst [vmem:[#allocation67_spill] sm:$0xff] %v12638_v35  ;;  %vm4004_vm11 = vcmp.gt.f32.partialorder %v494_v2, 0.5  ;;  %v6810_v40 = vmax.f32 %v6808_v5, %v6809_v52  ;;  %v12645_v25 = vpop.permute.xlu0 %4809  ;;  %v14547_v22 = vld [vmem:[#allocation68_spill] sm:$0xff]  ;;  %v12664_v9 = vpop.f32.mrf.mxu0 }
 0x223   :  { %14540 = vst [vmem:[#allocation87_spill] sm:$0xff] %v12594_v54  ;;  %v5425_v56 = vsel %vm5169_vm10, %v12444_v41, -3.4028235e+38  ;;  %v1053_v30 = vrot.slane %v1048_v46, %v8186_v4  ;;  %4944 = vperm.xlu1 %8023, %v4261_v27   ;;  %vm5171_vm12 = vcmp.eq.s32.totalorder %v14547_v22, 1  ;;  %v273_v33 = vld [vmem:[%s14172_s0 + $0x3ec] sm:$0xf] }
 0x224   :  { %v4260_v41 = vsel %vm4004_vm11, 1, %v14279_v1  ;;  %v6811_v4 = vsel %vm6257_vm0, %v494_v2, -inf  ;;  %v14548_v46 = vld [vmem:[#allocation17_spill] sm:$0xff]  ;;  %vm5217_vm13 = vcmp.eq.s32.totalorder %v14549_v61, 1  ;;  %v5837_v53 = vsel %vm5584_vm3, %v5424_v58, -inf  ;;  %v497_v58 = vld [vmem:[%s14174_s2 + $0x6b8] sm:$0xff] }
 0x225   :  { %v5472_v27 = vsel %vm5216_vm9, %v14548_v46, -3.4028235e+38  ;;  %v12658_v5 = vcombine.low %v1053_v30, %v1053_v30  ;;  %v6812_v52 = vmax.f32 %v6810_v40, %v6811_v4  ;;  %4941 = vperm.xlu0 %8022, %v4260_v41   ;;  %v5427_v35 = vsel %vm5171_vm12, %v12406_v44, -3.4028235e+38  ;;  %v496_v44 = vld [vmem:[%s14174_s2 + $0x6b0] sm:$0xff]  ;;  %v14551_v41 = vld [vmem:[#allocation94_spill] sm:$0xff] }
 0x226   :  { %v5838_v42 = vsel %vm5584_vm3, %v5425_v56, -inf  ;;  %v12678_v56 = vpop.permute.xlu1 %4818  ;;  %v14552_v4 = vld [vmem:[#allocation104_spill] sm:$0xff]  ;;  %v12692_v50 = vpop.permute.xlu0 %4815  ;;  %vm4007_vm1 = vcmp.gt.f32.partialorder %v497_v58, 0.5  ;;  %vm4006_vm2 = vcmp.gt.f32.partialorder %v496_v44, 0.5  ;;  %v6815_v57 = vsel %vm6257_vm0, %v496_v44, -inf }
 0x227   :  { %v1430_v7 = vsub.bf16 %v270_v51, %v12658_v5  ;;  %v1431_v46 = vsub.bf16 %v271_v39, %v12658_v5  ;;  %v1432_v30 = vsub.bf16 %v272_v11, %v12658_v5  ;;  %v1433_v40 = vsub.bf16 %v273_v33, %v12658_v5  ;;  %v277_v44 = vld [vmem:[%s14172_s0 + $0x3fc] sm:$0xf] }
 0x228   :  { %v5473_v51 = vsel %vm5217_vm13, %v14551_v41, -3.4028235e+38  ;;  %v5963_v39 = vsel %vm5584_vm3, %v5472_v27, -inf  ;;  %vm5218_vm14 = vcmp.eq.s32.totalorder %v14552_v4, 1  ;;  %v6813_v33 = vsel %vm6257_vm0, %v495_v49, -inf  ;;  %v14554_v41 = vld [vmem:[#allocation103_spill] sm:$0xff]  ;;  %v12695_v27 = vpop.f32.mrf.mxu0 }
 0x229   :  { %v1686_v22 = vmax.bf16 %v14279_v1, %v1430_v7  ;;  %v1687_v54 = vmax.bf16 %v14279_v1, %v1431_v46  ;;  %v1688_v60 = vmax.bf16 %v14279_v1, %v1432_v30  ;;  %v1689_v23 = vmax.bf16 %v14279_v1, %v1433_v40  ;;  %v274_v49 = vld [vmem:[%s14172_s0 + $0x3f0] sm:$0xf]  ;;  %v14556_v46 = vld [vmem:[#allocation48_spill] sm:$0xff] }
 0x22a   :  { %v12666_v2 = vpop.f32.mrf.mxu1  ;;  %v5839_v61 = vmax.f32 %v5837_v53, %v5838_v42  ;;  %vm5219_vm15 = vcmp.eq.s32.totalorder %v14554_v41, 1  ;;  %v5474_v4 = vsel %vm5218_vm14, %v14556_v46, -3.4028235e+38  ;;  %v4263_v40 = vsel %vm4007_vm1, 1, %v14279_v1  ;;  %v275_v42 = vld [vmem:[%s14172_s0 + $0x3f4] sm:$0xf] }
 0x22b   :  { %14550 = vst [vmem:[#allocation31_spill] sm:$0xff] %v12666_v2  ;;  %v7488_v30 = vcombine.low %v1686_v22, %v1687_v54  ;;  %v7489_v2 = vcombine.low %v1688_v60, %v1689_v23  ;;  %v5964_v53 = vsel %vm5584_vm3, %v5473_v51, -inf  ;;  %4950 = vperm.xlu1 %8023, %v4263_v40   ;;  %v4262_v12 = vsel %vm4006_vm2, 1, %v14279_v1  ;;  %v276_v46 = vld [vmem:[%s14172_s0 + $0x3f8] sm:$0xf]  ;;  %v14560_v40 = vld [vmem:[#allocation107_spill] sm:$0xff] }
 0x22c   :  { %v12686_v11 = vpop.f32.mrf.mxu1  ;;  %v12716_v60 = vsel %vm5584_vm3, %v5427_v35, -inf  ;;  %v14558_v23 = vld [vmem:[#allocation92_spill] sm:$0xff]  ;;  %v6817_v51 = vsel %vm6257_vm0, %v497_v58, -inf  ;;  %4947 = vperm.xlu0 %8022, %v4262_v12   ;;  %v5966_v35 = vsel %vm5584_vm3, %v5474_v4, -inf  ;;  %vm5220_vm5 = vcmp.eq.s32.totalorder %v14560_v40, 1  ;;  %v14565_v40 = vld [vmem:[#allocation37_spill] sm:$0xff] }
 0x22d   :  { %14553 = vst [vmem:[#allocation68_spill] sm:$0xff] %v12686_v11  ;;  %v6814_v11 = vmax.f32 %v6812_v52, %v6813_v33  ;;  %v5475_v22 = vsel %vm5219_vm15, %v14558_v23, -3.4028235e+38  ;;  %8005 = vmatprep.mubr.msk.bf16.mxu1 %vm2350_vm4, %v7488_v30  ;;  %v1434_v52 = vsub.bf16 %v274_v49, %v12658_v5  ;;  %v12727_v33 = vpop.permute.xlu1 %4824  ;;  %v1435_v30 = vsub.bf16 %v275_v42, %v12658_v5  ;;  %v12733_v23 = vpop.f32.mrf.mxu0  ;;  %v14561_v4 = vld [vmem:[#allocation36_spill] sm:$0xff]  ;;  %v14563_v42 = vld [vmem:[#allocation50_spill] sm:$0xff] }
 0x22e   :  { %v12700_v7 = vpop.f32.mrf.mxu1  ;;  %14559 = vst [vmem:[#allocation94_spill] sm:$0xff] %v12727_v33  ;;  %8006 = vmatmul.mubr.msk.bf16.gmra.mxu1 %vm2350_vm4, %v7489_v2  ;;  %v5965_v58 = vmax.f32 %v5963_v39, %v5964_v53  ;;  %v5841_v49 = vmax.f32 %v5839_v61, %v12615_v21  ;;  %v12740_v33 = vpop.permute.xlu0 %4821  ;;  %vm5174_vm6 = vcmp.eq.s32.totalorder %v14561_v4, 1  ;;  %v1437_v2 = vsub.bf16 %v277_v44, %v12658_v5  ;;  %v499_v39 = vld [vmem:[%s14174_s2 + $0x6c8] sm:$0xff] }
 0x22f   :  { %14555 = vst [vmem:[#allocation17_spill] sm:$0xff] %v12700_v7  ;;  %v6816_v41 = vmax.f32 %v6814_v11, %v6815_v57  ;;  %v1690_v7 = vmax.bf16 %v14279_v1, %v1434_v52  ;;  %v1691_v57 = vmax.bf16 %v14279_v1, %v1435_v30  ;;  %v5968_v21 = vsel %vm5584_vm3, %v5475_v22, -inf  ;;  %v14564_v52 = vld [vmem:[#allocation71_spill] sm:$0xff]  ;;  %v12763_v30 = vpop.f32.mrf.mxu0 }
 0x230   :  { %v12713_v54 = vpop.f32.mrf.mxu1  ;;  %v5967_v61 = vmax.f32 %v5965_v58, %v5966_v35  ;;  %v5476_v53 = vsel %vm5220_vm5, %v14563_v42, -3.4028235e+38  ;;  %vm5172_vm7 = vcmp.eq.s32.totalorder %v14564_v52, 1  ;;  %v1693_v44 = vmax.bf16 %v14279_v1, %v1437_v2 }
 0x231   :  { %14557 = vst [vmem:[#allocation100_spill] sm:$0xff] %v12713_v54  ;;  %v1436_v54 = vsub.bf16 %v276_v46, %v12658_v5  ;;  %v12743_v29 = vmax.f32 %v6816_v41, %v6817_v51  ;;  %v5430_v51 = vsel %vm5174_vm6, %v12472_v8, -3.4028235e+38  ;;  %v7490_v5 = vcombine.low %v1690_v7, %v1691_v57  ;;  %v498_v41 = vld [vmem:[%s14174_s2 + $0x6c0] sm:$0xff]  ;;  %v12787_v52 = vpop.f32.mrf.mxu0 }
 0x232   :  { %v12735_v12 = vpop.f32.mrf.mxu1  ;;  %v5428_v22 = vsel %vm5172_vm7, %v12507_v3, -3.4028235e+38  ;;  %v5843_v35 = vmax.f32 %v5841_v49, %v12716_v60  ;;  %vm5175_vm8 = vcmp.eq.s32.totalorder %v14565_v40, 1  ;;  %vm4009_vm9 = vcmp.gt.f32.partialorder %v499_v39, 0.5  ;;  %v501_v3 = vld [vmem:[%s14174_s2 + $0x6d8] sm:$0xff]  ;;  %v12781_v42 = vpop.permute.xlu0 %4827 }
 0x233   :  { %14562 = vst [vmem:[#allocation104_spill] sm:$0xff] %v12743_v29  ;;  %v1692_v46 = vmax.bf16 %v14279_v1, %v1436_v54  ;;  %v12768_v54 = vpop.permute.xlu1 %4830  ;;  %v5970_v8 = vsel %vm5584_vm3, %v5476_v53, -inf  ;;  %v5431_v7 = vsel %vm5175_vm8, %v12535_v18, -3.4028235e+38  ;;  %8009 = vmatprep.mubr.msk.bf16.mxu1 %vm2350_vm4, %v7490_v5  ;;  %v4265_v4 = vsel %vm4009_vm9, 1, %v14279_v1  ;;  %14567 = vst [vmem:[#allocation48_spill] sm:$0xff] %v12781_v42 }
 0x234   :  { %v12750_v11 = vpop.f32.mrf.mxu1  ;;  %14566 = vst [vmem:[#allocation103_spill] sm:$0xff] %v12768_v54  ;;  %v5969_v60 = vmax.f32 %v5967_v61, %v5968_v21  ;;  %v6826_v49 = vsel %vm6257_vm0, %v499_v39, -inf  ;;  %4956 = vperm.xlu1 %8023, %v4265_v4   ;;  %vm4008_vm10 = vcmp.gt.f32.partialorder %v498_v41, 0.5  ;;  %v6825_v2 = vsel %vm6257_vm0, %v498_v41, -inf  ;;  %v14568_v18 = vld [vmem:[#allocation59_spill] sm:$0xff]  ;;  %v14569_v61 = vld [vmem:[#allocation70_spill] sm:$0xff] }
 0x235   :  { %v7491_v58 = vcombine.low %v1692_v46, %v1693_v44  ;;  %vm5221_vm11 = vcmp.eq.s32.totalorder %v14568_v18, 1  ;;  %vm5223_vm12 = vcmp.eq.s32.totalorder %v12205_v32, 1  ;;  %v4264_v53 = vsel %vm4008_vm10, 1, %v14279_v1  ;;  %v500_v5 = vld [vmem:[%s14174_s2 + $0x6d0] sm:$0xff] }
 0x236   :  { %v12777_v57 = vpop.f32.mrf.mxu1  ;;  %v6827_v46 = vmax.f32 %v6825_v2, %v6826_v49  ;;  %v12790_v21 = vsel %vm5584_vm3, %v5430_v51, -inf  ;;  %v5844_v39 = vsel %vm5584_vm3, %v5428_v22, -inf  ;;  %vm5173_vm13 = vcmp.eq.s32.totalorder %v14569_v61, 1  ;;  %4953 = vperm.xlu0 %8022, %v4264_v53   ;;  %v14570_v22 = vld [vmem:[#allocation20_spill] sm:$0xff]  ;;  %v14571_v2 = vld [vmem:[#allocation49_spill] sm:$0xff] }
 0x237   :  { %8010 = vmatmul.mubr.msk.bf16.gmra.mxu1 %vm2350_vm4, %v7491_v58  ;;  %vm4011_vm14 = vcmp.gt.f32.partialorder %v501_v3, 0.5  ;;  %v12797_v44 = vmax.f32 %v5843_v35, %v5844_v39  ;;  %v12800_v41 = vsel %vm5584_vm3, %v5431_v7, -inf  ;;  %v5429_v40 = vsel %vm5173_vm13, %v12561_v45, -3.4028235e+38  ;;  %v12815_v35 = vpop.permute.xlu1 %4836  ;;  %v12820_v7 = vpop.f32.mrf.mxu0 }
 0x238   :  { %v4267_v51 = vsel %vm4011_vm14, 1, %v14279_v1  ;;  %v12804_v58 = vpop.f32.mrf.mxu1  ;;  %v5477_v4 = vsel %vm5221_vm11, %v14570_v22, -3.4028235e+38  ;;  %v5971_v49 = vmax.f32 %v5969_v60, %v5970_v8  ;;  %v12812_v53 = vsel %vm5223_vm12, %v14571_v2, -3.4028235e+38  ;;  %14572 = vst [vmem:[#allocation92_spill] sm:$0xff] %v12815_v35  ;;  %v12828_v39 = vpop.permute.xlu0 %4833 }
 0x239   :  { %vm5222_vm4 = vcmp.eq.s32.totalorder %v12209_v13, 1  ;;  %4962 = vperm.xlu1 %8023, %v4267_v51   ;;  %vm5224_vm15 = vcmp.eq.s32.totalorder %v12259_v15, 1  ;;  %vm5225_vm1 = vcmp.eq.s32.totalorder %v12246_v0, 1  ;;  %vm4010_vm2 = vcmp.gt.f32.partialorder %v500_v5, 0.5  ;;  %v14573_v60 = vld [vmem:[#allocation73_spill] sm:$0xff]  ;;  %v503_v13 = vld [vmem:[%s14174_s2 + $0x6e8] sm:$0xff]  ;;  %v12847_v29 = vpop.f32.mrf.mxu0 }
 0x23a   :  { %v6828_v45 = vsel %vm6257_vm0, %v500_v5, -inf  ;;  %v5846_v8 = vsel %vm5584_vm3, %v5429_v40, -inf  ;;  %vm5177_vm5 = vcmp.eq.s32.totalorder %v14573_v60, 1  ;;  %v4266_v32 = vsel %vm4010_vm2, 1, %v14279_v1  ;;  %14574 = vst [vmem:[#allocation107_spill] sm:$0xff] %v12828_v39  ;;  %v14575_v51 = vld [vmem:[#allocation97_spill] sm:$0xff] }
 0x23b   :  { %v6829_v18 = vmax.f32 %v6827_v46, %v6828_v45  ;;  %v5972_v61 = vsel %vm5584_vm3, %v5477_v4, -inf  ;;  %v5478_v22 = vsel %vm5222_vm4, %v14575_v51, -3.4028235e+38  ;;  %v5433_v5 = vsel %vm5177_vm5, %v12695_v27, -3.4028235e+38  ;;  %4959 = vperm.xlu0 %8022, %v4266_v32   ;;  %v14577_v60 = vld [vmem:[#allocation74_spill] sm:$0xff] }
 0x23c   :  { %vm5226_vm6 = vcmp.eq.s32.totalorder %v12303_v59, 1  ;;  %v5973_v2 = vmax.f32 %v5971_v49, %v5972_v61  ;;  %vm5176_vm7 = vcmp.eq.s32.totalorder %v14577_v60, 1  ;;  %v14578_v46 = vld [vmem:[#allocation52_spill] sm:$0xff]  ;;  %v5847_v51 = vmax.f32 %v12797_v44, %v5846_v8  ;;  %v14580_v39 = vld [vmem:[#allocation6_spill] sm:$0xff]  ;;  %v502_v49 = vld [vmem:[%s14174_s2 + $0x6e0] sm:$0xff] }
 0x23d   :  { %v5480_v45 = vsel %vm5224_vm15, %v14578_v46, -3.4028235e+38  ;;  %v14579_v35 = vld [vmem:[#allocation56_spill] sm:$0xff]  ;;  %vm5178_vm8 = vcmp.eq.s32.totalorder %v14580_v39, 1  ;;  %v5432_v27 = vsel %vm5176_vm7, %v12636_v38, -3.4028235e+38  ;;  %v12859_v38 = vpop.permute.xlu1 %4842 }
 0x23e   :  { %v5481_v4 = vsel %vm5225_vm1, %v14579_v35, -3.4028235e+38  ;;  %v6830_v32 = vsel %vm6257_vm0, %v501_v3, -inf  ;;  %v5974_v61 = vsel %vm5584_vm3, %v5478_v22, -inf  ;;  %v5859_v0 = vsel %vm5584_vm3, %v5433_v5, -inf  ;;  %v14581_v35 = vld [vmem:[#allocation54_spill] sm:$0xff] }
 0x23f   :  { %v12834_v40 = vpop.f32.mrf.mxu1  ;;  %v5482_v44 = vsel %vm5226_vm6, %v14581_v35, -3.4028235e+38  ;;  %vm4013_vm9 = vcmp.gt.f32.partialorder %v503_v13, 0.5  ;;  %14582 = vst [vmem:[#allocation50_spill] sm:$0xff] %v12859_v38  ;;  %v5434_v3 = vsel %vm5178_vm8, %v12596_v55, -3.4028235e+38  ;;  %v6831_v5 = vmax.f32 %v6829_v18, %v6830_v32  ;;  %v12869_v35 = vpop.permute.xlu0 %4839 }
 0x240   :  { %14576 = vst [vmem:[#allocation36_spill] sm:$0xff] %v12834_v40  ;;  %v5984_v8 = vsel %vm5584_vm3, %v5480_v45, -inf  ;;  %v5985_v39 = vsel %vm5584_vm3, %v5481_v4, -inf  ;;  %v4269_v60 = vsel %vm4013_vm9, 1, %v14279_v1  ;;  %v5858_v22 = vsel %vm5584_vm3, %v5432_v27, -inf  ;;  %14584 = vst [vmem:[#allocation37_spill] sm:$0xff] %v12869_v35  ;;  %v12874_v4 = vpop.f32.mrf.mxu0 }
 0x241   :  { %v12852_v15 = vpop.f32.mrf.mxu1  ;;  %4968 = vperm.xlu1 %8023, %v4269_v60   ;;  %vm4012_vm10 = vcmp.gt.f32.partialorder %v502_v49, 0.5  ;;  %v6832_v59 = vsel %vm6257_vm0, %v502_v49, -inf  ;;  %v5860_v38 = vmax.f32 %v5858_v22, %v5859_v0  ;;  %vm5227_vm11 = vcmp.eq.s32.totalorder %v12287_v26, 1  ;;  %v505_v27 = vld [vmem:[%s14174_s2 + $0x6f8] sm:$0xff]  ;;  %v504_v18 = vld [vmem:[%s14174_s2 + $0x6f0] sm:$0xff] }
 0x242   :  { %v5987_v55 = vsel %vm5584_vm3, %v5482_v44, -inf  ;;  %v4268_v45 = vsel %vm4012_vm10, 1, %v14279_v1  ;;  %v5849_v49 = vmax.f32 %v5847_v51, %v12790_v21  ;;  %v5975_v0 = vmax.f32 %v5973_v2, %v5974_v61  ;;  %v14586_v35 = vld [vmem:[#allocation75_spill] sm:$0xff]  ;;  %v12894_v21 = vpop.permute.xlu1 %4848  ;;  %v12897_v61 = vpop.f32.mrf.mxu0 }
 0x243   :  { %v12865_v46 = vpop.f32.mrf.mxu1  ;;  %v5986_v60 = vmax.f32 %v5984_v8, %v5985_v39  ;;  %v6833_v22 = vmax.f32 %v6831_v5, %v6832_v59  ;;  %4965 = vperm.xlu0 %8022, %v4268_v45   ;;  %v5861_v44 = vsel %vm5584_vm3, %v5434_v3, -inf  ;;  %vm5179_vm12 = vcmp.eq.s32.totalorder %v14586_v35, 1  ;;  %v14587_v40 = vld [vmem:[#allocation51_spill] sm:$0xff]  ;;  %14588 = vst [vmem:[#allocation70_spill] sm:$0xff] %v12894_v21  ;;  %v14589_v3 = vld [vmem:[#allocation77_spill] sm:$0xff]  ;;  %v12904_v5 = vpop.permute.xlu0 %4845 }
 0x244   :  { %14583 = vst [vmem:[#allocation71_spill] sm:$0xff] %v12865_v46  ;;  %vm5228_vm13 = vcmp.eq.s32.totalorder %v12353_v62, 1  ;;  %v6834_v42 = vsel %vm6257_vm0, %v503_v13, -inf  ;;  %v5483_v46 = vsel %vm5227_vm11, %v14587_v40, -3.4028235e+38  ;;  %vm4015_vm14 = vcmp.gt.f32.partialorder %v505_v27, 0.5 }
 0x245   :  { %v12882_v32 = vpop.f32.mrf.mxu1  ;;  %vm4014_vm4 = vcmp.gt.f32.partialorder %v504_v18, 0.5  ;;  %v5435_v2 = vsel %vm5179_vm12, %v12664_v9, -3.4028235e+38  ;;  %v5862_v51 = vmax.f32 %v5860_v38, %v5861_v44  ;;  %v4271_v62 = vsel %vm4015_vm14, 1, %v14279_v1  ;;  %v14590_v8 = vld [vmem:[#allocation55_spill] sm:$0xff]  ;;  %14591 = vst [vmem:[#allocation20_spill] sm:$0xff] %v12904_v5  ;;  %v12924_v44 = vpop.f32.mrf.mxu0 }
 0x246   :  { %14585 = vst [vmem:[#allocation59_spill] sm:$0xff] %v12882_v32  ;;  %v5988_v32 = vmax.f32 %v5986_v60, %v5987_v55  ;;  %v4270_v13 = vsel %vm4014_vm4, 1, %v14279_v1  ;;  %vm5180_vm15 = vcmp.eq.s32.totalorder %v14589_v3, 1  ;;  %v5484_v39 = vsel %vm5228_vm13, %v14590_v8, -3.4028235e+38  ;;  %4974 = vperm.xlu1 %8023, %v4271_v62   ;;  %v507_v60 = vld [vmem:[%s14174_s2 + $0x708] sm:$0xff] }
 0x247   :  { %v12889_v54 = vpop.f32.mrf.mxu1  ;;  %v6835_v26 = vmax.f32 %v6833_v22, %v6834_v42  ;;  %v6836_v40 = vsel %vm6257_vm0, %v504_v18, -inf  ;;  %4971 = vperm.xlu0 %8022, %v4270_v13   ;;  %v5976_v9 = vsel %vm5584_vm3, %v12812_v53, -inf  ;;  %v5989_v38 = vsel %vm5584_vm3, %v5483_v46, -inf  ;;  %v14593_v62 = vld [vmem:[#allocation76_spill] sm:$0xff]  ;;  %v512_v5 = vld [vmem:[%s14174_s2 + $0x730] sm:$0xff] }
 0x248   :  { %v5436_v35 = vsel %vm5180_vm15, %v12763_v30, -3.4028235e+38  ;;  %v6838_v55 = vsel %vm6257_vm0, %v505_v27, -inf  ;;  %v5863_v45 = vsel %vm5584_vm3, %v5435_v2, -inf  ;;  %vm5229_vm1 = vcmp.eq.s32.totalorder %v12336_v47, 1  ;;  %v506_v27 = vld [vmem:[%s14174_s2 + $0x700] sm:$0xff]  ;;  %v12951_v47 = vpop.f32.mrf.mxu0 }
 0x249   :  { %v12906_v59 = vpop.f32.mrf.mxu1  ;;  %v5990_v42 = vmax.f32 %v5988_v32, %v5989_v38  ;;  %v6837_v18 = vmax.f32 %v6835_v26, %v6836_v40  ;;  %v12919_v22 = vmax.f32 %v5849_v49, %v12800_v41  ;;  %v12921_v53 = vmax.f32 %v5975_v0, %v5976_v9  ;;  %v14592_v32 = vld [vmem:[#allocation79_spill] sm:$0xff]  ;;  %v12934_v41 = vpop.permute.xlu1 %4854  ;;  %v14596_v0 = vld [vmem:[#allocation25_spill] sm:$0xff]  ;;  %v509_v40 = vld [vmem:[%s14174_s2 + $0x718] sm:$0xff] }
 0x24a   :  { %v5864_v46 = vmax.f32 %v5862_v51, %v5863_v45  ;;  %v5991_v30 = vsel %vm5584_vm3, %v5484_v39, -inf  ;;  %vm5182_vm2 = vcmp.eq.s32.totalorder %v14592_v32, 1  ;;  %v5865_v2 = vsel %vm5584_vm3, %v5436_v35, -inf  ;;  %14595 = vst [vmem:[#allocation73_spill] sm:$0xff] %v12934_v41  ;;  %v12948_v9 = vpop.permute.xlu0 %4851  ;;  %v14598_v45 = vld [vmem:[#allocation78_spill] sm:$0xff]  ;;  %v14605_v41 = vld [vmem:[#allocation81_spill] sm:$0xff] }
 0x24b   :  { %vm5181_vm5 = vcmp.eq.s32.totalorder %v14593_v62, 1  ;;  %v12932_v13 = vmax.f32 %v6837_v18, %v6838_v55  ;;  %v12936_v49 = vpop.f32.mrf.mxu1  ;;  %v5485_v51 = vsel %vm5229_vm1, %v14596_v0, -3.4028235e+38  ;;  %vm4017_vm6 = vcmp.gt.f32.partialorder %v507_v60, 0.5  ;;  %14597 = vst [vmem:[#allocation97_spill] sm:$0xff] %v12948_v9  ;;  %v14600_v62 = vld [vmem:[#allocation58_spill] sm:$0xff] }
 0x24c   :  { %v5437_v3 = vsel %vm5181_vm5, %v12820_v7, -3.4028235e+38  ;;  %v6847_v8 = vsel %vm6257_vm0, %v507_v60, -inf  ;;  %v5992_v39 = vmax.f32 %v5990_v42, %v5991_v30  ;;  %vm5230_vm7 = vcmp.eq.s32.totalorder %v12394_v16, 1  ;;  %v508_v60 = vld [vmem:[%s14174_s2 + $0x710] sm:$0xff] }
 0x24d   :  { %14594 = vst [vmem:[#allocation49_spill] sm:$0xff] %v12932_v13  ;;  %v4273_v26 = vsel %vm4017_vm6, 1, %v14279_v1  ;;  %vm4016_vm8 = vcmp.gt.f32.partialorder %v506_v27, 0.5  ;;  %v5866_v38 = vmax.f32 %v5864_v46, %v5865_v2  ;;  %vm5231_vm9 = vcmp.eq.s32.totalorder %v12379_v6, 1  ;;  %v12963_v46 = vpop.f32.mrf.mxu1  ;;  %v14599_v2 = vld [vmem:[#allocation26_spill] sm:$0xff] }
 0x24e   :  { %4980 = vperm.xlu1 %8023, %v4273_v26   ;;  %v4272_v7 = vsel %vm4016_vm8, 1, %v14279_v1  ;;  %v6846_v35 = vsel %vm6257_vm0, %v506_v27, -inf  ;;  %v5438_v55 = vsel %vm5182_vm2, %v12733_v23, -3.4028235e+38  ;;  %vm5183_vm10 = vcmp.eq.s32.totalorder %v14598_v45, 1 }
 0x24f   :  { %v5867_v42 = vsel %vm5584_vm3, %v5437_v3, -inf  ;;  %v6848_v18 = vmax.f32 %v6846_v35, %v6847_v8  ;;  %4977 = vperm.xlu0 %8022, %v4272_v7   ;;  %v5439_v30 = vsel %vm5183_vm10, %v12787_v52, -3.4028235e+38  ;;  %v5993_v27 = vsel %vm5584_vm3, %v5485_v51, -inf  ;;  %v12975_v8 = vpop.permute.xlu1 %4860  ;;  %v12978_v52 = vpop.f32.mrf.mxu0 }
 0x250   :  { %v5486_v23 = vsel %vm5230_vm7, %v14599_v2, -3.4028235e+38  ;;  %vm4019_vm11 = vcmp.gt.f32.partialorder %v509_v40, 0.5  ;;  %v5994_v32 = vmax.f32 %v5992_v39, %v5993_v27  ;;  %v5487_v0 = vsel %vm5231_vm9, %v14600_v62, -3.4028235e+38  ;;  %v12984_v35 = vpop.permute.xlu0 %4857  ;;  %v14601_v27 = vld [vmem:[#allocation57_spill] sm:$0xff] }
 0x251   :  { %vm5232_vm12 = vcmp.eq.s32.totalorder %v12449_v36, 1  ;;  %v4275_v3 = vsel %vm4019_vm11, 1, %v14279_v1  ;;  %v5868_v26 = vmax.f32 %v5866_v38, %v5867_v42  ;;  %vm5233_vm13 = vcmp.eq.s32.totalorder %v12438_v17, 1  ;;  %v14602_v62 = vld [vmem:[#allocation39_spill] sm:$0xff]  ;;  %v510_v36 = vld [vmem:[%s14174_s2 + $0x720] sm:$0xff]  ;;  %v14604_v38 = vld [vmem:[#allocation40_spill] sm:$0xff]  ;;  %v13009_v51 = vpop.f32.mrf.mxu0 }
 0x252   :  { %4986 = vperm.xlu1 %8023, %v4275_v3   ;;  %vm4018_vm14 = vcmp.gt.f32.partialorder %v508_v60, 0.5  ;;  %v6849_v16 = vsel %vm6257_vm0, %v508_v60, -inf  ;;  %v5995_v6 = vsel %vm5584_vm3, %v5486_v23, -inf  ;;  %v5869_v42 = vsel %vm5584_vm3, %v5438_v55, -inf  ;;  %v511_v60 = vld [vmem:[%s14174_s2 + $0x728] sm:$0xff]  ;;  %v14606_v17 = vld [vmem:[#allocation99_spill] sm:$0xff] }
 0x253   :  { %v4274_v39 = vsel %vm4018_vm14, 1, %v14279_v1  ;;  %v6850_v7 = vmax.f32 %v6848_v18, %v6849_v16  ;;  %v5488_v2 = vsel %vm5232_vm12, %v14601_v27, -3.4028235e+38  ;;  %vm5234_vm4 = vcmp.eq.s32.totalorder %v12496_v63, 1  ;;  %v14603_v3 = vld [vmem:[#allocation102_spill] sm:$0xff]  ;;  %v13017_v9 = vpop.permute.xlu1 %4866 }
 0x254   :  { %4983 = vperm.xlu0 %8022, %v4274_v39   ;;  %v5871_v18 = vsel %vm5584_vm3, %v5439_v30, -inf  ;;  %v5997_v23 = vsel %vm5584_vm3, %v5487_v0, -inf  ;;  %vm5186_vm15 = vcmp.eq.s32.totalorder %v14602_v62, 1  ;;  %v5489_v55 = vsel %vm5233_vm13, %v14603_v3, -3.4028235e+38 }
 0x255   :  { %v5870_v39 = vmax.f32 %v5868_v26, %v5869_v42  ;;  %v5996_v27 = vmax.f32 %v5994_v32, %v5995_v6  ;;  %vm5184_vm1 = vcmp.eq.s32.totalorder %v14604_v38, 1  ;;  %v6851_v30 = vsel %vm6257_vm0, %v509_v40, -inf  ;;  %v513_v42 = vld [vmem:[%s14174_s2 + $0x738] sm:$0xff] }
 0x256   :  { %v12986_v45 = vpop.f32.mrf.mxu1  ;;  %v6005_v0 = vsel %vm5584_vm3, %v5488_v2, -inf  ;;  %vm5185_vm2 = vcmp.eq.s32.totalorder %v14605_v41, 1  ;;  %v5490_v3 = vsel %vm5234_vm4, %v14606_v17, -3.4028235e+38  ;;  %vm4021_vm5 = vcmp.gt.f32.partialorder %v511_v60, 0.5  ;;  %v13032_v2 = vpop.permute.xlu0 %4863 }
 0x257   :  { %v6006_v32 = vsel %vm5584_vm3, %v5489_v55, -inf  ;;  %v5441_v26 = vsel %vm5185_vm2, %v12924_v44, -3.4028235e+38  ;;  %v4277_v6 = vsel %vm4021_vm5, 1, %v14279_v1  ;;  %vm4020_vm6 = vcmp.gt.f32.partialorder %v510_v36, 0.5 }
 0x258   :  { %v13006_v16 = vpop.f32.mrf.mxu1  ;;  %v5442_v41 = vsel %vm5186_vm15, %v12847_v29, -3.4028235e+38  ;;  %v5440_v40 = vsel %vm5184_vm1, %v12874_v4, -3.4028235e+38  ;;  %4992 = vperm.xlu1 %8023, %v4277_v6   ;;  %v4276_v63 = vsel %vm4020_vm6, 1, %v14279_v1  ;;  %v6852_v38 = vmax.f32 %v6850_v7, %v6851_v30  ;;  %v13038_v29 = vpop.f32.mrf.mxu0 }
 0x259   :  { %v5872_v55 = vmax.f32 %v5870_v39, %v5871_v18  ;;  %vm5235_vm7 = vcmp.eq.s32.totalorder %v12482_v34, 1  ;;  %v6008_v62 = vsel %vm5584_vm3, %v5490_v3, -inf  ;;  %v6853_v4 = vsel %vm6257_vm0, %v510_v36, -inf  ;;  %4989 = vperm.xlu0 %8022, %v4276_v63   ;;  %v14608_v36 = vld [vmem:[#allocation41_spill] sm:$0xff]  ;;  %v13057_v63 = vpop.permute.xlu1 %4872 }
 0x25a   :  { %v13019_v21 = vpop.f32.mrf.mxu1  ;;  %v6007_v17 = vmax.f32 %v6005_v0, %v6006_v32  ;;  %v5880_v7 = vsel %vm5584_vm3, %v5441_v26, -inf  ;;  %v6855_v30 = vsel %vm6257_vm0, %v511_v60, -inf  ;;  %v6854_v6 = vmax.f32 %v6852_v38, %v6853_v4  ;;  %v14609_v0 = vld [vmem:[#allocation101_spill] sm:$0xff]  ;;  %v13059_v4 = vpop.f32.mrf.mxu0 }
 0x25b   :  { %v13048_v39 = vmax.f32 %v5996_v27, %v5997_v23  ;;  %v5879_v3 = vsel %vm5584_vm3, %v5440_v40, -inf  ;;  %vm5236_vm8 = vcmp.eq.s32.totalorder %v12545_v37, 1  ;;  %vm4023_vm9 = vcmp.gt.f32.partialorder %v513_v42, 0.5  ;;  %v14610_v40 = vld [vmem:[#allocation106_spill] sm:$0xff] }
 0x25c   :  { %v13034_v44 = vpop.f32.mrf.mxu1  ;;  %vm5187_vm10 = vcmp.eq.s32.totalorder %v14608_v36, 1  ;;  %v5491_v60 = vsel %vm5235_vm7, %v14609_v0, -3.4028235e+38  ;;  %v6009_v32 = vmax.f32 %v6007_v17, %v6008_v62  ;;  %v4279_v26 = vsel %vm4023_vm9, 1, %v14279_v1  ;;  %v13065_v62 = vpop.permute.xlu0 %4869 }
 0x25d   :  { %v5881_v38 = vmax.f32 %v5879_v3, %v5880_v7  ;;  %4998 = vperm.xlu1 %8023, %v4279_v26   ;;  %vm4022_vm11 = vcmp.gt.f32.partialorder %v512_v5, 0.5  ;;  %v6856_v23 = vmax.f32 %v6854_v6, %v6855_v30  ;;  %v6857_v37 = vsel %vm6257_vm0, %v512_v5, -inf }
 0x25e   :  { %v13046_v18 = vpop.f32.mrf.mxu1  ;;  %v5873_v27 = vrot.slane %v5872_v55, 4  ;;  %v5492_v13 = vsel %vm5236_vm8, %v14610_v40, -3.4028235e+38  ;;  %v4278_v34 = vsel %vm4022_vm11, 1, %v14279_v1  ;;  %v14611_v7 = vrot.slane %v12611_v28, 4 }
 0x25f   :  { %14607 = vst [vmem:[#allocation74_spill] sm:$0xff] %v13046_v18  ;;  %v6859_v18 = vsel %vm6257_vm0, %v513_v42, -inf  ;;  %v5443_v5 = vsel %vm5187_vm10, %v12897_v61, -3.4028235e+38  ;;  %v6010_v30 = vsel %vm5584_vm3, %v5491_v60, -inf  ;;  %v6858_v6 = vmax.f32 %v6856_v23, %v6857_v37  ;;  %4995 = vperm.xlu0 %8022, %v4278_v34   ;;  %v515_v61 = vld [vmem:[%s14174_s2 + $0x748] sm:$0xff]  ;;  %v13094_v23 = vpop.f32.mrf.mxu0 }
 0x260   :  { %v13067_v17 = vpop.f32.mrf.mxu1  ;;  %v13072_v3 = vmax.f32 %v12611_v28, %v14611_v7  ;;  %v14613_v42 = vrot.slane %v12621_v10, 4  ;;  %v14615_v26 = vrot.slane %v12919_v22, 4  ;;  %v5882_v28 = vsel %vm5584_vm3, %v5442_v41, -inf }
 0x261   :  { %v6011_v7 = vmax.f32 %v6009_v32, %v6010_v30  ;;  %v5883_v36 = vmax.f32 %v5881_v38, %v5882_v28  ;;  %v6012_v60 = vsel %vm5584_vm3, %v5492_v13, -inf  ;;  %vm5237_vm12 = vcmp.eq.s32.totalorder %v12527_v31, 1  ;;  %v514_v13 = vld [vmem:[%s14174_s2 + $0x740] sm:$0xff]  ;;  %v13110_v31 = vpop.permute.xlu1 %4878 }
 0x262   :  { %14612 = vst [vmem:[#allocation52_spill] sm:$0xff] %v13072_v3  ;;  %v13081_v0 = vmax.f32 %v12621_v10, %v14613_v42  ;;  %v13086_v40 = vmax.f32 %v12919_v22, %v14615_v26  ;;  %v13096_v10 = vmax.f32 %v6858_v6, %v6859_v18  ;;  %v14618_v37 = vrot.slane %v12921_v53, 4  ;;  %v13112_v38 = vpop.f32.mrf.mxu1  ;;  %v14621_v18 = vld [vmem:[#allocation83_spill] sm:$0xff]  ;;  %v517_v42 = vld [vmem:[%s14174_s2 + $0x758] sm:$0xff]  ;;  %v13123_v26 = vpop.permute.xlu0 %4875 }
 0x263   :  { %v13103_v41 = vmax.f32 %v5872_v55, %v5873_v27  ;;  %v5999_v32 = vrot.slane %v13048_v39, 4  ;;  %v5884_v34 = vsel %vm5584_vm3, %v5443_v5, -inf  ;;  %vm5188_vm13 = vcmp.eq.s32.totalorder %v14621_v18, 1  ;;  %v14622_v27 = vld [vmem:[#allocation111_spill] sm:$0xff] }
 0x264   :  { %14614 = vst [vmem:[#allocation56_spill] sm:$0xff] %v13081_v0  ;;  %14616 = vst [vmem:[#allocation6_spill] sm:$0xff] %v13086_v40  ;;  %v13101_v22 = vmax.f32 %v12921_v53, %v14618_v37  ;;  %vm5238_vm14 = vcmp.eq.s32.totalorder %v12574_v19, 1  ;;  %vm4025_vm4 = vcmp.gt.f32.partialorder %v515_v61, 0.5  ;;  %v6868_v53 = vsel %vm6257_vm0, %v515_v61, -inf  ;;  %v13126_v37 = vpop.f32.mrf.mxu0  ;;  %v14623_v61 = vld [vmem:[#allocation82_spill] sm:$0xff] }
 0x265   :  { %14617 = vst [vmem:[#allocation54_spill] sm:$0xff] %v13096_v10  ;;  %14620 = vst [vmem:[#allocation51_spill] sm:$0xff] %v13103_v41  ;;  %v5444_v55 = vsel %vm5188_vm13, %v12978_v52, -3.4028235e+38  ;;  %v5493_v30 = vsel %vm5237_vm12, %v14622_v27, -3.4028235e+38  ;;  %v6013_v5 = vmax.f32 %v6011_v7, %v6012_v60  ;;  %v5885_v28 = vmax.f32 %v5883_v36, %v5884_v34  ;;  %v13137_v34 = vpop.f32.mrf.mxu1  ;;  %v13147_v0 = vpop.permute.xlu1 %4884 }
 0x266   :  { %14619 = vst [vmem:[#allocation75_spill] sm:$0xff] %v13101_v22  ;;  %v4281_v6 = vsel %vm4025_vm4, 1, %v14279_v1  ;;  %vm5239_vm15 = vcmp.eq.s32.totalorder %v12568_v20, 1  ;;  %vm4024_vm1 = vcmp.gt.f32.partialorder %v514_v13, 0.5  ;;  %v6867_v52 = vsel %vm6257_vm0, %v514_v13, -inf  ;;  %v14624_v7 = vld [vmem:[#allocation105_spill] sm:$0xff] }
 0x267   :  { %5004 = vperm.xlu1 %8023, %v4281_v6   ;;  %vm5189_vm2 = vcmp.eq.s32.totalorder %v14623_v61, 1  ;;  %v5494_v60 = vsel %vm5238_vm14, %v14624_v7, -3.4028235e+38  ;;  %v4280_v18 = vsel %vm4024_vm1, 1, %v14279_v1  ;;  %v6869_v27 = vmax.f32 %v6867_v52, %v6868_v53  ;;  %v516_v36 = vld [vmem:[%s14174_s2 + $0x750] sm:$0xff]  ;;  %v14625_v22 = vld [vmem:[#allocation85_spill] sm:$0xff] }
 0x268   :  { %vm5190_vm5 = vcmp.eq.s32.totalorder %v14625_v22, 1  ;;  %v6014_v6 = vsel %vm5584_vm3, %v5493_v30, -inf  ;;  %v5445_v13 = vsel %vm5189_vm2, %v13038_v29, -3.4028235e+38  ;;  %5001 = vperm.xlu0 %8022, %v4280_v18   ;;  %vm4027_vm6 = vcmp.gt.f32.partialorder %v517_v42, 0.5  ;;  %v14626_v7 = vld [vmem:[#allocation110_spill] sm:$0xff]  ;;  %v3252_v30 = vpop.f32.mrf.mxu0 }
 0x269   :  { %v5886_v19 = vsel %vm5584_vm3, %v5444_v55, -inf  ;;  %v6015_v61 = vmax.f32 %v6013_v5, %v6014_v6  ;;  %v5495_v53 = vsel %vm5239_vm15, %v14626_v7, -3.4028235e+38  ;;  %v4283_v52 = vsel %vm4027_vm6, 1, %v14279_v1  ;;  %v14627_v18 = vld [vmem:[#allocation43_spill] sm:$0xff]  ;;  %v13161_v6 = vpop.permute.xlu0 %4881 }
 0x26a   :  { %v13149_v40 = vmax.f32 %v5885_v28, %v5886_v19  ;;  %v6016_v41 = vsel %vm5584_vm3, %v5494_v60, -inf  ;;  %vm4026_vm7 = vcmp.gt.f32.partialorder %v516_v36, 0.5  ;;  %v6870_v29 = vsel %vm6257_vm0, %v516_v36, -inf  ;;  %v519_v28 = vld [vmem:[%s14174_s2 + $0x768] sm:$0xff] }
 0x26b   :  { %5010 = vperm.xlu1 %8023, %v4283_v52   ;;  %vm5191_vm8 = vcmp.eq.s32.totalorder %v14627_v18, 1  ;;  %v13155_v55 = vsel %vm5584_vm3, %v5445_v13, -inf  ;;  %v4282_v20 = vsel %vm4026_vm7, 1, %v14279_v1  ;;  %v6871_v5 = vmax.f32 %v6869_v27, %v6870_v29  ;;  %v14629_v52 = vld [vmem:[#allocation91_spill] sm:$0xff]  ;;  %v14630_v29 = vld [vmem:[#allocation86_spill] sm:$0xff] }
 0x26c   :  { %v13166_v19 = vmax.f32 %v13048_v39, %v5999_v32  ;;  %v5446_v36 = vsel %vm5190_vm5, %v12951_v47, -3.4028235e+38  ;;  %v5447_v13 = vsel %vm5191_vm8, %v13009_v51, -3.4028235e+38  ;;  %v6018_v7 = vsel %vm5584_vm3, %v5495_v53, -inf  ;;  %5007 = vperm.xlu0 %8022, %v4282_v20   ;;  %v518_v39 = vld [vmem:[%s14174_s2 + $0x760] sm:$0xff]  ;;  %v13191_v20 = vpop.permute.xlu1 %4890 }
 0x26d   :  { %v6017_v27 = vmax.f32 %v6015_v61, %v6016_v41  ;;  %vm5194_vm9 = vcmp.eq.s32.totalorder %v14629_v52, 1  ;;  %vm5193_vm10 = vcmp.eq.s32.totalorder %v14630_v29, 1  ;;  %v6872_v18 = vsel %vm6257_vm0, %v517_v42, -inf  ;;  %v14631_v51 = vld [vmem:[#allocation88_spill] sm:$0xff]  ;;  %v13205_v3 = vpop.permute.xlu0 %4887 }
 0x26e   :  { %v13163_v60 = vpop.f32.mrf.mxu1  ;;  %14628 = vst [vmem:[#allocation77_spill] sm:$0xff] %v13166_v19  ;;  %v5889_v47 = vmax.f32 %v13149_v40, %v13155_v55  ;;  %vm5192_vm11 = vcmp.eq.s32.totalorder %v14631_v51, 1  ;;  %v5449_v22 = vsel %vm5193_vm10, %v3252_v30, -3.4028235e+38  ;;  %vm4029_vm12 = vcmp.gt.f32.partialorder %v519_v28, 0.5  ;;  %v521_v41 = vld [vmem:[%s14174_s2 + $0x778] sm:$0xff] }
 0x26f   :  { %v5450_v61 = vsel %vm5194_vm9, %v13059_v4, -3.4028235e+38  ;;  %v5448_v42 = vsel %vm5192_vm11, %v13094_v23, -3.4028235e+38  ;;  %vm5240_vm13 = vcmp.eq.s32.totalorder %v12645_v25, 1  ;;  %v4285_v53 = vsel %vm4029_vm12, 1, %v14279_v1 }
 0x270   :  { %v13179_v32 = vpop.f32.mrf.mxu1  ;;  %v14632_v40 = vld [vmem:[#allocation44_spill] sm:$0xff]  ;;  %5016 = vperm.xlu1 %8023, %v4285_v53   ;;  %vm4028_vm4 = vcmp.gt.f32.partialorder %v518_v39, 0.5  ;;  %v6873_v30 = vmax.f32 %v6871_v5, %v6872_v18  ;;  %v6874_v55 = vsel %vm6257_vm0, %v518_v39, -inf  ;;  %v520_v4 = vld [vmem:[%s14174_s2 + $0x770] sm:$0xff]  ;;  %v13200_v23 = vmax.f32 %v6017_v27, %v6018_v7 }
 0x271   :  { %vm5195_vm14 = vcmp.eq.s32.totalorder %v14632_v40, 1  ;;  %v5901_v29 = vsel %vm5584_vm3, %v5449_v22, -inf  ;;  %v6876_v51 = vsel %vm6257_vm0, %v519_v28, -inf  ;;  %v4284_v19 = vsel %vm4028_vm4, 1, %v14279_v1 }
 0x272   :  { %v13193_v52 = vpop.f32.mrf.mxu1  ;;  %v5900_v5 = vsel %vm5584_vm3, %v5448_v42, -inf  ;;  %vm5241_vm15 = vcmp.eq.s32.totalorder %v12624_v24, 1  ;;  %v6875_v18 = vmax.f32 %v6873_v30, %v6874_v55  ;;  %5013 = vperm.xlu0 %8022, %v4284_v19   ;;  %vm4031_vm1 = vcmp.gt.f32.partialorder %v521_v41, 0.5  ;;  %v13220_v42 = vpop.f32.mrf.mxu0  ;;  %v523_v55 = vld [vmem:[%s14174_s2 + $0x788] sm:$0xff] }
 0x273   :  { %v5496_v7 = vsel %vm5240_vm13, %v12268_v14, -3.4028235e+38  ;;  %v5451_v28 = vsel %vm5195_vm14, %v13126_v37, -3.4028235e+38  ;;  %v4287_v27 = vsel %vm4031_vm1, 1, %v14279_v1  ;;  %vm4030_vm2 = vcmp.gt.f32.partialorder %v520_v4, 0.5 }
 0x274   :  { %v13207_v10 = vpop.f32.mrf.mxu1  ;;  %v5902_v22 = vmax.f32 %v5900_v5, %v5901_v29  ;;  %5022 = vperm.xlu1 %8023, %v4287_v27   ;;  %v4286_v19 = vsel %vm4030_vm2, 1, %v14279_v1  ;;  %v6877_v53 = vmax.f32 %v6875_v18, %v6876_v51  ;;  %v6878_v30 = vsel %vm6257_vm0, %v520_v4, -inf  ;;  %v13233_v29 = vpop.permute.xlu1 %4896 }
 0x275   :  { %v5890_v14 = vsel %vm5584_vm3, %v5446_v36, -inf  ;;  %v5892_v25 = vsel %vm5584_vm3, %v5447_v13, -inf  ;;  %v5497_v37 = vsel %vm5241_vm15, %v12326_v48, -3.4028235e+38  ;;  %v6880_v40 = vsel %vm6257_vm0, %v521_v41, -inf  ;;  %v522_v48 = vld [vmem:[%s14174_s2 + $0x780] sm:$0xff]  ;;  %v13246_v18 = vpop.permute.xlu0 %4893  ;;  %v3265_v27 = vpop.f32.mrf.mxu0 }
 0x276   :  { %v13218_v39 = vpop.f32.mrf.mxu1  ;;  %v5891_v51 = vmax.f32 %v5889_v47, %v5890_v14  ;;  %v5903_v4 = vsel %vm5584_vm3, %v5450_v61, -inf  ;;  %vm5243_vm5 = vcmp.eq.s32.totalorder %v12678_v56, 1  ;;  %v6879_v36 = vmax.f32 %v6877_v53, %v6878_v30  ;;  %5019 = vperm.xlu0 %8022, %v4286_v19   ;;  %v525_v19 = vld [vmem:[%s14174_s2 + $0x798] sm:$0xff]  ;;  %v14637_v14 = vld [vmem:[#allocation114_spill] sm:$0xff] }
 0x277   :  { %14633 = vst [vmem:[#allocation55_spill] sm:$0xff] %v13218_v39  ;;  %v6020_v24 = vrot.slane %v13200_v23, 4  ;;  %v5905_v13 = vsel %vm5584_vm3, %v5451_v28, -inf  ;;  %v6026_v41 = vsel %vm5584_vm3, %v5496_v7, -inf  ;;  %vm5242_vm6 = vcmp.eq.s32.totalorder %v12692_v50, 1 }
 0x278   :  { %v13235_v5 = vpop.f32.mrf.mxu1  ;;  %v6027_v47 = vsel %vm5584_vm3, %v5497_v37, -inf  ;;  %v5904_v61 = vmax.f32 %v5902_v22, %v5903_v4  ;;  %v13249_v53 = vmax.f32 %v6879_v36, %v6880_v40  ;;  %vm4033_vm7 = vcmp.gt.f32.partialorder %v523_v55, 0.5  ;;  %v524_v22 = vld [vmem:[%s14174_s2 + $0x790] sm:$0xff] }
 0x279   :  { %14634 = vst [vmem:[#allocation79_spill] sm:$0xff] %v13235_v5  ;;  %v5499_v7 = vsel %vm5243_vm5, %v12289_v43, -3.4028235e+38  ;;  %v4289_v50 = vsel %vm4033_vm7, 1, %v14279_v1  ;;  %v6889_v28 = vsel %vm6257_vm0, %v523_v55, -inf  ;;  %vm4032_vm8 = vcmp.gt.f32.partialorder %v522_v48, 0.5 }
 0x27a   :  { %14635 = vst [vmem:[#allocation76_spill] sm:$0xff] %v13249_v53  ;;  %v13254_v30 = vpop.f32.mrf.mxu1  ;;  %v5498_v37 = vsel %vm5242_vm6, %v14637_v14, -3.4028235e+38  ;;  %v14638_v40 = vld [vmem:[#allocation47_spill] sm:$0xff]  ;;  %5028 = vperm.xlu1 %8023, %v4289_v50   ;;  %v4288_v4 = vsel %vm4032_vm8, 1, %v14279_v1  ;;  %v6888_v36 = vsel %vm6257_vm0, %v522_v48, -inf  ;;  %v13272_v53 = vpop.permute.xlu1 %4902  ;;  %v5906_v14 = vmax.f32 %v5904_v61, %v5905_v13 }
 0x27b   :  { %14636 = vst [vmem:[#allocation25_spill] sm:$0xff] %v13254_v30  ;;  %vm5196_vm9 = vcmp.eq.s32.totalorder %v14638_v40, 1  ;;  %vm5244_vm10 = vcmp.eq.s32.totalorder %v12740_v33, 1  ;;  %v6890_v43 = vmax.f32 %v6888_v36, %v6889_v28  ;;  %5025 = vperm.xlu0 %8022, %v4288_v4   ;;  %vm4035_vm11 = vcmp.gt.f32.partialorder %v525_v19, 0.5  ;;  %v527_v55 = vld [vmem:[%s14174_s2 + $0x7a8] sm:$0xff]  ;;  %v13282_v36 = vpop.permute.xlu0 %4899  ;;  %v14640_v5 = vld [vmem:[#allocation28_spill] sm:$0xff] }
 0x27c   :  { %v5452_v56 = vsel %vm5196_vm9, %v3265_v27, -3.4028235e+38  ;;  %v4291_v40 = vsel %vm4035_vm11, 1, %v14279_v1  ;;  %vm4034_vm12 = vcmp.gt.f32.partialorder %v524_v22, 0.5  ;;  %v6891_v50 = vsel %vm6257_vm0, %v524_v22, -inf  ;;  %v13276_v39 = vpop.f32.mrf.mxu1  ;;  %v529_v33 = vld [vmem:[%s14174_s2 + $0x7b8] sm:$0xff] }
 0x27d   :  { %v13278_v48 = vmax.f32 %v5891_v51, %v5892_v25  ;;  %v6029_v27 = vsel %vm5584_vm3, %v5498_v37, -inf  ;;  %v4290_v28 = vsel %vm4034_vm12, 1, %v14279_v1  ;;  %v6892_v4 = vmax.f32 %v6890_v43, %v6891_v50  ;;  %v526_v25 = vld [vmem:[%s14174_s2 + $0x7a0] sm:$0xff]  ;;  %v14642_v37 = vld [vmem:[#allocation96_spill] sm:$0xff] }
 0x27e   :  { %v6028_v30 = vmax.f32 %v6026_v41, %v6027_v47  ;;  %v5500_v13 = vsel %vm5244_vm10, %v14640_v5, -3.4028235e+38  ;;  %v6893_v61 = vsel %vm6257_vm0, %v525_v19, -inf  ;;  %5034 = vperm.xlu1 %8023, %v4291_v40   ;;  %vm4037_vm13 = vcmp.gt.f32.partialorder %v527_v55, 0.5  ;;  %v13319_v40 = vpop.permute.xlu1 %4908 }
 0x27f   :  { %14639 = vst [vmem:[#allocation78_spill] sm:$0xff] %v13278_v48  ;;  %v13292_v51 = vmax.f32 %v13200_v23, %v6020_v24  ;;  %v13295_v22 = vsel %vm5584_vm3, %v5499_v7, -inf  ;;  %vm5198_vm14 = vcmp.eq.s32.totalorder %v14642_v37, 1  ;;  %v5907_v41 = vsel %vm5584_vm3, %v5452_v56, -inf  ;;  %5031 = vperm.xlu0 %8022, %v4290_v28  }
 0x280   :  { %v13302_v5 = vmax.f32 %v6028_v30, %v6029_v27  ;;  %v13305_v47 = vsel %vm5198_vm14, %v13220_v42, -3.4028235e+38  ;;  %v13307_v19 = vmax.f32 %v5906_v14, %v5907_v41  ;;  %v4293_v23 = vsel %vm4037_vm13, 1, %v14279_v1  ;;  %v528_v30 = vld [vmem:[%s14174_s2 + $0x7b0] sm:$0xff]  ;;  %v14645_v27 = vld [vmem:[#allocation94_spill] sm:$0xff] }
 0x281   :  { %14641 = vst [vmem:[#allocation26_spill] sm:$0xff] %v13292_v51  ;;  %14643 = vst [vmem:[#allocation58_spill] sm:$0xff] %v13305_v47  ;;  %v13313_v7 = vsel %vm5584_vm3, %v5500_v13, -inf  ;;  %vm4036_vm4 = vcmp.gt.f32.partialorder %v526_v25, 0.5  ;;  %v6894_v56 = vmax.f32 %v6892_v4, %v6893_v61  ;;  %v6895_v43 = vsel %vm6257_vm0, %v526_v25, -inf  ;;  %v14646_v4 = vld [vmem:[#allocation68_spill] sm:$0xff]  ;;  %v13332_v25 = vpop.permute.xlu0 %4905 }
 0x282   :  { %14644 = vst [vmem:[#allocation57_spill] sm:$0xff] %v13307_v19  ;;  %v6897_v42 = vsel %vm6257_vm0, %v527_v55, -inf  ;;  %5040 = vperm.xlu1 %8023, %v4293_v23   ;;  %v4292_v14 = vsel %vm4036_vm4, 1, %v14279_v1  ;;  %vm5256_vm15 = vcmp.eq.s32.totalorder %v12984_v35, 1  ;;  %vm4039_vm1 = vcmp.gt.f32.partialorder %v529_v33, 0.5  ;;  %v531_v55 = vld [vmem:[%s14174_s2 + $0x7c8] sm:$0xff] }
 0x283   :  { %v13310_v24 = vpop.f32.mrf.mxu1  ;;  %vm5245_vm2 = vcmp.eq.s32.totalorder %v14645_v27, 1  ;;  %v6896_v28 = vmax.f32 %v6894_v56, %v6895_v43  ;;  %5037 = vperm.xlu0 %8022, %v4292_v14   ;;  %v5512_v13 = vsel %vm5256_vm15, %v14646_v4, -3.4028235e+38  ;;  %v4295_v61 = vsel %vm4039_vm1, 1, %v14279_v1  ;;  %v14647_v43 = vld [vmem:[#allocation100_spill] sm:$0xff] }
 0x284   :  { %v6901_v37 = vsel %vm6257_vm0, %v529_v33, -inf  ;;  %vm4038_vm5 = vcmp.gt.f32.partialorder %v528_v30, 0.5  ;;  %v6899_v35 = vsel %vm6257_vm0, %v528_v30, -inf  ;;  %vm5257_vm6 = vcmp.eq.s32.totalorder %v12975_v8, 1  ;;  %v530_v8 = vld [vmem:[%s14174_s2 + $0x7c0] sm:$0xff]  ;;  %v14648_v30 = vld [vmem:[#allocation64_spill] sm:$0xff] }
 0x285   :  { %v13324_v50 = vpop.f32.mrf.mxu1  ;;  %v4294_v23 = vsel %vm4038_vm5, 1, %v14279_v1  ;;  %v6898_v56 = vmax.f32 %v6896_v28, %v6897_v42  ;;  %v5513_v14 = vsel %vm5257_vm6, %v14647_v43, -3.4028235e+38  ;;  %v6068_v4 = vsel %vm5584_vm3, %v5512_v13, -inf  ;;  %v533_v27 = vld [vmem:[%s14174_s2 + $0x7d8] sm:$0xff] }
 0x286   :  { %5046 = vperm.xlu1 %8023, %v4295_v61   ;;  %v6069_v51 = vsel %vm5584_vm3, %v5513_v14, -inf  ;;  %vm5259_vm7 = vcmp.eq.s32.totalorder %v13017_v9, 1  ;;  %vm5258_vm8 = vcmp.eq.s32.totalorder %v13032_v2, 1  ;;  %vm4041_vm9 = vcmp.gt.f32.partialorder %v531_v55, 0.5  ;;  %v14649_v9 = vld [vmem:[#allocation17_spill] sm:$0xff]  ;;  %v13358_v2 = vpop.permute.xlu1 %4914  ;;  %v14650_v14 = vld [vmem:[#allocation31_spill] sm:$0xff] }
 0x287   :  { %v13337_v41 = vpop.f32.mrf.mxu1  ;;  %v13353_v42 = vsel %vm5245_vm2, %v14648_v30, -3.4028235e+38  ;;  %v6900_v13 = vmax.f32 %v6898_v56, %v6899_v35  ;;  %5043 = vperm.xlu0 %8022, %v4294_v23   ;;  %v5515_v61 = vsel %vm5259_vm7, %v14649_v9, -3.4028235e+38  ;;  %v6070_v43 = vmax.f32 %v6068_v4, %v6069_v51  ;;  %v532_v51 = vld [vmem:[%s14174_s2 + $0x7d0] sm:$0xff]  ;;  %v13375_v56 = vpop.permute.xlu0 %4911 }
 0x288   :  { %v5514_v48 = vsel %vm5258_vm8, %v14650_v14, -3.4028235e+38  ;;  %v4297_v19 = vsel %vm4041_vm9, 1, %v14279_v1  ;;  %v6910_v47 = vsel %vm6257_vm0, %v531_v55, -inf  ;;  %v6073_v35 = vsel %vm5584_vm3, %v5515_v61, -inf }
 0x289   :  { %v13348_v33 = vpop.f32.mrf.mxu1  ;;  %v13368_v28 = vmax.f32 %v6900_v13, %v6901_v37  ;;  %v6071_v23 = vsel %vm5584_vm3, %v5514_v48, -inf  ;;  %vm4040_vm10 = vcmp.gt.f32.partialorder %v530_v8, 0.5  ;;  %v6909_v9 = vsel %vm6257_vm0, %v530_v8, -inf }
 0x28a   :  { %v6072_v55 = vmax.f32 %v6070_v43, %v6071_v23  ;;  %5052 = vperm.xlu1 %8023, %v4297_v19   ;;  %v4296_v4 = vsel %vm4040_vm10, 1, %v14279_v1  ;;  %vm5260_vm11 = vcmp.eq.s32.totalorder %v13065_v62, 1  ;;  %v6911_v13 = vmax.f32 %v6909_v9, %v6910_v47  ;;  %v535_v43 = vld [vmem:[%s14174_s2 + $0x7e8] sm:$0xff]  ;;  %v13392_v23 = vpop.permute.xlu1 %4920 }
 0x28b   :  { %v13366_v30 = vpop.f32.mrf.mxu1  ;;  %5049 = vperm.xlu0 %8022, %v4296_v4   ;;  %v5516_v48 = vsel %vm5260_vm11, %v12750_v11, -3.4028235e+38  ;;  %vm4043_vm12 = vcmp.gt.f32.partialorder %v533_v27, 0.5  ;;  %v6914_v61 = vsel %vm6257_vm0, %v533_v27, -inf  ;;  %vm4042_vm13 = vcmp.gt.f32.partialorder %v532_v51, 0.5 }
 0x28c   :  { %v6075_v19 = vsel %vm5584_vm3, %v5516_v48, -inf  ;;  %v4299_v14 = vsel %vm4043_vm12, 1, %v14279_v1  ;;  %v6912_v62 = vsel %vm6257_vm0, %v532_v51, -inf  ;;  %v4298_v8 = vsel %vm4042_vm13, 1, %v14279_v1  ;;  %v534_v51 = vld [vmem:[%s14174_s2 + $0x7e0] sm:$0xff] }
 0x28d   :  { %v13380_v37 = vpop.f32.mrf.mxu1  ;;  %v6913_v47 = vmax.f32 %v6911_v13, %v6912_v62  ;;  %vm5261_vm14 = vcmp.eq.s32.totalorder %v13057_v63, 1  ;;  %v6074_v11 = vmax.f32 %v6072_v55, %v6073_v35  ;;  %vm5263_vm4 = vcmp.eq.s32.totalorder %v13110_v31, 1  ;;  %v13408_v31 = vpop.permute.xlu0 %4917 }
 0x28e   :  { %5058 = vperm.xlu1 %8023, %v4299_v14   ;;  %v5517_v27 = vsel %vm5261_vm14, %v12804_v58, -3.4028235e+38  ;;  %vm5262_vm15 = vcmp.eq.s32.totalorder %v13123_v26, 1  ;;  %vm4045_vm1 = vcmp.gt.f32.partialorder %v535_v43, 0.5  ;;  %v5519_v35 = vsel %vm5263_vm4, %v12777_v57, -3.4028235e+38 }
 0x28f   :  { %v13400_v4 = vpop.f32.mrf.mxu1  ;;  %5055 = vperm.xlu0 %8022, %v4298_v8   ;;  %v6076_v9 = vmax.f32 %v6074_v11, %v6075_v19  ;;  %v6077_v63 = vsel %vm5584_vm3, %v5517_v27, -inf  ;;  %v5518_v55 = vsel %vm5262_vm15, %v12735_v12, -3.4028235e+38  ;;  %v537_v58 = vld [vmem:[%s14174_s2 + $0x7f8] sm:$0xff]  ;;  %v6081_v26 = vsel %vm5584_vm3, %v5519_v35, -inf  ;;  %v536_v12 = vld [vmem:[%s14174_s2 + $0x7f0] sm:$0xff] }
 0x290   :  { %v6079_v13 = vsel %vm5584_vm3, %v5518_v55, -inf  ;;  %v4301_v48 = vsel %vm4045_vm1, 1, %v14279_v1  ;;  %v6918_v19 = vsel %vm6257_vm0, %v535_v43, -inf  ;;  %vm4044_vm2 = vcmp.gt.f32.partialorder %v534_v51, 0.5 }
 0x291   :  { %v6078_v14 = vmax.f32 %v6076_v9, %v6077_v63  ;;  %v6915_v62 = vmax.f32 %v6913_v47, %v6914_v61  ;;  %v6916_v57 = vsel %vm6257_vm0, %v534_v51, -inf  ;;  %v4300_v8 = vsel %vm4044_vm2, 1, %v14279_v1  ;;  %v13421_v11 = vpop.f32.mrf.mxu1  ;;  %v13425_v51 = vpop.permute.xlu1 %4926 }
 0x292   :  { %5064 = vperm.xlu1 %8023, %v4301_v48   ;;  %vm5265_vm5 = vcmp.eq.s32.totalorder %v13147_v0, 1  ;;  %vm5264_vm6 = vcmp.eq.s32.totalorder %v13161_v6, 1  ;;  %vm4047_vm7 = vcmp.gt.f32.partialorder %v537_v58, 0.5  ;;  %v6922_v63 = vsel %vm6257_vm0, %v537_v58, -inf  ;;  %v14652_v48 = vld [vmem:[#allocation59_spill] sm:$0xff] }
 0x293   :  { %v6080_v43 = vmax.f32 %v6078_v14, %v6079_v13  ;;  %v6917_v27 = vmax.f32 %v6915_v62, %v6916_v57  ;;  %5061 = vperm.xlu0 %8022, %v4300_v8   ;;  %v5520_v61 = vsel %vm5264_vm6, %v12852_v15, -3.4028235e+38  ;;  %v4303_v47 = vsel %vm4047_vm7, 1, %v14279_v1  ;;  %v13436_v14 = vpop.permute.xlu0 %4923  ;;  %v14653_v58 = vld [vmem:[#allocation7_spill] sm:$0xff] }
 0x294   :  { %v6089_v9 = vsel %vm5584_vm3, %v5520_v61, -inf  ;;  %vm4046_vm8 = vcmp.gt.f32.partialorder %v536_v12, 0.5  ;;  %v6920_v35 = vsel %vm6257_vm0, %v536_v12, -inf  ;;  %v5521_v15 = vsel %vm5265_vm5, %v14652_v48, -3.4028235e+38 }
 0x295   :  { %v13430_v6 = vmax.f32 %v6080_v43, %v6081_v26  ;;  %v4302_v55 = vsel %vm4046_vm8, 1, %v14279_v1  ;;  %v6919_v13 = vmax.f32 %v6917_v27, %v6918_v19  ;;  %v6090_v62 = vsel %vm5584_vm3, %v5521_v15, -inf  ;;  %v14657_v27 = vld [vmem:[#allocation71_spill] sm:$0xff]  ;;  %v14659_v15 = vld [vmem:[#allocation5_spill] sm:$0xff] }
 0x296   :  { %5070 = vperm.xlu1 %8023, %v4303_v47   ;;  %vm5267_vm9 = vcmp.eq.s32.totalorder %v13191_v20, 1  ;;  %vm5266_vm10 = vcmp.eq.s32.totalorder %v13205_v3, 1  ;;  %v14654_v57 = vrot.slane %v14653_v58, 4  ;;  %v14656_v0 = vmax.f32 %v13302_v5, %v13295_v22  ;;  %v14658_v20 = vld [vmem:[#allocation36_spill] sm:$0xff] }
 0x297   :  { %14651 = vst [vmem:[#allocation39_spill] sm:$0xff] %v13430_v6  ;;  %v6921_v8 = vmax.f32 %v6919_v13, %v6920_v35  ;;  %5067 = vperm.xlu0 %8022, %v4302_v55   ;;  %v6091_v43 = vmax.f32 %v6089_v9, %v6090_v62  ;;  %v5523_v61 = vsel %vm5267_vm9, %v14657_v27, -3.4028235e+38  ;;  %v13455_v3 = vsel %vm5584_vm3, %v13353_v42, -inf  ;;  %v13468_v9 = vpop.permute.xlu1 %4932  ;;  %v14661_v62 = vld [vmem:[#allocation9_spill] sm:$0xff] }
 0x298   :  { %v6295_v26 = vmax.f32 %v14653_v58, %v14654_v57  ;;  %v13450_v19 = vmax.f32 %v14656_v0, %v13313_v7  ;;  %v5522_v47 = vsel %vm5266_vm10, %v14658_v20, -3.4028235e+38  ;;  %v14660_v58 = vrot.slane %v14659_v15, 4 }
 0x299   :  { %v13444_v12 = vpop.f32.mrf.mxu1  ;;  %v13463_v22 = vmax.f32 %v6921_v8, %v6922_v63  ;;  %v6094_v5 = vsel %vm5584_vm3, %v5523_v61, -inf  ;;  %v6092_v7 = vsel %vm5584_vm3, %v5522_v47, -inf  ;;  %vm5269_vm0 = vcmp.eq.s32.totalorder %v13233_v29, 1  ;;  %v14663_v8 = vld [vmem:[#allocation8_spill] sm:$0xff]  ;;  %v13479_v29 = vpop.permute.xlu0 %4929 }
 0x29a   :  { %14655 = vst [vmem:[#allocation102_spill] sm:$0xff] %v13444_v12  ;;  %v6296_v48 = vrot.slane %v6295_v26, 2  ;;  %v6274_v57 = vmax.f32 %v14659_v15, %v14660_v58  ;;  %v6093_v42 = vmax.f32 %v6091_v43, %v6092_v7  ;;  %vm5268_vm11 = vcmp.eq.s32.totalorder %v13246_v18, 1  ;;  %v14666_v15 = vld [vmem:[#allocation103_spill] sm:$0xff] }
 0x29b   :  { %v13461_v6 = vpop.f32.mrf.mxu1  ;;  %v5524_v13 = vsel %vm5268_vm11, %v12906_v59, -3.4028235e+38  ;;  %v14662_v0 = vrot.slane %v14661_v62, 4  ;;  %v14664_v27 = vrot.slane %v14663_v8, 4  ;;  %v5525_v20 = vsel %vm5269_vm0, %v12963_v46, -3.4028235e+38  ;;  %v13488_v46 = vpop.f32.mrf.mxu0 }
 0x29c   :  { %v6297_v35 = vmax.f32 %v6295_v26, %v6296_v48  ;;  %v6275_v55 = vrot.slane %v6274_v57, 2  ;;  %v6095_v48 = vmax.f32 %v6093_v42, %v6094_v5  ;;  %v6096_v18 = vsel %vm5584_vm3, %v5524_v13, -inf  ;;  %v14665_v59 = vld [vmem:[#allocation16_spill] sm:$0xff]  ;;  %14667 = vst [vmem:[#allocation40_spill] sm:$0xff] %v13488_v46  ;;  %v13493_v13 = vpop.permute.xlu1 %4938 }
 0x29d   :  { %v6337_v63 = vmax.f32 %v14661_v62, %v14662_v0  ;;  %v6316_v61 = vmax.f32 %v14663_v8, %v14664_v27  ;;  %v13481_v47 = vpop.f32.mrf.mxu1  ;;  %vm5197_vm12 = vcmp.eq.s32.totalorder %v14665_v59, 1  ;;  %vm5247_vm13 = vcmp.eq.s32.totalorder %v14666_v15, 1  ;;  %v14678_v59 = vld [vmem:[#allocation60_spill] sm:$0xff] }
 0x29e   :  { %v6298_v26 = vrot.slane %v6297_v35, 1  ;;  %v6276_v43 = vmax.f32 %v6274_v57, %v6275_v55  ;;  %v6098_v62 = vsel %vm5584_vm3, %v5525_v20, -inf  ;;  %vm5271_vm14 = vcmp.eq.s32.totalorder %v13272_v53, 1 }
 0x29f   :  { %v6338_v58 = vrot.slane %v6337_v63, 2  ;;  %v6317_v7 = vrot.slane %v6316_v61, 2  ;;  %v6097_v27 = vmax.f32 %v6095_v48, %v6096_v18  ;;  %v5527_v57 = vsel %vm5271_vm14, %v12936_v49, -3.4028235e+38  ;;  %v13495_v12 = vpop.f32.mrf.mxu1 }
 0x2a0   :  { %v6299_v0 = vmax.f32 %v6297_v35, %v6298_v26  ;;  %v6277_v8 = vrot.slane %v6276_v43, 1  ;;  %v6102_v55 = vsel %vm5584_vm3, %v5527_v57, -inf  ;;  %vm5270_vm4 = vcmp.eq.s32.totalorder %v13282_v36, 1 }
 0x2a1   :  { %v6339_v5 = vmax.f32 %v6337_v63, %v6338_v58  ;;  %v6318_v42 = vmax.f32 %v6316_v61, %v6317_v7  ;;  %v6099_v53 = vmax.f32 %v6097_v27, %v6098_v62  ;;  %v5526_v46 = vsel %vm5270_vm4, %v12889_v54, -3.4028235e+38  ;;  %v13500_v63 = vpop.permute.xlu0 %4935  ;;  %v14668_v61 = vld [vmem:[#allocation11_spill] sm:$0xff]  ;;  %v14670_v7 = vld [vmem:[#allocation10_spill] sm:$0xff]  ;;  %v3268_v54 = vpop.f32.mrf.mxu0 }
 0x2a2   :  { %vm6931_vm15 = vcmp.gt.f32.partialorder %v6299_v0, 0.5  ;;  %v6278_v20 = vmax.f32 %v6276_v43, %v6277_v8  ;;  %v6100_v49 = vsel %vm5584_vm3, %v5526_v46, -inf  ;;  %v14669_v18 = vrot.slane %v14668_v61, 4  ;;  %v13510_v46 = vpop.f32.mrf.mxu1 }
 0x2a3   :  { %v7002_v35 = vsel %vm6931_vm15, 1, %v14279_v1  ;;  %v6340_v26 = vrot.slane %v6339_v5, 1  ;;  %v6319_v48 = vrot.slane %v6318_v42, 1  ;;  %v6101_v36 = vmax.f32 %v6099_v53, %v6100_v49  ;;  %v14673_v49 = vld [vmem:[#allocation13_spill] sm:$0xff] }
 0x2a4   :  { %7037 = vperm.xlu1 %8023, %v7002_v35   ;;  %vm6930_vm1 = vcmp.gt.f32.partialorder %v6278_v20, 0.5  ;;  %v6379_v58 = vmax.f32 %v14668_v61, %v14669_v18  ;;  %v14671_v43 = vrot.slane %v14670_v7, 4  ;;  %vm5273_vm2 = vcmp.eq.s32.totalorder %v13319_v40, 1 }
 0x2a5   :  { %v7001_v0 = vsel %vm6930_vm1, 1, %v14279_v1  ;;  %v6341_v8 = vmax.f32 %v6339_v5, %v6340_v26  ;;  %v6320_v27 = vmax.f32 %v6318_v42, %v6319_v48  ;;  %v13512_v57 = vmax.f32 %v6101_v36, %v6102_v55  ;;  %v13519_v42 = vpop.permute.xlu1 %4944 }
 0x2a6   :  { %v6358_v62 = vmax.f32 %v14670_v7, %v14671_v43  ;;  %7034 = vperm.xlu0 %8022, %v7001_v0   ;;  %v6380_v20 = vrot.slane %v6379_v58, 2  ;;  %vm5272_vm5 = vcmp.eq.s32.totalorder %v13332_v25, 1  ;;  %v14674_v61 = vrot.slane %v14673_v49, 4  ;;  %v14676_v7 = vld [vmem:[#allocation12_spill] sm:$0xff] }
 0x2a7   :  { %14672 = vst [vmem:[#allocation81_spill] sm:$0xff] %v13512_v57  ;;  %vm6933_vm6 = vcmp.gt.f32.partialorder %v6341_v8, 0.5  ;;  %vm6932_vm7 = vcmp.gt.f32.partialorder %v6320_v27, 0.5  ;;  %v5528_v35 = vsel %vm5272_vm5, %v13006_v16, -3.4028235e+38  ;;  %v14677_v43 = vrot.slane %v14676_v7, 4  ;;  %v13531_v8 = vpop.permute.xlu0 %4941  ;;  %v13533_v27 = vpop.f32.mrf.mxu1 }
 0x2a8   :  { %v6359_v53 = vrot.slane %v6358_v62, 2  ;;  %v6421_v5 = vmax.f32 %v14673_v49, %v14674_v61  ;;  %v13523_v26 = vsel %vm5197_vm12, %v3268_v54, -3.4028235e+38  ;;  %v7004_v55 = vsel %vm6933_vm6, 1, %v14279_v1 }
 0x2a9   :  { %14675 = vst [vmem:[#allocation99_spill] sm:$0xff] %v13523_v26  ;;  %v7003_v48 = vsel %vm6932_vm7, 1, %v14279_v1  ;;  %v6381_v36 = vmax.f32 %v6379_v58, %v6380_v20  ;;  %7043 = vperm.xlu1 %8023, %v7004_v55   ;;  %v6110_v18 = vsel %vm5584_vm3, %v5528_v35, -inf  ;;  %v6400_v0 = vmax.f32 %v14676_v7, %v14677_v43  ;;  %v13548_v40 = vpop.permute.xlu1 %4950 }
 0x2aa   :  { %v6360_v25 = vmax.f32 %v6358_v62, %v6359_v53  ;;  %v6422_v16 = vrot.slane %v6421_v5, 2  ;;  %v13538_v54 = vsel %vm5247_vm13, %v14678_v59, -3.4028235e+38  ;;  %7040 = vperm.xlu0 %8022, %v7003_v48   ;;  %v5529_v62 = vsel %vm5273_vm2, %v13034_v44, -3.4028235e+38  ;;  %v13550_v44 = vpop.f32.mrf.mxu1 }
 0x2ab   :  { %14679 = vst [vmem:[#allocation41_spill] sm:$0xff] %v13538_v54  ;;  %v6382_v58 = vrot.slane %v6381_v36, 1  ;;  %vm5275_vm8 = vcmp.eq.s32.totalorder %v13358_v2, 1  ;;  %v6401_v35 = vrot.slane %v6400_v0, 2  ;;  %v6111_v49 = vsel %vm5584_vm3, %v5529_v62, -inf  ;;  %v13560_v62 = vpop.permute.xlu0 %4947 }
 0x2ac   :  { %v6361_v20 = vrot.slane %v6360_v25, 1  ;;  %v6423_v53 = vmax.f32 %v6421_v5, %v6422_v16  ;;  %v6112_v55 = vmax.f32 %v6110_v18, %v6111_v49  ;;  %v5531_v7 = vsel %vm5275_vm8, %v13019_v21, -3.4028235e+38  ;;  %v14680_v5 = vld [vmem:[#allocation15_spill] sm:$0xff]  ;;  %v14682_v18 = vld [vmem:[#allocation14_spill] sm:$0xff] }
 0x2ad   :  { %v6383_v61 = vmax.f32 %v6381_v36, %v6382_v58  ;;  %vm5274_vm9 = vcmp.eq.s32.totalorder %v13375_v56, 1  ;;  %v6402_v43 = vmax.f32 %v6400_v0, %v6401_v35  ;;  %v6115_v59 = vsel %vm5584_vm3, %v5531_v7, -inf }
 0x2ae   :  { %v6362_v15 = vmax.f32 %v6360_v25, %v6361_v20  ;;  %v6424_v48 = vrot.slane %v6423_v53, 1  ;;  %v5530_v2 = vsel %vm5274_vm9, %v12986_v45, -3.4028235e+38  ;;  %v14681_v16 = vrot.slane %v14680_v5, 4 }
 0x2af   :  { %vm6935_vm10 = vcmp.gt.f32.partialorder %v6383_v61, 0.5  ;;  %v14683_v21 = vrot.slane %v14682_v18, 4  ;;  %v6403_v58 = vrot.slane %v6402_v43, 1  ;;  %v6113_v45 = vsel %vm5584_vm3, %v5530_v2, -inf }
 0x2b0   :  { %v6463_v36 = vmax.f32 %v14680_v5, %v14681_v16  ;;  %v7006_v25 = vsel %vm6935_vm10, 1, %v14279_v1  ;;  %vm6934_vm0 = vcmp.gt.f32.partialorder %v6362_v15, 0.5  ;;  %v6425_v0 = vmax.f32 %v6423_v53, %v6424_v48  ;;  %v13565_v5 = vpop.f32.mrf.mxu1 }
 0x2b1   :  { %v6442_v56 = vmax.f32 %v14682_v18, %v14683_v21  ;;  %7049 = vperm.xlu1 %8023, %v7006_v25   ;;  %v7005_v20 = vsel %vm6934_vm0, 1, %v14279_v1  ;;  %v6404_v61 = vmax.f32 %v6402_v43, %v6403_v58  ;;  %v6114_v7 = vmax.f32 %v6112_v55, %v6113_v45  ;;  %v14684_v18 = vld [vmem:[#allocation27_spill] sm:$0xff]  ;;  %v13573_v43 = vpop.permute.xlu1 %4956 }
 0x2b2   :  { %v6464_v35 = vrot.slane %v6463_v36, 2  ;;  %7046 = vperm.xlu0 %8022, %v7005_v20   ;;  %vm6937_vm11 = vcmp.gt.f32.partialorder %v6425_v0, 0.5  ;;  %vm5277_vm12 = vcmp.eq.s32.totalorder %v13392_v23, 1  ;;  %vm5276_vm13 = vcmp.eq.s32.totalorder %v13408_v31, 1 }
 0x2b3   :  { %v6443_v49 = vrot.slane %v6442_v56, 2  ;;  %v7008_v53 = vsel %vm6937_vm11, 1, %v14279_v1  ;;  %vm6936_vm14 = vcmp.gt.f32.partialorder %v6404_v61, 0.5  ;;  %v5532_v16 = vsel %vm5276_vm13, %v13067_v17, -3.4028235e+38  ;;  %v14687_v17 = vld [vmem:[#allocation18_spill] sm:$0xff] }
 0x2b4   :  { %v6465_v15 = vmax.f32 %v6463_v36, %v6464_v35  ;;  %v6116_v2 = vmax.f32 %v6114_v7, %v6115_v59  ;;  %v14685_v21 = vrot.slane %v14684_v18, 4  ;;  %v7007_v55 = vsel %vm6936_vm14, 1, %v14279_v1  ;;  %v13586_v61 = vpop.f32.mrf.mxu1 }
 0x2b5   :  { %v6444_v48 = vmax.f32 %v6442_v56, %v6443_v49  ;;  %7055 = vperm.xlu1 %8023, %v7008_v53   ;;  %v6117_v36 = vsel %vm5584_vm3, %v5532_v16, -inf  ;;  %v14686_v56 = vld [vmem:[#allocation48_spill] sm:$0xff]  ;;  %v14688_v59 = vrot.slane %v14687_v17, 4  ;;  %v5533_v35 = vsel %vm5277_vm12, %v13137_v34, -3.4028235e+38  ;;  %v13584_v49 = vpop.permute.xlu0 %4953 }
 0x2b6   :  { %v6505_v25 = vmax.f32 %v14684_v18, %v14685_v21  ;;  %v6466_v0 = vrot.slane %v6465_v15, 1  ;;  %vm5246_vm4 = vcmp.eq.s32.totalorder %v14686_v56, 1  ;;  %7052 = vperm.xlu0 %8022, %v7007_v55   ;;  %v6118_v31 = vmax.f32 %v6116_v2, %v6117_v36  ;;  %v13591_v36 = vpop.f32.mrf.mxu1 }
 0x2b7   :  { %v6445_v58 = vrot.slane %v6444_v48, 1  ;;  %v6484_v45 = vmax.f32 %v14687_v17, %v14688_v59  ;;  %v6119_v16 = vsel %vm5584_vm3, %v5533_v35, -inf  ;;  %vm5279_vm15 = vcmp.eq.s32.totalorder %v13425_v51, 1  ;;  %v13597_v51 = vpop.permute.xlu1 %4962 }
 0x2b8   :  { %v6506_v20 = vrot.slane %v6505_v25, 2  ;;  %v6467_v7 = vmax.f32 %v6465_v15, %v6466_v0  ;;  %v6120_v21 = vmax.f32 %v6118_v31, %v6119_v16  ;;  %v5535_v55 = vsel %vm5279_vm15, %v13112_v38, -3.4028235e+38 }
 0x2b9   :  { %v6446_v53 = vmax.f32 %v6444_v48, %v6445_v58  ;;  %v6485_v18 = vrot.slane %v6484_v45, 2  ;;  %v6123_v34 = vsel %vm5584_vm3, %v5535_v55, -inf  ;;  %vm5278_vm5 = vcmp.eq.s32.totalorder %v13436_v14, 1  ;;  %v14690_v58 = vld [vmem:[#allocation38_spill] sm:$0xff] }
 0x2ba   :  { %v6507_v2 = vmax.f32 %v6505_v25, %v6506_v20  ;;  %vm6939_vm1 = vcmp.gt.f32.partialorder %v6467_v7, 0.5  ;;  %v14689_v25 = vld [vmem:[#allocation74_spill] sm:$0xff]  ;;  %v6546_v31 = vrot.slane %v14690_v58, 4  ;;  %v14691_v20 = vld [vmem:[#allocation35_spill] sm:$0xff]  ;;  %vm5281_vm6 = vcmp.eq.s32.totalorder %v13468_v9, 1  ;;  %v13605_v7 = vpop.permute.xlu0 %4959 }
 0x2bb   :  { %vm6938_vm2 = vcmp.gt.f32.partialorder %v6446_v53, 0.5  ;;  %v7010_v23 = vsel %vm6939_vm1, 1, %v14279_v1  ;;  %v6486_v0 = vmax.f32 %v6484_v45, %v6485_v18  ;;  %v5534_v38 = vsel %vm5278_vm5, %v14689_v25, -3.4028235e+38  ;;  %v13607_v45 = vpop.f32.mrf.mxu1 }
 0x2bc   :  { %v7009_v15 = vsel %vm6938_vm2, 1, %v14279_v1  ;;  %v6508_v48 = vrot.slane %v6507_v2, 1  ;;  %7061 = vperm.xlu1 %8023, %v7010_v23   ;;  %v6525_v17 = vrot.slane %v14691_v20, 4  ;;  %v6121_v35 = vsel %vm5584_vm3, %v5534_v38, -inf }
 0x2bd   :  { %7058 = vperm.xlu0 %8022, %v7009_v15   ;;  %v6487_v14 = vrot.slane %v6486_v0, 1  ;;  %vm5280_vm7 = vcmp.eq.s32.totalorder %v13479_v29, 1  ;;  %v6122_v53 = vmax.f32 %v6120_v21, %v6121_v35  ;;  %v6547_v16 = vmax.f32 %v14690_v58, %v6546_v31  ;;  %v14692_v15 = vld [vmem:[#allocation65_spill] sm:$0xff] }
 0x2be   :  { %v6509_v59 = vmax.f32 %v6507_v2, %v6508_v48  ;;  %v6526_v18 = vmax.f32 %v14691_v20, %v6525_v17  ;;  %v5536_v55 = vsel %vm5280_vm7, %v13179_v32, -3.4028235e+38  ;;  %v6798_v48 = vrot.slane %v14692_v15, 4  ;;  %v14694_v58 = vld [vmem:[#allocation33_spill] sm:$0xff]  ;;  %v13624_v20 = vpop.f32.mrf.mxu1  ;;  %v14695_v17 = vld [vmem:[#allocation62_spill] sm:$0xff] }
 0x2bf   :  { %v6488_v23 = vmax.f32 %v6486_v0, %v6487_v14  ;;  %v6131_v2 = vsel %vm5584_vm3, %v5536_v55, -inf  ;;  %v13615_v29 = vmax.f32 %v6122_v53, %v6123_v34  ;;  %v6548_v38 = vrot.slane %v6547_v16, 2  ;;  %v13622_v0 = vpop.permute.xlu1 %4968 }
 0x2c0   :  { %vm6941_vm8 = vcmp.gt.f32.partialorder %v6509_v59, 0.5  ;;  %v6527_v54 = vrot.slane %v6526_v18, 2  ;;  %v6799_v21 = vmax.f32 %v14692_v15, %v6798_v48  ;;  %v6630_v31 = vrot.slane %v14694_v58, 4 }
 0x2c1   :  { %v7012_v25 = vsel %vm6941_vm8, 1, %v14279_v1  ;;  %14693 = vst [vmem:[#allocation101_spill] sm:$0xff] %v13615_v29  ;;  %vm6940_vm9 = vcmp.gt.f32.partialorder %v6488_v23, 0.5  ;;  %v5537_v32 = vsel %vm5281_vm6, %v13207_v10, -3.4028235e+38  ;;  %v6549_v14 = vmax.f32 %v6547_v16, %v6548_v38  ;;  %v13635_v10 = vpop.permute.xlu0 %4965  ;;  %v13641_v16 = vpop.f32.mrf.mxu1  ;;  %v14696_v23 = vld [vmem:[#allocation104_spill] sm:$0xff] }
 0x2c2   :  { %7067 = vperm.xlu1 %8023, %v7012_v25   ;;  %v13629_v34 = vsel %vm5246_vm4, %v14695_v17, -3.4028235e+38  ;;  %v7011_v59 = vsel %vm6940_vm9, 1, %v14279_v1  ;;  %v6528_v35 = vmax.f32 %v6526_v18, %v6527_v54  ;;  %v6800_v53 = vrot.slane %v6799_v21, 2 }
 0x2c3   :  { %7064 = vperm.xlu0 %8022, %v7011_v59   ;;  %v6631_v55 = vmax.f32 %v14694_v58, %v6630_v31  ;;  %v6132_v9 = vsel %vm5584_vm3, %v5537_v32, -inf  ;;  %vm5283_vm10 = vcmp.eq.s32.totalorder %v13493_v13, 1  ;;  %v6550_v56 = vrot.slane %v6549_v14, 1 }
 0x2c4   :  { %v6529_v15 = vrot.slane %v6528_v35, 1  ;;  %v6133_v48 = vmax.f32 %v6131_v2, %v6132_v9  ;;  %v6801_v25 = vmax.f32 %v6799_v21, %v6800_v53  ;;  %v5539_v54 = vsel %vm5283_vm10, %v13193_v52, -3.4028235e+38  ;;  %v13647_v21 = vpop.permute.xlu1 %4974 }
 0x2c5   :  { %v6632_v17 = vrot.slane %v6631_v55, 2  ;;  %vm5282_vm0 = vcmp.eq.s32.totalorder %v13500_v63, 1  ;;  %v6551_v18 = vmax.f32 %v6549_v14, %v6550_v56  ;;  %v6136_v13 = vsel %vm5584_vm3, %v5539_v54, -inf  ;;  %v14697_v63 = vld [vmem:[#allocation72_spill] sm:$0xff]  ;;  %v14698_v54 = vld [vmem:[#allocation79_spill] sm:$0xff] }
 0x2c6   :  { %v6530_v38 = vmax.f32 %v6528_v35, %v6529_v15  ;;  %v5538_v58 = vsel %vm5282_vm0, %v13163_v60, -3.4028235e+38  ;;  %v6802_v31 = vrot.slane %v6801_v25, 1  ;;  %v6819_v2 = vrot.slane %v14696_v23, 4  ;;  %v13652_v60 = vpop.permute.xlu0 %4971 }
 0x2c7   :  { %v6633_v32 = vmax.f32 %v6631_v55, %v6632_v17  ;;  %v6134_v59 = vsel %vm5584_vm3, %v5538_v58, -inf  ;;  %vm6943_vm11 = vcmp.gt.f32.partialorder %v6551_v18, 0.5  ;;  %v6651_v53 = vrot.slane %v14697_v63, 4  ;;  %v13654_v55 = vpop.f32.mrf.mxu1 }
 0x2c8   :  { %vm6942_vm12 = vcmp.gt.f32.partialorder %v6530_v38, 0.5  ;;  %v6135_v52 = vmax.f32 %v6133_v48, %v6134_v59  ;;  %v7014_v14 = vsel %vm6943_vm11, 1, %v14279_v1  ;;  %v6803_v9 = vmax.f32 %v6801_v25, %v6802_v31 }
 0x2c9   :  { %v7013_v35 = vsel %vm6942_vm12, 1, %v14279_v1  ;;  %v6634_v56 = vrot.slane %v6633_v32, 1  ;;  %7073 = vperm.xlu1 %8023, %v7014_v14   ;;  %v6820_v15 = vmax.f32 %v14696_v23, %v6819_v2  ;;  %v6652_v17 = vmax.f32 %v14697_v63, %v6651_v53  ;;  %v14699_v23 = vld [vmem:[#allocation80_spill] sm:$0xff]  ;;  %v14700_v63 = vld [vmem:[#allocation63_spill] sm:$0xff] }
 0x2ca   :  { %7070 = vperm.xlu0 %8022, %v7013_v35   ;;  %vm5285_vm13 = vcmp.eq.s32.totalorder %v13519_v42, 1  ;;  %vm5284_vm14 = vcmp.eq.s32.totalorder %v13531_v8, 1  ;;  %vm6955_vm4 = vcmp.gt.f32.partialorder %v6803_v9, 0.5  ;;  %v6137_v25 = vmax.f32 %v6135_v52, %v6136_v13  ;;  %v13665_v35 = vpop.permute.xlu1 %4980  ;;  %v13667_v8 = vpop.f32.mrf.mxu1 }
 0x2cb   :  { %v6635_v48 = vmax.f32 %v6633_v32, %v6634_v56  ;;  %v5540_v18 = vsel %vm5284_vm14, %v14698_v54, -3.4028235e+38  ;;  %v7026_v38 = vsel %vm6955_vm4, 1, %v14279_v1  ;;  %v6821_v58 = vrot.slane %v6820_v15, 2 }
 0x2cc   :  { %v6653_v31 = vrot.slane %v6652_v17, 2  ;;  %v6138_v59 = vsel %vm5584_vm3, %v5540_v18, -inf  ;;  %v6672_v2 = vrot.slane %v14699_v23, 4  ;;  %v6609_v53 = vrot.slane %v14700_v63, 4  ;;  %v13677_v18 = vpop.permute.xlu0 %4977  ;;  %v13682_v42 = vpop.f32.mrf.mxu1 }
 0x2cd   :  { %vm6947_vm15 = vcmp.gt.f32.partialorder %v6635_v48, 0.5  ;;  %v6139_v14 = vmax.f32 %v6137_v25, %v6138_v59  ;;  %7109 = vperm.xlu1 %8023, %v7026_v38   ;;  %v6822_v13 = vmax.f32 %v6820_v15, %v6821_v58  ;;  %v5541_v9 = vsel %vm5285_vm13, %v13276_v39, -3.4028235e+38  ;;  %v14701_v15 = vld [vmem:[#allocation25_spill] sm:$0xff] }
 0x2ce   :  { %v7018_v32 = vsel %vm6947_vm15, 1, %v14279_v1  ;;  %v6654_v52 = vmax.f32 %v6652_v17, %v6653_v31  ;;  %v6673_v56 = vmax.f32 %v14699_v23, %v6672_v2  ;;  %v6610_v48 = vmax.f32 %v14700_v63, %v6609_v53  ;;  %v14702_v63 = vld [vmem:[#allocation55_spill] sm:$0xff]  ;;  %v13688_v57 = vpop.permute.xlu1 %4986 }
 0x2cf   :  { %7085 = vperm.xlu0 %8022, %v7018_v32   ;;  %v6140_v54 = vsel %vm5584_vm3, %v5541_v9, -inf  ;;  %vm5287_vm1 = vcmp.eq.s32.totalorder %v13548_v40, 1  ;;  %v6823_v25 = vrot.slane %v6822_v13, 1  ;;  %vm5286_vm2 = vcmp.eq.s32.totalorder %v13560_v62, 1  ;;  %v14703_v40 = vld [vmem:[#allocation49_spill] sm:$0xff] }
 0x2d0   :  { %v6655_v38 = vrot.slane %v6654_v52, 1  ;;  %v6141_v59 = vmax.f32 %v6139_v14, %v6140_v54  ;;  %v5543_v17 = vsel %vm5287_vm1, %v14701_v15, -3.4028235e+38  ;;  %v6674_v58 = vrot.slane %v6673_v56, 2  ;;  %v14704_v54 = vld [vmem:[#allocation61_spill] sm:$0xff] }
 0x2d1   :  { %v6611_v31 = vrot.slane %v6610_v48, 2  ;;  %v6144_v39 = vsel %vm5584_vm3, %v5543_v17, -inf  ;;  %v6824_v23 = vmax.f32 %v6822_v13, %v6823_v25  ;;  %v5542_v53 = vsel %vm5286_vm2, %v14702_v63, -3.4028235e+38  ;;  %v13693_v63 = vpop.permute.xlu0 %4983 }
 0x2d2   :  { %v6656_v2 = vmax.f32 %v6654_v52, %v6655_v38  ;;  %v6840_v32 = vrot.slane %v14703_v40, 4  ;;  %v6675_v9 = vmax.f32 %v6673_v56, %v6674_v58  ;;  %v6142_v14 = vsel %vm5584_vm3, %v5542_v53, -inf  ;;  %v13695_v56 = vpop.f32.mrf.mxu1  ;;  %v14705_v53 = vld [vmem:[#allocation54_spill] sm:$0xff] }
 0x2d3   :  { %v6612_v26 = vmax.f32 %v6610_v48, %v6611_v31  ;;  %v6777_v15 = vrot.slane %v14704_v54, 4  ;;  %vm6956_vm5 = vcmp.gt.f32.partialorder %v6824_v23, 0.5  ;;  %v6143_v17 = vmax.f32 %v6141_v59, %v6142_v14 }
 0x2d4   :  { %vm6948_vm6 = vcmp.gt.f32.partialorder %v6656_v2, 0.5  ;;  %v6841_v62 = vmax.f32 %v14703_v40, %v6840_v32  ;;  %v7027_v13 = vsel %vm6956_vm5, 1, %v14279_v1  ;;  %v6676_v25 = vrot.slane %v6675_v9, 1 }
 0x2d5   :  { %v7019_v52 = vsel %vm6948_vm6, 1, %v14279_v1  ;;  %v6613_v38 = vrot.slane %v6612_v26, 1  ;;  %v6037_v48 = vsel %vm5584_vm3, %v13629_v34, -inf  ;;  %7112 = vperm.xlu1 %8023, %v7027_v13   ;;  %v13699_v58 = vmax.f32 %v6143_v17, %v6144_v39 }
 0x2d6   :  { %7088 = vperm.xlu0 %8022, %v7019_v52   ;;  %v6842_v59 = vrot.slane %v6841_v62, 2  ;;  %v6778_v31 = vmax.f32 %v14704_v54, %v6777_v15  ;;  %v6677_v23 = vmax.f32 %v6675_v9, %v6676_v25  ;;  %vm5288_vm7 = vcmp.eq.s32.totalorder %v13584_v49, 1  ;;  %v13714_v49 = vpop.f32.mrf.mxu1  ;;  %v13723_v25 = vpop.permute.xlu0 %4989 }
 0x2d7   :  { %v6614_v2 = vmax.f32 %v6612_v26, %v6613_v38  ;;  %v6861_v40 = vrot.slane %v14705_v53, 4  ;;  %vm5289_vm8 = vcmp.eq.s32.totalorder %v13573_v43, 1  ;;  %v5544_v29 = vsel %vm5288_vm7, %v13324_v50, -3.4028235e+38  ;;  %v13712_v26 = vpop.permute.xlu1 %4992 }
 0x2d8   :  { %v6843_v32 = vmax.f32 %v6841_v62, %v6842_v59  ;;  %v6779_v14 = vrot.slane %v6778_v31, 2  ;;  %v14706_v34 = vmax.f32 %v13450_v19, %v13455_v3  ;;  %vm6949_vm9 = vcmp.gt.f32.partialorder %v6677_v23, 0.5  ;;  %v14707_v62 = vld [vmem:[#allocation84_spill] sm:$0xff] }
 0x2d9   :  { %vm6946_vm10 = vcmp.gt.f32.partialorder %v6614_v2, 0.5  ;;  %v6862_v9 = vmax.f32 %v14705_v53, %v6861_v40  ;;  %v7020_v54 = vsel %vm6949_vm9, 1, %v14279_v1  ;;  %v6152_v50 = vsel %vm5584_vm3, %v5544_v29, -inf  ;;  %v13729_v2 = vpop.f32.mrf.mxu1  ;;  %v14708_v53 = vld [vmem:[#allocation76_spill] sm:$0xff] }
 0x2da   :  { %v13709_v39 = vmax.f32 %v14706_v34, %v6037_v48  ;;  %v7017_v15 = vsel %vm6946_vm10, 1, %v14279_v1  ;;  %v6844_v17 = vrot.slane %v6843_v32, 1  ;;  %7091 = vperm.xlu1 %8023, %v7020_v54   ;;  %v6780_v19 = vmax.f32 %v6778_v31, %v6779_v14 }
 0x2db   :  { %7082 = vperm.xlu0 %8022, %v7017_v15   ;;  %v6863_v3 = vrot.slane %v6862_v9, 2  ;;  %v6693_v13 = vrot.slane %v14707_v62, 4  ;;  %v5545_v52 = vsel %vm5289_vm8, %v13348_v33, -3.4028235e+38  ;;  %vm5291_vm0 = vcmp.eq.s32.totalorder %v13597_v51, 1 }
 0x2dc   :  { %v6845_v38 = vmax.f32 %v6843_v32, %v6844_v17  ;;  %v6153_v48 = vsel %vm5584_vm3, %v5545_v52, -inf  ;;  %vm5290_vm11 = vcmp.eq.s32.totalorder %v13605_v7, 1  ;;  %v6781_v29 = vrot.slane %v6780_v19, 1  ;;  %v13735_v7 = vpop.permute.xlu1 %4998  ;;  %v14709_v17 = vld [vmem:[#allocation93_spill] sm:$0xff] }
 0x2dd   :  { %v6864_v59 = vmax.f32 %v6862_v9, %v6863_v3  ;;  %v6694_v31 = vmax.f32 %v14707_v62, %v6693_v13  ;;  %v6154_v23 = vmax.f32 %v6152_v50, %v6153_v48  ;;  %v5547_v43 = vsel %vm5291_vm0, %v13337_v41, -3.4028235e+38  ;;  %v13741_v62 = vpop.permute.xlu0 %4995 }
 0x2de   :  { %vm6957_vm12 = vcmp.gt.f32.partialorder %v6845_v38, 0.5  ;;  %v5546_v33 = vsel %vm5290_vm11, %v13310_v24, -3.4028235e+38  ;;  %v6882_v40 = vrot.slane %v14708_v53, 4  ;;  %v6782_v14 = vmax.f32 %v6780_v19, %v6781_v29  ;;  %v13743_v19 = vpop.f32.mrf.mxu1 }
 0x2df   :  { %v7028_v32 = vsel %vm6957_vm12, 1, %v14279_v1  ;;  %v6865_v51 = vrot.slane %v6864_v59, 1  ;;  %v6695_v34 = vrot.slane %v6694_v31, 2  ;;  %v6157_v9 = vsel %vm5584_vm3, %v5547_v43, -inf }
 0x2e0   :  { %7115 = vperm.xlu1 %8023, %v7028_v32   ;;  %v6155_v54 = vsel %vm5584_vm3, %v5546_v33, -inf  ;;  %v6883_v15 = vmax.f32 %v14708_v53, %v6882_v40  ;;  %v6714_v41 = vrot.slane %v14709_v17, 4  ;;  %vm6954_vm13 = vcmp.gt.f32.partialorder %v6782_v14, 0.5  ;;  %v14710_v40 = vld [vmem:[#allocation19_spill] sm:$0xff]  ;;  %v14711_v14 = vld [vmem:[#allocation42_spill] sm:$0xff] }
 0x2e1   :  { %v6866_v24 = vmax.f32 %v6864_v59, %v6865_v51  ;;  %v6696_v50 = vmax.f32 %v6694_v31, %v6695_v34  ;;  %v6156_v3 = vmax.f32 %v6154_v23, %v6155_v54  ;;  %v7025_v13 = vsel %vm6954_vm13, 1, %v14279_v1  ;;  %v13756_v54 = vpop.f32.mrf.mxu1 }
 0x2e2   :  { %v6884_v52 = vrot.slane %v6883_v15, 2  ;;  %v6715_v38 = vmax.f32 %v14709_v17, %v6714_v41  ;;  %vm5293_vm14 = vcmp.eq.s32.totalorder %v13622_v0, 1  ;;  %7106 = vperm.xlu0 %8022, %v7025_v13   ;;  %vm5292_vm15 = vcmp.eq.s32.totalorder %v13635_v10, 1  ;;  %v13754_v34 = vpop.permute.xlu1 %5004 }
 0x2e3   :  { %vm6958_vm4 = vcmp.gt.f32.partialorder %v6866_v24, 0.5  ;;  %v6697_v48 = vrot.slane %v6696_v50, 1  ;;  %v6158_v29 = vmax.f32 %v6156_v3, %v6157_v9  ;;  %v5548_v43 = vsel %vm5292_vm15, %v13380_v37, -3.4028235e+38  ;;  %v14712_v3 = vld [vmem:[#allocation107_spill] sm:$0xff] }
 0x2e4   :  { %v7029_v59 = vsel %vm6958_vm4, 1, %v14279_v1  ;;  %v6885_v31 = vmax.f32 %v6883_v15, %v6884_v52  ;;  %v6716_v23 = vrot.slane %v6715_v38, 2  ;;  %v6159_v53 = vsel %vm5584_vm3, %v5548_v43, -inf }
 0x2e5   :  { %7118 = vperm.xlu1 %8023, %v7029_v59   ;;  %v6698_v33 = vmax.f32 %v6696_v50, %v6697_v48  ;;  %v6735_v32 = vrot.slane %v14710_v40, 4  ;;  %v6567_v51 = vrot.slane %v14711_v14, 4  ;;  %v6160_v17 = vmax.f32 %v6158_v29, %v6159_v53  ;;  %v13764_v50 = vpop.permute.xlu0 %5001  ;;  %v13772_v59 = vpop.f32.mrf.mxu1 }
 0x2e6   :  { %v6886_v10 = vrot.slane %v6885_v31, 1  ;;  %v6717_v9 = vmax.f32 %v6715_v38, %v6716_v23  ;;  %v5549_v15 = vsel %vm5293_vm14, %v13421_v11, -3.4028235e+38  ;;  %vm5248_vm2 = vcmp.eq.s32.totalorder %v14712_v3, 1  ;;  %v13770_v11 = vpop.permute.xlu1 %5010  ;;  %v14713_v23 = vld [vmem:[#allocation92_spill] sm:$0xff]  ;;  %v14717_v3 = vld [vmem:[#allocation23_spill] sm:$0xff] }
 0x2e7   :  { %vm6950_vm1 = vcmp.gt.f32.partialorder %v6698_v33, 0.5  ;;  %v6736_v37 = vmax.f32 %v14710_v40, %v6735_v32  ;;  %v6568_v41 = vmax.f32 %v14711_v14, %v6567_v51  ;;  %v6161_v24 = vsel %vm5584_vm3, %v5549_v15, -inf }
 0x2e8   :  { %v7021_v13 = vsel %vm6950_vm1, 1, %v14279_v1  ;;  %v6887_v52 = vmax.f32 %v6885_v31, %v6886_v10  ;;  %v6718_v38 = vrot.slane %v6717_v9, 1  ;;  %v6162_v48 = vmax.f32 %v6160_v17, %v6161_v24  ;;  %v13784_v24 = vpop.f32.mrf.mxu1 }
 0x2e9   :  { %7094 = vperm.xlu0 %8022, %v7021_v13   ;;  %v6737_v29 = vrot.slane %v6736_v37, 2  ;;  %v6569_v0 = vrot.slane %v6568_v41, 2  ;;  %vm5295_vm5 = vcmp.eq.s32.totalorder %v13647_v21, 1  ;;  %vm5294_vm6 = vcmp.eq.s32.totalorder %v13652_v60, 1  ;;  %v13778_v14 = vpop.permute.xlu0 %5007  ;;  %v14714_v60 = vld [vmem:[#allocation53_spill] sm:$0xff] }
 0x2ea   :  { %vm5249_vm7 = vcmp.eq.s32.totalorder %v14713_v23, 1  ;;  %vm6959_vm8 = vcmp.gt.f32.partialorder %v6887_v52, 0.5  ;;  %v6719_v43 = vmax.f32 %v6717_v9, %v6718_v38  ;;  %v5550_v33 = vsel %vm5294_vm6, %v13366_v30, -3.4028235e+38 }
 0x2eb   :  { %v7030_v31 = vsel %vm6959_vm8, 1, %v14279_v1  ;;  %v6738_v53 = vmax.f32 %v6736_v37, %v6737_v29  ;;  %v6570_v40 = vmax.f32 %v6568_v41, %v6569_v0  ;;  %v5551_v32 = vsel %vm5295_vm5, %v13400_v4, -3.4028235e+38  ;;  %v13793_v0 = vpop.permute.xlu1 %5016 }
 0x2ec   :  { %7121 = vperm.xlu1 %8023, %v7030_v31   ;;  %vm6951_vm9 = vcmp.gt.f32.partialorder %v6719_v43, 0.5  ;;  %v6163_v21 = vsel %vm5584_vm3, %v5550_v33, -inf  ;;  %v6588_v51 = vrot.slane %v14714_v60, 4  ;;  %v6903_v10 = vrot.slane %v13368_v28, 4  ;;  %v14715_v31 = vld [vmem:[#allocation98_spill] sm:$0xff] }
 0x2ed   :  { %v7022_v9 = vsel %vm6951_vm9, 1, %v14279_v1  ;;  %v6739_v17 = vrot.slane %v6738_v53, 1  ;;  %v6571_v30 = vrot.slane %v6570_v40, 1  ;;  %v6164_v15 = vmax.f32 %v6162_v48, %v6163_v21 }
 0x2ee   :  { %7097 = vperm.xlu0 %8022, %v7022_v9   ;;  %v6165_v4 = vsel %vm5584_vm3, %v5551_v32, -inf  ;;  %v6589_v37 = vmax.f32 %v14714_v60, %v6588_v51  ;;  %v6904_v41 = vmax.f32 %v13368_v28, %v6903_v10  ;;  %vm5296_vm10 = vcmp.eq.s32.totalorder %v13677_v18, 1  ;;  %v14716_v51 = vld [vmem:[#allocation29_spill] sm:$0xff] }
 0x2ef   :  { %v6740_v13 = vmax.f32 %v6738_v53, %v6739_v17  ;;  %v6572_v52 = vmax.f32 %v6570_v40, %v6571_v30  ;;  %v13790_v38 = vmax.f32 %v6164_v15, %v6165_v4  ;;  %v5552_v29 = vsel %vm5296_vm10, %v13461_v6, -3.4028235e+38  ;;  %v13799_v53 = vpop.permute.xlu0 %5013  ;;  %v13801_v40 = vpop.f32.mrf.mxu1 }
 0x2f0   :  { %v6590_v48 = vrot.slane %v6589_v37, 2  ;;  %v6905_v43 = vrot.slane %v6904_v41, 2  ;;  %vm5297_vm0 = vcmp.eq.s32.totalorder %v13665_v35, 1  ;;  %v6924_v33 = vrot.slane %v13463_v22, 4  ;;  %v13815_v15 = vpop.permute.xlu1 %5022 }
 0x2f1   :  { %vm6952_vm11 = vcmp.gt.f32.partialorder %v6740_v13, 0.5  ;;  %vm6944_vm12 = vcmp.gt.f32.partialorder %v6572_v52, 0.5  ;;  %v6173_v28 = vsel %vm5584_vm3, %v5552_v29, -inf  ;;  %v6756_v18 = vrot.slane %v14715_v31, 4  ;;  %v13826_v35 = vpop.f32.mrf.mxu1 }
 0x2f2   :  { %v7023_v6 = vsel %vm6952_vm11, 1, %v14279_v1  ;;  %v7015_v32 = vsel %vm6944_vm12, 1, %v14279_v1  ;;  %v6591_v21 = vmax.f32 %v6589_v37, %v6590_v48  ;;  %v6906_v60 = vmax.f32 %v6904_v41, %v6905_v43 }
 0x2f3   :  { %v13808_v10 = vsel %vm5248_vm2, %v14716_v51, -3.4028235e+38  ;;  %7100 = vperm.xlu1 %8023, %v7023_v6   ;;  %7076 = vperm.xlu0 %8022, %v7015_v32   ;;  %v6925_v9 = vmax.f32 %v13463_v22, %v6924_v33  ;;  %v6757_v17 = vmax.f32 %v14715_v31, %v6756_v18  ;;  %v5553_v30 = vsel %vm5297_vm0, %v13495_v12, -3.4028235e+38  ;;  %v13824_v48 = vpop.permute.xlu0 %5019  ;;  %v14718_v18 = vld [vmem:[#allocation102_spill] sm:$0xff] }
 0x2f4   :  { %v6592_v4 = vrot.slane %v6591_v21, 1  ;;  %v6907_v37 = vrot.slane %v6906_v60, 1  ;;  %v6174_v41 = vsel %vm5584_vm3, %v5553_v30, -inf  ;;  %vm5299_vm13 = vcmp.eq.s32.totalorder %v13688_v57, 1 }
 0x2f5   :  { %v13822_v13 = vsel %vm5249_vm7, %v14717_v3, -3.4028235e+38  ;;  %v6926_v22 = vrot.slane %v6925_v9, 2  ;;  %v6758_v52 = vrot.slane %v6757_v17, 2  ;;  %v6175_v29 = vmax.f32 %v6173_v28, %v6174_v41 }
 0x2f6   :  { %v6593_v12 = vmax.f32 %v6591_v21, %v6592_v4  ;;  %v6908_v43 = vmax.f32 %v6906_v60, %v6907_v37  ;;  %v5555_v33 = vsel %vm5299_vm13, %v13481_v47, -3.4028235e+38  ;;  %vm5298_vm14 = vcmp.eq.s32.totalorder %v13693_v63, 1  ;;  %v13836_v60 = vpop.permute.xlu1 %5028  ;;  %v13838_v63 = vpop.f32.mrf.mxu1 }
 0x2f7   :  { %v6927_v31 = vmax.f32 %v6925_v9, %v6926_v22  ;;  %v6759_v57 = vmax.f32 %v6757_v17, %v6758_v52  ;;  %v5554_v6 = vsel %vm5298_vm14, %v14718_v18, -3.4028235e+38  ;;  %vm5301_vm4 = vcmp.eq.s32.totalorder %v13712_v26, 1 }
 0x2f8   :  { %vm6945_vm15 = vcmp.gt.f32.partialorder %v6593_v12, 0.5  ;;  %vm6960_vm1 = vcmp.gt.f32.partialorder %v6908_v43, 0.5  ;;  %v6176_v23 = vsel %vm5584_vm3, %v5554_v6, -inf  ;;  %vm5300_vm2 = vcmp.eq.s32.totalorder %v13723_v25, 1  ;;  %v5026_v25 = vpop.permute.xlu0 %5025  ;;  %v13850_v22 = vpop.f32.mrf.mxu1 }
 0x2f9   :  { %v7016_v28 = vsel %vm6945_vm15, 1, %v14279_v1  ;;  %v7031_v32 = vsel %vm6960_vm1, 1, %v14279_v1  ;;  %v6928_v21 = vrot.slane %v6927_v31, 1  ;;  %v6760_v47 = vrot.slane %v6759_v57, 1 }
 0x2fa   :  { %7079 = vperm.xlu1 %8023, %v7016_v28   ;;  %7124 = vperm.xlu0 %8022, %v7031_v32   ;;  %v6177_v51 = vmax.f32 %v6175_v29, %v6176_v23  ;;  %v5556_v26 = vsel %vm5300_vm2, %v13533_v27, -3.4028235e+38  ;;  %v5557_v9 = vsel %vm5301_vm4, %v13565_v5, -3.4028235e+38  ;;  %vm5303_vm5 = vcmp.eq.s32.totalorder %v13735_v7, 1  ;;  %v5035_v7 = vpop.permute.xlu1 %5034 }
 0x2fb   :  { %v6929_v17 = vmax.f32 %v6927_v31, %v6928_v21  ;;  %v6761_v30 = vmax.f32 %v6759_v57, %v6760_v47  ;;  %v6178_v4 = vsel %vm5584_vm3, %v5555_v33, -inf  ;;  %v6180_v37 = vsel %vm5584_vm3, %v5556_v26, -inf }
 0x2fc   :  { %v6179_v41 = vmax.f32 %v6177_v51, %v6178_v4  ;;  %v6182_v3 = vsel %vm5584_vm3, %v5557_v9, -inf  ;;  %vm5302_vm6 = vcmp.eq.s32.totalorder %v13741_v62, 1  ;;  %vm5305_vm7 = vcmp.eq.s32.totalorder %v13754_v34, 1  ;;  %v5032_v33 = vpop.permute.xlu0 %5031 }
 0x2fd   :  { %vm6961_vm8 = vcmp.gt.f32.partialorder %v6929_v17, 0.5  ;;  %vm6953_vm9 = vcmp.gt.f32.partialorder %v6761_v30, 0.5  ;;  %v5559_v27 = vsel %vm5303_vm5, %v13550_v44, -3.4028235e+38  ;;  %v5558_v5 = vsel %vm5302_vm6, %v13510_v46, -3.4028235e+38 }
 0x2fe   :  { %v7032_v52 = vsel %vm6961_vm8, 1, %v14279_v1  ;;  %v7024_v29 = vsel %vm6953_vm9, 1, %v14279_v1  ;;  %v6181_v12 = vmax.f32 %v6179_v41, %v6180_v37  ;;  %v6184_v43 = vsel %vm5584_vm3, %v5558_v5, -inf }
 0x2ff   :  { %7127 = vperm.xlu1 %8023, %v7032_v52   ;;  %7103 = vperm.xlu0 %8022, %v7024_v29   ;;  %vm5304_vm10 = vcmp.eq.s32.totalorder %v13764_v50, 1  ;;  %v5561_v62 = vsel %vm5305_vm7, %v13624_v20, -3.4028235e+38  ;;  %vm5307_vm0 = vcmp.eq.s32.totalorder %v13770_v11, 1  ;;  %vm5306_vm11 = vcmp.eq.s32.totalorder %v13778_v14, 1  ;;  %v5041_v20 = vpop.permute.xlu1 %5040  ;;  %v3764_v50 = vpop.f32.mrf.mxu1 }
 0x300   :  { %v6183_v46 = vmax.f32 %v6181_v12, %v6182_v3  ;;  %v6186_v44 = vsel %vm5584_vm3, %v5559_v27, -inf  ;;  %v5560_v34 = vsel %vm5304_vm10, %v13591_v36, -3.4028235e+38  ;;  %v6195_v1 = vsel %vm5584_vm3, %v5561_v62, -inf  ;;  %v5038_v23 = vpop.permute.xlu0 %5037  ;;  %v14720_v27 = vld [vmem:[#allocation50_spill] sm:$0xff] }
 0x301   :  { %v6194_v31 = vsel %vm5584_vm3, %v5560_v34, -inf  ;;  %v5563_v57 = vsel %vm5307_vm0, %v13607_v45, -3.4028235e+38  ;;  %v5562_v18 = vsel %vm5306_vm11, %v13586_v61, -3.4028235e+38  ;;  %vm5309_vm12 = vcmp.eq.s32.totalorder %v13793_v0, 1 }
 0x302   :  { %v6185_v11 = vmax.f32 %v6183_v46, %v6184_v43  ;;  %v6196_v6 = vmax.f32 %v6194_v31, %v6195_v1  ;;  %v6197_v14 = vsel %vm5584_vm3, %v5562_v18, -inf  ;;  %vm5308_vm13 = vcmp.eq.s32.totalorder %v13799_v53, 1 }
 0x303   :  { %v5564_v36 = vsel %vm5308_vm13, %v13654_v55, -3.4028235e+38  ;;  %v5565_v28 = vsel %vm5309_vm12, %v13682_v42, -3.4028235e+38  ;;  %vm5311_vm14 = vcmp.eq.s32.totalorder %v13815_v15, 1  ;;  %vm5310_vm4 = vcmp.eq.s32.totalorder %v13824_v48, 1  ;;  %v5047_v55 = vpop.permute.xlu1 %5046  ;;  %v13882_v42 = vpop.f32.mrf.mxu1 }
 0x304   :  { %v13874_v61 = vsel %vm5584_vm3, %v13808_v10, -inf  ;;  %v13876_v45 = vmax.f32 %v6185_v11, %v6186_v44  ;;  %v6199_v0 = vsel %vm5584_vm3, %v5563_v57, -inf  ;;  %v6198_v32 = vmax.f32 %v6196_v6, %v6197_v14  ;;  %v5044_v51 = vpop.permute.xlu0 %5043 }
 0x305   :  { %v6201_v53 = vsel %vm5584_vm3, %v5564_v36, -inf  ;;  %v5566_v21 = vsel %vm5310_vm4, %v13641_v16, -3.4028235e+38  ;;  %vm5313_vm15 = vcmp.eq.s32.totalorder %v13836_v60, 1  ;;  %vm5312_vm1 = vcmp.eq.s32.totalorder %v5026_v25, 1  ;;  %v3777_v37 = vpop.f32.mrf.mxu1 }
 0x306   :  { %v13886_v15 = vsel %vm5584_vm3, %v13822_v13, -inf  ;;  %v6200_v10 = vmax.f32 %v6198_v32, %v6199_v0  ;;  %v6203_v48 = vsel %vm5584_vm3, %v5565_v28, -inf  ;;  %v5567_v47 = vsel %vm5311_vm14, %v13667_v8, -3.4028235e+38 }
 0x307   :  { %v5568_v26 = vsel %vm5312_vm1, %v13714_v49, -3.4028235e+38  ;;  %v5569_v16 = vsel %vm5313_vm15, %v13743_v19, -3.4028235e+38  ;;  %vm5315_vm2 = vcmp.eq.s32.totalorder %v5035_v7, 1  ;;  %vm5314_vm5 = vcmp.eq.s32.totalorder %v5032_v33, 1  ;;  %v5053_v8 = vpop.permute.xlu1 %5052  ;;  %v8012_v46 = vpop.f32.mrf.mxu1 }
 0x308   :  { %v6202_v60 = vmax.f32 %v6200_v10, %v6201_v53  ;;  %v6205_v9 = vsel %vm5584_vm3, %v5566_v21, -inf  ;;  %v6215_v25 = vsel %vm5584_vm3, %v5568_v26, -inf  ;;  %v6216_v13 = vsel %vm5584_vm3, %v5569_v16, -inf  ;;  %v14719_v49 = vld [vmem:[#allocation37_spill] sm:$0xff]  ;;  %v5050_v3 = vpop.permute.xlu0 %5049 }
 0x309   :  { %v6217_v17 = vmax.f32 %v6215_v25, %v6216_v13  ;;  %v5571_v30 = vsel %vm5315_vm2, %v13729_v2, -3.4028235e+38  ;;  %v5570_v4 = vsel %vm5314_vm5, %v13695_v56, -3.4028235e+38  ;;  %vm5317_vm6 = vcmp.eq.s32.totalorder %v5041_v20, 1  ;;  %v3780_v36 = vpop.f32.mrf.mxu1  ;;  %v14726_v13 = vld [vmem:[#allocation89_spill] sm:$0xff] }
 0x30a   :  { %vm5250_vm7 = vcmp.eq.s32.totalorder %v14719_v49, 1  ;;  %v6204_v19 = vmax.f32 %v6202_v60, %v6203_v48  ;;  %v6218_v41 = vsel %vm5584_vm3, %v5570_v4, -inf  ;;  %vm5316_vm8 = vcmp.eq.s32.totalorder %v5038_v23, 1  ;;  %v14722_v48 = vld [vmem:[#allocation21_spill] sm:$0xff]  ;;  %v14724_v60 = vld [vmem:[#allocation46_spill] sm:$0xff] }
 0x30b   :  { %vm5251_vm9 = vcmp.eq.s32.totalorder %v14720_v27, 1  ;;  %v6207_v5 = vsel %vm5584_vm3, %v5567_v47, -inf  ;;  %v6219_v7 = vmax.f32 %v6217_v17, %v6218_v41  ;;  %v5572_v52 = vsel %vm5316_vm8, %v13772_v59, -3.4028235e+38  ;;  %v5059_v62 = vpop.permute.xlu1 %5058 }
 0x30c   :  { %v5573_v2 = vsel %vm5317_vm6, %v13801_v40, -3.4028235e+38  ;;  %v6206_v56 = vmax.f32 %v6204_v19, %v6205_v9  ;;  %v6220_v29 = vsel %vm5584_vm3, %v5571_v30, -inf  ;;  %v6222_v12 = vsel %vm5584_vm3, %v5572_v52, -inf  ;;  %v5056_v40 = vpop.permute.xlu0 %5055  ;;  %v14728_v19 = vld [vmem:[#allocation20_spill] sm:$0xff] }
 0x30d   :  { %vm5319_vm10 = vcmp.eq.s32.totalorder %v5047_v55, 1  ;;  %v6221_v43 = vmax.f32 %v6219_v7, %v6220_v29  ;;  %v6224_v33 = vsel %vm5584_vm3, %v5573_v2, -inf  ;;  %vm5318_vm0 = vcmp.eq.s32.totalorder %v5044_v51, 1 }
 0x30e   :  { %vm5321_vm11 = vcmp.eq.s32.totalorder %v5053_v8, 1  ;;  %v13906_v44 = vmax.f32 %v6206_v56, %v6207_v5  ;;  %v5574_v34 = vsel %vm5318_vm0, %v13756_v54, -3.4028235e+38  ;;  %vm5320_vm12 = vcmp.eq.s32.totalorder %v5050_v3, 1  ;;  %v14727_v8 = vld [vmem:[#allocation109_spill] sm:$0xff] }
 0x30f   :  { %v5577_v59 = vsel %vm5321_vm11, %v3764_v50, -3.4028235e+38  ;;  %v6223_v1 = vmax.f32 %v6221_v43, %v6222_v12  ;;  %v5575_v31 = vsel %vm5319_vm10, %v13784_v24, -3.4028235e+38  ;;  %v5576_v57 = vsel %vm5320_vm12, %v13838_v63, -3.4028235e+38  ;;  %v5065_v23 = vpop.permute.xlu1 %5064 }
 0x310   :  { %v6237_v18 = vsel %vm5584_vm3, %v5577_v59, -inf  ;;  %v6226_v20 = vsel %vm5584_vm3, %v5574_v34, -inf  ;;  %v6236_v11 = vsel %vm5584_vm3, %v5576_v57, -inf  ;;  %vm5323_vm13 = vcmp.eq.s32.totalorder %v5059_v62, 1  ;;  %v14721_v63 = vld [vmem:[#allocation66_spill] sm:$0xff]  ;;  %v5062_v32 = vpop.permute.xlu0 %5061  ;;  %v14730_v34 = vld [vmem:[#allocation113_spill] sm:$0xff] }
 0x311   :  { %vm5322_vm14 = vcmp.eq.s32.totalorder %v5056_v40, 1  ;;  %v6225_v6 = vmax.f32 %v6223_v1, %v6224_v33  ;;  %v6238_v14 = vmax.f32 %v6236_v11, %v6237_v18  ;;  %v5579_v54 = vsel %vm5323_vm13, %v13850_v22, -3.4028235e+38  ;;  %v14729_v33 = vld [vmem:[#allocation108_spill] sm:$0xff]  ;;  %v14731_v40 = vld [vmem:[#allocation101_spill] sm:$0xff] }
 0x312   :  { %v5578_v50 = vsel %vm5322_vm14, %v13826_v35, -3.4028235e+38  ;;  %v6049_v24 = vmax.f32 %v13874_v61, %v13886_v15  ;;  %v5506_v28 = vsel %vm5250_vm7, %v14721_v63, -3.4028235e+38  ;;  %vm5325_vm4 = vcmp.eq.s32.totalorder %v5065_v23, 1  ;;  %v14733_v23 = vld [vmem:[#allocation90_spill] sm:$0xff] }
 0x313   :  { %v6239_v0 = vsel %vm5584_vm3, %v5578_v50, -inf  ;;  %v6228_v53 = vsel %vm5584_vm3, %v5575_v31, -inf  ;;  %v6227_v21 = vmax.f32 %v6225_v6, %v6226_v20  ;;  %vm5324_vm15 = vcmp.eq.s32.totalorder %v5062_v32, 1  ;;  %v5071_v16 = vpop.permute.xlu1 %5070 }
 0x314   :  { %v6240_v55 = vmax.f32 %v6238_v14, %v6239_v0  ;;  %v6241_v35 = vsel %vm5584_vm3, %v5579_v54, -inf  ;;  %v5580_v22 = vsel %vm5324_vm15, %v3777_v37, -3.4028235e+38  ;;  %v5581_v10 = vsel %vm5325_vm4, %v3780_v36, -3.4028235e+38  ;;  %v5068_v30 = vpop.permute.xlu0 %5067  ;;  %v14732_v54 = vld [vmem:[#allocation112_spill] sm:$0xff] }
 0x315   :  { %v14723_v47 = vrot.slane %v14722_v48, 4  ;;  %v13927_v15 = vmax.f32 %v6227_v21, %v6228_v53  ;;  %v6243_v26 = vsel %vm5584_vm3, %v5580_v22, -inf  ;;  %v14725_v9 = vrot.slane %v14724_v60, 4  ;;  %v14734_v53 = vld [vmem:[#allocation22_spill] sm:$0xff]  ;;  %v13968_v22 = vld [vmem:[%s14176_s4] ss:$0 sm:$0xff] }
 0x316   :  { %v6242_v51 = vmax.f32 %v6240_v55, %v6241_v35  ;;  %v5507_v17 = vsel %vm5251_vm9, %v14726_v13, -3.4028235e+38  ;;  %vm5327_vm1 = vcmp.eq.s32.totalorder %v5071_v16, 1  ;;  %v5665_v37 = vrot.slane %v14727_v8, 2  ;;  %v14735_v55 = vld [vmem:[#allocation81_spill] sm:$0xff]  ;;  %s8050_s4 = smov [#allocation2]  }
 0x317   :  { %v5622_v61 = vmax.f32 %v14722_v48, %v14723_v47  ;;  %v5601_v25 = vmax.f32 %v14724_v60, %v14725_v9  ;;  %v6050_v49 = vsel %vm5584_vm3, %v5506_v28, -inf  ;;  %vm5252_vm2 = vcmp.eq.s32.totalorder %v14728_v19, 1  ;;  %s7301_s25 = sshll.u32 %s8050_s4, 4  ;;  %s7302_s25 = int_to_ptr.vmem [resolvable:$true] %s7301_s25 }
 0x318   :  { %v6244_v41 = vmax.f32 %v6242_v51, %v6243_v26  ;;  %vm5326_vm5 = vcmp.eq.s32.totalorder %v5068_v30, 1  ;;  %v6245_v3 = vsel %vm5584_vm3, %v5581_v10, -inf  ;;  %v5583_v27 = vsel %vm5327_vm1, %v8012_v46, -3.4028235e+38  ;;  %s8026_s26 = scalar_lea.vmem %s7302_s25, 512  ;;  %p8031_p1 = scmp.lt.s32.totalorder %s7302_s25, %s7302_s25 }
 0x319   :  { %v5623_v4 = vrot.slane %v5622_v61, 2  ;;  %v5582_v5 = vsel %vm5326_vm5, %v13882_v42, -3.4028235e+38  ;;  %v5602_v52 = vrot.slane %v5601_v25, 2  ;;  %v5666_v29 = vmax.f32 %v14727_v8, %v5665_v37  ;;  %p8027_p0 = scmp.ne.s32.totalorder %s7302_s25, %s8026_s26  ;;  %p8032_p2 = scmp.lt.s32.totalorder %s8026_s26, %s8026_s26 }
 0x31a   :  { %v6246_v2 = vmax.f32 %v6244_v41, %v6245_v3  ;;  %v6247_v56 = vsel %vm5584_vm3, %v5582_v5, -inf  ;;  %v5644_v62 = vrot.slane %v14729_v33, 2  ;;  %v5707_v59 = vrot.slane %v14730_v34, 2  ;;  %v14738_v41 = vld [vmem:[#allocation32_spill] sm:$0xff] }
 0x31b   :  { %v5624_v7 = vmax.f32 %v5622_v61, %v5623_v4  ;;  %v5603_v43 = vmax.f32 %v5601_v25, %v5602_v52  ;;  %v6125_v1 = vrot.slane %v14731_v40, 4  ;;  %v6146_v31 = vrot.slane %v13699_v58, 4  ;;  %v14736_v4 = vld [vmem:[#allocation24_spill] sm:$0xff]  ;;  %p8033_p3 = por %p8032_p2, %p8031_p1 }
 0x31c   :  { %v6248_v57 = vmax.f32 %v6246_v2, %v6247_v56  ;;  %v5667_v42 = vrot.slane %v5666_v29, 1  ;;  %v6249_v18 = vsel %vm5584_vm3, %v5583_v27, -inf  ;;  %v5645_v11 = vmax.f32 %v14729_v33, %v5644_v62 }
 0x31d   :  { %v5625_v12 = vrot.slane %v5624_v7, 1  ;;  %v5604_v46 = vrot.slane %v5603_v43, 1  ;;  %v5708_v14 = vmax.f32 %v14730_v34, %v5707_v59  ;;  %v5686_v50 = vrot.slane %v14732_v54, 2  ;;  %p8034_p4 = pnand %p8033_p3, %p8027_p0 }
 0x31e   :  { %v13949_v6 = vmax.f32 %v6248_v57, %v6249_v18  ;;  %v5749_v36 = vrot.slane %v14733_v23, 2  ;;  %v13955_v63 = vsel %vm5584_vm3, %v5507_v17, -inf  ;;  %v13957_v28 = vmax.f32 %v6049_v24, %v6050_v49  ;;  %v14737_v49 = vld [vmem:[#allocation87_spill] sm:$0xff] }
 0x31f   :  { %v5626_v20 = vmax.f32 %v5624_v7, %v5625_v12  ;;  %v5605_v0 = vmax.f32 %v5603_v43, %v5604_v46  ;;  %v5668_v32 = vmax.f32 %v5666_v29, %v5667_v42  ;;  %v13962_v21 = vsel %vm5252_vm2, %v14734_v53, -3.4028235e+38  ;;  %v7038_v51 = vpop.permute.xlu1 %7037  ;;  %v14739_v43 = vld [vmem:[#allocation52_spill] sm:$0xff] }
 0x320   :  { %v6104_v35 = vrot.slane %v14735_v55, 4  ;;  %v5646_v10 = vrot.slane %v5645_v11, 1  ;;  %v5687_v48 = vmax.f32 %v14732_v54, %v5686_v50  ;;  %v13972_v24 = vmax.f32 %v14731_v40, %v6125_v1  ;;  %v14740_v40 = vld [vmem:[#allocation69_spill] sm:$0xff] }
 0x321   :  { %v13975_v47 = vmax.f32 %v13699_v58, %v6146_v31  ;;  %v6167_v61 = vrot.slane %v13790_v38, 4  ;;  %vm7226_vm6 = vcmask 1041409   ;;  %v6970_v26 = vadd.f32 %v13968_v22, %v5626_v20  ;;  %v7035_v17 = vpop.permute.xlu0 %7034 }
 0x322   :  { %vm7229_vm7 = vcmask 1042434   ;;  %v5709_v16 = vrot.slane %v5708_v14, 1  ;;  %v5750_v60 = vmax.f32 %v14733_v23, %v5749_v36  ;;  %vm7130_vm8 = vcmp.eq.s32.totalorder %v7038_v51, 1 }
 0x323   :  { %v6969_v9 = vadd.f32 %v13968_v22, %v5605_v0  ;;  %v6972_v25 = vadd.f32 %v13968_v22, %v5668_v32  ;;  %vm7232_vm9 = vcmask 1043459   ;;  %v7162_v13 = vsel %vm7130_vm8, %v6970_v26, 0.0 }
 0x324   :  { %v5647_v58 = vmax.f32 %v5645_v11, %v5646_v10  ;;  %v5688_v30 = vrot.slane %v5687_v48, 1  ;;  %v5728_v8 = vrot.slane %v14736_v4, 2  ;;  %v7225_v37 = vrot.slane %v7162_v13, 7  ;;  %v7044_v56 = vpop.permute.xlu1 %7043  ;;  %v14741_v13 = vld [vmem:[#allocation70_spill] sm:$0xff] }
 0x325   :  { %vm7129_vm10 = vcmp.eq.s32.totalorder %v7035_v17, 1  ;;  %v5791_v19 = vrot.slane %v14737_v49, 2  ;;  %v5770_v3 = vrot.slane %v14738_v41, 2  ;;  %v5710_v7 = vmax.f32 %v5708_v14, %v5709_v16  ;;  %v7041_v62 = vpop.permute.xlu0 %7040 }
 0x326   :  { %v7161_v5 = vsel %vm7129_vm10, %v6969_v9, 0.0  ;;  %v5751_v52 = vrot.slane %v5750_v60, 1  ;;  %v5729_v2 = vmax.f32 %v14736_v4, %v5728_v8  ;;  %v5833_v33 = vrot.slane %v14739_v43, 2 }
 0x327   :  { %v7227_v27 = vsel %vm7226_vm6, %v7225_v37, %v7161_v5  ;;  %v5792_v29 = vmax.f32 %v14737_v49, %v5791_v19  ;;  %v5771_v12 = vmax.f32 %v14738_v41, %v5770_v3  ;;  %vm7132_vm0 = vcmp.eq.s32.totalorder %v7044_v56, 1 }
 0x328   :  { %v6971_v34 = vadd.f32 %v13968_v22, %v5647_v58  ;;  %v5689_v59 = vmax.f32 %v5687_v48, %v5688_v30  ;;  %v5812_v1 = vrot.slane %v14740_v40, 2  ;;  %v7164_v31 = vsel %vm7132_vm0, %v6972_v25, 0.0 }
 0x329   :  { %vm7131_vm11 = vcmp.eq.s32.totalorder %v7041_v62, 1  ;;  %v5793_v57 = vrot.slane %v5792_v29, 1  ;;  %v5772_v42 = vrot.slane %v5771_v12, 1  ;;  %v7231_v18 = vrot.slane %v7164_v31, 5 }
 0x32a   :  { %v7163_v20 = vsel %vm7131_vm11, %v6971_v34, 0.0  ;;  %v5730_v46 = vrot.slane %v5729_v2, 1  ;;  %v5834_v11 = vmax.f32 %v14739_v43, %v5833_v33  ;;  %v5813_v23 = vmax.f32 %v14740_v40, %v5812_v1  ;;  %v14743_v40 = vld [vmem:[#allocation6_spill] sm:$0xff] }
 0x32b   :  { %v7228_v14 = vrot.slane %v7163_v20, 6  ;;  %v5794_v54 = vmax.f32 %v5792_v29, %v5793_v57  ;;  %v5773_v50 = vmax.f32 %v5771_v12, %v5772_v42  ;;  %v13995_v36 = vmax.f32 %v13790_v38, %v6167_v61 }
 0x32c   :  { %v6188_v0 = vrot.slane %v13876_v45, 4  ;;  %v6974_v32 = vadd.f32 %v13968_v22, %v5710_v7  ;;  %v5835_v53 = vrot.slane %v5834_v11, 1  ;;  %v5814_v26 = vrot.slane %v5813_v23, 1  ;;  %v7050_v16 = vpop.permute.xlu1 %7049 }
 0x32d   :  { %v7230_v10 = vsel %vm7229_vm7, %v7228_v14, %v7227_v27  ;;  %v6978_v48 = vadd.f32 %v13968_v22, %v5794_v54  ;;  %v14002_v51 = vadd.f32 %v13968_v22, %v5773_v50  ;;  %v6973_v9 = vadd.f32 %v13968_v22, %v5689_v59  ;;  %v7047_v17 = vpop.permute.xlu0 %7046  ;;  %v14742_v27 = vld [vmem:[#allocation51_spill] sm:$0xff] }
 0x32e   :  { %v7233_v25 = vsel %vm7232_vm9, %v7231_v18, %v7230_v10  ;;  %v5752_v38 = vmax.f32 %v5750_v60, %v5751_v52  ;;  %v5836_v61 = vmax.f32 %v5834_v11, %v5835_v53  ;;  %vm5253_vm12 = vcmp.eq.s32.totalorder %v14741_v13, 1  ;;  %v14745_v53 = vld [vmem:[#allocation97_spill] sm:$0xff] }
 0x32f   :  { %vm7134_vm13 = vcmp.eq.s32.totalorder %v7050_v16, 1  ;;  %v5731_v58 = vmax.f32 %v5729_v2, %v5730_v46  ;;  %v5815_v30 = vmax.f32 %v5813_v23, %v5814_v26  ;;  %v6127_v4 = vrot.slane %v13972_v24, 2 }
 0x330   :  { %v7166_v8 = vsel %vm7134_vm13, %v6974_v32, 0.0  ;;  %vm7235_vm14 = vcmask 1044484   ;;  %vm7133_vm4 = vcmp.eq.s32.totalorder %v7047_v17, 1  ;;  %v14009_v37 = vadd.f32 %v13968_v22, %v5836_v61  ;;  %v7056_v3 = vpop.permute.xlu1 %7055 }
 0x331   :  { %v7237_v49 = vrot.slane %v7166_v8, 3  ;;  %v7165_v19 = vsel %vm7133_vm4, %v6973_v9, 0.0  ;;  %vm7238_vm15 = vcmask 1045509   ;;  %v14012_v60 = vadd.f32 %v13968_v22, %v5815_v30  ;;  %v7053_v52 = vpop.permute.xlu0 %7052 }
 0x332   :  { %v7234_v41 = vrot.slane %v7165_v19, 4  ;;  %v6976_v5 = vadd.f32 %v13968_v22, %v5752_v38  ;;  %vm7241_vm1 = vcmask 1046534   ;;  %v6128_v7 = vmax.f32 %v13972_v24, %v6127_v4 }
 0x333   :  { %vm7136_vm2 = vcmp.eq.s32.totalorder %v7056_v3, 1  ;;  %v6975_v2 = vadd.f32 %v13968_v22, %v5731_v58  ;;  %v5875_v56 = vrot.slane %v14742_v27, 2  ;;  %v6148_v29 = vrot.slane %v13975_v47, 2  ;;  %v14746_v3 = vld [vmem:[#allocation56_spill] sm:$0xff] }
 0x334   :  { %v7236_v12 = vsel %vm7235_vm14, %v7234_v41, %v7233_v25  ;;  %v7168_v43 = vsel %vm7136_vm2, %v6976_v5, 0.0  ;;  %vm7135_vm5 = vcmp.eq.s32.totalorder %v7053_v52, 1  ;;  %v6129_v33 = vrot.slane %v6128_v7, 1 }
 0x335   :  { %v7243_v62 = vrot.slane %v7168_v43, 1  ;;  %v7167_v34 = vsel %vm7135_vm5, %v6975_v2, 0.0  ;;  %v7239_v59 = vsel %vm7238_vm15, %v7237_v49, %v7236_v12  ;;  %v5854_v1 = vrot.slane %v14743_v40, 2  ;;  %v14747_v12 = vld [vmem:[#allocation73_spill] sm:$0xff] }
 0x336   :  { %vm7244_vm8 = vcmask 1047559   ;;  %v7240_v24 = vrot.slane %v7167_v34, 2  ;;  %v6130_v31 = vmax.f32 %v6128_v7, %v6129_v33  ;;  %v6149_v57 = vmax.f32 %v13975_v47, %v6148_v29 }
 0x337   :  { %v6053_v42 = vmax.f32 %v13957_v28, %v13955_v63  ;;  %v6105_v18 = vmax.f32 %v14735_v55, %v6104_v35  ;;  %v6189_v20 = vmax.f32 %v13876_v45, %v6188_v0  ;;  %v5876_v46 = vmax.f32 %v14742_v27, %v5875_v56  ;;  %v7062_v14 = vpop.permute.xlu1 %7061  ;;  %v14744_v55 = vld [vmem:[#allocation67_spill] sm:$0xff] }
 0x338   :  { %v7242_v11 = vsel %vm7241_vm1, %v7240_v24, %v7239_v59  ;;  %v7059_v54 = vpop.permute.xlu0 %7058  ;;  %v14032_v50 = vadd.f32 %v13968_v22, %v6130_v31  ;;  %v6150_v23 = vrot.slane %v6149_v57, 1  ;;  %v6169_v47 = vrot.slane %v13995_v36, 2  ;;  %v14749_v59 = vld [vmem:[#allocation39_spill] sm:$0xff] }
 0x339   :  { %v7245_v63 = vsel %vm7244_vm8, %v7243_v62, %v7242_v11  ;;  %vm7138_vm10 = vcmp.eq.s32.totalorder %v7062_v14, 1  ;;  %vm7137_vm0 = vcmp.eq.s32.totalorder %v7059_v54, 1  ;;  %v5855_v28 = vmax.f32 %v14743_v40, %v5854_v1 }
 0x33a   :  { %v6054_v45 = vsel %vm5584_vm3, %v13962_v21, -inf  ;;  %v5509_v35 = vsel %vm5253_vm12, %v14744_v55, -3.4028235e+38  ;;  %7292 = vst.msk [vmem:[#allocation2] sm:$0xff] %vm5584_vm3, %v7245_v63  ;;  %v7170_v0 = vsel %vm7138_vm10, %v6978_v48, 0.0  ;;  %v6151_v32 = vmax.f32 %v6149_v57, %v6150_v23  ;;  %v14750_v57 = vld [vmem:[#allocation75_spill] sm:$0xff] }
 0x33b   :  { %vm5254_vm11 = vcmp.eq.s32.totalorder %v14745_v53, 1  ;;  %v6209_v10 = vrot.slane %v13906_v44, 4  ;;  %v7246_v26 = vrot.slane %v7170_v0, 7  ;;  %v7169_v16 = vsel %vm7137_vm0, %v14002_v51, 0.0  ;;  %v14752_v55 = vld [vmem:[#allocation45_spill] sm:$0xff] }
 0x33c   :  { %v14047_v9 = vadd.f32 %v13968_v22, %v6151_v32  ;;  %v6170_v21 = vmax.f32 %v13995_v36, %v6169_v47  ;;  %v6106_v25 = vrot.slane %v6105_v18, 2  ;;  %v6190_v38 = vrot.slane %v6189_v20, 2 }
 0x33d   :  { %v14050_v61 = vmax.f32 %v6053_v42, %v6054_v45  ;;  %v7247_v13 = vsel %vm7226_vm6, %v7246_v26, %v7169_v16  ;;  %v7068_v48 = vpop.permute.xlu1 %7067  ;;  %v5877_v17 = vrot.slane %v5876_v46, 1  ;;  %v5856_v58 = vrot.slane %v5855_v28, 1 }
 0x33e   :  { %vm7140_vm12 = vcmp.eq.s32.totalorder %v7068_v48, 1  ;;  %v6171_v30 = vrot.slane %v6170_v21, 1  ;;  %v6107_v4 = vmax.f32 %v6105_v18, %v6106_v25  ;;  %v6191_v8 = vmax.f32 %v6189_v20, %v6190_v38  ;;  %v7065_v41 = vpop.permute.xlu0 %7064 }
 0x33f   :  { %v14054_v51 = vsel %vm5584_vm3, %v5509_v35, -inf  ;;  %v6210_v49 = vmax.f32 %v13906_v44, %v6209_v10  ;;  %v6230_v36 = vrot.slane %v13927_v15, 4  ;;  %v7172_v19 = vsel %vm7140_vm12, %v14009_v37, 0.0  ;;  %v14748_v37 = vld [vmem:[#allocation30_spill] sm:$0xff] }
 0x340   :  { %vm7139_vm13 = vcmp.eq.s32.totalorder %v7065_v41, 1  ;;  %v5959_v5 = vrot.slane %v14746_v3, 2  ;;  %v6172_v7 = vmax.f32 %v6170_v21, %v6171_v30  ;;  %v6108_v52 = vrot.slane %v6107_v4, 1  ;;  %v14755_v41 = vld [vmem:[#allocation41_spill] sm:$0xff] }
 0x341   :  { %v7250_v2 = vrot.slane %v7172_v19, 5  ;;  %v7171_v27 = vsel %vm7139_vm13, %v14012_v60, 0.0  ;;  %v5878_v56 = vmax.f32 %v5876_v46, %v5877_v17  ;;  %v6192_v29 = vrot.slane %v6191_v8, 1 }
 0x342   :  { %vm5255_vm4 = vcmp.eq.s32.totalorder %v14747_v12, 1  ;;  %v7248_v43 = vrot.slane %v7171_v27, 6  ;;  %v5857_v33 = vmax.f32 %v5855_v28, %v5856_v58  ;;  %v14063_v44 = vadd.f32 %v13968_v22, %v6172_v7  ;;  %v14751_v28 = vld [vmem:[#allocation77_spill] sm:$0xff] }
 0x343   :  { %v6109_v62 = vmax.f32 %v6107_v4, %v6108_v52  ;;  %v5510_v34 = vsel %vm5254_vm11, %v14748_v37, -3.4028235e+38  ;;  %v6083_v40 = vrot.slane %v14749_v59, 4  ;;  %v6193_v1 = vmax.f32 %v6191_v8, %v6192_v29 }
 0x344   :  { %v6211_v24 = vrot.slane %v6210_v49, 2  ;;  %v6231_v60 = vmax.f32 %v13927_v15, %v6230_v36  ;;  %v7249_v31 = vsel %vm7229_vm7, %v7248_v43, %v7247_v13  ;;  %v5980_v42 = vrot.slane %v14750_v57, 2  ;;  %v7074_v54 = vpop.permute.xlu1 %7073  ;;  %v14753_v36 = vld [vmem:[#allocation58_spill] sm:$0xff]  ;;  %v14757_v43 = vld [vmem:[#allocation95_spill] sm:$0xff] }
 0x345   :  { %v14073_v18 = vadd.f32 %v13968_v22, %v6109_v62  ;;  %v6251_v20 = vrot.slane %v13949_v6, 4  ;;  %v7251_v46 = vsel %vm7232_vm9, %v7250_v2, %v7249_v31  ;;  %v14078_v11 = vadd.f32 %v13968_v22, %v6193_v1  ;;  %v7071_v47 = vpop.permute.xlu0 %7070  ;;  %v14756_v2 = vld [vmem:[#allocation34_spill] sm:$0xff] }
 0x346   :  { %v6212_v14 = vmax.f32 %v6210_v49, %v6211_v24  ;;  %v6982_v23 = vadd.f32 %v13968_v22, %v5878_v56  ;;  %v6981_v15 = vadd.f32 %v13968_v22, %v5857_v33  ;;  %v5960_v63 = vmax.f32 %v14746_v3, %v5959_v5 }
 0x347   :  { %v6001_v45 = vrot.slane %v14751_v28, 2  ;;  %vm7142_vm2 = vcmp.eq.s32.totalorder %v7074_v54, 1  ;;  %vm7141_vm5 = vcmp.eq.s32.totalorder %v7071_v47, 1  ;;  %v5938_v35 = vrot.slane %v14752_v55, 2 }
 0x348   :  { %v6213_v0 = vrot.slane %v6212_v14, 1  ;;  %v6058_v32 = vsel %vm5584_vm3, %v5510_v34, -inf  ;;  %v7174_v53 = vsel %vm7142_vm2, %v6982_v23, 0.0  ;;  %v7173_v10 = vsel %vm7141_vm5, %v6981_v15, 0.0  ;;  %v14103_v3 = vpop.permute.xlu1 %7109  ;;  %v14758_v34 = vld [vmem:[#allocation57_spill] sm:$0xff] }
 0x349   :  { %v5981_v26 = vmax.f32 %v14750_v57, %v5980_v42  ;;  %v6057_v16 = vmax.f32 %v14050_v61, %v14054_v51  ;;  %v7254_v21 = vrot.slane %v7174_v53, 3  ;;  %v7252_v25 = vrot.slane %v7173_v10, 4  ;;  %v14754_v51 = vld [vmem:[#allocation99_spill] sm:$0xff]  ;;  %v14759_v42 = vld [vmem:[#allocation40_spill] sm:$0xff]  ;;  %v14760_v10 = vld [vmem:[#allocation78_spill] sm:$0xff] }
 0x34a   :  { %v6214_v38 = vmax.f32 %v6212_v14, %v6213_v0  ;;  %v6084_v13 = vmax.f32 %v14749_v59, %v6083_v40  ;;  %v6252_v48 = vmax.f32 %v13949_v6, %v6251_v20  ;;  %v5961_v17 = vrot.slane %v5960_v63, 1  ;;  %v7086_v5 = vpop.permute.xlu0 %7085 }
 0x34b   :  { %v6232_v58 = vrot.slane %v6231_v60, 2  ;;  %v7253_v30 = vsel %vm7235_vm14, %v7252_v25, %v7251_v46  ;;  %v6002_v4 = vmax.f32 %v14751_v28, %v6001_v45  ;;  %v5939_v8 = vmax.f32 %v14752_v55, %v5938_v35 }
 0x34c   :  { %v14095_v49 = vadd.f32 %v13968_v22, %v6214_v38  ;;  %v5911_v61 = vsel %vm5584_vm3, %v14753_v36, -inf  ;;  %v5909_v19 = vsel %vm5584_vm3, %v14754_v51, -inf  ;;  %v6039_v6 = vsel %vm5584_vm3, %v14755_v41, -inf }
 0x34d   :  { %v5982_v7 = vrot.slane %v5981_v26, 1  ;;  %v6040_v52 = vmax.f32 %v13709_v39, %v6039_v6  ;;  %v5511_v27 = vsel %vm5255_vm4, %v14756_v2, -3.4028235e+38  ;;  %v6059_v56 = vmax.f32 %v6057_v16, %v6058_v32 }
 0x34e   :  { %v14110_v29 = vsel %vm7238_vm15, %v7254_v21, %v7253_v30  ;;  %vm5199_vm10 = vcmp.eq.s32.totalorder %v14757_v43, 1  ;;  %v5962_v33 = vmax.f32 %v5960_v63, %v5961_v17  ;;  %v6233_v62 = vmax.f32 %v6231_v60, %v6232_v58  ;;  %v14761_v21 = vld [vmem:[#allocation26_spill] sm:$0xff] }
 0x34f   :  { %v6253_v37 = vrot.slane %v6252_v48, 2  ;;  %v5910_v59 = vmax.f32 %v14758_v34, %v5909_v19  ;;  %v6003_v40 = vrot.slane %v6002_v4, 1  ;;  %v5940_v1 = vrot.slane %v5939_v8, 1 }
 0x350   :  { %v6085_v24 = vrot.slane %v6084_v13, 2  ;;  %v6060_v39 = vsel %vm5584_vm3, %v5511_v27, -inf  ;;  %v5983_v31 = vmax.f32 %v5981_v26, %v5982_v7  ;;  %v6234_v57 = vrot.slane %v6233_v62, 1  ;;  %v7113_v60 = vpop.permute.xlu1 %7112 }
 0x351   :  { %v6254_v12 = vmax.f32 %v6252_v48, %v6253_v37  ;;  %v5455_v20 = vsel %vm5199_vm10, %v14759_v42, -3.4028235e+38  ;;  %v6041_v46 = vrot.slane %v6040_v52, 4  ;;  %v6061_v14 = vmax.f32 %v6059_v56, %v6060_v39  ;;  %v7089_v47 = vpop.permute.xlu0 %7088 }
 0x352   :  { %v6086_v54 = vmax.f32 %v6084_v13, %v6085_v24  ;;  %v6986_v23 = vadd.f32 %v13968_v22, %v5962_v33  ;;  %vm7146_vm0 = vcmp.eq.s32.totalorder %v7086_v5, 1  ;;  %v6235_v15 = vmax.f32 %v6233_v62, %v6234_v57 }
 0x353   :  { %v6255_v63 = vrot.slane %v6254_v12, 1  ;;  %vm7147_vm11 = vcmp.eq.s32.totalorder %v7089_v47, 1  ;;  %v6004_v28 = vmax.f32 %v6002_v4, %v6003_v40  ;;  %v5941_v45 = vmax.f32 %v5939_v8, %v5940_v1 }
 0x354   :  { %v6087_v55 = vrot.slane %v6086_v54, 1  ;;  %v5912_v35 = vmax.f32 %v5910_v59, %v5911_v61  ;;  %v6987_v0 = vadd.f32 %v13968_v22, %v5983_v31  ;;  %v14119_v32 = vadd.f32 %v13968_v22, %v6235_v15 }
 0x355   :  { %v6256_v53 = vmax.f32 %v6254_v12, %v6255_v63  ;;  %v5894_v26 = vrot.slane %v14760_v10, 4  ;;  %v7178_v16 = vsel %vm7146_vm0, %v6986_v23, 0.0  ;;  %v6022_v25 = vrot.slane %v14761_v21, 2  ;;  %v7092_v4 = vpop.permute.xlu1 %7091 }
 0x356   :  { %v6088_v38 = vmax.f32 %v6086_v54, %v6087_v55  ;;  %v5913_v13 = vsel %vm5584_vm3, %v5455_v20, -inf  ;;  %v6042_v48 = vmax.f32 %v6040_v52, %v6041_v46  ;;  %v7179_v17 = vsel %vm7147_vm11, %v6987_v0, 0.0  ;;  %v7083_v36 = vpop.permute.xlu0 %7082 }
 0x357   :  { %v14125_v58 = vadd.f32 %v13968_v22, %v6256_v53  ;;  %v6062_v30 = vrot.slane %v6061_v14, 4  ;;  %v6988_v8 = vadd.f32 %v13968_v22, %v6004_v28  ;;  %v6985_v61 = vadd.f32 %v13968_v22, %v5941_v45 }
 0x358   :  { %v14130_v51 = vadd.f32 %v13968_v22, %v6088_v38  ;;  %v5914_v19 = vmax.f32 %v5912_v35, %v5913_v13  ;;  %v7260_v41 = vrot.slane %v7178_v16, 7  ;;  %vm7148_vm12 = vcmp.eq.s32.totalorder %v7092_v4, 1 }
 0x359   :  { %vm7145_vm13 = vcmp.eq.s32.totalorder %v7083_v36, 1  ;;  %v7262_v6 = vrot.slane %v7179_v17, 6  ;;  %v7180_v5 = vsel %vm7148_vm12, %v6988_v8, 0.0  ;;  %v6023_v52 = vmax.f32 %v14761_v21, %v6022_v25 }
 0x35a   :  { %v7177_v7 = vsel %vm7145_vm13, %v6985_v61, 0.0  ;;  %vm7154_vm4 = vcmp.eq.s32.totalorder %v14103_v3, 1  ;;  %v7264_v2 = vrot.slane %v7180_v5, 5  ;;  %v6043_v56 = vrot.slane %v6042_v48, 2 }
 0x35b   :  { %v7261_v27 = vsel %vm7226_vm6, %v7260_v41, %v7177_v7  ;;  %v5895_v43 = vmax.f32 %v14760_v10, %v5894_v26  ;;  %v6063_v33 = vmax.f32 %v6061_v14, %v6062_v30  ;;  %vm7155_vm2 = vcmp.eq.s32.totalorder %v7113_v60, 1  ;;  %v7116_v34 = vpop.permute.xlu1 %7115 }
 0x35c   :  { %v7263_v62 = vsel %vm7229_vm7, %v7262_v6, %v7261_v27  ;;  %v7186_v59 = vsel %vm7154_vm4, %v14032_v50, 0.0  ;;  %vm7156_vm5 = vcmp.eq.s32.totalorder %v7116_v34, 1  ;;  %v6024_v40 = vrot.slane %v6023_v52, 1 }
 0x35d   :  { %v7265_v37 = vsel %vm7232_vm9, %v7264_v2, %v7263_v62  ;;  %v5915_v1 = vrot.slane %v5914_v19, 4  ;;  %v7187_v3 = vsel %vm7155_vm2, %v14047_v9, 0.0  ;;  %v7188_v24 = vsel %vm7156_vm5, %v14063_v44, 0.0  ;;  %v7107_v31 = vpop.permute.xlu0 %7106 }
 0x35e   :  { %v6044_v39 = vmax.f32 %v6042_v48, %v6043_v56  ;;  %v6064_v57 = vrot.slane %v6063_v33, 2  ;;  %v5896_v12 = vrot.slane %v5895_v43, 2  ;;  %v7274_v42 = vrot.slane %v7186_v59, 7 }
 0x35f   :  { %v7278_v20 = vrot.slane %v7188_v24, 5  ;;  %vm7153_vm10 = vcmp.eq.s32.totalorder %v7107_v31, 1  ;;  %v7276_v46 = vrot.slane %v7187_v3, 6  ;;  %v6025_v23 = vmax.f32 %v6023_v52, %v6024_v40 }
 0x360   :  { %v7185_v14 = vsel %vm7153_vm10, %v14073_v18, 0.0  ;;  %v7119_v54 = vpop.permute.xlu1 %7118  ;;  %v5916_v50 = vmax.f32 %v5914_v19, %v5915_v1  ;;  %v6045_v47 = vrot.slane %v6044_v39, 1  ;;  %v6065_v15 = vmax.f32 %v6063_v33, %v6064_v57 }
 0x361   :  { %v7275_v60 = vsel %vm7226_vm6, %v7274_v42, %v7185_v14  ;;  %vm7157_vm0 = vcmp.eq.s32.totalorder %v7119_v54, 1  ;;  %v5897_v63 = vmax.f32 %v5895_v43, %v5896_v12  ;;  %v6989_v35 = vadd.f32 %v13968_v22, %v6025_v23 }
 0x362   :  { %v7277_v9 = vsel %vm7229_vm7, %v7276_v46, %v7275_v60  ;;  %v7189_v44 = vsel %vm7157_vm0, %v14078_v11, 0.0  ;;  %v6046_v0 = vmax.f32 %v6044_v39, %v6045_v47  ;;  %v5917_v53 = vrot.slane %v5916_v50, 2 }
 0x363   :  { %v7279_v28 = vsel %vm7232_vm9, %v7278_v20, %v7277_v9  ;;  %v7280_v45 = vrot.slane %v7189_v44, 4  ;;  %v6066_v26 = vrot.slane %v6065_v15, 1  ;;  %v5898_v16 = vrot.slane %v5897_v63, 1 }
 0x364   :  { %v7095_v55 = vpop.permute.xlu0 %7094  ;;  %v6990_v48 = vadd.f32 %v13968_v22, %v6046_v0  ;;  %v5918_v17 = vmax.f32 %v5916_v50, %v5917_v53 }
 0x365   :  { %v7281_v18 = vsel %vm7235_vm14, %v7280_v45, %v7279_v28  ;;  %vm7149_vm11 = vcmp.eq.s32.totalorder %v7095_v55, 1  ;;  %v6067_v4 = vmax.f32 %v6065_v15, %v6066_v26  ;;  %v5899_v8 = vmax.f32 %v5897_v63, %v5898_v16 }
 0x366   :  { %v7181_v10 = vsel %vm7149_vm11, %v6989_v35, 0.0  ;;  %v5919_v41 = vrot.slane %v5918_v17, 1 }
 0x367   :  { %v7266_v21 = vrot.slane %v7181_v10, 4  ;;  %v7122_v25 = vpop.permute.xlu1 %7121  ;;  %v6991_v7 = vadd.f32 %v13968_v22, %v6067_v4 }
 0x368   :  { %vm7158_vm6 = vcmp.eq.s32.totalorder %v7122_v25, 1  ;;  %v5920_v33 = vmax.f32 %v5918_v17, %v5919_v41 }
 0x369   :  { %v7267_v11 = vsel %vm7235_vm14, %v7266_v21, %v7265_v37  ;;  %v7190_v38 = vsel %vm7158_vm6, %v14095_v49, 0.0  ;;  %v7098_v13 = vpop.permute.xlu0 %7097  ;;  %v6983_v49 = vadd.f32 %v13968_v22, %v5899_v8 }
 0x36a   :  { %v7282_v30 = vrot.slane %v7190_v38, 3  ;;  %vm7150_vm7 = vcmp.eq.s32.totalorder %v7098_v13, 1  ;;  %v6984_v59 = vadd.f32 %v13968_v22, %v5920_v33 }
 0x36b   :  { %v7182_v36 = vsel %vm7150_vm7, %v6990_v48, 0.0 }
 0x36c   :  { %v7283_v61 = vsel %vm7238_vm15, %v7282_v30, %v7281_v18  ;;  %v7268_v19 = vrot.slane %v7182_v36, 3 }
 0x36e   :  { %v7269_v6 = vsel %vm7238_vm15, %v7268_v19, %v7267_v11  ;;  %v7101_v5 = vpop.permute.xlu1 %7100  ;;  %v7077_v52 = vpop.permute.xlu0 %7076 }
 0x36f   :  { %vm7151_vm9 = vcmp.eq.s32.totalorder %v7101_v5, 1  ;;  %vm7143_vm14 = vcmp.eq.s32.totalorder %v7077_v52, 1 }
 0x370   :  { %v7183_v2 = vsel %vm7151_vm9, %v6991_v7, 0.0  ;;  %v7175_v27 = vsel %vm7143_vm14, %v6983_v49, 0.0 }
 0x371   :  { %v7270_v56 = vrot.slane %v7183_v2, 2  ;;  %v7256_v43 = vrot.slane %v7175_v27, 2 }
 0x373   :  { %v7271_v62 = vsel %vm7241_vm1, %v7270_v56, %v7269_v6  ;;  %v7257_v37 = vsel %vm7241_vm1, %v7256_v43, %v14110_v29 }
 0x375   :  { %v7080_v34 = vpop.permute.xlu1 %7079  ;;  %v7125_v40 = vpop.permute.xlu0 %7124 }
 0x376   :  { %vm7144_vm15 = vcmp.eq.s32.totalorder %v7080_v34, 1  ;;  %vm7159_vm12 = vcmp.eq.s32.totalorder %v7125_v40, 1 }
 0x377   :  { %v7176_v1 = vsel %vm7144_vm15, %v6984_v59, 0.0  ;;  %v7191_v3 = vsel %vm7159_vm12, %v14119_v32, 0.0 }
 0x378   :  { %v7258_v24 = vrot.slane %v7176_v1, 1  ;;  %v7284_v39 = vrot.slane %v7191_v3, 2 }
 0x37a   :  { %v7259_v31 = vsel %vm7244_vm8, %v7258_v24, %v7257_v37  ;;  %v7285_v57 = vsel %vm7241_vm1, %v7284_v39, %v7283_v61  ;;  %v7128_v12 = vpop.permute.xlu1 %7127  ;;  %v7104_v42 = vpop.permute.xlu0 %7103 }
 0x37b   :  { %7293 = vst.msk [vmem:[#allocation2 + $0x8] sm:$0xff] %vm5584_vm3, %v7259_v31  ;;  %vm7160_vm13 = vcmp.eq.s32.totalorder %v7128_v12, 1  ;;  %vm7152_vm4 = vcmp.eq.s32.totalorder %v7104_v42, 1 }
 0x37c   :  { %v7192_v22 = vsel %vm7160_vm13, %v14125_v58, 0.0  ;;  %v7184_v29 = vsel %vm7152_vm4, %v14130_v51, 0.0 }
 0x37d   :  { %v7286_v20 = vrot.slane %v7192_v22, 1  ;;  %v7272_v32 = vrot.slane %v7184_v29, 1 }
 0x37f   :  { %v7287_v46 = vsel %vm7244_vm8, %v7286_v20, %v7285_v57  ;;  %v7273_v14 = vsel %vm7244_vm8, %v7272_v32, %v7271_v62 }
 0x380   :  { %7295 = vst.msk [vmem:[#allocation2 + $0x18] sm:$0xff] %vm5584_vm3, %v7287_v46  ;;  %7294 = vst.msk [vmem:[#allocation2 + $0x10] sm:$0xff] %vm5584_vm3, %v7273_v14 }
 0x381   :  { %8037 = shalt.err (!%p8034_p4)
}
 0x382   :  { %s8051_s27 = smov 128   ;;  %s8052_s0 = smov 8  }
 0x383   :  { %7307 = dma.vmem_to_hbm [thread:$0]  %s7302_s25, 512, %s14177_s5, [#allocation3], %s8051_s27, %s8051_s27, %s8052_s0  }
 0x384   :  { %8046 = dma.done.wait [#allocation3], 512  }
 0x385   :  { %8047 = vsyncadd [#allocation3], 4294966784 }
 0x386   :  { %7311 = vsyncpa [#allocation3], 1 }

</bundles_post_ra>
